<compile_context>
chip_gen: v5e
topology: v5e:2x2
jax: 0.10.0
libtpu: 0.0.40
codegen_flags: <defaults>
</compile_context>

<pallas_src>
import functools

import jax
import jax.numpy as jnp
import numpy as np
from jax import lax
from jax.experimental import pallas as pl
from jax.experimental.pallas import tpu as pltpu

BN_EPS = 1e-5


def _round_up(x, m):
    return (x + m - 1) // m * m


@functools.lru_cache(maxsize=None)
def _hw_config():
    # Lazy hardware query (avoids picking the wrong budget at import / AOT-trace time).
    try:
        vmem = pltpu.get_tpu_info().vmem_capacity_bytes
    except Exception:
        vmem = 64 * 1024 * 1024
    if vmem >= 96 * 1024 * 1024:
        # v5e / v6e: 128 MiB VMEM -> big tiles, 256-multiple caps for the 2x256 MXU.
        return dict(tm_cap=1024, tn_cap=512, tk_cap=1024,
                    vmem_limit=100 * 1024 * 1024)
    # v7x: 64 MiB VMEM per TensorCore.
    return dict(tm_cap=512, tn_cap=256, tk_cap=512, vmem_limit=48 * 1024 * 1024)


def _pick_tile(dim, cap, align):
    """Largest tile <= cap that divides `dim` and is `align`-aligned (or equals dim)."""
    for d in range(min(cap, dim), 0, -1):
        if dim % d == 0 and (d % align == 0 or d == dim):
            return d
    return None


# ----------------------- tiled matmul (+shift, +ReLU) kernels -----------------------
def _matmul_1step_kernel(x_ref, w_ref, shift_ref, o_ref, *, apply_relu):
    # Single K step: no accumulator scratch, no zero-fill.
    y = jnp.dot(x_ref[...], w_ref[...], preferred_element_type=jnp.float32)
    y = y + shift_ref[...]
    if apply_relu:
        y = jnp.maximum(y, 0.0)
    o_ref[...] = y.astype(o_ref.dtype)


def _matmul_acc_kernel(x_ref, w_ref, shift_ref, o_ref, acc_ref, *, apply_relu):
    @pl.when(pl.program_id(2) == 0)
    def _init():
        acc_ref[...] = jnp.zeros_like(acc_ref)

    acc_ref[...] += jnp.dot(x_ref[...], w_ref[...],
                            preferred_element_type=jnp.float32)

    @pl.when(pl.program_id(2) == pl.num_programs(2) - 1)
    def _finalize():
        y = acc_ref[...] + shift_ref[...]
        if apply_relu:
            y = jnp.maximum(y, 0.0)
        o_ref[...] = y.astype(o_ref.dtype)


def fused_matmul(x, w, shift, *, apply_relu=False, out_dtype=jnp.bfloat16):
    """(M,K)@(K,N) on the MXU in bf16 + per-column f32 shift (+ReLU).

    Callers guarantee N % 128 == 0 (lane-dense stores, no N padding / slicing).
    M tiles are chosen to divide M so the activation is not padded in HBM; the pad path
    is only a fallback.  K is kept whole unless it is a large multiple of 128.
    """
    M, K = x.shape
    Kw, N = w.shape
    assert K == Kw and N % 128 == 0
    hw = _hw_config()

    tm = _pick_tile(M, hw["tm_cap"], 8)
    Mp = M
    if tm is None:                                  # fallback: ragged M (not hit here)
        tm = min(hw["tm_cap"], _round_up(M, 8))
        Mp = _round_up(M, tm)
    tn = _pick_tile(N, hw["tn_cap"], 128)
    if K % 128 == 0 and K > hw["tk_cap"]:
        tk = _pick_tile(K, hw["tk_cap"], 128)
    else:
        tk = K                                      # whole-K block (no K padding)
    k_steps = K // tk

    xp = x.astype(jnp.bfloat16)
    if Mp != M:
        xp = jnp.pad(xp, ((0, Mp - M), (0, 0)))
    wp = w.astype(jnp.bfloat16)
    sp = shift.astype(jnp.float32).reshape(1, N)

    if k_steps == 1:
        kernel = functools.partial(_matmul_1step_kernel, apply_relu=apply_relu)
        scratch = []
    else:
        kernel = functools.partial(_matmul_acc_kernel, apply_relu=apply_relu)
        scratch = [pltpu.VMEM((tm, tn), jnp.float32)]

    out = pl.pallas_call(
        kernel,
        out_shape=jax.ShapeDtypeStruct((Mp, N), out_dtype),
        grid=(Mp // tm, N // tn, k_steps),
        in_specs=[
            pl.BlockSpec((tm, tk), lambda i, j, k: (i, k)),
            pl.BlockSpec((tk, tn), lambda i, j, k: (k, j)),
            pl.BlockSpec((1, tn), lambda i, j, k: (0, j)),
        ],
        out_specs=pl.BlockSpec((tm, tn), lambda i, j, k: (i, j)),
        scratch_shapes=scratch,
        compiler_params=pltpu.CompilerParams(
            dimension_semantics=("parallel", "parallel", "arbitrary"),
            vmem_limit_bytes=hw["vmem_limit"]),
    )(xp, wp, sp)
    return out if Mp == M else out[:M]


# ------------------- fused 3x3 conv + BN(eval) + ReLU kernel ------------------------
def _conv3x3_kernel(*refs, n_src, rh, wout, apply_relu):
    # refs = (x_0..x_{n-1}, w, shift, out); no accumulator scratch.
    x_refs = refs[:n_src]
    w_ref = refs[n_src]
    shift_ref = refs[n_src + 1]
    o_ref = refs[n_src + 2]

    row0 = pl.multiple_of(pl.program_id(1) * rh, rh)

    # Assemble the im2col patch in VMEM/vregs: K order = (dh, dw, [src0 ch, src1 ch, ...])
    # matching the weight row order built in the wrapper.  Channel pieces are 128-lane
    # aligned (inputs are channel-padded), so the concat is lane-block aligned.
    cols = []
    for dh in range(3):
        slabs = [x_refs[s][pl.ds(row0 + dh, rh), :, :] for s in range(n_src)]
        for dw in range(3):
            for s in range(n_src):
                cols.append(slabs[s][:, dw:dw + wout, :])
    patch = jnp.concatenate(cols, axis=-1).reshape(rh * wout, -1)

    # One deep-K MXU matmul per row block (K = 9 * sum padded Cin, a multiple of 128).
    y = jnp.dot(patch, w_ref[...], preferred_element_type=jnp.float32)
    y = y + shift_ref[...]
    if apply_relu:
        y = jnp.maximum(y, 0.0)
    o_ref[...] = y.astype(o_ref.dtype)


def conv3x3_bn_relu(sources, real_channels, w_oihw, scale, shift, *,
                    out_dtype=jnp.bfloat16):
    """3x3 'same' conv (no bias) + folded BN + ReLU directly from zero-padded NHWC
    sources (no im2col / concat tensor in HBM).

    `sources` are NHWC arrays whose channel dims may be zero-padded to a 128 multiple;
    `real_channels[s]` is the number of real channels of source s.  Concatenated in
    order, the real channels form the conv input channels.  The returned tensor keeps
    the output channel dim padded to a multiple of 128 (extra channels are exactly 0).
    """
    B, H, W, _ = sources[0].shape
    n_src = len(sources)
    Cout, Cin_real = w_oihw.shape[0], w_oihw.shape[1]
    assert Cin_real == sum(real_channels)
    for src, cr in zip(sources, real_channels):
        assert src.shape[-1] >= cr
    Cp = _round_up(Cout, 128)                        # lane-dense output stores
    CinP_total = sum(src.shape[-1] for src in sources)

    # Fold BN scale into the weights; rows ordered (kh, kw, cin) with per-source
    # channel padding, columns padded to Cp.  bf16 for the MXU.
    w = jnp.transpose(w_oihw, (2, 3, 1, 0)) * scale              # (3,3,Cin_real,Cout)
    w = jnp.pad(w, ((0, 0), (0, 0), (0, 0), (0, Cp - Cout)))     # (3,3,Cin_real,Cp)
    parts, c0 = [], 0
    for src, cr in zip(sources, real_channels):
        blk = w[:, :, c0:c0 + cr, :]
        blk = jnp.pad(blk, ((0, 0), (0, 0), (0, src.shape[-1] - cr), (0, 0)))
        parts.append(blk)
        c0 += cr
    w_full = jnp.concatenate(parts, axis=2).reshape(9 * CinP_total, Cp)
    w_full = w_full.astype(jnp.bfloat16)
    shift_p = jnp.pad(shift.astype(jnp.float32), (0, Cp - Cout)).reshape(1, Cp)

    # Zero-pad each source spatially for the 3x3 halo; pad W up to a multiple of 8 so
    # the padded image layout is sublane friendly.  bf16, NHWC.
    Wp = _round_up(W + 2, 8)
    Hp = H + 2
    xs = [jnp.pad(src.astype(jnp.bfloat16),
                  ((0, 0), (1, 1), (1, Wp - W - 1), (0, 0))) for src in sources]

    # Row-block size: largest divisor of H whose output/patch blocks fit a VMEM budget
    # and keep the out block's sublane dim (rh*W) 8-aligned.
    hw = _hw_config()
    budget = min(hw["vmem_limit"] // 3, 12 * 1024 * 1024)

    def blk_bytes(d):
        rows = d * W
        return rows * (4 * Cp + 2 * 9 * CinP_total + 2 * Cp)

    cands = [d for d in range(H, 0, -1)
             if H % d == 0 and ((d * W) % 8 == 0 or d == H)]
    rh = next((d for d in cands if blk_bytes(d) <= budget), cands[-1])

    # TODO(synk): for large images on v7x (64 MiB VMEM), stream overlapping (rh+2)-row
    # slabs with manual double-buffered DMA instead of keeping the whole padded image
    # VMEM-resident, and single-buffer the constant weight/shift blocks.
    in_specs = (
        [pl.BlockSpec((None, Hp, Wp, src.shape[-1]), lambda b, r: (b, 0, 0, 0))
         for src in xs]
        + [pl.BlockSpec((9 * CinP_total, Cp), lambda b, r: (0, 0)),
           pl.BlockSpec((1, Cp), lambda b, r: (0, 0))]
    )
    out = pl.pallas_call(
        functools.partial(_conv3x3_kernel, n_src=n_src, rh=rh, wout=W,
                          apply_relu=True),
        out_shape=jax.ShapeDtypeStruct((B, H * W, Cp), out_dtype),
        grid=(B, H // rh),
        in_specs=in_specs,
        out_specs=pl.BlockSpec((None, rh * W, Cp), lambda b, r: (b, r, 0)),
        compiler_params=pltpu.CompilerParams(
            # Shard the batch axis across cores; sharding r would duplicate the
            # whole-image block per TensorCore.
            dimension_semantics=("parallel", "arbitrary"),
            vmem_limit_bytes=hw["vmem_limit"]),
    )(*xs, w_full, shift_p)
    return out.reshape(B, H, W, Cp)


# --------------------------------- forward pass -------------------------------------
def decoder_block_forward(params, x, skip):
    """x: (B, Cin, H, W) NCHW; skip: (B, Cs, 2H, 2W) NCHW; returns NCHW float32."""
    B, Cin, H, W = x.shape
    Cout = params["up_b"].shape[0]
    Cp = _round_up(Cout, 128)

    # --- ConvTranspose2d(kernel=2, stride=2): one matmul over (B*H*W, Cin) with
    #     (di, dj, cout_padded) column order, then a channel-last pixel shuffle
    #     (sublane-only rearrangement; output stays channel-padded to Cp) ---
    x_flat = jnp.transpose(x, (0, 2, 3, 1)).reshape(B * H * W, Cin)
    w_up = jnp.transpose(params["up_w"], (0, 2, 3, 1))            # (Cin, 2, 2, Cout)
    w_up = jnp.pad(w_up, ((0, 0), (0, 0), (0, 0), (0, Cp - Cout))).reshape(Cin, 4 * Cp)
    b_up = jnp.pad(params["up_b"], (0, Cp - Cout))
    y = fused_matmul(x_flat, w_up, jnp.tile(b_up, 4), out_dtype=jnp.bfloat16)
    y = y.reshape(B, H, W, 2, 2, Cp)
    y = jnp.transpose(y, (0, 1, 3, 2, 4, 5)).reshape(B, 2 * H, 2 * W, Cp)   # NHWC, Cp

    # --- skip 1x1 conv: (B*Hs*Ws, Cs) @ (Cs, Cp); output stays channel-padded ---
    Bs, Cs, Hs, Ws = skip.shape
    # TODO(synk): F.interpolate(mode='bilinear', align_corners=True) fallback (only hit
    # when upsample/skip spatial sizes differ) is not implemented.
    assert (2 * H, 2 * W) == (Hs, Ws)
    s_flat = jnp.transpose(skip, (0, 2, 3, 1)).reshape(Bs * Hs * Ws, Cs)
    w_sk = jnp.pad(params["skip_w"][:, :, 0, 0].T, ((0, 0), (0, Cp - Cout)))
    b_sk = jnp.pad(params["skip_b"], (0, Cp - Cout))
    s = fused_matmul(s_flat, w_sk, b_sk, out_dtype=jnp.bfloat16)
    s = s.reshape(Bs, Hs, Ws, Cp)
    # TODO(synk): the skip 1x1 conv could be folded into conv1's split-K weights with a
    # border-aware bias correction, removing this whole matmul pass.

    # --- conv1 3x3 + BN(eval) + ReLU; torch.cat([y, s], dim=1) fused into the patch ---
    scale1 = params["bn1_g"] * lax.rsqrt(params["bn1_rv"] + BN_EPS)
    shift1 = params["bn1_b"] - params["bn1_rm"] * scale1
    h1 = conv3x3_bn_relu([y, s], [Cout, Cout], params["conv1_w"], scale1, shift1,
                         out_dtype=jnp.bfloat16)

    # --- conv2 3x3 + BN(eval) + ReLU ---
    scale2 = params["bn2_g"] * lax.rsqrt(params["bn2_rv"] + BN_EPS)
    shift2 = params["bn2_b"] - params["bn2_rm"] * scale2
    h2 = conv3x3_bn_relu([h1], [Cout], params["conv2_w"], scale2, shift2,
                         out_dtype=jnp.float32)

    # Dropout (applied twice in the torch module) is identity in eval mode.
    # The only channel slice happens on the final output.
    return jnp.transpose(h2[..., :Cout], (0, 3, 1, 2))            # NCHW out


# ------------------------- pure-JAX reference (for checking) -----------------------
def reference_forward(params, x, skip):
    N, Cin, H, W = x.shape
    Cout = params["up_b"].shape[0]
    r = jnp.einsum("nchw,cokl->nohkwl", x, params["up_w"])
    y = r.reshape(N, Cout, 2 * H, 2 * W) + params["up_b"][None, :, None, None]
    s = jnp.einsum("nchw,ocij->nohw", skip, params["skip_w"]) \
        + params["skip_b"][None, :, None, None]
    z = jnp.concatenate([y, s], axis=1)

    def conv_bn_relu(z, w, g, b, rm, rv):
        z = lax.conv_general_dilated(z, w, (1, 1), ((1, 1), (1, 1)),
                                     dimension_numbers=("NCHW", "OIHW", "NCHW"))
        sc = g / jnp.sqrt(rv + BN_EPS)
        z = z * sc[None, :, None, None] + (b - rm * sc)[None, :, None, None]
        return jnp.maximum(z, 0.0)

    z = conv_bn_relu(z, params["conv1_w"], params["bn1_g"], params["bn1_b"],
                     params["bn1_rm"], params["bn1_rv"])
    z = conv_bn_relu(z, params["conv2_w"], params["bn2_g"], params["bn2_b"],
                     params["bn2_rm"], params["bn2_rv"])
    return z


# ----------------------------------- params ----------------------------------------
def init_params(key, in_channels, out_channels, skip_channels):
    ks = jax.random.split(key, 12)

    def rnd(k, shape, scale=0.1):
        return scale * jax.random.normal(k, shape, jnp.float32)

    return dict(
        up_w=rnd(ks[0], (in_channels, out_channels, 2, 2)),     # ConvTranspose2d (Cin, Cout, 2, 2)
        up_b=rnd(ks[1], (out_channels,)),
        skip_w=rnd(ks[2], (out_channels, skip_channels, 1, 1)), # Conv2d 1x1 (Cout, Cs, 1, 1)
        skip_b=rnd(ks[3], (out_channels,)),
        conv1_w=rnd(ks[4], (out_channels, 2 * out_channels, 3, 3)),
        bn1_g=1.0 + 0.1 * jax.random.normal(ks[5], (out_channels,), jnp.float32),
        bn1_b=rnd(ks[6], (out_channels,)),
        bn1_rm=rnd(ks[7], (out_channels,)),
        bn1_rv=1.0 + 0.1 * jax.random.uniform(ks[8], (out_channels,), jnp.float32),
        conv2_w=rnd(ks[9], (out_channels, out_channels, 3, 3)),
        bn2_g=1.0 + 0.1 * jax.random.normal(ks[10], (out_channels,), jnp.float32),
        bn2_b=rnd(ks[11], (out_channels,)),
        bn2_rm=jnp.zeros((out_channels,), jnp.float32),
        bn2_rv=jnp.ones((out_channels,), jnp.float32),
    )


# ------------------------------------ main ------------------------------------------
if __name__ == "__main__":
    key = jax.random.PRNGKey(0)
    k_x, k_s, k_p = jax.random.split(key, 3)

    batch, in_channels, out_channels, skip_channels = 2, 8, 4, 6
    H, W = 8, 8                        # low-res input; upsampled to 16x16
    Hs, Ws = 2 * H, 2 * W              # skip resolution

    x = jax.random.normal(k_x, (batch, in_channels, H, W), jnp.float32)
    skip = jax.random.normal(k_s, (batch, skip_channels, Hs, Ws), jnp.float32)
    params = init_params(k_p, in_channels, out_channels, skip_channels)

    out = jax.block_until_ready(jax.jit(decoder_block_forward)(params, x, skip))
    ref = jax.block_until_ready(reference_forward(params, x, skip))

    # bf16 MXU inputs / bf16 intermediates -> compare at bf16-appropriate tolerance.
    np.testing.assert_allclose(np.asarray(out), np.asarray(ref), rtol=2e-2, atol=2e-2)
    assert out.shape == (batch, out_channels, Hs, Ws)

    print("KERNEL_OK")
</pallas_src>

<mosaic_0001>
module attributes {stable_mosaic.version = 11 : i64} {
  func.func @_matmul_1step_kernel(%arg0: i32, %arg1: i32, %arg2: i32, %arg3: memref<128x8xbf16, #tpu.memory_space<vmem>>, %arg4: memref<8x256xbf16, #tpu.memory_space<vmem>>, %arg5: memref<1x256xf32, #tpu.memory_space<vmem>>, %arg6: memref<128x256xbf16, #tpu.memory_space<vmem>>) attributes {dimension_semantics = [#tpu.dimension_semantics<parallel>, #tpu.dimension_semantics<parallel>, #tpu.dimension_semantics<arbitrary>], iteration_bounds = array<i64: 1, 2, 1>, scalar_prefetch = 0 : i64, scratch_operands = 0 : i64, tpu.core_type = #tpu.core_type<tc>, window_params = [{transform_indices = @transform_0, window_bounds = array<i64: 128, 8>}, {transform_indices = @transform_1, window_bounds = array<i64: 8, 256>}, {transform_indices = @transform_2, window_bounds = array<i64: 1, 256>}, {transform_indices = @transform_3, window_bounds = array<i64: 128, 256>}]} {
    %c0 = arith.constant 0 : index
    %c0_0 = arith.constant 0 : index
    %0 = vector.load %arg3[%c0, %c0_0] : memref<128x8xbf16, #tpu.memory_space<vmem>>, vector<128x8xbf16>
    %c0_1 = arith.constant 0 : index
    %c0_2 = arith.constant 0 : index
    %1 = vector.load %arg4[%c0_1, %c0_2] : memref<8x256xbf16, #tpu.memory_space<vmem>>, vector<8x256xbf16>
    %cst = arith.constant dense<0.000000e+00> : vector<128x256xf32>
    %2 = tpu.matmul %0, %1, %cst {dimension_numbers = #tpu.dot_dimension_numbers<[1], [0], [0], [1], [0, 0, 1, 1], [], []>} : vector<128x8xbf16>, vector<8x256xbf16>, vector<128x256xf32> -> vector<128x256xf32>
    %c0_3 = arith.constant 0 : index
    %c0_4 = arith.constant 0 : index
    %3 = vector.load %arg5[%c0_3, %c0_4] : memref<1x256xf32, #tpu.memory_space<vmem>>, vector<1x256xf32>
    %4 = vector.broadcast %3 : vector<1x256xf32> to vector<128x256xf32>
    %5 = arith.addf %2, %4 : vector<128x256xf32>
    %6 = arith.truncf %5 : vector<128x256xf32> to vector<128x256xbf16>
    %c0_5 = arith.constant 0 : index
    %c0_6 = arith.constant 0 : index
    %7 = vector.load %arg6[%c0_5, %c0_6] : memref<128x256xbf16, #tpu.memory_space<vmem>>, vector<128x256xbf16>
    tpu.vector_store %arg6[%c0_5, %c0_6], %6 {strides = array<i32>} : memref<128x256xbf16, #tpu.memory_space<vmem>>, vector<128x256xbf16>,
    return
  }
  func.func @transform_0(%arg0: i32, %arg1: i32, %arg2: i32) -> (i32, i32) {
    %c0_i32 = arith.constant 0 : i32
    return %arg0, %arg2 : i32, i32
  }
  func.func @transform_1(%arg0: i32, %arg1: i32, %arg2: i32) -> (i32, i32) {
    %c0_i32 = arith.constant 0 : i32
    return %arg2, %arg1 : i32, i32
  }
  func.func @transform_2(%arg0: i32, %arg1: i32, %arg2: i32) -> (i32, i32) {
    %c0_i32 = arith.constant 0 : i32
    %c0_i32_0 = arith.constant 0 : i32
    return %c0_i32, %arg1 : i32, i32
  }
  func.func @transform_3(%arg0: i32, %arg1: i32, %arg2: i32) -> (i32, i32) {
    %c0_i32 = arith.constant 0 : i32
    return %arg0, %arg1 : i32, i32
  }
}

module attributes {stable_mosaic.version = 11 : i64} {
  func.func @_matmul_1step_kernel(%arg0: i32, %arg1: i32, %arg2: i32, %arg3: memref<512x6xbf16, #tpu.memory_space<vmem>>, %arg4: memref<6x128xbf16, #tpu.memory_space<vmem>>, %arg5: memref<1x128xf32, #tpu.memory_space<vmem>>, %arg6: memref<512x128xbf16, #tpu.memory_space<vmem>>) attributes {dimension_semantics = [#tpu.dimension_semantics<parallel>, #tpu.dimension_semantics<parallel>, #tpu.dimension_semantics<arbitrary>], iteration_bounds = array<i64: 1, 1, 1>, scalar_prefetch = 0 : i64, scratch_operands = 0 : i64, tpu.core_type = #tpu.core_type<tc>, window_params = [{transform_indices = @transform_0, window_bounds = array<i64: 512, 6>}, {transform_indices = @transform_1, window_bounds = array<i64: 6, 128>}, {transform_indices = @transform_2, window_bounds = array<i64: 1, 128>}, {transform_indices = @transform_3, window_bounds = array<i64: 512, 128>}]} {
    %c0 = arith.constant 0 : index
    %c0_0 = arith.constant 0 : index
    %0 = vector.load %arg3[%c0, %c0_0] : memref<512x6xbf16, #tpu.memory_space<vmem>>, vector<512x6xbf16>
    %c0_1 = arith.constant 0 : index
    %c0_2 = arith.constant 0 : index
    %1 = vector.load %arg4[%c0_1, %c0_2] : memref<6x128xbf16, #tpu.memory_space<vmem>>, vector<6x128xbf16>
    %cst = arith.constant dense<0.000000e+00> : vector<512x128xf32>
    %2 = tpu.matmul %0, %1, %cst {dimension_numbers = #tpu.dot_dimension_numbers<[1], [0], [0], [1], [0, 0, 1, 1], [], []>} : vector<512x6xbf16>, vector<6x128xbf16>, vector<512x128xf32> -> vector<512x128xf32>
    %c0_3 = arith.constant 0 : index
    %c0_4 = arith.constant 0 : index
    %3 = vector.load %arg5[%c0_3, %c0_4] : memref<1x128xf32, #tpu.memory_space<vmem>>, vector<1x128xf32>
    %4 = vector.broadcast %3 : vector<1x128xf32> to vector<512x128xf32>
    %5 = arith.addf %2, %4 : vector<512x128xf32>
    %6 = arith.truncf %5 : vector<512x128xf32> to vector<512x128xbf16>
    %c0_5 = arith.constant 0 : index
    %c0_6 = arith.constant 0 : index
    %7 = vector.load %arg6[%c0_5, %c0_6] : memref<512x128xbf16, #tpu.memory_space<vmem>>, vector<512x128xbf16>
    tpu.vector_store %arg6[%c0_5, %c0_6], %6 {strides = array<i32>} : memref<512x128xbf16, #tpu.memory_space<vmem>>, vector<512x128xbf16>,
    return
  }
  func.func @transform_0(%arg0: i32, %arg1: i32, %arg2: i32) -> (i32, i32) {
    %c0_i32 = arith.constant 0 : i32
    return %arg0, %arg2 : i32, i32
  }
  func.func @transform_1(%arg0: i32, %arg1: i32, %arg2: i32) -> (i32, i32) {
    %c0_i32 = arith.constant 0 : i32
    return %arg2, %arg1 : i32, i32
  }
  func.func @transform_2(%arg0: i32, %arg1: i32, %arg2: i32) -> (i32, i32) {
    %c0_i32 = arith.constant 0 : i32
    %c0_i32_0 = arith.constant 0 : i32
    return %c0_i32, %arg1 : i32, i32
  }
  func.func @transform_3(%arg0: i32, %arg1: i32, %arg2: i32) -> (i32, i32) {
    %c0_i32 = arith.constant 0 : i32
    return %arg0, %arg1 : i32, i32
  }
}

module attributes {stable_mosaic.version = 11 : i64} {
  func.func @_conv3x3_kernel(%arg0: i32, %arg1: i32, %arg2: memref<1x18x24x128xbf16, #tpu.memory_space<vmem>>, %arg3: memref<1x18x24x128xbf16, #tpu.memory_space<vmem>>, %arg4: memref<2304x128xbf16, #tpu.memory_space<vmem>>, %arg5: memref<1x128xf32, #tpu.memory_space<vmem>>, %arg6: memref<1x256x128xbf16, #tpu.memory_space<vmem>>) attributes {dimension_semantics = [#tpu.dimension_semantics<parallel>, #tpu.dimension_semantics<arbitrary>], iteration_bounds = array<i64: 2, 1>, scalar_prefetch = 0 : i64, scratch_operands = 0 : i64, tpu.core_type = #tpu.core_type<tc>, window_params = [{transform_indices = @transform_0, window_bounds = array<i64: 1, 18, 24, 128>}, {transform_indices = @transform_1, window_bounds = array<i64: 1, 18, 24, 128>}, {pipeline_mode = #tpu.pipeline_mode<synchronous>, transform_indices = @transform_2, window_bounds = array<i64: 2304, 128>}, {pipeline_mode = #tpu.pipeline_mode<synchronous>, transform_indices = @transform_3, window_bounds = array<i64: 1, 128>}, {transform_indices = @transform_4, window_bounds = array<i64: 1, 256, 128>}]} {
    %c16_i32 = arith.constant 16 : i32
    %0 = arith.muli %arg1, %c16_i32 : i32
    %1 = tpu.assume_multiple %0, 16 : i32
    %c0_i32 = arith.constant 0 : i32
    %2 = arith.addi %1, %c0_i32 : i32
    %c0 = arith.constant 0 : index
    %3 = arith.index_cast %2 : i32 to index
    %c0_0 = arith.constant 0 : index
    %c0_1 = arith.constant 0 : index
    %4 = vector.load %arg2[%c0, %3, %c0_0, %c0_1] : memref<1x18x24x128xbf16, #tpu.memory_space<vmem>>, vector<1x16x24x128xbf16>
    %5 = vector.shape_cast %4 : vector<1x16x24x128xbf16> to vector<16x24x128xbf16>
    %c0_i32_2 = arith.constant 0 : i32
    %6 = arith.addi %1, %c0_i32_2 : i32
    %c0_3 = arith.constant 0 : index
    %7 = arith.index_cast %6 : i32 to index
    %c0_4 = arith.constant 0 : index
    %c0_5 = arith.constant 0 : index
    %8 = vector.load %arg3[%c0_3, %7, %c0_4, %c0_5] : memref<1x18x24x128xbf16, #tpu.memory_space<vmem>>, vector<1x16x24x128xbf16>
    %9 = vector.shape_cast %8 : vector<1x16x24x128xbf16> to vector<16x24x128xbf16>
    %10 = vector.extract_strided_slice %5 {offsets = [0, 0, 0], sizes = [16, 16, 128], strides = [1, 1, 1]} : vector<16x24x128xbf16> to vector<16x16x128xbf16>
    %11 = vector.extract_strided_slice %9 {offsets = [0, 0, 0], sizes = [16, 16, 128], strides = [1, 1, 1]} : vector<16x24x128xbf16> to vector<16x16x128xbf16>
    %12 = vector.extract_strided_slice %5 {offsets = [0, 1, 0], sizes = [16, 16, 128], strides = [1, 1, 1]} : vector<16x24x128xbf16> to vector<16x16x128xbf16>
    %13 = vector.extract_strided_slice %9 {offsets = [0, 1, 0], sizes = [16, 16, 128], strides = [1, 1, 1]} : vector<16x24x128xbf16> to vector<16x16x128xbf16>
    %14 = vector.extract_strided_slice %5 {offsets = [0, 2, 0], sizes = [16, 16, 128], strides = [1, 1, 1]} : vector<16x24x128xbf16> to vector<16x16x128xbf16>
    %15 = vector.extract_strided_slice %9 {offsets = [0, 2, 0], sizes = [16, 16, 128], strides = [1, 1, 1]} : vector<16x24x128xbf16> to vector<16x16x128xbf16>
    %c1_i32 = arith.constant 1 : i32
    %16 = arith.addi %1, %c1_i32 : i32
    %c0_6 = arith.constant 0 : index
    %17 = arith.index_cast %16 : i32 to index
    %c0_7 = arith.constant 0 : index
    %c0_8 = arith.constant 0 : index
    %18 = vector.load %arg2[%c0_6, %17, %c0_7, %c0_8] : memref<1x18x24x128xbf16, #tpu.memory_space<vmem>>, vector<1x16x24x128xbf16>
    %19 = vector.shape_cast %18 : vector<1x16x24x128xbf16> to vector<16x24x128xbf16>
    %c1_i32_9 = arith.constant 1 : i32
    %20 = arith.addi %1, %c1_i32_9 : i32
    %c0_10 = arith.constant 0 : index
    %21 = arith.index_cast %20 : i32 to index
    %c0_11 = arith.constant 0 : index
    %c0_12 = arith.constant 0 : index
    %22 = vector.load %arg3[%c0_10, %21, %c0_11, %c0_12] : memref<1x18x24x128xbf16, #tpu.memory_space<vmem>>, vector<1x16x24x128xbf16>
    %23 = vector.shape_cast %22 : vector<1x16x24x128xbf16> to vector<16x24x128xbf16>
    %24 = vector.extract_strided_slice %19 {offsets = [0, 0, 0], sizes = [16, 16, 128], strides = [1, 1, 1]} : vector<16x24x128xbf16> to vector<16x16x128xbf16>
    %25 = vector.extract_strided_slice %23 {offsets = [0, 0, 0], sizes = [16, 16, 128], strides = [1, 1, 1]} : vector<16x24x128xbf16> to vector<16x16x128xbf16>
    %26 = vector.extract_strided_slice %19 {offsets = [0, 1, 0], sizes = [16, 16, 128], strides = [1, 1, 1]} : vector<16x24x128xbf16> to vector<16x16x128xbf16>
    %27 = vector.extract_strided_slice %23 {offsets = [0, 1, 0], sizes = [16, 16, 128], strides = [1, 1, 1]} : vector<16x24x128xbf16> to vector<16x16x128xbf16>
    %28 = vector.extract_strided_slice %19 {offsets = [0, 2, 0], sizes = [16, 16, 128], strides = [1, 1, 1]} : vector<16x24x128xbf16> to vector<16x16x128xbf16>
    %29 = vector.extract_strided_slice %23 {offsets = [0, 2, 0], sizes = [16, 16, 128], strides = [1, 1, 1]} : vector<16x24x128xbf16> to vector<16x16x128xbf16>
    %c2_i32 = arith.constant 2 : i32
    %30 = arith.addi %1, %c2_i32 : i32
    %c0_13 = arith.constant 0 : index
    %31 = arith.index_cast %30 : i32 to index
    %c0_14 = arith.constant 0 : index
    %c0_15 = arith.constant 0 : index
    %32 = vector.load %arg2[%c0_13, %31, %c0_14, %c0_15] : memref<1x18x24x128xbf16, #tpu.memory_space<vmem>>, vector<1x16x24x128xbf16>
    %33 = vector.shape_cast %32 : vector<1x16x24x128xbf16> to vector<16x24x128xbf16>
    %c2_i32_16 = arith.constant 2 : i32
    %34 = arith.addi %1, %c2_i32_16 : i32
    %c0_17 = arith.constant 0 : index
    %35 = arith.index_cast %34 : i32 to index
    %c0_18 = arith.constant 0 : index
    %c0_19 = arith.constant 0 : index
    %36 = vector.load %arg3[%c0_17, %35, %c0_18, %c0_19] : memref<1x18x24x128xbf16, #tpu.memory_space<vmem>>, vector<1x16x24x128xbf16>
    %37 = vector.shape_cast %36 : vector<1x16x24x128xbf16> to vector<16x24x128xbf16>
    %38 = vector.extract_strided_slice %33 {offsets = [0, 0, 0], sizes = [16, 16, 128], strides = [1, 1, 1]} : vector<16x24x128xbf16> to vector<16x16x128xbf16>
    %39 = vector.extract_strided_slice %37 {offsets = [0, 0, 0], sizes = [16, 16, 128], strides = [1, 1, 1]} : vector<16x24x128xbf16> to vector<16x16x128xbf16>
    %40 = vector.extract_strided_slice %33 {offsets = [0, 1, 0], sizes = [16, 16, 128], strides = [1, 1, 1]} : vector<16x24x128xbf16> to vector<16x16x128xbf16>
    %41 = vector.extract_strided_slice %37 {offsets = [0, 1, 0], sizes = [16, 16, 128], strides = [1, 1, 1]} : vector<16x24x128xbf16> to vector<16x16x128xbf16>
    %42 = vector.extract_strided_slice %33 {offsets = [0, 2, 0], sizes = [16, 16, 128], strides = [1, 1, 1]} : vector<16x24x128xbf16> to vector<16x16x128xbf16>
    %43 = vector.extract_strided_slice %37 {offsets = [0, 2, 0], sizes = [16, 16, 128], strides = [1, 1, 1]} : vector<16x24x128xbf16> to vector<16x16x128xbf16>
    %44 = tpu.concatenate %10, %11, %12, %13, %14, %15, %24, %25, %26, %27, %28, %29, %38, %39, %40, %41 in 2 : vector<16x16x128xbf16>, vector<16x16x128xbf16>, vector<16x16x128xbf16>, vector<16x16x128xbf16>, vector<16x16x128xbf16>, vector<16x16x128xbf16>, vector<16x16x128xbf16>, vector<16x16x128xbf16>, vector<16x16x128xbf16>, vector<16x16x128xbf16>, vector<16x16x128xbf16>, vector<16x16x128xbf16>, vector<16x16x128xbf16>, vector<16x16x128xbf16>, vector<16x16x128xbf16>, vector<16x16x128xbf16> -> vector<16x16x2048xbf16>
    %45 = tpu.concatenate %42, %43 in 2 : vector<16x16x128xbf16>, vector<16x16x128xbf16> -> vector<16x16x256xbf16>
    %46 = tpu.concatenate %44, %45 in 2 : vector<16x16x2048xbf16>, vector<16x16x256xbf16> -> vector<16x16x2304xbf16>
    %47 = vector.shape_cast %46 : vector<16x16x2304xbf16> to vector<256x2304xbf16>
    %c0_20 = arith.constant 0 : index
    %c0_21 = arith.constant 0 : index
    %48 = vector.load %arg4[%c0_20, %c0_21] : memref<2304x128xbf16, #tpu.memory_space<vmem>>, vector<2304x128xbf16>
    %cst = arith.constant dense<0.000000e+00> : vector<256x128xf32>
    %49 = tpu.matmul %47, %48, %cst {dimension_numbers = #tpu.dot_dimension_numbers<[1], [0], [0], [1], [0, 0, 1, 1], [], []>} : vector<256x2304xbf16>, vector<2304x128xbf16>, vector<256x128xf32> -> vector<256x128xf32>
    %c0_22 = arith.constant 0 : index
    %c0_23 = arith.constant 0 : index
    %50 = vector.load %arg5[%c0_22, %c0_23] : memref<1x128xf32, #tpu.memory_space<vmem>>, vector<1x128xf32>
    %51 = vector.broadcast %50 : vector<1x128xf32> to vector<256x128xf32>
    %52 = arith.addf %49, %51 : vector<256x128xf32>
    %cst_24 = arith.constant 0.000000e+00 : f32
    %53 = vector.broadcast %cst_24 : f32 to vector<256x128xf32>
    %54 = arith.maximumf %52, %53 : vector<256x128xf32>
    %55 = arith.truncf %54 : vector<256x128xf32> to vector<256x128xbf16>
    %c0_25 = arith.constant 0 : index
    %c0_26 = arith.constant 0 : index
    %c0_27 = arith.constant 0 : index
    %56 = vector.load %arg6[%c0_25, %c0_26, %c0_27] : memref<1x256x128xbf16, #tpu.memory_space<vmem>>, vector<1x256x128xbf16>
    %57 = vector.shape_cast %56 : vector<1x256x128xbf16> to vector<256x128xbf16>
    %58 = vector.shape_cast %55 : vector<256x128xbf16> to vector<1x256x128xbf16>
    tpu.vector_store %arg6[%c0_25, %c0_26, %c0_27], %58 {strides = array<i32>} : memref<1x256x128xbf16, #tpu.memory_space<vmem>>, vector<1x256x128xbf16>,
    return
  }
  func.func @transform_0(%arg0: i32, %arg1: i32) -> (i32, i32, i32, i32) {
    %c0_i32 = arith.constant 0 : i32
    %c0_i32_0 = arith.constant 0 : i32
    %c0_i32_1 = arith.constant 0 : i32
    %c0_i32_2 = arith.constant 0 : i32
    return %arg0, %c0_i32, %c0_i32_0, %c0_i32_1 : i32, i32, i32, i32
  }
  func.func @transform_1(%arg0: i32, %arg1: i32) -> (i32, i32, i32, i32) {
    %c0_i32 = arith.constant 0 : i32
    %c0_i32_0 = arith.constant 0 : i32
    %c0_i32_1 = arith.constant 0 : i32
    %c0_i32_2 = arith.constant 0 : i32
    return %arg0, %c0_i32, %c0_i32_0, %c0_i32_1 : i32, i32, i32, i32
  }
  func.func @transform_2(%arg0: i32, %arg1: i32) -> (i32, i32) {
    %c0_i32 = arith.constant 0 : i32
    %c0_i32_0 = arith.constant 0 : i32
    %c0_i32_1 = arith.constant 0 : i32
    return %c0_i32, %c0_i32_0 : i32, i32
  }
  func.func @transform_3(%arg0: i32, %arg1: i32) -> (i32, i32) {
    %c0_i32 = arith.constant 0 : i32
    %c0_i32_0 = arith.constant 0 : i32
    %c0_i32_1 = arith.constant 0 : i32
    return %c0_i32, %c0_i32_0 : i32, i32
  }
  func.func @transform_4(%arg0: i32, %arg1: i32) -> (i32, i32, i32) {
    %c0_i32 = arith.constant 0 : i32
    %c0_i32_0 = arith.constant 0 : i32
    return %arg0, %arg1, %c0_i32 : i32, i32, i32
  }
}

module attributes {stable_mosaic.version = 11 : i64} {
  func.func @_conv3x3_kernel(%arg0: i32, %arg1: i32, %arg2: memref<1x18x24x128xbf16, #tpu.memory_space<vmem>>, %arg3: memref<1152x128xbf16, #tpu.memory_space<vmem>>, %arg4: memref<1x128xf32, #tpu.memory_space<vmem>>, %arg5: memref<1x256x128xf32, #tpu.memory_space<vmem>>) attributes {dimension_semantics = [#tpu.dimension_semantics<parallel>, #tpu.dimension_semantics<arbitrary>], iteration_bounds = array<i64: 2, 1>, scalar_prefetch = 0 : i64, scratch_operands = 0 : i64, tpu.core_type = #tpu.core_type<tc>, window_params = [{transform_indices = @transform_0, window_bounds = array<i64: 1, 18, 24, 128>}, {pipeline_mode = #tpu.pipeline_mode<synchronous>, transform_indices = @transform_1, window_bounds = array<i64: 1152, 128>}, {pipeline_mode = #tpu.pipeline_mode<synchronous>, transform_indices = @transform_2, window_bounds = array<i64: 1, 128>}, {transform_indices = @transform_3, window_bounds = array<i64: 1, 256, 128>}]} {
    %c16_i32 = arith.constant 16 : i32
    %0 = arith.muli %arg1, %c16_i32 : i32
    %1 = tpu.assume_multiple %0, 16 : i32
    %c0_i32 = arith.constant 0 : i32
    %2 = arith.addi %1, %c0_i32 : i32
    %c0 = arith.constant 0 : index
    %3 = arith.index_cast %2 : i32 to index
    %c0_0 = arith.constant 0 : index
    %c0_1 = arith.constant 0 : index
    %4 = vector.load %arg2[%c0, %3, %c0_0, %c0_1] : memref<1x18x24x128xbf16, #tpu.memory_space<vmem>>, vector<1x16x24x128xbf16>
    %5 = vector.shape_cast %4 : vector<1x16x24x128xbf16> to vector<16x24x128xbf16>
    %6 = vector.extract_strided_slice %5 {offsets = [0, 0, 0], sizes = [16, 16, 128], strides = [1, 1, 1]} : vector<16x24x128xbf16> to vector<16x16x128xbf16>
    %7 = vector.extract_strided_slice %5 {offsets = [0, 1, 0], sizes = [16, 16, 128], strides = [1, 1, 1]} : vector<16x24x128xbf16> to vector<16x16x128xbf16>
    %8 = vector.extract_strided_slice %5 {offsets = [0, 2, 0], sizes = [16, 16, 128], strides = [1, 1, 1]} : vector<16x24x128xbf16> to vector<16x16x128xbf16>
    %c1_i32 = arith.constant 1 : i32
    %9 = arith.addi %1, %c1_i32 : i32
    %c0_2 = arith.constant 0 : index
    %10 = arith.index_cast %9 : i32 to index
    %c0_3 = arith.constant 0 : index
    %c0_4 = arith.constant 0 : index
    %11 = vector.load %arg2[%c0_2, %10, %c0_3, %c0_4] : memref<1x18x24x128xbf16, #tpu.memory_space<vmem>>, vector<1x16x24x128xbf16>
    %12 = vector.shape_cast %11 : vector<1x16x24x128xbf16> to vector<16x24x128xbf16>
    %13 = vector.extract_strided_slice %12 {offsets = [0, 0, 0], sizes = [16, 16, 128], strides = [1, 1, 1]} : vector<16x24x128xbf16> to vector<16x16x128xbf16>
    %14 = vector.extract_strided_slice %12 {offsets = [0, 1, 0], sizes = [16, 16, 128], strides = [1, 1, 1]} : vector<16x24x128xbf16> to vector<16x16x128xbf16>
    %15 = vector.extract_strided_slice %12 {offsets = [0, 2, 0], sizes = [16, 16, 128], strides = [1, 1, 1]} : vector<16x24x128xbf16> to vector<16x16x128xbf16>
    %c2_i32 = arith.constant 2 : i32
    %16 = arith.addi %1, %c2_i32 : i32
    %c0_5 = arith.constant 0 : index
    %17 = arith.index_cast %16 : i32 to index
    %c0_6 = arith.constant 0 : index
    %c0_7 = arith.constant 0 : index
    %18 = vector.load %arg2[%c0_5, %17, %c0_6, %c0_7] : memref<1x18x24x128xbf16, #tpu.memory_space<vmem>>, vector<1x16x24x128xbf16>
    %19 = vector.shape_cast %18 : vector<1x16x24x128xbf16> to vector<16x24x128xbf16>
    %20 = vector.extract_strided_slice %19 {offsets = [0, 0, 0], sizes = [16, 16, 128], strides = [1, 1, 1]} : vector<16x24x128xbf16> to vector<16x16x128xbf16>
    %21 = vector.extract_strided_slice %19 {offsets = [0, 1, 0], sizes = [16, 16, 128], strides = [1, 1, 1]} : vector<16x24x128xbf16> to vector<16x16x128xbf16>
    %22 = vector.extract_strided_slice %19 {offsets = [0, 2, 0], sizes = [16, 16, 128], strides = [1, 1, 1]} : vector<16x24x128xbf16> to vector<16x16x128xbf16>
    %23 = tpu.concatenate %6, %7, %8, %13, %14, %15, %20, %21, %22 in 2 : vector<16x16x128xbf16>, vector<16x16x128xbf16>, vector<16x16x128xbf16>, vector<16x16x128xbf16>, vector<16x16x128xbf16>, vector<16x16x128xbf16>, vector<16x16x128xbf16>, vector<16x16x128xbf16>, vector<16x16x128xbf16> -> vector<16x16x1152xbf16>
    %24 = vector.shape_cast %23 : vector<16x16x1152xbf16> to vector<256x1152xbf16>
    %c0_8 = arith.constant 0 : index
    %c0_9 = arith.constant 0 : index
    %25 = vector.load %arg3[%c0_8, %c0_9] : memref<1152x128xbf16, #tpu.memory_space<vmem>>, vector<1152x128xbf16>
    %cst = arith.constant dense<0.000000e+00> : vector<256x128xf32>
    %26 = tpu.matmul %24, %25, %cst {dimension_numbers = #tpu.dot_dimension_numbers<[1], [0], [0], [1], [0, 0, 1, 1], [], []>} : vector<256x1152xbf16>, vector<1152x128xbf16>, vector<256x128xf32> -> vector<256x128xf32>
    %c0_10 = arith.constant 0 : index
    %c0_11 = arith.constant 0 : index
    %27 = vector.load %arg4[%c0_10, %c0_11] : memref<1x128xf32, #tpu.memory_space<vmem>>, vector<1x128xf32>
    %28 = vector.broadcast %27 : vector<1x128xf32> to vector<256x128xf32>
    %29 = arith.addf %26, %28 : vector<256x128xf32>
    %cst_12 = arith.constant 0.000000e+00 : f32
    %30 = vector.broadcast %cst_12 : f32 to vector<256x128xf32>
    %31 = arith.maximumf %29, %30 : vector<256x128xf32>
    %c0_13 = arith.constant 0 : index
    %c0_14 = arith.constant 0 : index
    %c0_15 = arith.constant 0 : index
    %32 = vector.load %arg5[%c0_13, %c0_14, %c0_15] : memref<1x256x128xf32, #tpu.memory_space<vmem>>, vector<1x256x128xf32>
    %33 = vector.shape_cast %32 : vector<1x256x128xf32> to vector<256x128xf32>
    %34 = vector.shape_cast %31 : vector<256x128xf32> to vector<1x256x128xf32>
    tpu.vector_store %arg5[%c0_13, %c0_14, %c0_15], %34 {strides = array<i32>} : memref<1x256x128xf32, #tpu.memory_space<vmem>>, vector<1x256x128xf32>,
    return
  }
  func.func @transform_0(%arg0: i32, %arg1: i32) -> (i32, i32, i32, i32) {
    %c0_i32 = arith.constant 0 : i32
    %c0_i32_0 = arith.constant 0 : i32
    %c0_i32_1 = arith.constant 0 : i32
    %c0_i32_2 = arith.constant 0 : i32
    return %arg0, %c0_i32, %c0_i32_0, %c0_i32_1 : i32, i32, i32, i32
  }
  func.func @transform_1(%arg0: i32, %arg1: i32) -> (i32, i32) {
    %c0_i32 = arith.constant 0 : i32
    %c0_i32_0 = arith.constant 0 : i32
    %c0_i32_1 = arith.constant 0 : i32
    return %c0_i32, %c0_i32_0 : i32, i32
  }
  func.func @transform_2(%arg0: i32, %arg1: i32) -> (i32, i32) {
    %c0_i32 = arith.constant 0 : i32
    %c0_i32_0 = arith.constant 0 : i32
    %c0_i32_1 = arith.constant 0 : i32
    return %c0_i32, %c0_i32_0 : i32, i32
  }
  func.func @transform_3(%arg0: i32, %arg1: i32) -> (i32, i32, i32) {
    %c0_i32 = arith.constant 0 : i32
    %c0_i32_0 = arith.constant 0 : i32
    return %arg0, %arg1, %c0_i32 : i32, i32, i32
  }
}

</mosaic_0001>

<bundles_post_ra>
// kernel: tile.8
= control target key start
LH: loop header
LB: loop body
LE: loop exit
PB: predicated region body
PF: predicated region fallthrough
CT: control target
= control target key end

     0   :  { %s22_s0 = inlined_call_operand.vmem [shape: f32[128], index: 0, kind: input, shape index: {}]   ;;  %s23_s1 = inlined_call_operand.vmem [shape: f32[4,128], index: 1, kind: output, shape index: {}]  }
   0x1   :  { %v4_v0 = vld [vmem:[%s22_s0] ss:$0 sm:$0xff] }
   0x2   :  { %5 = vst [vmem:[%s23_s1] sm:$0xf] %v4_v0 }

// kernel: decoder_block_forward.4
= control target key start
LH: loop header
LB: loop body
LE: loop exit
PB: predicated region body
PF: predicated region fallthrough
CT: control target
= control target key end

     0   :  { %s865_s12 = smov 0   ;;  %s867_s13 = smov 0   ;;  %s1051_s0 = inlined_call_operand.vmem [shape: bf16[128,8], index: 0, kind: input, shape index: {}]   ;;  %s1052_s1 = inlined_call_operand.vmem [shape: bf16[8,512], index: 1, kind: input, shape index: {}]   ;;  %s1053_s2 = inlined_call_operand.vmem [shape: f32[1,512], index: 2, kind: input, shape index: {}]   ;;  %s1054_s3 = inlined_call_operand.vmem [shape: bf16[128,512], index: 3, kind: output, shape index: {}]  }
   0x1   :  { %s869_s14 = smov 0   ;;  %s871_s15 = smov 0  }
   0x2   :  { %s873_s16 = smov 0  }
   0x3 LB: > { %s691_s17 = sadd.s32 4294967295, %s843_s16   ;;  %s28_s18 = sadd.s32 1, %s839_s15  ;;  %s843_s16 = sphi %s873_s16, %s13_s16   ;;  %s839_s15 = sphi %s871_s15, %s1059_s15   ;;  %s835_s14 = sphi %s869_s14, %s1058_s14   ;;  %s831_s13 = sphi %s867_s13, %s1057_s13   ;;  %s827_s12 = sphi %s865_s12, %s1056_s12  }
   0x4   : > { %p30_p0 = scmp.ge.s32.totalorder %s28_s18, 2  ;;  %s123_s19 = sadd.s32 1, %s831_s13 }
   0x5   : > { %p133_p1 = scmp.ne.s32.totalorder %s831_s13, %s827_s12  ;;  %p134_p2 = scmp.eq.s32.totalorder %s691_s17, 1 }
   0x6   : > { %s1061_s18 = smov (%p30_p0, %s28_s18), 0  ;;  %p696_p4 = scmp.ge.s32.totalorder %s843_s16, 1 }
   0x7   : > { %p897_p3 = por %p134_p2, %p133_p1  ;;  %s119_s21 = ssub.s32 %s839_s15, %s1061_s18 }
   0x8   : > { %p191_p5 = scmp.lt.s32.totalorder %s843_s16, 3  ;;  %p121_p6 = scmp.eq.s32.totalorder %s119_s21, 0 }
   0xa   : > { %p192_p7 = pnand %p696_p4, %p191_p5 }
   0xb   : > { %s906_s22 = scalar_select %p121_p6, %s831_s13, %s123_s19  }
   0xc   : > { %195 = sbr.rel (%p192_p7) target bundleno = 231 (0xe7), region = 32  ;;  %s698_s23 = sshll.u32 (!%p192_p7), %s835_s14, 1 }
   0xd   : > { %p242_p8 = scmp.lt.s32.totalorder (!%p192_p7), %s698_s23, 3  ;;  %s227_s29 = sand.u32 (!%p192_p7), 1, %s827_s12  }
   0xe   : > { %s697_s30 = sshll.u32 (!%p192_p7), %s227_s29, 7 }
   0xf   : > { %s966_s4 = scalar_lea.vmem (!%p192_p7), [#allocation2], %s697_s30 }
  0x11   : > { %s1063_s23 = smov (!%p242_p8, %s698_s23), 3  ;;  %vm350_vm0 = vcmask 1043456   ;;  %v754_v7 = vld [vmem:[%s1051_s0] sm:$0xff]  ;;  %vm325_vm1 = vcmask 64512   ;;  %v755_v9 = vld [vmem:[%s1051_s0 + $0x8] sm:$0xff]  ;;  %v756_v11 = vld [vmem:[%s1051_s0 + $0x10] sm:$0xff] }
  0x12   : > { %s699_s24 = sshll.u32 %s1063_s23, 2  ;;  %v758_v8 = vld [vmem:[%s1051_s0 + $0x20] sm:$0xff]  ;;  %v759_v10 = vld [vmem:[%s1051_s0 + $0x28] sm:$0xff]  ;;  %v760_v12 = vld [vmem:[%s1051_s0 + $0x30] sm:$0xff]  ;;  %s252_s28 = scalar_lea.vmem %s1053_s2, %s1063_s23 }
  0x13   : > { %s247_s27 = scalar_lea.vmem %s1052_s1, %s699_s24  ;;  %v757_v13 = vld [vmem:[%s1051_s0 + $0x18] sm:$0xff]  ;;  %v274_v15 = vld [vmem:[%s252_s28] sm:$0x3]  ;;  %s762_s12 = sshll.u32 (%p897_p3), %s835_s14, 3 }
  0x14   : > { %v273_v0 = vld [vmem:[%s247_s27] sm:$0xff]  ;;  %v761_v14 = vld [vmem:[%s1051_s0 + $0x38] sm:$0xff]  ;;  %v959_v16 = vperm.slane %v274_v15, 0  ;;  %v962_v17 = vperm.slane %v274_v15, 1  ;;  %s499_s6 = scalar_lea.vmem (%p897_p3), %s1054_s3, %s762_s12 }
  0x15   : > { %v321_v1 = vunpack.c.l.b16 %v273_v0  ;;  %v322_v2 = vunpack.c.h.b16 %v273_v0 }
  0x17   : > { %v323_v3 = vpack.c.b16 %v321_v1, %v321_v1  ;;  %v324_v4 = vpack.c.b16 %v322_v2, %v322_v2 }
  0x19   : > { %v352_v5 = vsel %vm350_vm0, %v323_v3, 0  ;;  %v355_v6 = vsel %vm350_vm0, %v324_v4, 0 }
  0x1a   : > { %364 = vmatpush.bf16.msra.mxu0 %v352_v5  ;;  %763 = vmatpush.bf16.msra.mxu2 %v352_v5 }
  0x1b   : > { %413 = vmatpush.bf16.msra.mxu1 %v355_v6  ;;  %764 = vmatpush.bf16.msra.mxu3 %v355_v6 }
  0x1d   : > { %733 = vmatmul.msk.bf16.vlgmr.msra.gmra.mxu0 %vm325_vm1, %v754_v7  ;;  %737 = vmatmul.msk.bf16.vlgmr.msra.gmra.mxu2 %vm325_vm1, %v758_v8 }
  0x1e   : > { %741 = vmatmul.msk.bf16.vlgmr.msra.gmra.mxu1 %vm325_vm1, %v754_v7  ;;  %745 = vmatmul.msk.bf16.vlgmr.msra.gmra.mxu3 %vm325_vm1, %v758_v8 }
  0x2d   : > { %734 = vmatmul.msk.bf16.gmra.mxu0 %vm325_vm1, %v755_v9  ;;  %738 = vmatmul.msk.bf16.gmra.mxu2 %vm325_vm1, %v759_v10 }
  0x2e   : > { %742 = vmatmul.msk.bf16.gmra.mxu1 %vm325_vm1, %v755_v9  ;;  %746 = vmatmul.msk.bf16.gmra.mxu3 %vm325_vm1, %v759_v10 }
  0x3d   : > { %735 = vmatmul.msk.bf16.gmra.mxu0 %vm325_vm1, %v756_v11  ;;  %739 = vmatmul.msk.bf16.gmra.mxu2 %vm325_vm1, %v760_v12 }
  0x3e   : > { %743 = vmatmul.msk.bf16.gmra.mxu1 %vm325_vm1, %v756_v11  ;;  %747 = vmatmul.msk.bf16.gmra.mxu3 %vm325_vm1, %v760_v12 }
  0x4d   : > { %736 = vmatmul.msk.bf16.gmra.mxu0 %vm325_vm1, %v757_v13  ;;  %740 = vmatmul.msk.bf16.gmra.mxu2 %vm325_vm1, %v761_v14 }
  0x4e   : > { %744 = vmatmul.msk.bf16.gmra.mxu1 %vm325_vm1, %v757_v13  ;;  %748 = vmatmul.msk.bf16.gmra.mxu3 %vm325_vm1, %v761_v14 }
  0x9a   : > { %v366_v18 = vpop.f32.mrf.mxu0 }
  0x9b   : > { %v367_v19 = vadd.f32 %v366_v18, %v959_v16  ;;  %v415_v20 = vpop.f32.mrf.mxu1 }
  0x9c   : > { %v416_v21 = vadd.f32 %v415_v20, %v962_v17 }
  0x9e   : > { %v455_v22 = vpack.c.bf16 %v416_v21, %v367_v19 }
  0xa0   : > { %471 = vst [vmem:[%s966_s4] sm:$0xff] %v455_v22  ;;  %v386_v23 = vpop.f32.mrf.mxu2 }
  0xa1   : > { %v387_v24 = vadd.f32 %v386_v23, %v959_v16  ;;  %v435_v25 = vpop.f32.mrf.mxu3 }
  0xa2   : > { %v436_v26 = vadd.f32 %v435_v25, %v962_v17  ;;  %v368_v27 = vpop.f32.mrf.mxu0 }
  0xa3   : > { %v369_v28 = vadd.f32 %v368_v27, %v959_v16  ;;  %v417_v29 = vpop.f32.mrf.mxu1 }
  0xa4   : > { %v463_v30 = vpack.c.bf16 %v436_v26, %v387_v24  ;;  %v418_v31 = vadd.f32 %v417_v29, %v962_v17 }
  0xa6   : > { %479 = vst [vmem:[%s966_s4 + $0x40] sm:$0xff] %v463_v30  ;;  %v456_v32 = vpack.c.bf16 %v418_v31, %v369_v28 }
  0xa8   : > { %472 = vst [vmem:[%s966_s4 + $0x8] sm:$0xff] %v456_v32  ;;  %v388_v33 = vpop.f32.mrf.mxu2 }
  0xa9   : > { %v389_v34 = vadd.f32 %v388_v33, %v959_v16  ;;  %v437_v35 = vpop.f32.mrf.mxu3 }
  0xaa   : > { %v438_v36 = vadd.f32 %v437_v35, %v962_v17  ;;  %v371_v37 = vpop.f32.mrf.mxu0 }
  0xab   : > { %v372_v38 = vadd.f32 %v371_v37, %v959_v16  ;;  %v420_v39 = vpop.f32.mrf.mxu1 }
  0xac   : > { %v464_v40 = vpack.c.bf16 %v438_v36, %v389_v34  ;;  %v421_v41 = vadd.f32 %v420_v39, %v962_v17 }
  0xae   : > { %480 = vst [vmem:[%s966_s4 + $0x48] sm:$0xff] %v464_v40  ;;  %v457_v42 = vpack.c.bf16 %v421_v41, %v372_v38 }
  0xaf   : > { %v560_v36 = vld [vmem:[%s966_s4 + $0x8] sm:$0xff] (%p897_p3) }
  0xb0   : > { %473 = vst [vmem:[%s966_s4 + $0x10] sm:$0xff] %v457_v42  ;;  %v391_v43 = vpop.f32.mrf.mxu2  ;;  %v574_v42 = vld [vmem:[%s966_s4 + $0x40] sm:$0xff] (%p897_p3) }
  0xb1   : > { %v392_v44 = vadd.f32 %v391_v43, %v959_v16  ;;  %v440_v45 = vpop.f32.mrf.mxu3  ;;  %561 = vst [vmem:[%s499_s6 + $0x10] sm:$0xff] (%p897_p3), %v560_v36 }
  0xb2   : > { %v441_v46 = vadd.f32 %v440_v45, %v962_v17  ;;  %v373_v47 = vpop.f32.mrf.mxu0  ;;  %575 = vst [vmem:[%s499_s6 + $0x80] sm:$0xff] (%p897_p3), %v574_v42 }
  0xb3   : > { %v374_v48 = vadd.f32 %v373_v47, %v959_v16  ;;  %v422_v49 = vpop.f32.mrf.mxu1 }
  0xb4   : > { %v465_v50 = vpack.c.bf16 %v441_v46, %v392_v44  ;;  %v423_v51 = vadd.f32 %v422_v49, %v962_v17 }
  0xb5   : > { %v576_v43 = vld [vmem:[%s966_s4 + $0x48] sm:$0xff] (%p897_p3) }
  0xb6   : > { %481 = vst [vmem:[%s966_s4 + $0x50] sm:$0xff] %v465_v50  ;;  %v458_v52 = vpack.c.bf16 %v423_v51, %v374_v48 }
  0xb7   : > { %577 = vst [vmem:[%s499_s6 + $0x90] sm:$0xff] (%p897_p3), %v576_v43 }
  0xb8   : > { %474 = vst [vmem:[%s966_s4 + $0x18] sm:$0xff] %v458_v52  ;;  %v393_v53 = vpop.f32.mrf.mxu2 }
  0xb9   : > { %v394_v54 = vadd.f32 %v393_v53, %v959_v16  ;;  %v442_v55 = vpop.f32.mrf.mxu3 }
  0xba   : > { %v443_v56 = vadd.f32 %v442_v55, %v962_v17  ;;  %v376_v57 = vpop.f32.mrf.mxu0 }
  0xbb   : > { %v377_v58 = vadd.f32 %v376_v57, %v959_v16  ;;  %v425_v59 = vpop.f32.mrf.mxu1 }
  0xbc   : > { %v466_v60 = vpack.c.bf16 %v443_v56, %v394_v54  ;;  %v426_v61 = vadd.f32 %v425_v59, %v962_v17 }
  0xbd   : > { %v578_v44 = vld [vmem:[%s966_s4 + $0x50] sm:$0xff] (%p897_p3) }
  0xbe   : > { %482 = vst [vmem:[%s966_s4 + $0x58] sm:$0xff] %v466_v60  ;;  %v459_v62 = vpack.c.bf16 %v426_v61, %v377_v58 }
  0xbf   : > { %v564_v37 = vld [vmem:[%s966_s4 + $0x18] sm:$0xff] (%p897_p3)  ;;  %579 = vst [vmem:[%s499_s6 + $0xa0] sm:$0xff] (%p897_p3), %v578_v44 }
  0xc0   : > { %475 = vst [vmem:[%s966_s4 + $0x20] sm:$0xff] %v459_v62  ;;  %v396_v63 = vpop.f32.mrf.mxu2 }
  0xc1   : > { %v397_v0 = vadd.f32 %v396_v63, %v959_v16  ;;  %v445_v1 = vpop.f32.mrf.mxu3  ;;  %565 = vst [vmem:[%s499_s6 + $0x30] sm:$0xff] (%p897_p3), %v564_v37 }
  0xc2   : > { %v446_v2 = vadd.f32 %v445_v1, %v962_v17  ;;  %v378_v3 = vpop.f32.mrf.mxu0 }
  0xc3   : > { %v379_v4 = vadd.f32 %v378_v3, %v959_v16  ;;  %v427_v5 = vpop.f32.mrf.mxu1 }
  0xc4   : > { %v467_v6 = vpack.c.bf16 %v446_v2, %v397_v0  ;;  %v428_v7 = vadd.f32 %v427_v5, %v962_v17 }
  0xc5   : > { %v580_v45 = vld [vmem:[%s966_s4 + $0x58] sm:$0xff] (%p897_p3) }
  0xc6   : > { %483 = vst [vmem:[%s966_s4 + $0x60] sm:$0xff] %v467_v6  ;;  %v460_v8 = vpack.c.bf16 %v428_v7, %v379_v4 }
  0xc7   : > { %v566_v38 = vld [vmem:[%s966_s4 + $0x20] sm:$0xff] (%p897_p3)  ;;  %581 = vst [vmem:[%s499_s6 + $0xb0] sm:$0xff] (%p897_p3), %v580_v45 }
  0xc8   : > { %476 = vst [vmem:[%s966_s4 + $0x28] sm:$0xff] %v460_v8  ;;  %v398_v9 = vpop.f32.mrf.mxu2 }
  0xc9   : > { %v399_v10 = vadd.f32 %v398_v9, %v959_v16  ;;  %v447_v11 = vpop.f32.mrf.mxu3  ;;  %567 = vst [vmem:[%s499_s6 + $0x40] sm:$0xff] (%p897_p3), %v566_v38 }
  0xca   : > { %v448_v12 = vadd.f32 %v447_v11, %v962_v17  ;;  %v381_v13 = vpop.f32.mrf.mxu0 }
  0xcb   : > { %v382_v14 = vadd.f32 %v381_v13, %v959_v16  ;;  %v430_v15 = vpop.f32.mrf.mxu1 }
  0xcc   : > { %v468_v18 = vpack.c.bf16 %v448_v12, %v399_v10  ;;  %v431_v19 = vadd.f32 %v430_v15, %v962_v17 }
  0xcd   : > { %v582_v46 = vld [vmem:[%s966_s4 + $0x60] sm:$0xff] (%p897_p3) }
  0xce   : > { %484 = vst [vmem:[%s966_s4 + $0x68] sm:$0xff] %v468_v18  ;;  %v461_v20 = vpack.c.bf16 %v431_v19, %v382_v14 }
  0xcf   : > { %v568_v39 = vld [vmem:[%s966_s4 + $0x28] sm:$0xff] (%p897_p3)  ;;  %583 = vst [vmem:[%s499_s6 + $0xc0] sm:$0xff] (%p897_p3), %v582_v46 }
  0xd0   : > { %477 = vst [vmem:[%s966_s4 + $0x30] sm:$0xff] %v461_v20  ;;  %v401_v21 = vpop.f32.mrf.mxu2 }
  0xd1   : > { %v402_v22 = vadd.f32 %v401_v21, %v959_v16  ;;  %v450_v23 = vpop.f32.mrf.mxu3  ;;  %569 = vst [vmem:[%s499_s6 + $0x50] sm:$0xff] (%p897_p3), %v568_v39 }
  0xd2   : > { %v451_v24 = vadd.f32 %v450_v23, %v962_v17  ;;  %v383_v25 = vpop.f32.mrf.mxu0 }
  0xd3   : > { %v384_v26 = vadd.f32 %v383_v25, %v959_v16  ;;  %v432_v27 = vpop.f32.mrf.mxu1 }
  0xd4   : > { %v469_v28 = vpack.c.bf16 %v451_v24, %v402_v22  ;;  %v433_v29 = vadd.f32 %v432_v27, %v962_v17 }
  0xd5   : > { %v584_v47 = vld [vmem:[%s966_s4 + $0x68] sm:$0xff] (%p897_p3) }
  0xd6   : > { %485 = vst [vmem:[%s966_s4 + $0x70] sm:$0xff] %v469_v28  ;;  %v462_v30 = vpack.c.bf16 %v433_v29, %v384_v26 }
  0xd7   : > { %v570_v40 = vld [vmem:[%s966_s4 + $0x30] sm:$0xff] (%p897_p3)  ;;  %585 = vst [vmem:[%s499_s6 + $0xd0] sm:$0xff] (%p897_p3), %v584_v47 }
  0xd8   : > { %478 = vst [vmem:[%s966_s4 + $0x38] sm:$0xff] %v462_v30  ;;  %v403_v31 = vpop.f32.mrf.mxu2 }
  0xd9   : > { %v404_v32 = vadd.f32 %v403_v31, %v959_v16  ;;  %v452_v33 = vpop.f32.mrf.mxu3  ;;  %v558_v16 = vld [vmem:[%s966_s4] sm:$0xff] (%p897_p3)  ;;  %571 = vst [vmem:[%s499_s6 + $0x60] sm:$0xff] (%p897_p3), %v570_v40 }
  0xda   : > { %v453_v34 = vadd.f32 %v452_v33, %v962_v17  ;;  %493 = sbr.rel (!%p897_p3) target bundleno = 231 (0xe7), region = 36  ;;  %v562_v17 = vld [vmem:[%s966_s4 + $0x10] sm:$0xff] (%p897_p3)  ;;  %559 = vst [vmem:[%s499_s6] sm:$0xff] (%p897_p3), %v558_v16 }
  0xdb   : > { %563 = vst [vmem:[%s499_s6 + $0x20] sm:$0xff] (%p897_p3), %v562_v17 }
  0xdc   : > { %v470_v35 = vpack.c.bf16 %v453_v34, %v404_v32 }
  0xdd   : > { %v586_v48 = vld [vmem:[%s966_s4 + $0x70] sm:$0xff] (%p897_p3) }
  0xde   : > { %486 = vst [vmem:[%s966_s4 + $0x78] sm:$0xff] %v470_v35 }
  0xdf   : > { %v572_v41 = vld [vmem:[%s966_s4 + $0x38] sm:$0xff]  ;;  %587 = vst [vmem:[%s499_s6 + $0xe0] sm:$0xff] %v586_v48 }
  0xe0   : > { %573 = vst [vmem:[%s499_s6 + $0x70] sm:$0xff] %v572_v41 }
  0xe5   : > { %v588_v49 = vld [vmem:[%s966_s4 + $0x78] sm:$0xff] }
  0xe6   : > { %589 = vst [vmem:[%s499_s6 + $0xf0] sm:$0xff] %v588_v49 }
  0xe7 PF: > { %s13_s16 = sadd.s32 1, %s843_s16   ;;  %s1056_s12 = smov %s831_s13 }
  0xe8   : > { %p10_p9 = scmp.ge.s32.totalorder %s13_s16, 4   ;;  %s1057_s13 = smov %s906_s22 }
  0xe9   : > { %s1058_s14 = smov %s839_s15  ;;  %s1059_s15 = smov %s1061_s18 }
  0xea   :  { %12 = sbr.rel (!%p10_p9) target bundleno = 3 (0x3), region = 106 }

// kernel: decoder_block_forward.5
= control target key start
LH: loop header
LB: loop body
LE: loop exit
PB: predicated region body
PF: predicated region fallthrough
CT: control target
= control target key end

     0   :  { %vm341_vm0 = vcmask 1042432   ;;  %vm244_vm1 = vcmask 48128   ;;  %s1349_s1 = inlined_call_operand.vmem [shape: bf16[6,128], index: 1, kind: input, shape index: {}]   ;;  %s1350_s0 = inlined_call_operand.vmem [shape: bf16[512,6], index: 0, kind: input, shape index: {}]   ;;  %s1351_s2 = inlined_call_operand.vmem [shape: f32[1,128], index: 2, kind: input, shape index: {}]   ;;  %s1352_s3 = inlined_call_operand.vmem [shape: bf16[512,128], index: 3, kind: output, shape index: {}]  }
   0x1   :  { %v79_v0 = vld [vmem:[%s1349_s1] sm:$0x7]  ;;  %v807_v6 = vld [vmem:[%s1350_s0 + $0x8] sm:$0xff]  ;;  %v808_v10 = vld [vmem:[%s1350_s0 + $0x10] sm:$0xff] }
   0x2   :  { %v343_v1 = vsel %vm341_vm0, %v79_v0, 0  ;;  %v806_v2 = vld [vmem:[%s1350_s0] sm:$0xff]  ;;  %v815_v7 = vld [vmem:[%s1350_s0 + $0x48] sm:$0xff]  ;;  %v816_v11 = vld [vmem:[%s1350_s0 + $0x50] sm:$0xff] }
   0x3   :  { %v814_v3 = vld [vmem:[%s1350_s0 + $0x40] sm:$0xff]  ;;  %352 = vmatpush.bf16.msra.mxu0 %v343_v1  ;;  %1029 = vmatpush.bf16.msra.mxu1 %v343_v1  ;;  %v823_v8 = vld [vmem:[%s1350_s0 + $0x88] sm:$0xff]  ;;  %v824_v12 = vld [vmem:[%s1350_s0 + $0x90] sm:$0xff] }
   0x4   :  { %v822_v4 = vld [vmem:[%s1350_s0 + $0x80] sm:$0xff]  ;;  %1030 = vmatpush.bf16.msra.mxu2 %v343_v1  ;;  %1031 = vmatpush.bf16.msra.mxu3 %v343_v1  ;;  %v831_v9 = vld [vmem:[%s1350_s0 + $0xc8] sm:$0xff]  ;;  %v832_v13 = vld [vmem:[%s1350_s0 + $0xd0] sm:$0xff] }
   0x5   :  { %v830_v5 = vld [vmem:[%s1350_s0 + $0xc0] sm:$0xff]  ;;  %v809_v14 = vld [vmem:[%s1350_s0 + $0x18] sm:$0xff]  ;;  %v811_v22 = vld [vmem:[%s1350_s0 + $0x28] sm:$0xff] }
   0x6   :  { %774 = vmatmul.msk.bf16.vlgmr.msra.gmra.mxu0 %vm244_vm1, %v806_v2  ;;  %782 = vmatmul.msk.bf16.vlgmr.msra.gmra.mxu1 %vm244_vm1, %v814_v3  ;;  %v817_v15 = vld [vmem:[%s1350_s0 + $0x58] sm:$0xff]  ;;  %v810_v18 = vld [vmem:[%s1350_s0 + $0x20] sm:$0xff]  ;;  %v819_v23 = vld [vmem:[%s1350_s0 + $0x68] sm:$0xff] }
   0x7   :  { %790 = vmatmul.msk.bf16.vlgmr.msra.gmra.mxu2 %vm244_vm1, %v822_v4  ;;  %798 = vmatmul.msk.bf16.vlgmr.msra.gmra.mxu3 %vm244_vm1, %v830_v5  ;;  %v825_v16 = vld [vmem:[%s1350_s0 + $0x98] sm:$0xff]  ;;  %v818_v19 = vld [vmem:[%s1350_s0 + $0x60] sm:$0xff]  ;;  %v827_v24 = vld [vmem:[%s1350_s0 + $0xa8] sm:$0xff] }
   0x8   :  { %v833_v17 = vld [vmem:[%s1350_s0 + $0xd8] sm:$0xff]  ;;  %v826_v20 = vld [vmem:[%s1350_s0 + $0xa0] sm:$0xff]  ;;  %v835_v25 = vld [vmem:[%s1350_s0 + $0xe8] sm:$0xff] }
   0x9   :  { %v834_v21 = vld [vmem:[%s1350_s0 + $0xe0] sm:$0xff]  ;;  %v812_v26 = vld [vmem:[%s1350_s0 + $0x30] sm:$0xff]  ;;  %v813_v30 = vld [vmem:[%s1350_s0 + $0x38] sm:$0xff] }
   0xa   :  { %v820_v27 = vld [vmem:[%s1350_s0 + $0x70] sm:$0xff]  ;;  %v821_v31 = vld [vmem:[%s1350_s0 + $0x78] sm:$0xff]  ;;  %v1187_v36 = vld [vmem:[%s1351_s2] ss:$0 sm:$0xff] }
   0xb   :  { %v828_v28 = vld [vmem:[%s1350_s0 + $0xb0] sm:$0xff]  ;;  %v829_v32 = vld [vmem:[%s1350_s0 + $0xb8] sm:$0xff] }
   0xc   :  { %v836_v29 = vld [vmem:[%s1350_s0 + $0xf0] sm:$0xff]  ;;  %v837_v33 = vld [vmem:[%s1350_s0 + $0xf8] sm:$0xff] }
  0x16   :  { %775 = vmatmul.msk.bf16.gmra.mxu0 %vm244_vm1, %v807_v6  ;;  %783 = vmatmul.msk.bf16.gmra.mxu1 %vm244_vm1, %v815_v7 }
  0x17   :  { %791 = vmatmul.msk.bf16.gmra.mxu2 %vm244_vm1, %v823_v8  ;;  %799 = vmatmul.msk.bf16.gmra.mxu3 %vm244_vm1, %v831_v9 }
  0x26   :  { %776 = vmatmul.msk.bf16.gmra.mxu0 %vm244_vm1, %v808_v10  ;;  %784 = vmatmul.msk.bf16.gmra.mxu1 %vm244_vm1, %v816_v11 }
  0x27   :  { %792 = vmatmul.msk.bf16.gmra.mxu2 %vm244_vm1, %v824_v12  ;;  %800 = vmatmul.msk.bf16.gmra.mxu3 %vm244_vm1, %v832_v13 }
  0x36   :  { %777 = vmatmul.msk.bf16.gmra.mxu0 %vm244_vm1, %v809_v14  ;;  %785 = vmatmul.msk.bf16.gmra.mxu1 %vm244_vm1, %v817_v15 }
  0x37   :  { %793 = vmatmul.msk.bf16.gmra.mxu2 %vm244_vm1, %v825_v16  ;;  %801 = vmatmul.msk.bf16.gmra.mxu3 %vm244_vm1, %v833_v17 }
  0x46   :  { %778 = vmatmul.msk.bf16.gmra.mxu0 %vm244_vm1, %v810_v18  ;;  %786 = vmatmul.msk.bf16.gmra.mxu1 %vm244_vm1, %v818_v19 }
  0x47   :  { %794 = vmatmul.msk.bf16.gmra.mxu2 %vm244_vm1, %v826_v20  ;;  %802 = vmatmul.msk.bf16.gmra.mxu3 %vm244_vm1, %v834_v21 }
  0x56   :  { %779 = vmatmul.msk.bf16.gmra.mxu0 %vm244_vm1, %v811_v22  ;;  %787 = vmatmul.msk.bf16.gmra.mxu1 %vm244_vm1, %v819_v23 }
  0x57   :  { %795 = vmatmul.msk.bf16.gmra.mxu2 %vm244_vm1, %v827_v24  ;;  %803 = vmatmul.msk.bf16.gmra.mxu3 %vm244_vm1, %v835_v25 }
  0x66   :  { %780 = vmatmul.msk.bf16.gmra.mxu0 %vm244_vm1, %v812_v26  ;;  %788 = vmatmul.msk.bf16.gmra.mxu1 %vm244_vm1, %v820_v27 }
  0x67   :  { %796 = vmatmul.msk.bf16.gmra.mxu2 %vm244_vm1, %v828_v28  ;;  %804 = vmatmul.msk.bf16.gmra.mxu3 %vm244_vm1, %v836_v29 }
  0x76   :  { %781 = vmatmul.msk.bf16.gmra.mxu0 %vm244_vm1, %v813_v30  ;;  %789 = vmatmul.msk.bf16.gmra.mxu1 %vm244_vm1, %v821_v31 }
  0x77   :  { %797 = vmatmul.msk.bf16.gmra.mxu2 %vm244_vm1, %v829_v32  ;;  %805 = vmatmul.msk.bf16.gmra.mxu3 %vm244_vm1, %v837_v33 }
  0x83   :  { %v354_v34 = vpop.f32.mrf.mxu0  ;;  %v394_v35 = vpop.f32.mrf.mxu1 }
  0x84   :  { %v355_v41 = vadd.f32 %v1187_v36, %v354_v34  ;;  %v395_v42 = vadd.f32 %v1187_v36, %v394_v35 }
  0x8a   :  { %v434_v37 = vpop.f32.mrf.mxu2  ;;  %v474_v38 = vpop.f32.mrf.mxu3 }
  0x8b   :  { %v356_v39 = vpop.f32.mrf.mxu0  ;;  %v396_v40 = vpop.f32.mrf.mxu1  ;;  %v435_v49 = vadd.f32 %v1187_v36, %v434_v37  ;;  %v475_v50 = vadd.f32 %v1187_v36, %v474_v38 }
  0x8c   :  { %v357_v43 = vadd.f32 %v1187_v36, %v356_v39  ;;  %v397_v44 = vadd.f32 %v1187_v36, %v396_v40 }
  0x8e   :  { %v841_v45 = vpack.c.bf16 %v357_v43, %v355_v41  ;;  %v881_v46 = vpack.c.bf16 %v397_v44, %v395_v42 }
  0x90   :  { %842 = vst [vmem:[%s1352_s3] sm:$0xff] %v841_v45  }
  0x91   :  { %1005 = vst [vmem:[%s1352_s3 + $0x40] sm:$0xff] %v881_v46  }
  0x92   :  { %v436_v47 = vpop.f32.mrf.mxu2  ;;  %v476_v48 = vpop.f32.mrf.mxu3 }
  0x93   :  { %v437_v51 = vadd.f32 %v1187_v36, %v436_v47  ;;  %v477_v52 = vadd.f32 %v1187_v36, %v476_v48  ;;  %v359_v53 = vpop.f32.mrf.mxu0  ;;  %v399_v54 = vpop.f32.mrf.mxu1 }
  0x94   :  { %v360_v61 = vadd.f32 %v1187_v36, %v359_v53  ;;  %v400_v62 = vadd.f32 %v1187_v36, %v399_v54 }
  0x95   :  { %v921_v55 = vpack.c.bf16 %v437_v51, %v435_v49  ;;  %v961_v56 = vpack.c.bf16 %v477_v52, %v475_v50 }
  0x97   :  { %1013 = vst [vmem:[%s1352_s3 + $0x80] sm:$0xff] %v921_v55  }
  0x98   :  { %1021 = vst [vmem:[%s1352_s3 + $0xc0] sm:$0xff] %v961_v56  }
  0x9a   :  { %v439_v57 = vpop.f32.mrf.mxu2  ;;  %v479_v58 = vpop.f32.mrf.mxu3 }
  0x9b   :  { %v361_v59 = vpop.f32.mrf.mxu0  ;;  %v401_v60 = vpop.f32.mrf.mxu1  ;;  %v440_v5 = vadd.f32 %v1187_v36, %v439_v57  ;;  %v480_v6 = vadd.f32 %v1187_v36, %v479_v58 }
  0x9c   :  { %v362_v63 = vadd.f32 %v1187_v36, %v361_v59  ;;  %v402_v0 = vadd.f32 %v1187_v36, %v401_v60 }
  0x9e   :  { %v846_v1 = vpack.c.bf16 %v362_v63, %v360_v61  ;;  %v886_v2 = vpack.c.bf16 %v402_v0, %v400_v62 }
  0xa0   :  { %998 = vst [vmem:[%s1352_s3 + $0x8] sm:$0xff] %v846_v1  }
  0xa1   :  { %1006 = vst [vmem:[%s1352_s3 + $0x48] sm:$0xff] %v886_v2  }
  0xa2   :  { %v441_v3 = vpop.f32.mrf.mxu2  ;;  %v481_v4 = vpop.f32.mrf.mxu3 }
  0xa3   :  { %v442_v7 = vadd.f32 %v1187_v36, %v441_v3  ;;  %v482_v8 = vadd.f32 %v1187_v36, %v481_v4  ;;  %v364_v9 = vpop.f32.mrf.mxu0  ;;  %v404_v10 = vpop.f32.mrf.mxu1 }
  0xa4   :  { %v365_v17 = vadd.f32 %v1187_v36, %v364_v9  ;;  %v405_v18 = vadd.f32 %v1187_v36, %v404_v10 }
  0xa5   :  { %v926_v11 = vpack.c.bf16 %v442_v7, %v440_v5  ;;  %v966_v12 = vpack.c.bf16 %v482_v8, %v480_v6 }
  0xa7   :  { %1014 = vst [vmem:[%s1352_s3 + $0x88] sm:$0xff] %v926_v11  }
  0xa8   :  { %1022 = vst [vmem:[%s1352_s3 + $0xc8] sm:$0xff] %v966_v12  }
  0xaa   :  { %v444_v13 = vpop.f32.mrf.mxu2  ;;  %v484_v14 = vpop.f32.mrf.mxu3 }
  0xab   :  { %v366_v15 = vpop.f32.mrf.mxu0  ;;  %v406_v16 = vpop.f32.mrf.mxu1  ;;  %v445_v25 = vadd.f32 %v1187_v36, %v444_v13  ;;  %v485_v26 = vadd.f32 %v1187_v36, %v484_v14 }
  0xac   :  { %v367_v19 = vadd.f32 %v1187_v36, %v366_v15  ;;  %v407_v20 = vadd.f32 %v1187_v36, %v406_v16 }
  0xae   :  { %v851_v21 = vpack.c.bf16 %v367_v19, %v365_v17  ;;  %v891_v22 = vpack.c.bf16 %v407_v20, %v405_v18 }
  0xb0   :  { %999 = vst [vmem:[%s1352_s3 + $0x10] sm:$0xff] %v851_v21  }
  0xb1   :  { %1007 = vst [vmem:[%s1352_s3 + $0x50] sm:$0xff] %v891_v22  }
  0xb2   :  { %v446_v23 = vpop.f32.mrf.mxu2  ;;  %v486_v24 = vpop.f32.mrf.mxu3 }
  0xb3   :  { %v447_v27 = vadd.f32 %v1187_v36, %v446_v23  ;;  %v487_v28 = vadd.f32 %v1187_v36, %v486_v24  ;;  %v369_v29 = vpop.f32.mrf.mxu0  ;;  %v409_v30 = vpop.f32.mrf.mxu1 }
  0xb4   :  { %v370_v38 = vadd.f32 %v1187_v36, %v369_v29  ;;  %v410_v39 = vadd.f32 %v1187_v36, %v409_v30 }
  0xb5   :  { %v931_v31 = vpack.c.bf16 %v447_v27, %v445_v25  ;;  %v971_v32 = vpack.c.bf16 %v487_v28, %v485_v26 }
  0xb7   :  { %1015 = vst [vmem:[%s1352_s3 + $0x90] sm:$0xff] %v931_v31  }
  0xb8   :  { %1023 = vst [vmem:[%s1352_s3 + $0xd0] sm:$0xff] %v971_v32  }
  0xba   :  { %v449_v33 = vpop.f32.mrf.mxu2  ;;  %v489_v34 = vpop.f32.mrf.mxu3 }
  0xbb   :  { %v371_v35 = vpop.f32.mrf.mxu0  ;;  %v411_v37 = vpop.f32.mrf.mxu1  ;;  %v450_v46 = vadd.f32 %v1187_v36, %v449_v33  ;;  %v490_v47 = vadd.f32 %v1187_v36, %v489_v34 }
  0xbc   :  { %v372_v40 = vadd.f32 %v1187_v36, %v371_v35  ;;  %v412_v41 = vadd.f32 %v1187_v36, %v411_v37 }
  0xbe   :  { %v856_v42 = vpack.c.bf16 %v372_v40, %v370_v38  ;;  %v896_v43 = vpack.c.bf16 %v412_v41, %v410_v39 }
  0xc0   :  { %1000 = vst [vmem:[%s1352_s3 + $0x18] sm:$0xff] %v856_v42  }
  0xc1   :  { %1008 = vst [vmem:[%s1352_s3 + $0x58] sm:$0xff] %v896_v43  }
  0xc2   :  { %v451_v44 = vpop.f32.mrf.mxu2  ;;  %v491_v45 = vpop.f32.mrf.mxu3 }
  0xc3   :  { %v452_v48 = vadd.f32 %v1187_v36, %v451_v44  ;;  %v492_v49 = vadd.f32 %v1187_v36, %v491_v45  ;;  %v374_v50 = vpop.f32.mrf.mxu0  ;;  %v414_v51 = vpop.f32.mrf.mxu1 }
  0xc4   :  { %v375_v58 = vadd.f32 %v1187_v36, %v374_v50  ;;  %v415_v59 = vadd.f32 %v1187_v36, %v414_v51 }
  0xc5   :  { %v936_v52 = vpack.c.bf16 %v452_v48, %v450_v46  ;;  %v976_v53 = vpack.c.bf16 %v492_v49, %v490_v47 }
  0xc7   :  { %1016 = vst [vmem:[%s1352_s3 + $0x98] sm:$0xff] %v936_v52  }
  0xc8   :  { %1024 = vst [vmem:[%s1352_s3 + $0xd8] sm:$0xff] %v976_v53  }
  0xca   :  { %v454_v54 = vpop.f32.mrf.mxu2  ;;  %v494_v55 = vpop.f32.mrf.mxu3 }
  0xcb   :  { %v376_v56 = vpop.f32.mrf.mxu0  ;;  %v416_v57 = vpop.f32.mrf.mxu1  ;;  %v455_v2 = vadd.f32 %v1187_v36, %v454_v54  ;;  %v495_v3 = vadd.f32 %v1187_v36, %v494_v55 }
  0xcc   :  { %v377_v60 = vadd.f32 %v1187_v36, %v376_v56  ;;  %v417_v61 = vadd.f32 %v1187_v36, %v416_v57 }
  0xce   :  { %v861_v62 = vpack.c.bf16 %v377_v60, %v375_v58  ;;  %v901_v63 = vpack.c.bf16 %v417_v61, %v415_v59 }
  0xd0   :  { %1001 = vst [vmem:[%s1352_s3 + $0x20] sm:$0xff] %v861_v62  }
  0xd1   :  { %1009 = vst [vmem:[%s1352_s3 + $0x60] sm:$0xff] %v901_v63  }
  0xd2   :  { %v456_v0 = vpop.f32.mrf.mxu2  ;;  %v496_v1 = vpop.f32.mrf.mxu3 }
  0xd3   :  { %v457_v4 = vadd.f32 %v1187_v36, %v456_v0  ;;  %v497_v5 = vadd.f32 %v1187_v36, %v496_v1  ;;  %v379_v6 = vpop.f32.mrf.mxu0  ;;  %v419_v7 = vpop.f32.mrf.mxu1 }
  0xd4   :  { %v380_v14 = vadd.f32 %v1187_v36, %v379_v6  ;;  %v420_v15 = vadd.f32 %v1187_v36, %v419_v7 }
  0xd5   :  { %v941_v8 = vpack.c.bf16 %v457_v4, %v455_v2  ;;  %v981_v9 = vpack.c.bf16 %v497_v5, %v495_v3 }
  0xd7   :  { %1017 = vst [vmem:[%s1352_s3 + $0xa0] sm:$0xff] %v941_v8  }
  0xd8   :  { %1025 = vst [vmem:[%s1352_s3 + $0xe0] sm:$0xff] %v981_v9  }
  0xda   :  { %v459_v10 = vpop.f32.mrf.mxu2  ;;  %v499_v11 = vpop.f32.mrf.mxu3 }
  0xdb   :  { %v381_v12 = vpop.f32.mrf.mxu0  ;;  %v421_v13 = vpop.f32.mrf.mxu1  ;;  %v460_v22 = vadd.f32 %v1187_v36, %v459_v10  ;;  %v500_v23 = vadd.f32 %v1187_v36, %v499_v11 }
  0xdc   :  { %v382_v16 = vadd.f32 %v1187_v36, %v381_v12  ;;  %v422_v17 = vadd.f32 %v1187_v36, %v421_v13 }
  0xde   :  { %v866_v18 = vpack.c.bf16 %v382_v16, %v380_v14  ;;  %v906_v19 = vpack.c.bf16 %v422_v17, %v420_v15 }
  0xe0   :  { %1002 = vst [vmem:[%s1352_s3 + $0x28] sm:$0xff] %v866_v18  }
  0xe1   :  { %1010 = vst [vmem:[%s1352_s3 + $0x68] sm:$0xff] %v906_v19  }
  0xe2   :  { %v461_v20 = vpop.f32.mrf.mxu2  ;;  %v501_v21 = vpop.f32.mrf.mxu3 }
  0xe3   :  { %v462_v24 = vadd.f32 %v1187_v36, %v461_v20  ;;  %v502_v25 = vadd.f32 %v1187_v36, %v501_v21  ;;  %v384_v26 = vpop.f32.mrf.mxu0  ;;  %v424_v27 = vpop.f32.mrf.mxu1 }
  0xe4   :  { %v385_v34 = vadd.f32 %v1187_v36, %v384_v26  ;;  %v425_v35 = vadd.f32 %v1187_v36, %v424_v27 }
  0xe5   :  { %v946_v28 = vpack.c.bf16 %v462_v24, %v460_v22  ;;  %v986_v29 = vpack.c.bf16 %v502_v25, %v500_v23 }
  0xe7   :  { %1018 = vst [vmem:[%s1352_s3 + $0xa8] sm:$0xff] %v946_v28  }
  0xe8   :  { %1026 = vst [vmem:[%s1352_s3 + $0xe8] sm:$0xff] %v986_v29  }
  0xea   :  { %v464_v30 = vpop.f32.mrf.mxu2  ;;  %v504_v31 = vpop.f32.mrf.mxu3 }
  0xeb   :  { %v386_v32 = vpop.f32.mrf.mxu0  ;;  %v426_v33 = vpop.f32.mrf.mxu1  ;;  %v465_v43 = vadd.f32 %v1187_v36, %v464_v30  ;;  %v505_v44 = vadd.f32 %v1187_v36, %v504_v31 }
  0xec   :  { %v387_v37 = vadd.f32 %v1187_v36, %v386_v32  ;;  %v427_v38 = vadd.f32 %v1187_v36, %v426_v33 }
  0xee   :  { %v871_v39 = vpack.c.bf16 %v387_v37, %v385_v34  ;;  %v911_v40 = vpack.c.bf16 %v427_v38, %v425_v35 }
  0xf0   :  { %1003 = vst [vmem:[%s1352_s3 + $0x30] sm:$0xff] %v871_v39  }
  0xf1   :  { %1011 = vst [vmem:[%s1352_s3 + $0x70] sm:$0xff] %v911_v40  }
  0xf2   :  { %v466_v41 = vpop.f32.mrf.mxu2  ;;  %v506_v42 = vpop.f32.mrf.mxu3 }
  0xf3   :  { %v467_v45 = vadd.f32 %v1187_v36, %v466_v41  ;;  %v507_v46 = vadd.f32 %v1187_v36, %v506_v42  ;;  %v389_v47 = vpop.f32.mrf.mxu0  ;;  %v429_v48 = vpop.f32.mrf.mxu1 }
  0xf4   :  { %v390_v55 = vadd.f32 %v1187_v36, %v389_v47  ;;  %v430_v56 = vadd.f32 %v1187_v36, %v429_v48 }
  0xf5   :  { %v951_v49 = vpack.c.bf16 %v467_v45, %v465_v43  ;;  %v991_v50 = vpack.c.bf16 %v507_v46, %v505_v44 }
  0xf7   :  { %1019 = vst [vmem:[%s1352_s3 + $0xb0] sm:$0xff] %v951_v49  }
  0xf8   :  { %1027 = vst [vmem:[%s1352_s3 + $0xf0] sm:$0xff] %v991_v50  }
  0xfa   :  { %v469_v51 = vpop.f32.mrf.mxu2  ;;  %v509_v52 = vpop.f32.mrf.mxu3 }
  0xfb   :  { %v391_v53 = vpop.f32.mrf.mxu0  ;;  %v431_v54 = vpop.f32.mrf.mxu1  ;;  %v470_v63 = vadd.f32 %v1187_v36, %v469_v51  ;;  %v510_v0 = vadd.f32 %v1187_v36, %v509_v52 }
  0xfc   :  { %v392_v57 = vadd.f32 %v1187_v36, %v391_v53  ;;  %v432_v58 = vadd.f32 %v1187_v36, %v431_v54 }
  0xfe   :  { %v876_v59 = vpack.c.bf16 %v392_v57, %v390_v55  ;;  %v916_v60 = vpack.c.bf16 %v432_v58, %v430_v56 }
 0x100   :  { %1004 = vst [vmem:[%s1352_s3 + $0x38] sm:$0xff] %v876_v59  }
 0x101   :  { %1012 = vst [vmem:[%s1352_s3 + $0x78] sm:$0xff] %v916_v60  }
 0x102   :  { %v471_v61 = vpop.f32.mrf.mxu2  ;;  %v511_v62 = vpop.f32.mrf.mxu3 }
 0x103   :  { %v472_v1 = vadd.f32 %v1187_v36, %v471_v61  ;;  %v512_v2 = vadd.f32 %v1187_v36, %v511_v62 }
 0x105   :  { %v956_v3 = vpack.c.bf16 %v472_v1, %v470_v63  ;;  %v996_v4 = vpack.c.bf16 %v512_v2, %v510_v0 }
 0x107   :  { %1020 = vst [vmem:[%s1352_s3 + $0xb8] sm:$0xff] %v956_v3  }
 0x108   :  { %1028 = vst [vmem:[%s1352_s3 + $0xf8] sm:$0xff] %v996_v4  }

// kernel: decoder_block_forward.7
= control target key start
LH: loop header
LB: loop body
LE: loop exit
PB: predicated region body
PF: predicated region fallthrough
CT: control target
= control target key end

     0   :  { %s3957_s12 = smov 0   ;;  %s3959_s13 = smov 0   ;;  %s4827_s0 = inlined_call_operand.vmem [shape: bf16[2,18,24,128], index: 0, kind: input, shape index: {}]   ;;  %s4828_s1 = inlined_call_operand.vmem [shape: bf16[1152,128], index: 1, kind: input, shape index: {}]   ;;  %s4829_s2 = inlined_call_operand.vmem [shape: f32[1,128], index: 2, kind: input, shape index: {}]   ;;  %s4830_s3 = inlined_call_operand.vmem [shape: f32[2,256,128], index: 3, kind: output, shape index: {}]  }
   0x1   :  { %s3961_s14 = smov 0  }
   0x2 LB: > { %s25_s15 = sadd.s32 1, %s3931_s13  ;;  %p3140_p0 = scmp.ge.s32.totalorder %s3935_s14, 1  ;;  %s3935_s14 = sphi %s3961_s14, %s13_s14   ;;  %s3931_s13 = sphi %s3959_s13, %s4858_s13   ;;  %s3927_s12 = sphi %s3957_s12, %s4857_s12  }
   0x3   : > { %p27_p1 = scmp.ge.s32.totalorder %s25_s15, 2  ;;  %p151_p2 = scmp.lt.s32.totalorder %s3935_s14, 3 }
   0x5   : > { %s4860_s15 = smov (%p27_p1, %s25_s15), 0  ;;  %p152_p3 = pnand %p3140_p0, %p151_p2 }
   0x7   : > { %155 = sbr.rel (%p152_p3) target bundleno = 753 (0x2f1), region = 32 }
   0xc   : > { %v3778_v0 = vld [vmem:[%s4828_s1 + $0x38] sm:$0xff]  ;;  %v3777_v1 = vld [vmem:[%s4828_s1 + $0x30] sm:$0xff]  ;;  %v3776_v2 = vld [vmem:[%s4828_s1 + $0x28] sm:$0xff]  ;;  %p179_p4 = scmp.lt.s32.totalorder %s3927_s12, 1  ;;  %vm494_vm0 = vsmask.f32 7424 }
   0xd   : > { %3843 = vmatpush.bf16.msra.mxu1 %v3778_v0  ;;  %3844 = vmatpush.bf16.msra.mxu2 %v3778_v0  ;;  %v3775_v3 = vld [vmem:[%s4828_s1 + $0x20] sm:$0xff]  ;;  %v3774_v4 = vld [vmem:[%s4828_s1 + $0x18] sm:$0xff]  ;;  %v3773_v5 = vld [vmem:[%s4828_s1 + $0x10] sm:$0xff]  ;;  %vm703_vm1 = vcmask 1046528  }
   0xe   : > { %3845 = vmatpush.bf16.msra.mxu3 %v3778_v0  ;;  %2180 = vmatpush.bf16.msra.mxu0 %v3778_v0  ;;  %s4862_s12 = smov (!%p179_p4, %s3927_s12), 1  ;;  %v3772_v6 = vld [vmem:[%s4828_s1 + $0x8] sm:$0xff]  ;;  %v3771_v7 = vld [vmem:[%s4828_s1] sm:$0xff]  ;;  %v3794_v8 = vld [vmem:[%s4828_s1 + $0xb8] sm:$0xff] }
   0xf   : > { %s3867_s30 = smul.u32 216, %s4862_s12  ;;  %v3802_v9 = vld [vmem:[%s4828_s1 + $0xf8] sm:$0xff]  ;;  %v3793_v16 = vld [vmem:[%s4828_s1 + $0xb0] sm:$0xff]  ;;  %v3792_v20 = vld [vmem:[%s4828_s1 + $0xa8] sm:$0xff]  ;;  %s3722_s6 = sshll.u32 %s4862_s12, 8 }
  0x10   : > { %v3786_v14 = vld [vmem:[%s4828_s1 + $0x78] sm:$0xff]  ;;  %v3801_v17 = vld [vmem:[%s4828_s1 + $0xf0] sm:$0xff]  ;;  %v3800_v21 = vld [vmem:[%s4828_s1 + $0xe8] sm:$0xff]  ;;  %s4706_s10 = scalar_lea.vmem %s4830_s3, %s3722_s6 }
  0x11   : > { %3846 = vmatpush.bf16.msra.mxu1 %v3777_v1  ;;  %3847 = vmatpush.bf16.msra.mxu2 %v3777_v1  ;;  %s4009_s8 = scalar_lea.vmem %s4827_s0, %s3867_s30  ;;  %v3810_v15 = vld [vmem:[%s4828_s1 + $0x138] sm:$0xff]  ;;  %v3785_v18 = vld [vmem:[%s4828_s1 + $0x70] sm:$0xff]  ;;  %v3784_v22 = vld [vmem:[%s4828_s1 + $0x68] sm:$0xff] }
  0x12   : > { %3848 = vmatpush.bf16.msra.mxu3 %v3777_v1  ;;  %2181 = vmatpush.bf16.msra.mxu0 %v3777_v1  ;;  %v4018_v10 = vld [vmem:[%s4009_s8 + $0x30] sm:$0xff]  ;;  %v4021_v11 = vld [vmem:[%s4009_s8 + $0x60] sm:$0xff]  ;;  %v3808_v23 = vld [vmem:[%s4828_s1 + $0x128] sm:$0xff] }
  0x13   : > { %v3735_v12 = vld [vmem:[%s4009_s8 + $0x90] sm:$0xff]  ;;  %v4025_v13 = vld [vmem:[%s4009_s8] sm:$0xff]  ;;  %v3790_v28 = vld [vmem:[%s4828_s1 + $0x98] sm:$0xff] }
  0x14   : > { %v3809_v19 = vld [vmem:[%s4828_s1 + $0x130] sm:$0xff]  ;;  %v3791_v24 = vld [vmem:[%s4828_s1 + $0xa0] sm:$0xff]  ;;  %v3798_v29 = vld [vmem:[%s4828_s1 + $0xd8] sm:$0xff] }
  0x15   : > { %3849 = vmatpush.bf16.msra.mxu1 %v3776_v2  ;;  %3850 = vmatpush.bf16.msra.mxu2 %v3776_v2  ;;  %v3799_v25 = vld [vmem:[%s4828_s1 + $0xe0] sm:$0xff]  ;;  %v4082_v31 = vld [vmem:[%s4009_s8 + $0x6c] sm:$0xff]  ;;  %v3782_v34 = vld [vmem:[%s4828_s1 + $0x58] sm:$0xff] }
  0x16   : > { %3851 = vmatpush.bf16.msra.mxu3 %v3776_v2  ;;  %2182 = vmatpush.bf16.msra.mxu0 %v3776_v2  ;;  %v3783_v26 = vld [vmem:[%s4828_s1 + $0x60] sm:$0xff]  ;;  %v4086_v33 = vld [vmem:[%s4009_s8 + $0xc] sm:$0xff]  ;;  %v3806_v35 = vld [vmem:[%s4828_s1 + $0x118] sm:$0xff]  ;;  %v498_v2 = vshll.u32 %v4025_v13, 16 }
  0x17   : > { %v3807_v27 = vld [vmem:[%s4828_s1 + $0x120] sm:$0xff]  ;;  %v3789_v36 = vld [vmem:[%s4828_s1 + $0x90] sm:$0xff]  ;;  %v3788_v40 = vld [vmem:[%s4828_s1 + $0x88] sm:$0xff] }
  0x18   : > { %v4079_v30 = vld [vmem:[%s4009_s8 + $0x3c] sm:$0xff]  ;;  %v3797_v37 = vld [vmem:[%s4828_s1 + $0xd0] sm:$0xff]  ;;  %v3796_v41 = vld [vmem:[%s4828_s1 + $0xc8] sm:$0xff] }
  0x19   : > { %3852 = vmatpush.bf16.msra.mxu1 %v3775_v3  ;;  %3853 = vmatpush.bf16.msra.mxu2 %v3775_v3  ;;  %v3736_v32 = vld [vmem:[%s4009_s8 + $0x9c] sm:$0xff]  ;;  %v3781_v38 = vld [vmem:[%s4828_s1 + $0x50] sm:$0xff]  ;;  %v3780_v42 = vld [vmem:[%s4828_s1 + $0x48] sm:$0xff] }
  0x1a   : > { %3854 = vmatpush.bf16.msra.mxu3 %v3775_v3  ;;  %2183 = vmatpush.bf16.msra.mxu0 %v3775_v3  ;;  %v3805_v39 = vld [vmem:[%s4828_s1 + $0x110] sm:$0xff]  ;;  %v3804_v43 = vld [vmem:[%s4828_s1 + $0x108] sm:$0xff]  ;;  %v3787_v44 = vld [vmem:[%s4828_s1 + $0x80] sm:$0xff] }
  0x1b   : > { %v3795_v45 = vld [vmem:[%s4828_s1 + $0xc0] sm:$0xff]  ;;  %v4134_v48 = vld [vmem:[%s4009_s8 + $0x48] sm:$0xff]  ;;  %v4137_v49 = vld [vmem:[%s4009_s8 + $0x78] sm:$0xff] }
  0x1c   : > { %v3779_v46 = vld [vmem:[%s4828_s1 + $0x40] sm:$0xff]  ;;  %v3737_v50 = vld [vmem:[%s4009_s8 + $0xa8] sm:$0xff]  ;;  %v4141_v51 = vld [vmem:[%s4009_s8 + $0x18] sm:$0xff] }
  0x1d   : > { %3855 = vmatpush.bf16.msra.mxu1 %v3774_v4  ;;  %3856 = vmatpush.bf16.msra.mxu2 %v3774_v4  ;;  %v3803_v47 = vld [vmem:[%s4828_s1 + $0x100] sm:$0xff]  ;;  %v3826_v52 = vld [vmem:[%s4828_s1 + $0x1b8] sm:$0xff]  ;;  %v200_v56 = vld [vmem:[%s4009_s8 + $0x8] sm:$0xf] }
  0x1e   : > { %3857 = vmatpush.bf16.msra.mxu3 %v3774_v4  ;;  %2184 = vmatpush.bf16.msra.mxu0 %v3774_v4  ;;  %v3834_v53 = vld [vmem:[%s4828_s1 + $0x1f8] sm:$0xff]  ;;  %v3146_v57 = vld [vmem:[%s4009_s8 + $0x14] sm:$0xf]  ;;  %v4164_v59 = vld [vmem:[%s4009_s8 + $0x84] sm:$0xff]  ;;  %v462_v62 = vunpack.c.l.b16 %v200_v56 }
  0x1f   : > { %v3818_v54 = vld [vmem:[%s4828_s1 + $0x178] sm:$0xff]  ;;  %v4168_v61 = vld [vmem:[%s4009_s8 + $0x24] sm:$0xff]  ;;  %v3739_v63 = vld [vmem:[%s4009_s8 + $0xc] sm:$0xff]  ;;  %v880_v0 = vunpack.c.l.b16 %v3146_v57 }
  0x20   : > { %v3842_v55 = vld [vmem:[%s4828_s1 + $0x238] sm:$0xff]  ;;  %v478_v1 = vpack.c.b16 %v462_v62, %v462_v62  ;;  %v915_v4 = vshll.u32 %v3739_v63, 16  ;;  %v3741_v62 = vld [vmem:[%s4009_s8 + $0x24] sm:$0xff] }
  0x21   : > { %3858 = vmatpush.bf16.msra.mxu1 %v3773_v5  ;;  %3859 = vmatpush.bf16.msra.mxu2 %v3773_v5  ;;  %v4161_v58 = vld [vmem:[%s4009_s8 + $0x54] sm:$0xff]  ;;  %v4175_v3 = vpack.c.b16 %v880_v0, %v880_v0 }
  0x22   : > { %3860 = vmatpush.bf16.msra.mxu3 %v3773_v5  ;;  %2185 = vmatpush.bf16.msra.mxu0 %v3773_v5  ;;  %v3738_v60 = vld [vmem:[%s4009_s8 + $0xb4] sm:$0xff]  ;;  %v496_v5 = vshrl.u32 %v4025_v13, 16 }
  0x25   : > { %3861 = vmatpush.bf16.msra.mxu1 %v3772_v6  ;;  %3862 = vmatpush.bf16.msra.mxu2 %v3772_v6 }
  0x26   : > { %3863 = vmatpush.bf16.msra.mxu3 %v3772_v6  ;;  %2186 = vmatpush.bf16.msra.mxu0 %v3772_v6  ;;  %v500_v6 = vrot.slane %v498_v2, 1  ;;  %v939_v2 = vshll.u32 %v3741_v62, 16 }
  0x29   : > { %3864 = vmatpush.bf16.msra.mxu1 %v3771_v7  ;;  %3865 = vmatpush.bf16.msra.mxu2 %v3771_v7 }
  0x2a   : > { %3866 = vmatpush.bf16.msra.mxu3 %v3771_v7  ;;  %2187 = vmatpush.bf16.msra.mxu0 %v3771_v7  ;;  %v503_v7 = vshll.u32 %v478_v1, 16 }
  0x2c   : > { %2208 = vmatmul.bf16.vlgmr.msra.gmra.mxu1 %v4018_v10  ;;  %2228 = vmatmul.bf16.vlgmr.msra.gmra.mxu2 %v4021_v11 }
  0x2d   : > { %2358 = vmatpush.bf16.msrb.mxu2 %v3794_v8  ;;  %2248 = vmatmul.bf16.vlgmr.msra.gmra.mxu3 %v3735_v12  ;;  %v913_v8 = vshrl.u32 %v3739_v63, 16  ;;  %v920_v12 = vshll.u32 %v4175_v3, 16 }
  0x2e   : > { %2447 = vmatpush.bf16.msrb.mxu3 %v3802_v9  ;;  %2188 = vmatmul.bf16.vlgmr.msra.gmra.mxu0 %v4025_v13  ;;  %v917_v9 = vrot.slane %v915_v4, 1  ;;  %v520_v4 = vshrl.u32 %v4141_v51, 16 }
  0x2f   : > { %2269 = vmatpush.bf16.msrb.mxu1 %v3786_v14  ;;  %2536 = vmatpush.bf16.msrb.mxu0 %v3810_v15  ;;  %v501_v14 = vor.u32 %v500_v6, %v496_v5  ;;  %v505_v15 = vrot.slane %v503_v7, 1  ;;  %v937_v7 = vshrl.u32 %v3741_v62, 16 }
  0x31   : > { %2359 = vmatpush.bf16.msrb.mxu2 %v3793_v16  ;;  %v704_v16 = vrot.slane %v4025_v13, 1 }
  0x32   : > { %2448 = vmatpush.bf16.msrb.mxu3 %v3801_v17  ;;  %v705_v17 = vrot.slane %v478_v1, 1 }
  0x33   : > { %2270 = vmatpush.bf16.msrb.mxu1 %v3785_v18  ;;  %2537 = vmatpush.bf16.msrb.mxu0 %v3809_v19  ;;  %v918_v18 = vor.u32 %v917_v9, %v913_v8  ;;  %v922_v19 = vrot.slane %v920_v12, 1  ;;  %v941_v8 = vrot.slane %v939_v2, 1  ;;  %v544_v2 = vshrl.u32 %v4018_v10, 16 }
  0x35   : > { %2360 = vmatpush.bf16.msrb.mxu2 %v3792_v20  ;;  %v203_v20 = vld [vmem:[%s4009_s8 + $0x14] sm:$0xf] }
  0x36   : > { %2449 = vmatpush.bf16.msrb.mxu3 %v3800_v21  ;;  %v3149_v21 = vld [vmem:[%s4009_s8 + $0x20] sm:$0xf] }
  0x37   : > { %2271 = vmatpush.bf16.msrb.mxu1 %v3784_v22  ;;  %2538 = vmatpush.bf16.msrb.mxu0 %v3808_v23  ;;  %v506_v22 = vsel %vm494_vm0, %v501_v14, %v505_v15  ;;  %v706_v23 = vsel %vm703_vm1, %v704_v16, %v705_v17  ;;  %v710_v15 = vrot.slane %v4141_v51, 1  ;;  %v942_v17 = vor.u32 %v941_v8, %v937_v7 }
  0x39   : > { %2361 = vmatpush.bf16.msrb.mxu2 %v3791_v24  ;;  %v463_v24 = vunpack.c.l.b16 %v203_v20  ;;  %v3155_v20 = vld [vmem:[%s4009_s8 + $0x38] sm:$0xf] }
  0x3a   : > { %2450 = vmatpush.bf16.msrb.mxu3 %v3799_v25  ;;  %v923_v25 = vsel %vm494_vm0, %v918_v18, %v922_v19  ;;  %v209_v19 = vld [vmem:[%s4009_s8 + $0x2c] sm:$0xf] }
  0x3b   : > { %2272 = vmatpush.bf16.msrb.mxu1 %v3783_v26  ;;  %2539 = vmatpush.bf16.msrb.mxu0 %v3807_v27  ;;  %v3740_v26 = vld [vmem:[%s4009_s8 + $0x18] sm:$0xff]  ;;  %v881_v27 = vunpack.c.l.b16 %v3149_v21  ;;  %v479_v13 = vpack.c.b16 %v463_v24, %v463_v24 }
  0x3c   : > { %2213 = vmatmul.bf16.gmra.mxu1 %v4079_v30  ;;  %2233 = vmatmul.bf16.gmra.mxu2 %v4082_v31 }
  0x3d   : > { %2362 = vmatpush.bf16.msrb.mxu2 %v3790_v28  ;;  %2253 = vmatmul.bf16.gmra.mxu3 %v3736_v32  ;;  %v510_v28 = vshll.u32 %v4086_v33, 16  ;;  %v3833_v32 = vld [vmem:[%s4828_s1 + $0x1f0] sm:$0xff] }
  0x3e   : > { %2451 = vmatpush.bf16.msrb.mxu3 %v3798_v29  ;;  %2193 = vmatmul.bf16.gmra.mxu0 %v4086_v33  ;;  %v3825_v29 = vld [vmem:[%s4828_s1 + $0x1b0] sm:$0xff] }
  0x3f   : > { %2273 = vmatpush.bf16.msrb.mxu1 %v3782_v34  ;;  %2540 = vmatpush.bf16.msrb.mxu0 %v3806_v35  ;;  %v3817_v34 = vld [vmem:[%s4828_s1 + $0x170] sm:$0xff]  ;;  %v4196_v35 = vpack.c.b16 %v881_v27, %v881_v27 }
  0x41   : > { %2363 = vmatpush.bf16.msrb.mxu2 %v3789_v36  ;;  %v927_v36 = vshll.u32 %v3740_v26, 16 }
  0x42   : > { %2452 = vmatpush.bf16.msrb.mxu3 %v3797_v37  ;;  %v3841_v37 = vld [vmem:[%s4828_s1 + $0x230] sm:$0xff] }
  0x43   : > { %2274 = vmatpush.bf16.msrb.mxu1 %v3781_v38  ;;  %2541 = vmatpush.bf16.msrb.mxu0 %v3805_v39  ;;  %v508_v38 = vshrl.u32 %v4086_v33, 16  ;;  %v512_v39 = vrot.slane %v510_v28, 1  ;;  %v3832_v28 = vld [vmem:[%s4828_s1 + $0x1e8] sm:$0xff] }
  0x45   : > { %2364 = vmatpush.bf16.msrb.mxu2 %v3788_v40  ;;  %v515_v40 = vshll.u32 %v479_v13, 16 }
  0x46   : > { %2453 = vmatpush.bf16.msrb.mxu3 %v3796_v41  ;;  %v925_v41 = vshrl.u32 %v3740_v26, 16 }
  0x47   : > { %2275 = vmatpush.bf16.msrb.mxu1 %v3780_v42  ;;  %2542 = vmatpush.bf16.msrb.mxu0 %v3804_v43  ;;  %v929_v42 = vrot.slane %v927_v36, 1  ;;  %v932_v43 = vshll.u32 %v4196_v35, 16 }
  0x49   : > { %2365 = vmatpush.bf16.msrb.mxu2 %v3787_v44  ;;  %v513_v44 = vor.u32 %v512_v39, %v508_v38  ;;  %v3816_v38 = vld [vmem:[%s4828_s1 + $0x168] sm:$0xff] }
  0x4a   : > { %2454 = vmatpush.bf16.msrb.mxu3 %v3795_v45  ;;  %v517_v45 = vrot.slane %v515_v40, 1 }
  0x4b   : > { %2276 = vmatpush.bf16.msrb.mxu1 %v3779_v46  ;;  %2543 = vmatpush.bf16.msrb.mxu0 %v3803_v47  ;;  %v707_v46 = vrot.slane %v4086_v33, 1  ;;  %v708_v47 = vrot.slane %v479_v13, 1  ;;  %v522_v33 = vshll.u32 %v4141_v51, 16  ;;  %v3824_v13 = vld [vmem:[%s4828_s1 + $0x1a8] sm:$0xff] }
  0x4c   : > { %2218 = vmatmul.bf16.gmra.mxu1 %v4134_v48  ;;  %2238 = vmatmul.bf16.gmra.mxu2 %v4137_v49 }
  0x4d   : > { %2258 = vmatmul.bf16.gmra.mxu3 %v3737_v50  ;;  %2714 = vmatpush.bf16.msra.mxu2 %v3826_v52  ;;  %v930_v50 = vor.u32 %v929_v42, %v925_v41  ;;  %v934_v52 = vrot.slane %v932_v43, 1  ;;  %v709_v56 = vsel %vm703_vm1, %v707_v46, %v708_v47  ;;  %v524_v5 = vrot.slane %v522_v33, 1  ;;  %v3840_v42 = vld [vmem:[%s4828_s1 + $0x228] sm:$0xff] }
  0x4e   : > { %2198 = vmatmul.bf16.gmra.mxu0 %v4141_v51  ;;  %2803 = vmatpush.bf16.msra.mxu3 %v3834_v53  ;;  %v206_v53 = vld [vmem:[%s4009_s8 + $0x20] sm:$0xf]  ;;  %v534_v51 = vshll.u32 %v4168_v61, 16 }
  0x4f   : > { %2625 = vmatpush.bf16.msra.mxu1 %v3818_v54  ;;  %2892 = vmatpush.bf16.msra.mxu0 %v3842_v55  ;;  %v3152_v54 = vld [vmem:[%s4009_s8 + $0x2c] sm:$0xf]  ;;  %v518_v55 = vsel %vm494_vm0, %v513_v44, %v517_v45  ;;  %v464_v57 = vunpack.c.l.b16 %v206_v53  ;;  %v525_v12 = vor.u32 %v524_v5, %v520_v4  ;;  %v713_v45 = vrot.slane %v4168_v61, 1  ;;  %v3158_v53 = vld [vmem:[%s4009_s8 + $0x44] sm:$0xf] }
  0x50   : > { %v536_v36 = vrot.slane %v534_v51, 1 }
  0x51   : > { %2715 = vmatpush.bf16.msra.mxu2 %v3825_v29  ;;  %v480_v0 = vpack.c.b16 %v464_v57, %v464_v57 }
  0x52   : > { %2804 = vmatpush.bf16.msra.mxu3 %v3833_v32 }
  0x53   : > { %2626 = vmatpush.bf16.msra.mxu1 %v3817_v34  ;;  %2893 = vmatpush.bf16.msra.mxu0 %v3841_v37  ;;  %v527_v6 = vshll.u32 %v480_v0, 16  ;;  %v711_v16 = vrot.slane %v480_v0, 1  ;;  %v532_v34 = vshrl.u32 %v4168_v61, 16 }
  0x55   : > { %v529_v14 = vrot.slane %v527_v6, 1  ;;  %2716 = vmatpush.bf16.msra.mxu2 %v3824_v13  ;;  %v537_v43 = vor.u32 %v536_v36, %v532_v34  ;;  %v3831_v34 = vld [vmem:[%s4828_s1 + $0x1e0] sm:$0xff] }
  0x56   : > { %2805 = vmatpush.bf16.msra.mxu3 %v3832_v28  ;;  %v558_v28 = vshll.u32 %v4079_v30, 16 }
  0x57   : > { %v530_v21 = vsel %vm494_vm0, %v525_v12, %v529_v14  ;;  %2627 = vmatpush.bf16.msra.mxu1 %v3816_v38  ;;  %2894 = vmatpush.bf16.msra.mxu0 %v3840_v42  ;;  %v716_v14 = vrot.slane %v4018_v10, 1 }
  0x5a   : > { %2806 = vmatpush.bf16.msra.mxu3 %v3831_v34 }
  0x5c   : > { %2223 = vmatmul.bf16.gmra.mxu1 %v4161_v58  ;;  %2243 = vmatmul.bf16.gmra.mxu2 %v4164_v59 }
  0x5d   : > { %2263 = vmatmul.bf16.gmra.mxu3 %v3738_v60  ;;  %v935_v60 = vsel %vm494_vm0, %v930_v50, %v934_v52  ;;  %v212_v52 = vld [vmem:[%s4009_s8 + $0x38] sm:$0xf] }
  0x5e   : > { %2203 = vmatmul.bf16.gmra.mxu0 %v4168_v61 }
  0x6c   : > { %2277 = vmatmul.bf16.vlgmr.msrb.gmra.mxu1 %v506_v22  ;;  %2366 = vmatmul.bf16.vlgmr.msrb.gmra.mxu2 %v706_v23  ;;  %v712_v22 = vsel %vm703_vm1, %v710_v15, %v711_v16  ;;  %v465_v23 = vunpack.c.l.b16 %v209_v19  ;;  %v4255_v16 = vld [vmem:[%s4829_s2] ss:$0 sm:$0xff]  ;;  %v215_v19 = vld [vmem:[%s4009_s8 + $0x44] sm:$0xf] }
  0x6d   : > { %2455 = vmatmul.bf16.vlgmr.msrb.gmra.mxu3 %v3739_v63  ;;  %v882_v63 = vunpack.c.l.b16 %v3152_v54 }
  0x6e   : > { %2544 = vmatmul.bf16.vlgmr.msrb.gmra.mxu0 %v923_v25  ;;  %v3742_v25 = vld [vmem:[%s4009_s8 + $0x30] sm:$0xff]  ;;  %v481_v27 = vpack.c.b16 %v465_v23, %v465_v23 }
  0x6f   : > { %v4211_v1 = vpack.c.b16 %v882_v63, %v882_v63  ;;  %v951_v32 = vshll.u32 %v3742_v25, 16  ;;  %v949_v39 = vshrl.u32 %v3742_v25, 16  ;;  %v546_v63 = vshll.u32 %v4018_v10, 16 }
  0x70   : > { %v539_v37 = vshll.u32 %v481_v27, 16  ;;  %v714_v46 = vrot.slane %v481_v27, 1  ;;  %v3744_v27 = vld [vmem:[%s4009_s8 + $0x48] sm:$0xff] }
  0x71   : > { %v944_v9 = vshll.u32 %v4211_v1, 16  ;;  %v953_v40 = vrot.slane %v951_v32, 1  ;;  %v548_v4 = vrot.slane %v546_v63, 1  ;;  %v3823_v32 = vld [vmem:[%s4828_s1 + $0x1a0] sm:$0xff] }
  0x72   : > { %v541_v44 = vrot.slane %v539_v37, 1  ;;  %v975_v37 = vshll.u32 %v3744_v27, 16  ;;  %2717 = vmatpush.bf16.msra.mxu2 %v3823_v32  ;;  %v568_v32 = vshrl.u32 %v4134_v48, 16 }
  0x73   : > { %v946_v18 = vrot.slane %v944_v9, 1  ;;  %v954_v47 = vor.u32 %v953_v40, %v949_v39  ;;  %v549_v9 = vor.u32 %v548_v4, %v544_v2  ;;  %v3164_v4 = vld [vmem:[%s4009_s8 + $0x5c] sm:$0xf] }
  0x74   : > { %v542_v54 = vsel %vm494_vm0, %v537_v43, %v541_v44  ;;  %v556_v43 = vshrl.u32 %v4079_v30, 16  ;;  %v560_v44 = vrot.slane %v558_v28, 1 }
  0x75   : > { %v947_v24 = vsel %vm494_vm0, %v942_v17, %v946_v18 }
  0x7c   : > { %2282 = vmatmul.bf16.gmra.mxu1 %v518_v55  ;;  %2371 = vmatmul.bf16.gmra.mxu2 %v709_v56  ;;  %v715_v55 = vsel %vm703_vm1, %v713_v45, %v714_v46  ;;  %v466_v56 = vunpack.c.l.b16 %v212_v52  ;;  %v3815_v46 = vld [vmem:[%s4828_s1 + $0x160] sm:$0xff]  ;;  %v973_v52 = vshrl.u32 %v3744_v27, 16 }
  0x7d   : > { %2460 = vmatmul.bf16.gmra.mxu3 %v3740_v26  ;;  %v883_v26 = vunpack.c.l.b16 %v3155_v20  ;;  %v3161_v20 = vld [vmem:[%s4009_s8 + $0x50] sm:$0xf]  ;;  %2628 = vmatpush.bf16.msra.mxu1 %v3815_v46  ;;  %v722_v46 = vrot.slane %v4134_v48, 1 }
  0x7e   : > { %2549 = vmatmul.bf16.gmra.mxu0 %v935_v60  ;;  %v3743_v60 = vld [vmem:[%s4009_s8 + $0x3c] sm:$0xff]  ;;  %v482_v61 = vpack.c.b16 %v466_v56, %v466_v56  ;;  %v885_v51 = vunpack.c.l.b16 %v3161_v20  ;;  %v561_v56 = vor.u32 %v560_v44, %v556_v43 }
  0x7f   : > { %v4229_v29 = vpack.c.b16 %v883_v26, %v883_v26  ;;  %v963_v33 = vshll.u32 %v3743_v60, 16  ;;  %v961_v6 = vshrl.u32 %v3743_v60, 16 }
  0x80   : > { %v551_v5 = vshll.u32 %v482_v61, 16  ;;  %v717_v15 = vrot.slane %v482_v61, 1  ;;  %v4275_v36 = vpack.c.b16 %v885_v51, %v885_v51 }
  0x81   : > { %v956_v41 = vshll.u32 %v4229_v29, 16  ;;  %v965_v7 = vrot.slane %v963_v33, 1  ;;  %v218_v33 = vld [vmem:[%s4009_s8 + $0x50] sm:$0xf] }
  0x82   : > { %v553_v12 = vrot.slane %v551_v5, 1  ;;  %v718_v23 = vsel %vm703_vm1, %v716_v14, %v717_v15 }
  0x83   : > { %v958_v50 = vrot.slane %v956_v41, 1  ;;  %v966_v17 = vor.u32 %v965_v7, %v961_v6 }
  0x85   : > { %v959_v57 = vsel %vm494_vm0, %v954_v47, %v958_v50 }
  0x8c   : > { %2287 = vmatmul.bf16.gmra.mxu1 %v530_v21  ;;  %2376 = vmatmul.bf16.gmra.mxu2 %v712_v22  ;;  %v554_v22 = vsel %vm494_vm0, %v549_v9, %v553_v12  ;;  %v468_v12 = vunpack.c.l.b16 %v218_v33 }
  0x8d   : > { %2465 = vmatmul.bf16.gmra.mxu3 %v3741_v62  ;;  %v884_v62 = vunpack.c.l.b16 %v3158_v53  ;;  %v977_v53 = vrot.slane %v975_v37, 1 }
  0x8e   : > { %2554 = vmatmul.bf16.gmra.mxu0 %v947_v24  ;;  %v467_v24 = vunpack.c.l.b16 %v215_v19  ;;  %v886_v19 = vunpack.c.l.b16 %v3164_v4  ;;  %v484_v20 = vpack.c.b16 %v468_v12, %v468_v12 }
  0x8f   : > { %v4247_v0 = vpack.c.b16 %v884_v62, %v884_v62  ;;  %v978_v61 = vor.u32 %v977_v53, %v973_v52 }
  0x90   : > { %v483_v13 = vpack.c.b16 %v467_v24, %v467_v24  ;;  %v575_v34 = vshll.u32 %v484_v20, 16  ;;  %v723_v52 = vrot.slane %v484_v20, 1  ;;  %v3830_v20 = vld [vmem:[%s4828_s1 + $0x1d8] sm:$0xff] }
  0x91   : > { %v968_v8 = vshll.u32 %v4247_v0, 16  ;;  %2807 = vmatpush.bf16.msra.mxu3 %v3830_v20 }
  0x92   : > { %v563_v45 = vshll.u32 %v483_v13, 16  ;;  %v720_v62 = vrot.slane %v483_v13, 1 }
  0x93   : > { %v970_v18 = vrot.slane %v968_v8, 1 }
  0x95   : > { %v971_v26 = vsel %vm494_vm0, %v966_v17, %v970_v18  ;;  %v3745_v18 = vld [vmem:[%s4009_s8 + $0x54] sm:$0xff] }
  0x9c   : > { %2292 = vmatmul.bf16.gmra.mxu1 %v542_v54  ;;  %2381 = vmatmul.bf16.gmra.mxu2 %v715_v55  ;;  %v980_v54 = vshll.u32 %v4275_v36, 16  ;;  %v3839_v55 = vld [vmem:[%s4828_s1 + $0x220] sm:$0xff] }
  0x9d   : > { %2470 = vmatmul.bf16.gmra.mxu3 %v3742_v25  ;;  %2895 = vmatpush.bf16.msra.mxu0 %v3839_v55  ;;  %v221_v55 = vld [vmem:[%s4009_s8 + $0x5c] sm:$0xf] }
  0x9e   : > { %2559 = vmatmul.bf16.gmra.mxu0 %v959_v57  ;;  %v565_v57 = vrot.slane %v563_v45, 1  ;;  %v982_v63 = vrot.slane %v980_v54, 1  ;;  %v577_v45 = vrot.slane %v575_v34, 1 }
  0xa0   : > { %v566_v9 = vsel %vm494_vm0, %v561_v56, %v565_v57  ;;  %v983_v17 = vsel %vm494_vm0, %v978_v61, %v982_v63  ;;  %v3167_v57 = vld [vmem:[%s4009_s8 + $0x68] sm:$0xf] }
  0xa9   : > { %v2209_v21 = vpop.f32.mrf.mxu1 }
  0xaa   : > { %v4262_v25 = vadd.f32 %v4255_v16, %v2209_v21  ;;  %v570_v21 = vshll.u32 %v4134_v48, 16  ;;  %v469_v48 = vunpack.c.l.b16 %v221_v55 }
  0xab   : > { %v4264_v10 = vpop.f32.mrf.mxu0 }
  0xac   : > { %2297 = vmatmul.bf16.gmra.mxu1 %v554_v22  ;;  %2386 = vmatmul.bf16.gmra.mxu2 %v718_v23  ;;  %v4315_v22 = vpack.c.b16 %v886_v19, %v886_v19  ;;  %v987_v23 = vshll.u32 %v3745_v18, 16  ;;  %v485_v12 = vpack.c.b16 %v469_v48, %v469_v48  ;;  %v3822_v19 = vld [vmem:[%s4828_s1 + $0x198] sm:$0xff]  ;;  %v3170_v48 = vld [vmem:[%s4009_s8 + $0x74] sm:$0xf] }
  0xad   : > { %2475 = vmatmul.bf16.gmra.mxu3 %v3743_v60  ;;  %v719_v60 = vrot.slane %v4079_v30, 1  ;;  %2718 = vmatpush.bf16.msra.mxu2 %v3822_v19 }
  0xae   : > { %2564 = vmatmul.bf16.gmra.mxu0 %v971_v26  ;;  %v992_v43 = vshll.u32 %v4315_v22, 16 }
  0xaf   : > { %v2229_v38 = vpop.f32.mrf.mxu2  ;;  %v721_v30 = vsel %vm703_vm1, %v719_v60, %v720_v62 }
  0xb0   : > { %v4278_v39 = vadd.f32 %v4255_v16, %v2229_v38  ;;  %v2249_v40 = vpop.f32.mrf.mxu3  ;;  %v994_v54 = vrot.slane %v992_v43, 1 }
  0xb1   : > { %v4281_v41 = vadd.f32 %v4255_v16, %v2249_v40  ;;  %v2211_v42 = vpop.f32.mrf.mxu1  ;;  %v985_v40 = vshrl.u32 %v3745_v18, 16 }
  0xb2   : > { %v4288_v47 = vadd.f32 %v4255_v16, %v2211_v42  ;;  %v989_v42 = vrot.slane %v987_v23, 1 }
  0xb3   : > { %v4290_v50 = vpop.f32.mrf.mxu0 }
  0xb4   : > { %v990_v53 = vor.u32 %v989_v42, %v985_v40  ;;  %v587_v40 = vshll.u32 %v485_v12, 16 }
  0xb6   : > { %v589_v55 = vrot.slane %v587_v40, 1  ;;  %v594_v40 = vshll.u32 %v4021_v11, 16 }
  0xb7   : > { %v2231_v2 = vpop.f32.mrf.mxu2 }
  0xb8   : > { %v4300_v5 = vadd.f32 %v4255_v16, %v2231_v2  ;;  %v2251_v6 = vpop.f32.mrf.mxu3  ;;  %v724_v2 = vsel %vm703_vm1, %v722_v46, %v723_v52  ;;  %v3814_v52 = vld [vmem:[%s4828_s1 + $0x158] sm:$0xff] }
  0xb9   : > { %v4303_v7 = vadd.f32 %v4255_v16, %v2251_v6  ;;  %v2214_v8 = vpop.f32.mrf.mxu1  ;;  %2629 = vmatpush.bf16.msra.mxu1 %v3814_v52 }
  0xba   : > { %v4308_v14 = vadd.f32 %v4255_v16, %v2214_v8  ;;  %v995_v8 = vsel %vm494_vm0, %v990_v53, %v994_v54  ;;  %v3838_v53 = vld [vmem:[%s4828_s1 + $0x218] sm:$0xff] }
  0xbb   : > { %v4310_v15 = vpop.f32.mrf.mxu0  ;;  %2896 = vmatpush.bf16.msra.mxu0 %v3838_v53 }
  0xbc   : > { %2302 = vmatmul.bf16.gmra.mxu1 %v566_v9  ;;  %2391 = vmatmul.bf16.gmra.mxu2 %v721_v30  ;;  %v3746_v9 = vld [vmem:[%s4009_s8 + $0x60] sm:$0xff]  ;;  %v887_v30 = vunpack.c.l.b16 %v3167_v57  ;;  %v726_v57 = vrot.slane %v485_v12, 1 }
  0xbd   : > { %2480 = vmatmul.bf16.gmra.mxu3 %v3744_v27  ;;  %v572_v27 = vrot.slane %v570_v21, 1  ;;  %v999_v23 = vshll.u32 %v3746_v9, 16 }
  0xbe   : > { %2569 = vmatmul.bf16.gmra.mxu0 %v983_v17  ;;  %v582_v17 = vshll.u32 %v4161_v58, 16  ;;  %v4355_v21 = vpack.c.b16 %v887_v30, %v887_v30 }
  0xbf   : > { %v2234_v24 = vpop.f32.mrf.mxu2  ;;  %v573_v44 = vor.u32 %v572_v27, %v568_v32  ;;  %v580_v27 = vshrl.u32 %v4161_v58, 16 }
  0xc0   : > { %v4318_v26 = vadd.f32 %v4255_v16, %v2234_v24  ;;  %v2254_v51 = vpop.f32.mrf.mxu3  ;;  %4835 = vst [vmem:[#allocation2_spill] sm:$0xff] %v4355_v21  ;;  %v584_v34 = vrot.slane %v582_v17, 1  ;;  %v1004_v46 = vshll.u32 %v4355_v21, 16  ;;  %v2195_v21 = vadd.f32 %v4255_v16, %v4310_v15 }
  0xc1   : > { %v4321_v13 = vadd.f32 %v4255_v16, %v2254_v51  ;;  %v2216_v28 = vpop.f32.mrf.mxu1  ;;  %v578_v33 = vsel %vm494_vm0, %v573_v44, %v577_v45  ;;  %v997_v44 = vshrl.u32 %v3746_v9, 16  ;;  %v1001_v45 = vrot.slane %v999_v23, 1 }
  0xc2   : > { %v4325_v37 = vadd.f32 %v4255_v16, %v2216_v28  ;;  %v585_v54 = vor.u32 %v584_v34, %v580_v27  ;;  %v888_v27 = vunpack.c.l.b16 %v3170_v48 }
  0xc3   : > { %v4327_v38 = vpop.f32.mrf.mxu0 }
  0xc4   : > { %v590_v20 = vsel %vm494_vm0, %v585_v54, %v589_v55 }
  0xc7   : > { %v2236_v56 = vpop.f32.mrf.mxu2 }
  0xc8   : > { %v4334_v60 = vadd.f32 %v4255_v16, %v2236_v56  ;;  %v2256_v62 = vpop.f32.mrf.mxu3  ;;  %v725_v56 = vrot.slane %v4161_v58, 1 }
  0xc9   : > { %v4337_v61 = vadd.f32 %v4255_v16, %v2256_v62  ;;  %v2219_v63 = vpop.f32.mrf.mxu1  ;;  %v1002_v62 = vor.u32 %v1001_v45, %v997_v44  ;;  %v4395_v44 = vpack.c.b16 %v888_v27, %v888_v27  ;;  %v227_v27 = vld [vmem:[%s4009_s8 + $0x74] sm:$0xf] }
  0xca   : > { %v4342_v4 = vadd.f32 %v4255_v16, %v2219_v63  ;;  %v1006_v63 = vrot.slane %v1004_v46, 1  ;;  %v727_v23 = vsel %vm703_vm1, %v725_v56, %v726_v57  ;;  %v592_v56 = vshrl.u32 %v4021_v11, 16 }
  0xcb   : > { %v4344_v6 = vpop.f32.mrf.mxu0  ;;  %4838 = vst [vmem:[#allocation5_spill] sm:$0xff] %v4395_v44  ;;  %v1016_v48 = vshll.u32 %v4395_v44, 16 }
  0xcc   : > { %2307 = vmatmul.bf16.gmra.mxu1 %v578_v33  ;;  %2396 = vmatmul.bf16.gmra.mxu2 %v724_v2  ;;  %v224_v33 = vld [vmem:[%s4009_s8 + $0x68] sm:$0xf] }
  0xcd   : > { %2485 = vmatmul.bf16.gmra.mxu3 %v3745_v18  ;;  %v470_v58 = vunpack.c.l.b16 %v224_v33 }
  0xce   : > { %2574 = vmatmul.bf16.gmra.mxu0 %v995_v8 }
  0xcf   : > { %v2239_v24 = vpop.f32.mrf.mxu2  ;;  %v486_v34 = vpack.c.b16 %v470_v58, %v470_v58 }
  0xd0   : > { %v4358_v18 = vadd.f32 %v4255_v16, %v2239_v24  ;;  %v2259_v51 = vpop.f32.mrf.mxu3 }
  0xd1   : > { %v4361_v28 = vadd.f32 %v4255_v16, %v2259_v51  ;;  %v2221_v32 = vpop.f32.mrf.mxu1  ;;  %v1007_v51 = vsel %vm494_vm0, %v1002_v62, %v1006_v63  ;;  %v599_v57 = vshll.u32 %v486_v34, 16 }
  0xd2   : > { %v4365_v42 = vadd.f32 %v4255_v16, %v2221_v32  ;;  %v3747_v32 = vld [vmem:[%s4009_s8 + $0x6c] sm:$0xff] }
  0xd3   : > { %4836 = vst [vmem:[#allocation3_spill] sm:$0xff] %v4361_v28  ;;  %v4367_v43 = vpop.f32.mrf.mxu0  ;;  %v1011_v45 = vshll.u32 %v3747_v32, 16  ;;  %v1009_v33 = vshrl.u32 %v3747_v32, 16 }
  0xd7   : > { %v2241_v2 = vpop.f32.mrf.mxu2 }
  0xd8   : > { %v4380_v8 = vadd.f32 %v4255_v16, %v2241_v2  ;;  %v2261_v30 = vpop.f32.mrf.mxu3  ;;  %v1013_v2 = vrot.slane %v1011_v45, 1 }
  0xd9   : > { %v4383_v17 = vadd.f32 %v4255_v16, %v2261_v30  ;;  %v2224_v19 = vpop.f32.mrf.mxu1 }
  0xda   : > { %v4388_v12 = vadd.f32 %v4255_v16, %v2224_v19  ;;  %v601_v19 = vrot.slane %v599_v57, 1  ;;  %v1014_v58 = vor.u32 %v1013_v2, %v1009_v33 }
  0xdb   : > { %4837 = vst [vmem:[#allocation4_spill] sm:$0xff] %v4383_v17  ;;  %v4390_v24 = vpop.f32.mrf.mxu0 }
  0xdc   : > { %2312 = vmatmul.bf16.gmra.mxu1 %v590_v20  ;;  %2401 = vmatmul.bf16.gmra.mxu2 %v727_v23  ;;  %v728_v20 = vrot.slane %v4021_v11, 1  ;;  %v729_v23 = vrot.slane %v486_v34, 1 }
  0xdd   : > { %2490 = vmatmul.bf16.gmra.mxu3 %v3746_v9  ;;  %v596_v9 = vrot.slane %v594_v40, 1 }
  0xde   : > { %2579 = vmatmul.bf16.gmra.mxu0 %v1007_v51  ;;  %v1018_v51 = vrot.slane %v1016_v48, 1  ;;  %v730_v34 = vsel %vm703_vm1, %v728_v20, %v729_v23  ;;  %v3748_v48 = vld [vmem:[%s4009_s8 + $0x78] sm:$0xff] }
  0xdf   : > { %v2244_v46 = vpop.f32.mrf.mxu2  ;;  %v597_v30 = vor.u32 %v596_v9, %v592_v56  ;;  %v471_v9 = vunpack.c.l.b16 %v227_v27  ;;  %v1023_v23 = vshll.u32 %v3748_v48, 16 }
  0xe0   : > { %v4398_v52 = vadd.f32 %v4255_v16, %v2244_v46  ;;  %v2264_v53 = vpop.f32.mrf.mxu3  ;;  %v3173_v46 = vld [vmem:[%s4009_s8 + $0x80] sm:$0xf]  ;;  %v1019_v2 = vsel %vm494_vm0, %v1014_v58, %v1018_v51 }
  0xe1   : > { %v4401_v54 = vadd.f32 %v4255_v16, %v2264_v53  ;;  %v2226_v55 = vpop.f32.mrf.mxu1  ;;  %v2190_v53 = vadd.f32 %v4255_v16, %v4264_v10  ;;  %v602_v11 = vsel %vm494_vm0, %v597_v30, %v601_v19  ;;  %v487_v10 = vpack.c.b16 %v471_v9, %v471_v9  ;;  %v3821_v30 = vld [vmem:[%s4828_s1 + $0x190] sm:$0xff] }
  0xe2   : > { %v4405_v62 = vadd.f32 %v4255_v16, %v2226_v55  ;;  %v3829_v19 = vld [vmem:[%s4828_s1 + $0x1d0] sm:$0xff]  ;;  %2719 = vmatpush.bf16.msra.mxu2 %v3821_v30 }
  0xe3   : > { %4839 = vst [vmem:[#allocation6_spill] sm:$0xff] %v4401_v54  ;;  %v4407_v63 = vpop.f32.mrf.mxu0  ;;  %v889_v54 = vunpack.c.l.b16 %v3173_v46  ;;  %2808 = vmatpush.bf16.msra.mxu3 %v3829_v19 }
  0xe5   : > { %v4432_v20 = vpack.c.b16 %v889_v54, %v889_v54 }
  0xe7   : > { %v2246_v40 = vpop.f32.mrf.mxu2  ;;  %4841 = vst [vmem:[#allocation8_spill] sm:$0xff] %v4432_v20  ;;  %v1028_v30 = vshll.u32 %v4432_v20, 16 }
  0xe8   : > { %v4416_v55 = vadd.f32 %v4255_v16, %v2246_v40  ;;  %v2266_v45 = vpop.f32.mrf.mxu3  ;;  %v606_v40 = vshll.u32 %v4082_v31, 16 }
  0xe9   : > { %v4419_v44 = vadd.f32 %v4255_v16, %v2266_v45  ;;  %v2278_v56 = vpop.f32.mrf.mxu1 }
  0xea   : > { %v2279_v57 = vadd.f32 %v2278_v56, %v2190_v53  ;;  %v604_v53 = vshrl.u32 %v4082_v31, 16  ;;  %v608_v45 = vrot.slane %v606_v40, 1  ;;  %v611_v56 = vshll.u32 %v487_v10, 16 }
  0xeb   : > { %4840 = vst [vmem:[#allocation7_spill] sm:$0xff] %v4419_v44  ;;  %v2545_v33 = vpop.f32.mrf.mxu0  ;;  %v3176_v44 = vld [vmem:[%s4009_s8 + $0x8c] sm:$0xf] }
  0xec   : > { %2317 = vmatmul.bf16.gmra.mxu1 %v602_v11  ;;  %2406 = vmatmul.bf16.gmra.mxu2 %v730_v34  ;;  %v1021_v11 = vshrl.u32 %v3748_v48, 16  ;;  %v609_v19 = vor.u32 %v608_v45, %v604_v53 }
  0xed   : > { %2495 = vmatmul.bf16.gmra.mxu3 %v3747_v32  ;;  %v2192_v32 = vadd.f32 %v4255_v16, %v4290_v50  ;;  %v3813_v50 = vld [vmem:[%s4828_s1 + $0x150] sm:$0xff] }
  0xee   : > { %2584 = vmatmul.bf16.gmra.mxu0 %v1019_v2  ;;  %v1025_v2 = vrot.slane %v1023_v23, 1  ;;  %2630 = vmatpush.bf16.msra.mxu1 %v3813_v50 }
  0xef   : > { %v2367_v58 = vpop.f32.mrf.mxu2 }
  0xf0   : > { %v2368_v51 = vadd.f32 %v2367_v58, %v2279_v57  ;;  %v2456_v27 = vpop.f32.mrf.mxu3  ;;  %v3837_v57 = vld [vmem:[%s4828_s1 + $0x210] sm:$0xff]  ;;  %v613_v58 = vrot.slane %v611_v56, 1  ;;  %v1026_v23 = vor.u32 %v1025_v2, %v1021_v11  ;;  %v890_v2 = vunpack.c.l.b16 %v3176_v44 }
  0xf1   : > { %v2280_v46 = vpop.f32.mrf.mxu1  ;;  %2897 = vmatpush.bf16.msra.mxu0 %v3837_v57  ;;  %v616_v44 = vshrl.u32 %v4137_v49, 16 }
  0xf2   : > { %v2457_v34 = vadd.f32 %v2456_v27, %v2368_v51  ;;  %v2281_v9 = vadd.f32 %v2280_v46, %v2192_v32  ;;  %v731_v32 = vrot.slane %v4082_v31, 1  ;;  %v732_v51 = vrot.slane %v487_v10, 1  ;;  %v230_v46 = vld [vmem:[%s4009_s8 + $0x80] sm:$0xf] }
  0xf3   : > { %v2547_v54 = vpop.f32.mrf.mxu0  ;;  %v1030_v27 = vrot.slane %v1028_v30, 1  ;;  %v472_v45 = vunpack.c.l.b16 %v230_v46 }
  0xf4   : > { %v4444_v40 = vadd.f32 %v2545_v33, %v2457_v34  ;;  %v614_v33 = vsel %vm494_vm0, %v609_v19, %v613_v58  ;;  %v733_v53 = vsel %vm703_vm1, %v731_v32, %v732_v51  ;;  %v3749_v34 = vld [vmem:[%s4009_s8 + $0x84] sm:$0xff] }
  0xf5   : > { %v1031_v11 = vsel %vm494_vm0, %v1026_v23, %v1030_v27  ;;  %v488_v15 = vpack.c.b16 %v472_v45, %v472_v45  ;;  %v1035_v57 = vshll.u32 %v3749_v34, 16  ;;  %v734_v45 = vrot.slane %v4137_v49, 1 }
  0xf7   : > { %v2369_v20 = vpop.f32.mrf.mxu2  ;;  %v623_v32 = vshll.u32 %v488_v15, 16  ;;  %v1037_v46 = vrot.slane %v1035_v57, 1 }
  0xf8   : > { %v2370_v17 = vadd.f32 %v2369_v20, %v2281_v9  ;;  %v2458_v28 = vpop.f32.mrf.mxu3  ;;  %v618_v20 = vshll.u32 %v4137_v49, 16  ;;  %v4458_v9 = vpack.c.b16 %v890_v2, %v890_v2  ;;  %v233_v2 = vld [vmem:[%s4009_s8 + $0x8c] sm:$0xf] }
  0xf9   : > { %v2283_v50 = vpop.f32.mrf.mxu1 }
  0xfa   : > { %v2459_v56 = vadd.f32 %v2458_v28, %v2370_v17  ;;  %v2284_v31 = vadd.f32 %v2283_v50, %v2195_v21  ;;  %v2197_v21 = vadd.f32 %v4255_v16, %v4327_v38  ;;  %v1040_v50 = vshll.u32 %v4458_v9, 16 }
  0xfb   : > { %v2550_v10 = vpop.f32.mrf.mxu0  ;;  %v625_v38 = vrot.slane %v623_v32, 1 }
  0xfc   : > { %2322 = vmatmul.bf16.gmra.mxu1 %v614_v33  ;;  %2411 = vmatmul.bf16.gmra.mxu2 %v733_v53  ;;  %v4455_v30 = vadd.f32 %v2547_v54, %v2459_v56  ;;  %v620_v54 = vrot.slane %v618_v20, 1  ;;  %v735_v56 = vrot.slane %v488_v15, 1 }
  0xfd   : > { %2500 = vmatmul.bf16.gmra.mxu3 %v3748_v48  ;;  %v1033_v48 = vshrl.u32 %v3749_v34, 16 }
  0xfe   : > { %2589 = vmatmul.bf16.gmra.mxu0 %v1031_v11  ;;  %v621_v53 = vor.u32 %v620_v54, %v616_v44  ;;  %v1042_v11 = vrot.slane %v1040_v50, 1  ;;  %v473_v44 = vunpack.c.l.b16 %v233_v2  ;;  %v3820_v50 = vld [vmem:[%s4828_s1 + $0x188] sm:$0xff]  ;;  %v628_v2 = vshrl.u32 %v4164_v59, 16 }
  0xff   : > { %v2372_v19 = vpop.f32.mrf.mxu2  ;;  %2720 = vmatpush.bf16.msra.mxu2 %v3820_v50 }
 0x100   : > { %v2373_v28 = vadd.f32 %v2372_v19, %v2284_v31  ;;  %v2461_v17 = vpop.f32.mrf.mxu3  ;;  %v1038_v31 = vor.u32 %v1037_v46, %v1033_v48  ;;  %v3179_v19 = vld [vmem:[%s4009_s8 + $0x98] sm:$0xf]  ;;  %v3750_v48 = vld [vmem:[%s4009_s8 + $0x90] sm:$0xff] }
 0x101   : > { %v2285_v58 = vpop.f32.mrf.mxu1 }
 0x102   : > { %v2462_v51 = vadd.f32 %v2461_v17, %v2373_v28  ;;  %v2286_v23 = vadd.f32 %v2285_v58, %v2197_v21  ;;  %v2200_v21 = vadd.f32 %v4255_v16, %v4344_v6  ;;  %v736_v58 = vsel %vm703_vm1, %v734_v45, %v735_v56 }
 0x103   : > { %v2552_v27 = vpop.f32.mrf.mxu0  ;;  %v1043_v32 = vsel %vm494_vm0, %v1038_v31, %v1042_v11  ;;  %v489_v6 = vpack.c.b16 %v473_v44, %v473_v44  ;;  %v1047_v45 = vshll.u32 %v3750_v48, 16  ;;  %v3836_v44 = vld [vmem:[%s4828_s1 + $0x208] sm:$0xff] }
 0x104   : > { %v4464_v33 = vadd.f32 %v2550_v10, %v2462_v51  ;;  %v626_v10 = vsel %vm494_vm0, %v621_v53, %v625_v38  ;;  %v891_v51 = vunpack.c.l.b16 %v3179_v19  ;;  %v3828_v53 = vld [vmem:[%s4828_s1 + $0x1c8] sm:$0xff]  ;;  %2898 = vmatpush.bf16.msra.mxu0 %v3836_v44 }
 0x105   : > { %2809 = vmatpush.bf16.msra.mxu3 %v3828_v53  ;;  %v635_v19 = vshll.u32 %v489_v6, 16 }
 0x106   : > { %v4484_v38 = vpack.c.b16 %v891_v51, %v891_v51  ;;  %v737_v51 = vrot.slane %v4164_v59, 1 }
 0x107   : > { %v2374_v20 = vpop.f32.mrf.mxu2 }
 0x108   : > { %v2375_v28 = vadd.f32 %v2374_v20, %v2286_v23  ;;  %v2463_v57 = vpop.f32.mrf.mxu3  ;;  %v630_v23 = vshll.u32 %v4164_v59, 16  ;;  %4842 = vst [vmem:[#allocation9_spill] sm:$0xff] %v4484_v38 }
 0x109   : > { %v2288_v17 = vpop.f32.mrf.mxu1 }
 0x10a   : > { %v2464_v54 = vadd.f32 %v2463_v57, %v2375_v28  ;;  %v2289_v49 = vadd.f32 %v2288_v17, %v2200_v21  ;;  %v632_v20 = vrot.slane %v630_v23, 1  ;;  %v1045_v21 = vshrl.u32 %v3750_v48, 16 }
 0x10b   : > { %v2555_v15 = vpop.f32.mrf.mxu0  ;;  %v738_v23 = vrot.slane %v489_v6, 1 }
 0x10c   : > { %2327 = vmatmul.bf16.gmra.mxu1 %v626_v10  ;;  %2416 = vmatmul.bf16.gmra.mxu2 %v736_v58  ;;  %v4475_v46 = vadd.f32 %v2552_v27, %v2464_v54  ;;  %v1049_v10 = vrot.slane %v1047_v45, 1  ;;  %v1052_v58 = vshll.u32 %v4484_v38, 16  ;;  %v236_v45 = vld [vmem:[%s4009_s8 + $0x98] sm:$0xf] }
 0x10d   : > { %2505 = vmatmul.bf16.gmra.mxu3 %v3749_v34  ;;  %v2202_v34 = vadd.f32 %v4255_v16, %v4367_v43  ;;  %v3812_v43 = vld [vmem:[%s4828_s1 + $0x148] sm:$0xff] }
 0x10e   : > { %2594 = vmatmul.bf16.gmra.mxu0 %v1043_v32  ;;  %2631 = vmatpush.bf16.msra.mxu1 %v3812_v43  ;;  %v637_v32 = vrot.slane %v635_v19, 1  ;;  %v1050_v50 = vor.u32 %v1049_v10, %v1045_v21  ;;  %v1054_v53 = vrot.slane %v1052_v58, 1 }
 0x10f   : > { %v2377_v56 = vpop.f32.mrf.mxu2 }
 0x110   : > { %v2378_v27 = vadd.f32 %v2377_v56, %v2289_v49  ;;  %v2466_v31 = vpop.f32.mrf.mxu3  ;;  %v633_v49 = vor.u32 %v632_v20, %v628_v2  ;;  %v739_v2 = vsel %vm703_vm1, %v737_v51, %v738_v23  ;;  %v474_v20 = vunpack.c.l.b16 %v236_v45 }
 0x111   : > { %v2290_v11 = vpop.f32.mrf.mxu1  ;;  %v1055_v21 = vsel %vm494_vm0, %v1050_v50, %v1054_v53  ;;  %v2207_v23 = vadd.f32 %v4255_v16, %v4407_v63 }
 0x112   : > { %v2467_v28 = vadd.f32 %v2466_v31, %v2378_v27  ;;  %v2291_v57 = vadd.f32 %v2290_v11, %v2202_v34  ;;  %v3182_v34 = vld [vmem:[%s4009_s8 + $0xa4] sm:$0xf]  ;;  %v2205_v27 = vadd.f32 %v4255_v16, %v4390_v24  ;;  %v490_v24 = vpack.c.b16 %v474_v20, %v474_v20 }
 0x113   : > { %v2557_v17 = vpop.f32.mrf.mxu0  ;;  %v892_v10 = vunpack.c.l.b16 %v3182_v34 }
 0x114   : > { %v4496_v54 = vadd.f32 %v2555_v15, %v2467_v28  ;;  %v638_v15 = vsel %vm494_vm0, %v633_v49, %v637_v32  ;;  %v3751_v28 = vld [vmem:[%s4009_s8 + $0x9c] sm:$0xff]  ;;  %v741_v63 = vrot.slane %v490_v24, 1 }
 0x115   : > { %v4510_v49 = vpack.c.b16 %v892_v10, %v892_v10  ;;  %v1059_v32 = vshll.u32 %v3751_v28, 16  ;;  %v239_v10 = vld [vmem:[%s4009_s8 + $0xa4] sm:$0xf] }
 0x117   : > { %v2379_v56 = vpop.f32.mrf.mxu2 }
 0x118   : > { %v2380_v31 = vadd.f32 %v2379_v56, %v2291_v57  ;;  %v2468_v11 = vpop.f32.mrf.mxu3  ;;  %v3893_v57 = vld [vmem:[%s4009_s8 + $0x90] sm:$0xff] }
 0x119   : > { %v2293_v43 = vpop.f32.mrf.mxu1  ;;  %v642_v44 = vshll.u32 %v3893_v57, 16  ;;  %v640_v56 = vshrl.u32 %v3893_v57, 16  ;;  %v740_v16 = vrot.slane %v3893_v57, 1 }
 0x11a   : > { %v2469_v59 = vadd.f32 %v2468_v11, %v2380_v31  ;;  %v2294_v6 = vadd.f32 %v2293_v43, %v2205_v27  ;;  %v1061_v43 = vrot.slane %v1059_v32, 1 }
 0x11b   : > { %v2560_v19 = vpop.f32.mrf.mxu0  ;;  %v644_v34 = vrot.slane %v642_v44, 1 }
 0x11c   : > { %2332 = vmatmul.bf16.gmra.mxu1 %v638_v15  ;;  %2421 = vmatmul.bf16.gmra.mxu2 %v739_v2  ;;  %v4507_v58 = vadd.f32 %v2557_v17, %v2469_v59  ;;  %v647_v17 = vshll.u32 %v490_v24, 16  ;;  %v1064_v15 = vshll.u32 %v4510_v49, 16 }
 0x11d   : > { %2510 = vmatmul.bf16.gmra.mxu3 %v3750_v48  ;;  %v1057_v48 = vshrl.u32 %v3751_v28, 16  ;;  %v645_v20 = vor.u32 %v644_v34, %v640_v56  ;;  %v3752_v56 = vld [vmem:[%s4009_s8 + $0xa8] sm:$0xff] }
 0x11e   : > { %4843 = vst [vmem:[#allocation10_spill] sm:$0xff] %v4507_v58  ;;  %2599 = vmatmul.bf16.gmra.mxu0 %v1055_v21  ;;  %v649_v59 = vrot.slane %v647_v17, 1  ;;  %v1066_v21 = vrot.slane %v1064_v15, 1 }
 0x11f   : > { %v2382_v51 = vpop.f32.mrf.mxu2 }
 0x120   : > { %v2383_v45 = vadd.f32 %v2382_v51, %v2294_v6  ;;  %v2471_v50 = vpop.f32.mrf.mxu3  ;;  %v1062_v6 = vor.u32 %v1061_v43, %v1057_v48  ;;  %v3185_v51 = vld [vmem:[%s4009_s8 + $0xb0] sm:$0xf]  ;;  %v650_v32 = vsel %vm494_vm0, %v645_v20, %v649_v59  ;;  %v1071_v43 = vshll.u32 %v3752_v56, 16 }
 0x121   : > { %v2295_v53 = vpop.f32.mrf.mxu1  ;;  %v893_v34 = vunpack.c.l.b16 %v3185_v51 }
 0x122   : > { %v2472_v27 = vadd.f32 %v2471_v50, %v2383_v45  ;;  %v2296_v31 = vadd.f32 %v2295_v53, %v2207_v23  ;;  %v742_v23 = vsel %vm703_vm1, %v740_v16, %v741_v63  ;;  %v1067_v24 = vsel %vm494_vm0, %v1062_v6, %v1066_v21 }
 0x123   : > { %v2562_v11 = vpop.f32.mrf.mxu0  ;;  %v1069_v6 = vshrl.u32 %v3752_v56, 16  ;;  %v1073_v51 = vrot.slane %v1071_v43, 1  ;;  %v3188_v43 = vld [vmem:[%s4009_s8 + $0xbc] sm:$0xf] }
 0x124   : > { %v4515_v2 = vadd.f32 %v2560_v19, %v2472_v27  ;;  %v475_v19 = vunpack.c.l.b16 %v239_v10  ;;  %v3894_v27 = vld [vmem:[%s4009_s8 + $0x9c] sm:$0xff] }
 0x125   : > { %v652_v59 = vshrl.u32 %v3894_v27, 16 }
 0x126   : > { %v491_v48 = vpack.c.b16 %v475_v19, %v475_v19 }
 0x127   : > { %v2384_v44 = vpop.f32.mrf.mxu2 }
 0x128   : > { %v2385_v58 = vadd.f32 %v2384_v44, %v2296_v31  ;;  %v2473_v38 = vpop.f32.mrf.mxu3  ;;  %v654_v31 = vshll.u32 %v3894_v27, 16  ;;  %v659_v63 = vshll.u32 %v491_v48, 16 }
 0x129   : > { %v2298_v45 = vpop.f32.mrf.mxu1 }
 0x12a   : > { %v2474_v50 = vadd.f32 %v2473_v38, %v2385_v58  ;;  %v2299_v53 = vadd.f32 %v2298_v45, %v4262_v25  ;;  %v3819_v38 = vld [vmem:[%s4828_s1 + $0x180] sm:$0xff]  ;;  %v4533_v58 = vpack.c.b16 %v893_v34, %v893_v34  ;;  %v656_v16 = vrot.slane %v654_v31, 1 }
 0x12b   : > { %v2565_v57 = vpop.f32.mrf.mxu0  ;;  %v3827_v25 = vld [vmem:[%s4828_s1 + $0x1c0] sm:$0xff]  ;;  %2721 = vmatpush.bf16.msra.mxu2 %v3819_v38  ;;  %v1074_v34 = vor.u32 %v1073_v51, %v1069_v6  ;;  %v242_v38 = vld [vmem:[%s4009_s8 + $0xb0] sm:$0xf]  ;;  %v3895_v51 = vld [vmem:[%s4009_s8 + $0xa8] sm:$0xff] }
 0x12c   : > { %2337 = vmatmul.bf16.gmra.mxu1 %v650_v32  ;;  %2426 = vmatmul.bf16.gmra.mxu2 %v742_v23  ;;  %v4524_v17 = vadd.f32 %v2562_v11, %v2474_v50  ;;  %v1076_v45 = vshll.u32 %v4533_v58, 16  ;;  %v3811_v32 = vld [vmem:[%s4828_s1 + $0x140] sm:$0xff]  ;;  %v657_v50 = vor.u32 %v656_v16, %v652_v59  ;;  %v3753_v16 = vld [vmem:[%s4009_s8 + $0xb4] sm:$0xff] }
 0x12d   : > { %2515 = vmatmul.bf16.gmra.mxu3 %v3751_v28  ;;  %v3835_v23 = vld [vmem:[%s4828_s1 + $0x200] sm:$0xff]  ;;  %2632 = vmatpush.bf16.msra.mxu1 %v3811_v32 }
 0x12e   : > { %2604 = vmatmul.bf16.gmra.mxu0 %v1067_v24  ;;  %2810 = vmatpush.bf16.msra.mxu3 %v3827_v25  ;;  %v744_v24 = vrot.slane %v491_v48, 1  ;;  %v1078_v31 = vrot.slane %v1076_v45, 1  ;;  %v666_v45 = vshll.u32 %v3895_v51, 16 }
 0x12f   : > { %v2387_v15 = vpop.f32.mrf.mxu2  ;;  %2899 = vmatpush.bf16.msra.mxu0 %v3835_v23 }
 0x130   : > { %v2388_v11 = vadd.f32 %v2387_v15, %v2299_v53  ;;  %v2476_v28 = vpop.f32.mrf.mxu3  ;;  %v661_v53 = vrot.slane %v659_v63, 1  ;;  %v1079_v48 = vsel %vm494_vm0, %v1074_v34, %v1078_v31  ;;  %v894_v63 = vunpack.c.l.b16 %v3188_v43 }
 0x131   : > { %v2300_v20 = vpop.f32.mrf.mxu1  ;;  %v668_v34 = vrot.slane %v666_v45, 1 }
 0x132   : > { %v2477_v21 = vadd.f32 %v2476_v28, %v2388_v11  ;;  %v2301_v10 = vadd.f32 %v2300_v20, %v4288_v47  ;;  %v743_v47 = vrot.slane %v3894_v27, 1  ;;  %v662_v20 = vsel %vm494_vm0, %v657_v50, %v661_v53 }
 0x133   : > { %v2567_v44 = vpop.f32.mrf.mxu0  ;;  %v4555_v23 = vpack.c.b16 %v894_v63, %v894_v63  ;;  %v1083_v50 = vshll.u32 %v3753_v16, 16  ;;  %v245_v63 = vld [vmem:[%s4009_s8 + $0xbc] sm:$0xf] }
 0x134   : > { %v4543_v19 = vadd.f32 %v2565_v57, %v2477_v21  ;;  %v745_v32 = vsel %vm703_vm1, %v743_v47, %v744_v24  ;;  %v476_v57 = vunpack.c.l.b16 %v242_v38  ;;  %v664_v38 = vshrl.u32 %v3895_v51, 16 }
 0x137   : > { %v2389_v25 = vpop.f32.mrf.mxu2 }
 0x138   : > { %v2390_v15 = vadd.f32 %v2389_v25, %v2301_v10  ;;  %v2478_v11 = vpop.f32.mrf.mxu3  ;;  %v492_v10 = vpack.c.b16 %v476_v57, %v476_v57  ;;  %v1081_v25 = vshrl.u32 %v3753_v16, 16  ;;  %v746_v57 = vrot.slane %v3895_v51, 1 }
 0x139   : > { %v2303_v28 = vpop.f32.mrf.mxu1 }
 0x13a   : > { %v2479_v21 = vadd.f32 %v2478_v11, %v2390_v15  ;;  %v2304_v59 = vadd.f32 %v2303_v28, %v4308_v14  ;;  %v671_v31 = vshll.u32 %v492_v10, 16  ;;  %v1085_v15 = vrot.slane %v1083_v50, 1 }
 0x13b   : > { %v2570_v27 = vpop.f32.mrf.mxu0  ;;  %v1088_v11 = vshll.u32 %v4555_v23, 16 }
 0x13c   : > { %2342 = vmatmul.bf16.gmra.mxu1 %v662_v20  ;;  %2431 = vmatmul.bf16.gmra.mxu2 %v745_v32  ;;  %v4552_v6 = vadd.f32 %v2567_v44, %v2479_v21  ;;  %v669_v20 = vor.u32 %v668_v34, %v664_v38  ;;  %v673_v32 = vrot.slane %v671_v31, 1  ;;  %v747_v21 = vrot.slane %v492_v10, 1  ;;  %v3754_v34 = vld [vmem:[%s4009_s8 + $0xc0] sm:$0xff] }
 0x13d   : > { %2520 = vmatmul.bf16.gmra.mxu3 %v3752_v56 }
 0x13e   : > { %4844 = vst [vmem:[#allocation11_spill] sm:$0xff] %v4552_v6  ;;  %2609 = vmatmul.bf16.gmra.mxu0 %v1079_v48  ;;  %v1090_v48 = vrot.slane %v1088_v11, 1  ;;  %v748_v50 = vsel %vm703_vm1, %v746_v57, %v747_v21 }
 0x13f   : > { %v2392_v53 = vpop.f32.mrf.mxu2 }
 0x140   : > { %v2393_v47 = vadd.f32 %v2392_v53, %v2304_v59  ;;  %v2481_v14 = vpop.f32.mrf.mxu3  ;;  %v1086_v59 = vor.u32 %v1085_v15, %v1081_v25  ;;  %v3191_v53 = vld [vmem:[%s4009_s8 + $0xc8] sm:$0xf] }
 0x141   : > { %v2305_v24 = vpop.f32.mrf.mxu1  ;;  %v895_v31 = vunpack.c.l.b16 %v3191_v53 }
 0x142   : > { %v2482_v44 = vadd.f32 %v2481_v14, %v2393_v47  ;;  %v2306_v56 = vadd.f32 %v2305_v24, %v4325_v37  ;;  %v674_v37 = vsel %vm494_vm0, %v669_v20, %v673_v32  ;;  %v1091_v10 = vsel %vm494_vm0, %v1086_v59, %v1090_v48 }
 0x143   : > { %v2572_v43 = vpop.f32.mrf.mxu0  ;;  %v4571_v11 = vpack.c.b16 %v895_v31, %v895_v31  ;;  %v1095_v20 = vshll.u32 %v3754_v34, 16 }
 0x144   : > { %v4559_v28 = vadd.f32 %v2570_v27, %v2482_v44  ;;  %v477_v27 = vunpack.c.l.b16 %v245_v63  ;;  %v1093_v63 = vshrl.u32 %v3754_v34, 16 }
 0x145   : > { %v1097_v53 = vrot.slane %v1095_v20, 1 }
 0x146   : > { %v493_v44 = vpack.c.b16 %v477_v27, %v477_v27 }
 0x147   : > { %v2394_v45 = vpop.f32.mrf.mxu2 }
 0x148   : > { %v2395_v6 = vadd.f32 %v2394_v45, %v2306_v56  ;;  %v2483_v47 = vpop.f32.mrf.mxu3  ;;  %v3896_v56 = vld [vmem:[%s4009_s8 + $0xb4] sm:$0xff]  ;;  %v683_v48 = vshll.u32 %v493_v44, 16 }
 0x149   : > { %v2308_v14 = vpop.f32.mrf.mxu1  ;;  %v678_v15 = vshll.u32 %v3896_v56, 16  ;;  %v676_v21 = vshrl.u32 %v3896_v56, 16  ;;  %v749_v27 = vrot.slane %v3896_v56, 1 }
 0x14a   : > { %v2484_v24 = vadd.f32 %v2483_v47, %v2395_v6  ;;  %v2309_v38 = vadd.f32 %v2308_v14, %v4342_v4  ;;  %v1100_v47 = vshll.u32 %v4571_v11, 16 }
 0x14b   : > { %v2575_v51 = vpop.f32.mrf.mxu0  ;;  %v680_v59 = vrot.slane %v678_v15, 1  ;;  %v3194_v15 = vld [vmem:[%s4009_s8 + $0x20] sm:$0xf] }
 0x14c   : > { %2347 = vmatmul.bf16.gmra.mxu1 %v674_v37  ;;  %2436 = vmatmul.bf16.gmra.mxu2 %v748_v50  ;;  %v4568_v25 = vadd.f32 %v2572_v43, %v2484_v24  ;;  %v685_v50 = vrot.slane %v683_v48, 1  ;;  %v750_v24 = vrot.slane %v493_v44, 1  ;;  %v1296_v56 = vunpack.c.l.b16 %v3194_v15 }
 0x14d   : > { %2525 = vmatmul.bf16.gmra.mxu3 %v3753_v16  ;;  %v681_v37 = vor.u32 %v680_v59, %v676_v21  ;;  %v3755_v59 = vld [vmem:[%s4009_s8 + $0x18] sm:$0xff] }
 0x14e   : > { %4845 = vst [vmem:[#allocation12_spill] sm:$0xff] %v4568_v25  ;;  %2614 = vmatmul.bf16.gmra.mxu0 %v1091_v10  ;;  %v1102_v10 = vrot.slane %v1100_v47, 1  ;;  %v751_v20 = vsel %vm703_vm1, %v749_v27, %v750_v24  ;;  %v1312_v48 = vpack.c.b16 %v1296_v56, %v1296_v56  ;;  %v3756_v56 = vld [vmem:[%s4009_s8 + $0x24] sm:$0xff] }
 0x14f   : > { %v2397_v6 = vpop.f32.mrf.mxu2 }
 0x150   : > { %v2398_v32 = vadd.f32 %v2397_v6, %v2309_v38  ;;  %v2486_v4 = vpop.f32.mrf.mxu3  ;;  %v1098_v38 = vor.u32 %v1097_v53, %v1093_v63  ;;  %v1331_v63 = vshll.u32 %v3755_v59, 16  ;;  %v1336_v24 = vshll.u32 %v1312_v48, 16 }
 0x151   : > { %v2310_v57 = vpop.f32.mrf.mxu1 }
 0x152   : > { %v2487_v45 = vadd.f32 %v2486_v4, %v2398_v32  ;;  %v2311_v43 = vadd.f32 %v2310_v57, %v4365_v42  ;;  %v686_v42 = vsel %vm494_vm0, %v681_v37, %v685_v50  ;;  %v1103_v21 = vsel %vm494_vm0, %v1098_v38, %v1102_v10  ;;  %v3897_v38 = vld [vmem:[%s4009_s8 + $0xc] sm:$0xff] }
 0x153   : > { %v2577_v16 = vpop.f32.mrf.mxu0  ;;  %v1333_v27 = vrot.slane %v1331_v63, 1  ;;  %v1121_v10 = vrot.slane %v4175_v3, 1  ;;  %v1338_v15 = vrot.slane %v1336_v24, 1 }
 0x154   : > { %v4575_v14 = vadd.f32 %v2575_v51, %v2487_v45 }
 0x157   : > { %v2399_v31 = vpop.f32.mrf.mxu2 }
 0x158   : > { %v2400_v6 = vadd.f32 %v2399_v31, %v2311_v43  ;;  %v2488_v25 = vpop.f32.mrf.mxu3 }
 0x159   : > { %v2313_v32 = vpop.f32.mrf.mxu1 }
 0x15a   : > { %v2489_v4 = vadd.f32 %v2488_v25, %v2400_v6  ;;  %v2314_v51 = vadd.f32 %v2313_v32, %v4388_v12  ;;  %v1329_v12 = vshrl.u32 %v3755_v59, 16  ;;  %v1536_v6 = vrot.slane %v3755_v59, 1 }
 0x15b   : > { %v2580_v57 = vpop.f32.mrf.mxu0  ;;  %v1537_v32 = vrot.slane %v1312_v48, 1 }
 0x15c   : > { %2352 = vmatmul.bf16.gmra.mxu1 %v686_v42  ;;  %2441 = vmatmul.bf16.gmra.mxu2 %v751_v20  ;;  %v4583_v44 = vadd.f32 %v2577_v16, %v2489_v4  ;;  %v1334_v31 = vor.u32 %v1333_v27, %v1329_v12  ;;  %v3197_v42 = vld [vmem:[%s4009_s8 + $0x2c] sm:$0xf]  ;;  %v1343_v12 = vshll.u32 %v3756_v56, 16 }
 0x15d   : > { %2530 = vmatmul.bf16.gmra.mxu3 %v3754_v34  ;;  %v1120_v34 = vrot.slane %v3897_v38, 1  ;;  %v1297_v63 = vunpack.c.l.b16 %v3197_v42  ;;  %v1538_v3 = vsel %vm703_vm1, %v1536_v6, %v1537_v32  ;;  %v1124_v32 = vrot.slane %v4196_v35, 1 }
 0x15e   : > { %2619 = vmatmul.bf16.gmra.mxu0 %v1103_v21  ;;  %v1345_v38 = vrot.slane %v1343_v12, 1 }
 0x15f   : > { %v2402_v45 = vpop.f32.mrf.mxu2 }
 0x160   : > { %v2403_v43 = vadd.f32 %v2402_v45, %v2314_v51  ;;  %v2491_v53 = vpop.f32.mrf.mxu3 }
 0x161   : > { %v2315_v25 = vpop.f32.mrf.mxu1 }
 0x162   : > { %v2492_v47 = vadd.f32 %v2491_v53, %v2403_v43  ;;  %v2316_v37 = vadd.f32 %v2315_v25, %v4405_v62  ;;  %v1122_v62 = vsel %vm703_vm1, %v1120_v34, %v1121_v10  ;;  %v1339_v53 = vsel %vm494_vm0, %v1334_v31, %v1338_v15 }
 0x163   : > { %v2582_v50 = vpop.f32.mrf.mxu0  ;;  %v1313_v25 = vpack.c.b16 %v1297_v63, %v1297_v63 }
 0x164   : > { %v4586_v16 = vadd.f32 %v2580_v57, %v2492_v47 }
 0x165   : > { %v1348_v34 = vshll.u32 %v1313_v25, 16 }
 0x167   : > { %v2404_v20 = vpop.f32.mrf.mxu2 }
 0x168   : > { %v2405_v4 = vadd.f32 %v2404_v20, %v2316_v37  ;;  %v2493_v51 = vpop.f32.mrf.mxu3  ;;  %v1350_v20 = vrot.slane %v1348_v34, 1 }
 0x169   : > { %v2318_v21 = vpop.f32.mrf.mxu1 }
 0x16a   : > { %v2494_v45 = vadd.f32 %v2493_v51, %v2405_v4  ;;  %v2319_v57 = vadd.f32 %v2318_v21, %v4278_v39  ;;  %v1341_v39 = vshrl.u32 %v3756_v56, 16  ;;  %v1539_v4 = vrot.slane %v3756_v56, 1 }
 0x16b   : > { %v2585_v43 = vpop.f32.mrf.mxu0  ;;  %v1540_v51 = vrot.slane %v1313_v25, 1 }
 0x16c   : > { %2633 = vmatmul.bf16.vlgmr.msra.gmra.mxu1 %v1122_v62  ;;  %2722 = vmatmul.bf16.vlgmr.msra.gmra.mxu2 %v3755_v59  ;;  %v4596_v48 = vadd.f32 %v2582_v50, %v2494_v45  ;;  %v3898_v50 = vld [vmem:[%s4009_s8 + $0x18] sm:$0xff]  ;;  %v1346_v42 = vor.u32 %v1345_v38, %v1341_v39 }
 0x16d   : > { %2811 = vmatmul.bf16.vlgmr.msra.gmra.mxu3 %v1339_v53  ;;  %v1123_v6 = vrot.slane %v3898_v50, 1  ;;  %v3200_v62 = vld [vmem:[%s4009_s8 + $0x38] sm:$0xf]  ;;  %v1541_v35 = vsel %vm703_vm1, %v1539_v4, %v1540_v51  ;;  %v1127_v4 = vrot.slane %v4211_v1, 1 }
 0x16e   : > { %2900 = vmatmul.bf16.vlgmr.msra.gmra.mxu0 %v1538_v3 }
 0x16f   : > { %v2407_v47 = vpop.f32.mrf.mxu2  ;;  %v1125_v53 = vsel %vm703_vm1, %v1123_v6, %v1124_v32 }
 0x170   : > { %v2408_v37 = vadd.f32 %v2407_v47, %v2319_v57  ;;  %v2496_v27 = vpop.f32.mrf.mxu3  ;;  %v3757_v47 = vld [vmem:[%s4009_s8 + $0x30] sm:$0xff] }
 0x171   : > { %v2320_v24 = vpop.f32.mrf.mxu1 }
 0x172   : > { %v2497_v10 = vadd.f32 %v2496_v27, %v2408_v37  ;;  %v2321_v31 = vadd.f32 %v2320_v24, %v4300_v5  ;;  %v1351_v5 = vsel %vm494_vm0, %v1346_v42, %v1350_v20  ;;  %v1298_v37 = vunpack.c.l.b16 %v3200_v62  ;;  %v3899_v42 = vld [vmem:[%s4009_s8 + $0x24] sm:$0xff] }
 0x173   : > { %v2587_v15 = vpop.f32.mrf.mxu0  ;;  %v1355_v24 = vshll.u32 %v3757_v47, 16  ;;  %v1126_v20 = vrot.slane %v3899_v42, 1  ;;  %v1542_v62 = vrot.slane %v3757_v47, 1 }
 0x174   : > { %v4599_v59 = vadd.f32 %v2585_v43, %v2497_v10  ;;  %v1314_v27 = vpack.c.b16 %v1298_v37, %v1298_v37 }
 0x175   : > { %v1357_v32 = vrot.slane %v1355_v24, 1 }
 0x177   : > { %v2409_v21 = vpop.f32.mrf.mxu2 }
 0x178   : > { %v2410_v63 = vadd.f32 %v2409_v21, %v2321_v31  ;;  %v2498_v45 = vpop.f32.mrf.mxu3 }
 0x179   : > { %v2323_v57 = vpop.f32.mrf.mxu1 }
 0x17a   : > { %v2499_v43 = vadd.f32 %v2498_v45, %v2410_v63  ;;  %v2324_v3 = vadd.f32 %v2323_v57, %v4318_v26  ;;  %v1353_v26 = vshrl.u32 %v3757_v47, 16  ;;  %v1543_v63 = vrot.slane %v1314_v27, 1  ;;  %v3203_v45 = vld [vmem:[%s4009_s8 + $0x44] sm:$0xf] }
 0x17b   : > { %v2590_v12 = vpop.f32.mrf.mxu0 }
 0x17c   : > { %2638 = vmatmul.bf16.gmra.mxu1 %v1125_v53  ;;  %2727 = vmatmul.bf16.gmra.mxu2 %v3756_v56  ;;  %v4609_v25 = vadd.f32 %v2587_v15, %v2499_v43  ;;  %v1360_v56 = vshll.u32 %v1314_v27, 16  ;;  %v1358_v51 = vor.u32 %v1357_v32, %v1353_v26  ;;  %v1544_v1 = vsel %vm703_vm1, %v1542_v62, %v1543_v63 }
 0x17d   : > { %2816 = vmatmul.bf16.gmra.mxu3 %v1351_v5 }
 0x17e   : > { %2905 = vmatmul.bf16.gmra.mxu0 %v1541_v35  ;;  %v1362_v21 = vrot.slane %v1360_v56, 1  ;;  %v1299_v35 = vunpack.c.l.b16 %v3203_v45 }
 0x17f   : > { %v2412_v39 = vpop.f32.mrf.mxu2 }
 0x180   : > { %v2413_v38 = vadd.f32 %v2412_v39, %v2324_v3  ;;  %v2501_v34 = vpop.f32.mrf.mxu3  ;;  %v3758_v3 = vld [vmem:[%s4009_s8 + $0x3c] sm:$0xff]  ;;  %v1363_v39 = vsel %vm494_vm0, %v1358_v51, %v1362_v21  ;;  %v1130_v21 = vrot.slane %v4229_v29, 1 }
 0x181   : > { %v2325_v10 = vpop.f32.mrf.mxu1  ;;  %v1545_v45 = vrot.slane %v3758_v3, 1 }
 0x182   : > { %v2502_v31 = vadd.f32 %v2501_v34, %v2413_v38  ;;  %v2326_v50 = vadd.f32 %v2325_v10, %v4334_v60  ;;  %v1128_v60 = vsel %vm703_vm1, %v1126_v20, %v1127_v4  ;;  %v1315_v38 = vpack.c.b16 %v1299_v35, %v1299_v35 }
 0x183   : > { %v2592_v6 = vpop.f32.mrf.mxu0  ;;  %v1367_v34 = vshll.u32 %v3758_v3, 16 }
 0x184   : > { %v4612_v15 = vadd.f32 %v2590_v12, %v2502_v31  ;;  %v1372_v56 = vshll.u32 %v1315_v38, 16 }
 0x185   : > { %v1369_v32 = vrot.slane %v1367_v34, 1 }
 0x186   : > { %v1374_v63 = vrot.slane %v1372_v56, 1 }
 0x187   : > { %v2414_v57 = vpop.f32.mrf.mxu2 }
 0x188   : > { %v2415_v53 = vadd.f32 %v2414_v57, %v2326_v50  ;;  %v2503_v5 = vpop.f32.mrf.mxu3  ;;  %v1546_v57 = vrot.slane %v1315_v38, 1 }
 0x189   : > { %v2328_v43 = vpop.f32.mrf.mxu1 }
 0x18a   : > { %v2504_v37 = vadd.f32 %v2503_v5, %v2415_v53  ;;  %v2329_v12 = vadd.f32 %v2328_v43, %v4358_v18  ;;  %v1365_v18 = vshrl.u32 %v3758_v3, 16  ;;  %v3206_v5 = vld [vmem:[%s4009_s8 + $0x50] sm:$0xf]  ;;  %v1547_v29 = vsel %vm703_vm1, %v1545_v45, %v1546_v57 }
 0x18b   : > { %v2595_v24 = vpop.f32.mrf.mxu0  ;;  %v1300_v34 = vunpack.c.l.b16 %v3206_v5  ;;  %v3209_v5 = vld [vmem:[%s4009_s8 + $0x5c] sm:$0xf] }
 0x18c   : > { %2643 = vmatmul.bf16.gmra.mxu1 %v1128_v60  ;;  %2732 = vmatmul.bf16.gmra.mxu2 %v3757_v47  ;;  %v4622_v27 = vadd.f32 %v2592_v6, %v2504_v37  ;;  %v3900_v6 = vld [vmem:[%s4009_s8 + $0x30] sm:$0xff]  ;;  %v1370_v62 = vor.u32 %v1369_v32, %v1365_v18 }
 0x18d   : > { %2821 = vmatmul.bf16.gmra.mxu3 %v1363_v39  ;;  %v1129_v51 = vrot.slane %v3900_v6, 1 }
 0x18e   : > { %2910 = vmatmul.bf16.gmra.mxu0 %v1544_v1  ;;  %v3759_v1 = vld [vmem:[%s4009_s8 + $0x48] sm:$0xff] }
 0x18f   : > { %v2417_v10 = vpop.f32.mrf.mxu2  ;;  %v1131_v37 = vsel %vm703_vm1, %v1129_v51, %v1130_v21  ;;  %v3901_v51 = vld [vmem:[%s4009_s8 + $0x3c] sm:$0xff]  ;;  %v1548_v57 = vrot.slane %v3759_v1, 1 }
 0x190   : > { %v2418_v26 = vadd.f32 %v2417_v10, %v2329_v12  ;;  %v2506_v31 = vpop.f32.mrf.mxu3  ;;  %v1316_v10 = vpack.c.b16 %v1300_v34, %v1300_v34  ;;  %v1132_v21 = vrot.slane %v3901_v51, 1 }
 0x191   : > { %v2330_v50 = vpop.f32.mrf.mxu1 }
 0x192   : > { %v2507_v42 = vadd.f32 %v2506_v31, %v2418_v26  ;;  %v2331_v20 = vadd.f32 %v2330_v50, %v4380_v8  ;;  %v1375_v8 = vsel %vm494_vm0, %v1370_v62, %v1374_v63  ;;  %v1379_v26 = vshll.u32 %v3759_v1, 16 }
 0x193   : > { %v2597_v4 = vpop.f32.mrf.mxu0  ;;  %v1133_v62 = vrot.slane %v4247_v0, 1 }
 0x194   : > { %v4625_v47 = vadd.f32 %v2595_v24, %v2507_v42  ;;  %v1381_v6 = vrot.slane %v1379_v26, 1 }
 0x197   : > { %v2419_v53 = vpop.f32.mrf.mxu2 }
 0x198   : > { %v2420_v43 = vadd.f32 %v2419_v53, %v2331_v20  ;;  %v2508_v60 = vpop.f32.mrf.mxu3  ;;  %v1549_v53 = vrot.slane %v1316_v10, 1 }
 0x199   : > { %v2333_v35 = vpop.f32.mrf.mxu1 }
 0x19a   : > { %v2509_v12 = vadd.f32 %v2508_v60, %v2420_v43  ;;  %v2334_v24 = vadd.f32 %v2333_v35, %v4398_v52  ;;  %v1377_v52 = vshrl.u32 %v3759_v1, 16  ;;  %v1550_v0 = vsel %vm703_vm1, %v1548_v57, %v1549_v53 }
 0x19b   : > { %v2600_v39 = vpop.f32.mrf.mxu0 }
 0x19c   : > { %2648 = vmatmul.bf16.gmra.mxu1 %v1131_v37  ;;  %2737 = vmatmul.bf16.gmra.mxu2 %v3758_v3  ;;  %v4635_v38 = vadd.f32 %v2597_v4, %v2509_v12  ;;  %v1384_v3 = vshll.u32 %v1316_v10, 16  ;;  %v1382_v63 = vor.u32 %v1381_v6, %v1377_v52  ;;  %v1301_v12 = vunpack.c.l.b16 %v3209_v5 }
 0x19d   : > { %2826 = vmatmul.bf16.gmra.mxu3 %v1375_v8  ;;  %v3760_v8 = vld [vmem:[%s4009_s8 + $0x54] sm:$0xff] }
 0x19e   : > { %2915 = vmatmul.bf16.gmra.mxu0 %v1547_v29  ;;  %v1386_v45 = vrot.slane %v1384_v3, 1  ;;  %v1317_v26 = vpack.c.b16 %v1301_v12, %v1301_v12  ;;  %v1551_v57 = vrot.slane %v3760_v8, 1 }
 0x19f   : > { %v2422_v31 = vpop.f32.mrf.mxu2 }
 0x1a0   : > { %v2423_v50 = vadd.f32 %v2422_v31, %v2334_v24  ;;  %v2511_v18 = vpop.f32.mrf.mxu3  ;;  %v1387_v34 = vsel %vm494_vm0, %v1382_v63, %v1386_v45  ;;  %v1391_v31 = vshll.u32 %v3760_v8, 16  ;;  %v1552_v53 = vrot.slane %v1317_v26, 1 }
 0x1a1   : > { %v2335_v32 = vpop.f32.mrf.mxu1 }
 0x1a2   : > { %v2512_v56 = vadd.f32 %v2511_v18, %v2423_v50  ;;  %v2336_v42 = vadd.f32 %v2335_v32, %v4416_v55  ;;  %v1134_v55 = vsel %vm703_vm1, %v1132_v21, %v1133_v62  ;;  %v1136_v62 = vrot.slane %v4275_v36, 1 }
 0x1a3   : > { %v2602_v20 = vpop.f32.mrf.mxu0  ;;  %v1553_v36 = vsel %vm703_vm1, %v1551_v57, %v1552_v53  ;;  %v3215_v53 = vld [vmem:[%s4009_s8 + $0x74] sm:$0xf] }
 0x1a4   : > { %v4638_v4 = vadd.f32 %v2600_v39, %v2512_v56  ;;  %v1393_v56 = vrot.slane %v1391_v31, 1 }
 0x1a7   : > { %v2424_v43 = vpop.f32.mrf.mxu2 }
 0x1a8   : > { %v2425_v60 = vadd.f32 %v2424_v43, %v2336_v42  ;;  %v2513_v35 = vpop.f32.mrf.mxu3  ;;  %v1396_v42 = vshll.u32 %v1317_v26, 16  ;;  %v3212_v43 = vld [vmem:[%s4009_s8 + $0x68] sm:$0xf] }
 0x1a9   : > { %v2338_v37 = vpop.f32.mrf.mxu1 }
 0x1aa   : > { %v2514_v24 = vadd.f32 %v2513_v35, %v2425_v60  ;;  %v2339_v39 = vadd.f32 %v2338_v37, %v4281_v41  ;;  %v1389_v41 = vshrl.u32 %v3760_v8, 16  ;;  %v1398_v45 = vrot.slane %v1396_v42, 1 }
 0x1ab   : > { %v2605_v29 = vpop.f32.mrf.mxu0 }
 0x1ac   : > { %2653 = vmatmul.bf16.gmra.mxu1 %v1134_v55  ;;  %2742 = vmatmul.bf16.gmra.mxu2 %v3759_v1  ;;  %v4648_v10 = vadd.f32 %v2602_v20, %v2514_v24  ;;  %v3902_v20 = vld [vmem:[%s4009_s8 + $0x48] sm:$0xff]  ;;  %v1394_v63 = vor.u32 %v1393_v56, %v1389_v41 }
 0x1ad   : > { %2831 = vmatmul.bf16.gmra.mxu3 %v1387_v34  ;;  %v1135_v21 = vrot.slane %v3902_v20, 1  ;;  %v1302_v34 = vunpack.c.l.b16 %v3212_v43 }
 0x1ae   : > { %2920 = vmatmul.bf16.gmra.mxu0 %v1550_v0 }
 0x1af   : > { %v2427_v50 = vpop.f32.mrf.mxu2  ;;  %v1137_v55 = vsel %vm703_vm1, %v1135_v21, %v1136_v62  ;;  %v1318_v26 = vpack.c.b16 %v1302_v34, %v1302_v34  ;;  %v1139_v21 = vrot.slane %v4315_v22, 1 }
 0x1b0   : > { %v2428_v18 = vadd.f32 %v2427_v50, %v2339_v39  ;;  %v2516_v32 = vpop.f32.mrf.mxu3 }
 0x1b1   : > { %v2340_v52 = vpop.f32.mrf.mxu1  ;;  %v1555_v57 = vrot.slane %v1318_v26, 1 }
 0x1b2   : > { %v2517_v6 = vadd.f32 %v2516_v32, %v2428_v18  ;;  %v2341_v3 = vadd.f32 %v2340_v52, %v4303_v7  ;;  %v1399_v7 = vsel %vm494_vm0, %v1394_v63, %v1398_v45 }
 0x1b3   : > { %v2607_v51 = vpop.f32.mrf.mxu0 }
 0x1b4   : > { %v4651_v1 = vadd.f32 %v2605_v29, %v2517_v6  ;;  %v3761_v29 = vld [vmem:[%s4009_s8 + $0x60] sm:$0xff] }
 0x1b5   : > { %v1403_v31 = vshll.u32 %v3761_v29, 16  ;;  %v1554_v45 = vrot.slane %v3761_v29, 1 }
 0x1b7   : > { %v2429_v5 = vpop.f32.mrf.mxu2  ;;  %v1405_v6 = vrot.slane %v1403_v31, 1  ;;  %v1556_v22 = vsel %vm703_vm1, %v1554_v45, %v1555_v57 }
 0x1b8   : > { %v2430_v60 = vadd.f32 %v2429_v5, %v2341_v3  ;;  %v2518_v35 = vpop.f32.mrf.mxu3 }
 0x1b9   : > { %v2343_v37 = vpop.f32.mrf.mxu1 }
 0x1ba   : > { %v2519_v12 = vadd.f32 %v2518_v35, %v2430_v60  ;;  %v2344_v24 = vadd.f32 %v2343_v37, %v4321_v13  ;;  %v1401_v13 = vshrl.u32 %v3761_v29, 16  ;;  %v3762_v37 = vld [vmem:[%s4009_s8 + $0x6c] sm:$0xff] }
 0x1bb   : > { %v2610_v39 = vpop.f32.mrf.mxu0  ;;  %v1415_v31 = vshll.u32 %v3762_v37, 16 }
 0x1bc   : > { %2658 = vmatmul.bf16.gmra.mxu1 %v1137_v55  ;;  %2747 = vmatmul.bf16.gmra.mxu2 %v3760_v8  ;;  %v4661_v0 = vadd.f32 %v2607_v51, %v2519_v12  ;;  %v1408_v8 = vshll.u32 %v1318_v26, 16  ;;  %v3903_v51 = vld [vmem:[%s4009_s8 + $0x54] sm:$0xff]  ;;  %v1406_v62 = vor.u32 %v1405_v6, %v1401_v13  ;;  %v1303_v55 = vunpack.c.l.b16 %v3215_v53  ;;  %v4846_v12 = vld [vmem:[#allocation3_spill] sm:$0xff] }
 0x1bd   : > { %2836 = vmatmul.bf16.gmra.mxu3 %v1399_v7  ;;  %v1138_v20 = vrot.slane %v3903_v51, 1  ;;  %v1413_v13 = vshrl.u32 %v3762_v37, 16  ;;  %v1557_v53 = vrot.slane %v3762_v37, 1 }
 0x1be   : > { %2925 = vmatmul.bf16.gmra.mxu0 %v1553_v36  ;;  %v1410_v63 = vrot.slane %v1408_v8, 1  ;;  %v1319_v26 = vpack.c.b16 %v1303_v55, %v1303_v55  ;;  %v4847_v8 = vld [vmem:[#allocation4_spill] sm:$0xff] }
 0x1bf   : > { %v2432_v50 = vpop.f32.mrf.mxu2 }
 0x1c0   : > { %v2433_v18 = vadd.f32 %v2432_v50, %v2344_v24  ;;  %v2521_v32 = vpop.f32.mrf.mxu3  ;;  %v1411_v36 = vsel %vm494_vm0, %v1406_v62, %v1410_v63  ;;  %v4848_v62 = vld [vmem:[#allocation2_spill] sm:$0xff] }
 0x1c1   : > { %v2345_v52 = vpop.f32.mrf.mxu1  ;;  %v1142_v63 = vrot.slane %v4848_v62, 1 }
 0x1c2   : > { %v2522_v41 = vadd.f32 %v2521_v32, %v2433_v18  ;;  %v2346_v56 = vadd.f32 %v2345_v52, %v4337_v61  ;;  %v1140_v61 = vsel %vm703_vm1, %v1138_v20, %v1139_v21 }
 0x1c3   : > { %v2612_v42 = vpop.f32.mrf.mxu0 }
 0x1c4   : > { %v4664_v3 = vadd.f32 %v2610_v39, %v2522_v41  ;;  %v1417_v41 = vrot.slane %v1415_v31, 1 }
 0x1c6   : > { %v1418_v45 = vor.u32 %v1417_v41, %v1413_v13 }
 0x1c7   : > { %v2434_v5 = vpop.f32.mrf.mxu2 }
 0x1c8   : > { %v2435_v43 = vadd.f32 %v2434_v5, %v2346_v56  ;;  %v2523_v60 = vpop.f32.mrf.mxu3  ;;  %v1420_v56 = vshll.u32 %v1319_v26, 16  ;;  %v1558_v5 = vrot.slane %v1319_v26, 1 }
 0x1c9   : > { %v2348_v35 = vpop.f32.mrf.mxu1 }
 0x1ca   : > { %v2524_v7 = vadd.f32 %v2523_v60, %v2435_v43  ;;  %v2349_v24 = vadd.f32 %v2348_v35, %v4846_v12  ;;  %v1422_v57 = vrot.slane %v1420_v56, 1  ;;  %v3218_v60 = vld [vmem:[%s4009_s8 + $0x80] sm:$0xf]  ;;  %v1559_v31 = vsel %vm703_vm1, %v1557_v53, %v1558_v5  ;;  %v4851_v53 = vld [vmem:[#allocation5_spill] sm:$0xff] }
 0x1cb   : > { %v2615_v39 = vpop.f32.mrf.mxu0  ;;  %v1145_v5 = vrot.slane %v4851_v53, 1 }
 0x1cc   : > { %2663 = vmatmul.bf16.gmra.mxu1 %v1140_v61  ;;  %2752 = vmatmul.bf16.gmra.mxu2 %v3761_v29  ;;  %v4674_v34 = vadd.f32 %v2612_v42, %v2524_v7  ;;  %v3904_v42 = vld [vmem:[%s4009_s8 + $0x60] sm:$0xff]  ;;  %v1423_v12 = vsel %vm494_vm0, %v1418_v45, %v1422_v57  ;;  %v3905_v45 = vld [vmem:[%s4009_s8 + $0x6c] sm:$0xff] }
 0x1cd   : > { %2841 = vmatmul.bf16.gmra.mxu3 %v1411_v36  ;;  %v1141_v21 = vrot.slane %v3904_v42, 1  ;;  %v4850_v42 = vld [vmem:[#allocation7_spill] sm:$0xff]  ;;  %v1144_v57 = vrot.slane %v3905_v45, 1 }
 0x1ce   : > { %2930 = vmatmul.bf16.gmra.mxu0 %v1556_v22 }
 0x1cf   : > { %v2437_v50 = vpop.f32.mrf.mxu2  ;;  %v1143_v7 = vsel %vm703_vm1, %v1141_v21, %v1142_v63 }
 0x1d0   : > { %v2438_v18 = vadd.f32 %v2437_v50, %v2349_v24  ;;  %v2526_v32 = vpop.f32.mrf.mxu3  ;;  %v3763_v50 = vld [vmem:[%s4009_s8 + $0x78] sm:$0xff] }
 0x1d1   : > { %v2350_v52 = vpop.f32.mrf.mxu1 }
 0x1d2   : > { %v2527_v6 = vadd.f32 %v2526_v32, %v2438_v18  ;;  %v2351_v51 = vadd.f32 %v2350_v52, %v4847_v8  ;;  %v1304_v18 = vunpack.c.l.b16 %v3218_v60  ;;  %v1427_v52 = vshll.u32 %v3763_v50, 16 }
 0x1d3   : > { %v2617_v20 = vpop.f32.mrf.mxu0  ;;  %v1425_v8 = vshrl.u32 %v3763_v50, 16 }
 0x1d4   : > { %v4677_v29 = vadd.f32 %v2615_v39, %v2527_v6  ;;  %v4849_v39 = vld [vmem:[#allocation6_spill] sm:$0xff]  ;;  %v1320_v32 = vpack.c.b16 %v1304_v18, %v1304_v18  ;;  %v1429_v63 = vrot.slane %v1427_v52, 1 }
 0x1d7   : > { %v2439_v43 = vpop.f32.mrf.mxu2 }
 0x1d8   : > { %v2440_v35 = vadd.f32 %v2439_v43, %v2351_v51  ;;  %v2528_v61 = vpop.f32.mrf.mxu3  ;;  %v1430_v43 = vor.u32 %v1429_v63, %v1425_v8 }
 0x1d9   : > { %v2353_v55 = vpop.f32.mrf.mxu1 }
 0x1da   : > { %v2529_v24 = vadd.f32 %v2528_v61, %v2440_v35  ;;  %v2354_v36 = vadd.f32 %v2353_v55, %v4849_v39  ;;  %v1560_v35 = vrot.slane %v3763_v50, 1  ;;  %v1561_v61 = vrot.slane %v1320_v32, 1  ;;  %v3221_v55 = vld [vmem:[%s4009_s8 + $0x8c] sm:$0xf] }
 0x1db   : > { %v2620_v22 = vpop.f32.mrf.mxu0  ;;  %v1305_v18 = vunpack.c.l.b16 %v3221_v55 }
 0x1dc   : > { %2668 = vmatmul.bf16.gmra.mxu1 %v1143_v7  ;;  %2757 = vmatmul.bf16.gmra.mxu2 %v3762_v37  ;;  %v4687_v26 = vadd.f32 %v2617_v20, %v2529_v24  ;;  %v1432_v37 = vshll.u32 %v1320_v32, 16 }
 0x1dd   : > { %2846 = vmatmul.bf16.gmra.mxu3 %v1423_v12  ;;  %v1321_v32 = vpack.c.b16 %v1305_v18, %v1305_v18 }
 0x1de   : > { %2935 = vmatmul.bf16.gmra.mxu0 %v1559_v31  ;;  %v1434_v60 = vrot.slane %v1432_v37, 1  ;;  %v3764_v31 = vld [vmem:[%s4009_s8 + $0x84] sm:$0xff] }
 0x1df   : > { %v2442_v13 = vpop.f32.mrf.mxu2  ;;  %v1437_v37 = vshrl.u32 %v3764_v31, 16 }
 0x1e0   : > { %v2443_v41 = vadd.f32 %v2442_v13, %v2354_v36  ;;  %v2531_v56 = vpop.f32.mrf.mxu3  ;;  %v1146_v36 = vsel %vm703_vm1, %v1144_v57, %v1145_v5  ;;  %v1435_v13 = vsel %vm494_vm0, %v1430_v43, %v1434_v60  ;;  %v1444_v57 = vshll.u32 %v1321_v32, 16  ;;  %v3906_v5 = vld [vmem:[%s4009_s8 + $0x78] sm:$0xff]  ;;  %v4852_v43 = vld [vmem:[#allocation8_spill] sm:$0xff] }
 0x1e1   : > { %v2355_v6 = vpop.f32.mrf.mxu1  ;;  %v1148_v60 = vrot.slane %v4852_v43, 1 }
 0x1e2   : > { %v2532_v51 = vadd.f32 %v2531_v56, %v2443_v41  ;;  %v2356_v21 = vadd.f32 %v2355_v6, %v4850_v42  ;;  %v1562_v41 = vsel %vm703_vm1, %v1560_v35, %v1561_v61  ;;  %v1439_v6 = vshll.u32 %v3764_v31, 16 }
 0x1e3   : > { %v2622_v62 = vpop.f32.mrf.mxu0  ;;  %v1446_v61 = vrot.slane %v1444_v57, 1 }
 0x1e4   : > { %v4690_v20 = vadd.f32 %v2620_v22, %v2532_v51  ;;  %v1441_v45 = vrot.slane %v1439_v6, 1 }
 0x1e6   : > { %v1442_v35 = vor.u32 %v1441_v45, %v1437_v37 }
 0x1e7   : > { %v2444_v7 = vpop.f32.mrf.mxu2 }
 0x1e8   : > { %v2445_v12 = vadd.f32 %v2444_v7, %v2356_v21  ;;  %v2533_v24 = vpop.f32.mrf.mxu3 }
 0x1e9   : > { %v2634_v39 = vpop.f32.mrf.mxu1 }
 0x1ea   : > { %v2534_v52 = vadd.f32 %v2533_v24, %v2445_v12  ;;  %v2635_v8 = vadd.f32 %v2634_v39, %v4444_v40  ;;  %v1147_v40 = vrot.slane %v3906_v5, 1  ;;  %v1563_v12 = vrot.slane %v3764_v31, 1  ;;  %v3224_v39 = vld [vmem:[%s4009_s8 + $0x98] sm:$0xf] }
 0x1eb   : > { %v2901_v22 = vpop.f32.mrf.mxu0  ;;  %v1564_v24 = vrot.slane %v1321_v32, 1  ;;  %v1306_v6 = vunpack.c.l.b16 %v3224_v39 }
 0x1ec   : > { %2673 = vmatmul.bf16.gmra.mxu1 %v1146_v36  ;;  %2762 = vmatmul.bf16.gmra.mxu2 %v3763_v50  ;;  %v4699_v56 = vadd.f32 %v2622_v62, %v2534_v52 }
 0x1ed   : > { %2851 = vmatmul.bf16.gmra.mxu3 %v1435_v13  ;;  %v1149_v13 = vsel %vm703_vm1, %v1147_v40, %v1148_v60  ;;  %v1322_v32 = vpack.c.b16 %v1306_v6, %v1306_v6 }
 0x1ee   : > { %2940 = vmatmul.bf16.gmra.mxu0 %v1562_v41  ;;  %v3765_v41 = vld [vmem:[%s4009_s8 + $0x90] sm:$0xff] }
 0x1ef   : > { %v2723_v51 = vpop.f32.mrf.mxu2  ;;  %v1449_v40 = vshrl.u32 %v3765_v41, 16 }
 0x1f0   : > { %v2724_v42 = vadd.f32 %v2723_v51, %v2635_v8  ;;  %v2812_v21 = vpop.f32.mrf.mxu3 }
 0x1f1   : > { %v2636_v63 = vpop.f32.mrf.mxu1 }
 0x1f2   : > { %v2813_v53 = vadd.f32 %v2812_v21, %v2724_v42  ;;  %v2637_v7 = vadd.f32 %v2636_v63, %v4455_v30  ;;  %v1447_v42 = vsel %vm494_vm0, %v1442_v35, %v1446_v61  ;;  %v1565_v21 = vsel %vm703_vm1, %v1563_v12, %v1564_v24  ;;  %v3907_v61 = vld [vmem:[%s4009_s8 + $0x84] sm:$0xff] }
 0x1f3   : > { %v2903_v50 = vpop.f32.mrf.mxu0  ;;  %v1451_v63 = vshll.u32 %v3765_v41, 16 }
 0x1f4   : > { %v2902_v62 = vadd.f32 %v2901_v22, %v2813_v53 }
 0x1f5   : > { %v1453_v43 = vrot.slane %v1451_v63, 1 }
 0x1f6   : > { %v2981_v55 = vmax.f32 %v2902_v62, 0.0 }
 0x1f7   : > { %v2725_v36 = vpop.f32.mrf.mxu2  ;;  %v1454_v12 = vor.u32 %v1453_v43, %v1449_v40 }
 0x1f8   : > { %3013 = vst [vmem:[%s4706_s10] sm:$0xff] %v2981_v55  ;;  %v2726_v18 = vadd.f32 %v2725_v36, %v2637_v7  ;;  %v2814_v52 = vpop.f32.mrf.mxu3  ;;  %v1150_v55 = vrot.slane %v3907_v61, 1  ;;  %v1151_v7 = vrot.slane %v4458_v9, 1  ;;  %v1566_v36 = vrot.slane %v3765_v41, 1 }
 0x1f9   : > { %v2639_v22 = vpop.f32.mrf.mxu1 }
 0x1fa   : > { %v2815_v8 = vadd.f32 %v2814_v52, %v2726_v18  ;;  %v2640_v45 = vadd.f32 %v2639_v22, %v4464_v33  ;;  %v1567_v18 = vrot.slane %v1322_v32, 1  ;;  %v3227_v52 = vld [vmem:[%s4009_s8 + $0xa4] sm:$0xf] }
 0x1fb   : > { %v2906_v51 = vpop.f32.mrf.mxu0 }
 0x1fc   : > { %v2904_v30 = vadd.f32 %v2903_v50, %v2815_v8  ;;  %2678 = vmatmul.bf16.gmra.mxu1 %v1149_v13  ;;  %2767 = vmatmul.bf16.gmra.mxu2 %v3764_v31  ;;  %v1456_v50 = vshll.u32 %v1322_v32, 16 }
 0x1fd   : > { %2856 = vmatmul.bf16.gmra.mxu3 %v1447_v42  ;;  %v3766_v42 = vld [vmem:[%s4009_s8 + $0x9c] sm:$0xff] }
 0x1fe   : > { %2945 = vmatmul.bf16.gmra.mxu0 %v1565_v21  ;;  %v2982_v37 = vmax.f32 %v2904_v30, 0.0  ;;  %v1458_v33 = vrot.slane %v1456_v50, 1  ;;  %v1307_v21 = vunpack.c.l.b16 %v3227_v52  ;;  %v1461_v50 = vshrl.u32 %v3766_v42, 16 }
 0x1ff   : > { %v2728_v57 = vpop.f32.mrf.mxu2  ;;  %v1569_v52 = vrot.slane %v3766_v42, 1 }
 0x200   : > { %3014 = vst [vmem:[%s4706_s10 + $0x8] sm:$0xff] %v2982_v37  ;;  %v2729_v53 = vadd.f32 %v2728_v57, %v2640_v45  ;;  %v2817_v62 = vpop.f32.mrf.mxu3  ;;  %v1459_v63 = vsel %vm494_vm0, %v1454_v12, %v1458_v33  ;;  %v1568_v37 = vsel %vm703_vm1, %v1566_v36, %v1567_v18  ;;  %v1323_v32 = vpack.c.b16 %v1307_v21, %v1307_v21  ;;  %v4853_v12 = vld [vmem:[#allocation9_spill] sm:$0xff]  ;;  %v4854_v36 = vld [vmem:[#allocation10_spill] sm:$0xff] }
 0x201   : > { %v2641_v5 = vpop.f32.mrf.mxu1  ;;  %v1463_v45 = vshll.u32 %v3766_v42, 16  ;;  %v1154_v33 = vrot.slane %v4853_v12, 1  ;;  %v3909_v12 = vld [vmem:[%s4009_s8 + $0x9c] sm:$0xff] }
 0x202   : > { %v2818_v60 = vadd.f32 %v2817_v62, %v2729_v53  ;;  %v2642_v39 = vadd.f32 %v2641_v5, %v4475_v46 }
 0x203   : > { %v2908_v31 = vpop.f32.mrf.mxu0 }
 0x204   : > { %v2907_v35 = vadd.f32 %v2906_v51, %v2818_v60  ;;  %v1152_v51 = vsel %vm703_vm1, %v1150_v55, %v1151_v7  ;;  %v1465_v60 = vrot.slane %v1463_v45, 1  ;;  %v3908_v55 = vld [vmem:[%s4009_s8 + $0x90] sm:$0xff] }
 0x205   : > { %v1153_v7 = vrot.slane %v3908_v55, 1 }
 0x206   : > { %v2983_v24 = vmax.f32 %v2907_v35, 0.0 }
 0x207   : > { %v2730_v22 = vpop.f32.mrf.mxu2 }
 0x208   : > { %3015 = vst [vmem:[%s4706_s10 + $0x10] sm:$0xff] %v2983_v24  ;;  %v2731_v13 = vadd.f32 %v2730_v22, %v2642_v39  ;;  %v2819_v6 = vpop.f32.mrf.mxu3  ;;  %v1466_v24 = vor.u32 %v1465_v60, %v1461_v50  ;;  %v1570_v22 = vrot.slane %v1323_v32, 1 }
 0x209   : > { %v2644_v8 = vpop.f32.mrf.mxu1 }
 0x20a   : > { %v2820_v30 = vadd.f32 %v2819_v6, %v2731_v13  ;;  %v2645_v53 = vadd.f32 %v2644_v8, %v4496_v54  ;;  %v3230_v13 = vld [vmem:[%s4009_s8 + $0xb0] sm:$0xf] }
 0x20b   : > { %v2911_v9 = vpop.f32.mrf.mxu0 }
 0x20c   : > { %v2909_v46 = vadd.f32 %v2908_v31, %v2820_v30  ;;  %2683 = vmatmul.bf16.gmra.mxu1 %v1152_v51  ;;  %2772 = vmatmul.bf16.gmra.mxu2 %v3765_v41  ;;  %v1468_v31 = vshll.u32 %v1323_v32, 16  ;;  %v1155_v30 = vsel %vm703_vm1, %v1153_v7, %v1154_v33  ;;  %v1156_v33 = vrot.slane %v3909_v12, 1 }
 0x20d   : > { %2861 = vmatmul.bf16.gmra.mxu3 %v1459_v63  ;;  %v1308_v63 = vunpack.c.l.b16 %v3230_v13 }
 0x20e   : > { %2950 = vmatmul.bf16.gmra.mxu0 %v1568_v37  ;;  %v2984_v57 = vmax.f32 %v2909_v46, 0.0  ;;  %v1470_v54 = vrot.slane %v1468_v31, 1 }
 0x20f   : > { %v2733_v62 = vpop.f32.mrf.mxu2  ;;  %v1324_v32 = vpack.c.b16 %v1308_v63, %v1308_v63 }
 0x210   : > { %3016 = vst [vmem:[%s4706_s10 + $0x18] sm:$0xff] %v2984_v57  ;;  %v2734_v5 = vadd.f32 %v2733_v62, %v2645_v53  ;;  %v2822_v40 = vpop.f32.mrf.mxu3  ;;  %v1471_v45 = vsel %vm494_vm0, %v1466_v24, %v1470_v54  ;;  %v1571_v57 = vsel %vm703_vm1, %v1569_v52, %v1570_v22  ;;  %v1157_v24 = vrot.slane %v4510_v49, 1  ;;  %v3233_v22 = vld [vmem:[%s4009_s8 + $0xbc] sm:$0xf] }
 0x211   : > { %v2646_v43 = vpop.f32.mrf.mxu1  ;;  %v1573_v52 = vrot.slane %v1324_v32, 1  ;;  %v1309_v63 = vunpack.c.l.b16 %v3233_v22 }
 0x212   : > { %v2823_v35 = vadd.f32 %v2822_v40, %v2734_v5  ;;  %v2647_v18 = vadd.f32 %v2646_v43, %v4854_v36 }
 0x213   : > { %v2913_v41 = vpop.f32.mrf.mxu0 }
 0x214   : > { %v2912_v61 = vadd.f32 %v2911_v9, %v2823_v35  ;;  %v3767_v9 = vld [vmem:[%s4009_s8 + $0xa8] sm:$0xff] }
 0x215   : > { %v1475_v62 = vshll.u32 %v3767_v9, 16  ;;  %v1473_v35 = vshrl.u32 %v3767_v9, 16 }
 0x216   : > { %v2985_v39 = vmax.f32 %v2912_v61, 0.0 }
 0x217   : > { %v2735_v6 = vpop.f32.mrf.mxu2  ;;  %v1477_v61 = vrot.slane %v1475_v62, 1 }
 0x218   : > { %3017 = vst [vmem:[%s4706_s10 + $0x20] sm:$0xff] %v2985_v39  ;;  %v2736_v8 = vadd.f32 %v2735_v6, %v2647_v18  ;;  %v2824_v51 = vpop.f32.mrf.mxu3  ;;  %v1572_v18 = vrot.slane %v3767_v9, 1 }
 0x219   : > { %v2649_v21 = vpop.f32.mrf.mxu1  ;;  %v1478_v54 = vor.u32 %v1477_v61, %v1473_v35 }
 0x21a   : > { %v2825_v37 = vadd.f32 %v2824_v51, %v2736_v8  ;;  %v2650_v40 = vadd.f32 %v2649_v21, %v4515_v2  ;;  %v1158_v21 = vsel %vm703_vm1, %v1156_v33, %v1157_v24  ;;  %v4855_v24 = vld [vmem:[#allocation11_spill] sm:$0xff] }
 0x21b   : > { %v2916_v46 = vpop.f32.mrf.mxu0 }
 0x21c   : > { %v2914_v53 = vadd.f32 %v2913_v41, %v2825_v37  ;;  %2688 = vmatmul.bf16.gmra.mxu1 %v1155_v30  ;;  %2777 = vmatmul.bf16.gmra.mxu2 %v3766_v42  ;;  %v1480_v41 = vshll.u32 %v1324_v32, 16  ;;  %v3768_v30 = vld [vmem:[%s4009_s8 + $0xb4] sm:$0xff] }
 0x21d   : > { %2866 = vmatmul.bf16.gmra.mxu3 %v1471_v45  ;;  %v1574_v45 = vsel %vm703_vm1, %v1572_v18, %v1573_v52 }
 0x21e   : > { %2955 = vmatmul.bf16.gmra.mxu0 %v1571_v57  ;;  %v2986_v5 = vmax.f32 %v2914_v53, 0.0  ;;  %v1482_v2 = vrot.slane %v1480_v41, 1  ;;  %v1325_v57 = vpack.c.b16 %v1309_v63, %v1309_v63  ;;  %v1487_v53 = vshll.u32 %v3768_v30, 16 }
 0x21f   : > { %v2738_v43 = vpop.f32.mrf.mxu2 }
 0x220   : > { %3018 = vst [vmem:[%s4706_s10 + $0x28] sm:$0xff] %v2986_v5  ;;  %v2739_v50 = vadd.f32 %v2738_v43, %v2650_v40  ;;  %v2827_v60 = vpop.f32.mrf.mxu3  ;;  %v1492_v35 = vshll.u32 %v1325_v57, 16 }
 0x221   : > { %v2651_v31 = vpop.f32.mrf.mxu1 }
 0x222   : > { %v2828_v55 = vadd.f32 %v2827_v60, %v2739_v50  ;;  %v2652_v36 = vadd.f32 %v2651_v31, %v4524_v17  ;;  %v1485_v60 = vshrl.u32 %v3768_v30, 16  ;;  %v1489_v31 = vrot.slane %v1487_v53, 1 }
 0x223   : > { %v2918_v42 = vpop.f32.mrf.mxu0 }
 0x224   : > { %v2917_v7 = vadd.f32 %v2916_v46, %v2828_v55  ;;  %v1483_v46 = vsel %vm494_vm0, %v1478_v54, %v1482_v2  ;;  %v3910_v55 = vld [vmem:[%s4009_s8 + $0xa8] sm:$0xff]  ;;  %v1490_v12 = vor.u32 %v1489_v31, %v1485_v60  ;;  %v1575_v2 = vrot.slane %v3768_v30, 1 }
 0x226   : > { %v2987_v39 = vmax.f32 %v2917_v7, 0.0  ;;  %v1160_v7 = vrot.slane %v4533_v58, 1 }
 0x227   : > { %v2740_v13 = vpop.f32.mrf.mxu2 }
 0x228   : > { %3019 = vst [vmem:[%s4706_s10 + $0x30] sm:$0xff] %v2987_v39  ;;  %v2741_v6 = vadd.f32 %v2740_v13, %v2652_v36  ;;  %v2829_v8 = vpop.f32.mrf.mxu3  ;;  %v1576_v39 = vrot.slane %v1325_v57, 1  ;;  %v3236_v36 = vld [vmem:[%s4009_s8 + $0xc8] sm:$0xf] }
 0x229   : > { %v2654_v51 = vpop.f32.mrf.mxu1 }
 0x22a   : > { %v2830_v37 = vadd.f32 %v2829_v8, %v2741_v6  ;;  %v2655_v62 = vadd.f32 %v2654_v51, %v4543_v19  ;;  %v1494_v19 = vrot.slane %v1492_v35, 1  ;;  %v3769_v8 = vld [vmem:[%s4009_s8 + $0xc0] sm:$0xff]  ;;  %v1310_v51 = vunpack.c.l.b16 %v3236_v36  ;;  %v3911_v35 = vld [vmem:[%s4009_s8 + $0xb4] sm:$0xff] }
 0x22b   : > { %v2921_v49 = vpop.f32.mrf.mxu0 }
 0x22c   : > { %v2919_v17 = vadd.f32 %v2918_v42, %v2830_v37  ;;  %2693 = vmatmul.bf16.gmra.mxu1 %v1158_v21  ;;  %2782 = vmatmul.bf16.gmra.mxu2 %v3767_v9  ;;  %v1159_v42 = vrot.slane %v3910_v55, 1  ;;  %v1495_v63 = vsel %vm494_vm0, %v1490_v12, %v1494_v19  ;;  %v1577_v37 = vsel %vm703_vm1, %v1575_v2, %v1576_v39 }
 0x22d   : > { %2871 = vmatmul.bf16.gmra.mxu3 %v1483_v46  ;;  %v1326_v46 = vpack.c.b16 %v1310_v51, %v1310_v51  ;;  %v1578_v12 = vrot.slane %v3769_v8, 1 }
 0x22e   : > { %2960 = vmatmul.bf16.gmra.mxu0 %v1574_v45  ;;  %v2988_v32 = vmax.f32 %v2919_v17, 0.0  ;;  %v1161_v6 = vsel %vm703_vm1, %v1159_v42, %v1160_v7  ;;  %v1499_v45 = vshll.u32 %v3769_v8, 16  ;;  %v4856_v42 = vld [vmem:[#allocation12_spill] sm:$0xff] }
 0x22f   : > { %v2743_v5 = vpop.f32.mrf.mxu2  ;;  %v1579_v19 = vrot.slane %v1326_v46, 1 }
 0x230   : > { %3020 = vst [vmem:[%s4706_s10 + $0x38] sm:$0xff] %v2988_v32  ;;  %v2744_v40 = vadd.f32 %v2743_v5, %v2655_v62  ;;  %v2832_v43 = vpop.f32.mrf.mxu3 }
 0x231   : > { %v2656_v50 = vpop.f32.mrf.mxu1 }
 0x232   : > { %v2833_v61 = vadd.f32 %v2832_v43, %v2744_v40  ;;  %v2657_v54 = vadd.f32 %v2656_v50, %v4855_v24  ;;  %v1497_v40 = vshrl.u32 %v3769_v8, 16  ;;  %v1501_v43 = vrot.slane %v1499_v45, 1 }
 0x233   : > { %v2923_v9 = vpop.f32.mrf.mxu0  ;;  %v1504_v50 = vshll.u32 %v1326_v46, 16 }
 0x234   : > { %v2922_v41 = vadd.f32 %v2921_v49, %v2833_v61  ;;  %v1162_v61 = vrot.slane %v3911_v35, 1 }
 0x236   : > { %v2989_v33 = vmax.f32 %v2922_v41, 0.0  ;;  %v1502_v41 = vor.u32 %v1501_v43, %v1497_v40  ;;  %v3912_v40 = vld [vmem:[%s4009_s8 + $0xc0] sm:$0xff] }
 0x237   : > { %v2745_v18 = vpop.f32.mrf.mxu2  ;;  %v1165_v43 = vrot.slane %v3912_v40, 1 }
 0x238   : > { %3021 = vst [vmem:[%s4706_s10 + $0x40] sm:$0xff] %v2989_v33  ;;  %v2746_v52 = vadd.f32 %v2745_v18, %v2657_v54  ;;  %v2834_v22 = vpop.f32.mrf.mxu3  ;;  %v3239_v33 = vld [vmem:[%s4009_s8 + $0xd4] sm:$0xf]  ;;  %v3770_v18 = vld [vmem:[%s4009_s8 + $0xcc] sm:$0xff] }
 0x239   : > { %v2659_v13 = vpop.f32.mrf.mxu1  ;;  %v1581_v35 = vrot.slane %v3770_v18, 1 }
 0x23a   : > { %v2835_v21 = vadd.f32 %v2834_v22, %v2746_v52  ;;  %v2660_v57 = vadd.f32 %v2659_v13, %v4559_v28  ;;  %v1506_v28 = vrot.slane %v1504_v50, 1  ;;  %v1311_v52 = vunpack.c.l.b16 %v3239_v33 }
 0x23b   : > { %v2926_v58 = vpop.f32.mrf.mxu0  ;;  %v1166_v50 = vrot.slane %v4571_v11, 1 }
 0x23c   : > { %v2924_v49 = vadd.f32 %v2923_v9, %v2835_v21  ;;  %2698 = vmatmul.bf16.gmra.mxu1 %v1161_v6  ;;  %2787 = vmatmul.bf16.gmra.mxu2 %v3768_v30  ;;  %v1163_v9 = vrot.slane %v4555_v23, 1  ;;  %v1507_v13 = vsel %vm494_vm0, %v1502_v41, %v1506_v28  ;;  %v1580_v6 = vsel %vm703_vm1, %v1578_v12, %v1579_v19 }
 0x23d   : > { %2876 = vmatmul.bf16.gmra.mxu3 %v1495_v63  ;;  %v1327_v21 = vpack.c.b16 %v1311_v52, %v1311_v52 }
 0x23e   : > { %2965 = vmatmul.bf16.gmra.mxu0 %v1577_v37  ;;  %v2990_v17 = vmax.f32 %v2924_v49, 0.0  ;;  %v1164_v36 = vsel %vm703_vm1, %v1162_v61, %v1163_v9 }
 0x23f   : > { %v2748_v53 = vpop.f32.mrf.mxu2  ;;  %v1582_v61 = vrot.slane %v1327_v21, 1 }
 0x240   : > { %3022 = vst [vmem:[%s4706_s10 + $0x48] sm:$0xff] %v2990_v17  ;;  %v2749_v32 = vadd.f32 %v2748_v53, %v2660_v57  ;;  %v2837_v62 = vpop.f32.mrf.mxu3  ;;  %v1509_v57 = vshrl.u32 %v3770_v18, 16 }
 0x241   : > { %v2661_v5 = vpop.f32.mrf.mxu1  ;;  %v1583_v11 = vsel %vm703_vm1, %v1581_v35, %v1582_v61 }
 0x242   : > { %v2838_v60 = vadd.f32 %v2837_v62, %v2749_v32  ;;  %v2662_v7 = vadd.f32 %v2661_v5, %v4856_v42  ;;  %v1516_v32 = vshll.u32 %v1327_v21, 16  ;;  %v1167_v42 = vsel %vm703_vm1, %v1165_v43, %v1166_v50 }
 0x243   : > { %v2928_v30 = vpop.f32.mrf.mxu0 }
 0x244   : > { %v2927_v31 = vadd.f32 %v2926_v58, %v2838_v60  ;;  %v1511_v58 = vshll.u32 %v3770_v18, 16 }
 0x246   : > { %v2991_v55 = vmax.f32 %v2927_v31, 0.0  ;;  %v1513_v53 = vrot.slane %v1511_v58, 1 }
 0x247   : > { %v2750_v24 = vpop.f32.mrf.mxu2 }
 0x248   : > { %3023 = vst [vmem:[%s4706_s10 + $0x50] sm:$0xff] %v2991_v55  ;;  %v2751_v54 = vadd.f32 %v2750_v24, %v2662_v7  ;;  %v2839_v2 = vpop.f32.mrf.mxu3  ;;  %v1514_v60 = vor.u32 %v1513_v53, %v1509_v57 }
 0x249   : > { %v2664_v39 = vpop.f32.mrf.mxu1 }
 0x24a   : > { %v2840_v22 = vadd.f32 %v2839_v2, %v2751_v54  ;;  %v2665_v37 = vadd.f32 %v2664_v39, %v4575_v14 }
 0x24b   : > { %v2931_v23 = vpop.f32.mrf.mxu0 }
 0x24c   : > { %v2929_v51 = vadd.f32 %v2928_v30, %v2840_v22  ;;  %2703 = vmatmul.bf16.gmra.mxu1 %v1164_v36  ;;  %2792 = vmatmul.bf16.gmra.mxu2 %v3769_v8  ;;  %v1518_v30 = vrot.slane %v1516_v32, 1 }
 0x24d   : > { %2881 = vmatmul.bf16.gmra.mxu3 %v1507_v13 }
 0x24e   : > { %2970 = vmatmul.bf16.gmra.mxu0 %v1580_v6  ;;  %v2992_v63 = vmax.f32 %v2929_v51, 0.0  ;;  %v1519_v19 = vsel %vm494_vm0, %v1514_v60, %v1518_v30 }
 0x24f   : > { %v2753_v49 = vpop.f32.mrf.mxu2 }
 0x250   : > { %3024 = vst [vmem:[%s4706_s10 + $0x58] sm:$0xff] %v2992_v63  ;;  %v2754_v46 = vadd.f32 %v2753_v49, %v2665_v37  ;;  %v2842_v45 = vpop.f32.mrf.mxu3 }
 0x251   : > { %v2666_v17 = vpop.f32.mrf.mxu1 }
 0x252   : > { %v2843_v62 = vadd.f32 %v2842_v45, %v2754_v46  ;;  %v2667_v14 = vadd.f32 %v2666_v17, %v4583_v44 }
 0x253   : > { %v2933_v5 = vpop.f32.mrf.mxu0 }
 0x254   : > { %v2932_v8 = vadd.f32 %v2931_v23, %v2843_v62 }
 0x256   : > { %v2993_v31 = vmax.f32 %v2932_v8, 0.0 }
 0x257   : > { %v2755_v9 = vpop.f32.mrf.mxu2 }
 0x258   : > { %3025 = vst [vmem:[%s4706_s10 + $0x60] sm:$0xff] %v2993_v31  ;;  %v2756_v41 = vadd.f32 %v2755_v9, %v2667_v14  ;;  %v2844_v28 = vpop.f32.mrf.mxu3 }
 0x259   : > { %v2669_v55 = vpop.f32.mrf.mxu1 }
 0x25a   : > { %v2845_v7 = vadd.f32 %v2844_v28, %v2756_v41  ;;  %v2670_v24 = vadd.f32 %v2669_v55, %v4586_v16 }
 0x25b   : > { %v2936_v12 = vpop.f32.mrf.mxu0 }
 0x25c   : > { %v2934_v33 = vadd.f32 %v2933_v5, %v2845_v7  ;;  %2708 = vmatmul.bf16.gmra.mxu1 %v1167_v42  ;;  %2797 = vmatmul.bf16.gmra.mxu2 %v3770_v18 }
 0x25d   : > { %2886 = vmatmul.bf16.gmra.mxu3 %v1519_v19 }
 0x25e   : > { %2975 = vmatmul.bf16.gmra.mxu0 %v1583_v11  ;;  %v2994_v44 = vmax.f32 %v2934_v33, 0.0 }
 0x25f   : > { %v2758_v54 = vpop.f32.mrf.mxu2 }
 0x260   : > { %3026 = vst [vmem:[%s4706_s10 + $0x68] sm:$0xff] %v2994_v44  ;;  %v2759_v2 = vadd.f32 %v2758_v54, %v2670_v24  ;;  %v2847_v39 = vpop.f32.mrf.mxu3 }
 0x261   : > { %v2671_v36 = vpop.f32.mrf.mxu1 }
 0x262   : > { %v2848_v52 = vadd.f32 %v2847_v39, %v2759_v2  ;;  %v2672_v6 = vadd.f32 %v2671_v36, %v4596_v48 }
 0x263   : > { %v2938_v22 = vpop.f32.mrf.mxu0 }
 0x264   : > { %v2937_v23 = vadd.f32 %v2936_v12, %v2848_v52 }
 0x266   : > { %v2995_v13 = vmax.f32 %v2937_v23, 0.0 }
 0x267   : > { %v2760_v51 = vpop.f32.mrf.mxu2 }
 0x268   : > { %3027 = vst [vmem:[%s4706_s10 + $0x70] sm:$0xff] %v2995_v13  ;;  %v2761_v18 = vadd.f32 %v2760_v51, %v2672_v6  ;;  %v2849_v21 = vpop.f32.mrf.mxu3 }
 0x269   : > { %v2674_v58 = vpop.f32.mrf.mxu1 }
 0x26a   : > { %v2850_v63 = vadd.f32 %v2849_v21, %v2761_v18  ;;  %v2675_v46 = vadd.f32 %v2674_v58, %v4599_v59 }
 0x26b   : > { %v2941_v16 = vpop.f32.mrf.mxu0 }
 0x26c   : > { %v2939_v37 = vadd.f32 %v2938_v22, %v2850_v63 }
 0x26e   : > { %v2996_v49 = vmax.f32 %v2939_v37, 0.0 }
 0x26f   : > { %v2763_v45 = vpop.f32.mrf.mxu2 }
 0x270   : > { %3028 = vst [vmem:[%s4706_s10 + $0x78] sm:$0xff] %v2996_v49  ;;  %v2764_v17 = vadd.f32 %v2763_v45, %v2675_v46  ;;  %v2852_v57 = vpop.f32.mrf.mxu3 }
 0x271   : > { %v2676_v53 = vpop.f32.mrf.mxu1 }
 0x272   : > { %v2853_v32 = vadd.f32 %v2852_v57, %v2764_v17  ;;  %v2677_v8 = vadd.f32 %v2676_v53, %v4609_v25 }
 0x273   : > { %v2943_v48 = vpop.f32.mrf.mxu0 }
 0x274   : > { %v2942_v62 = vadd.f32 %v2941_v16, %v2853_v32 }
 0x276   : > { %v2997_v5 = vmax.f32 %v2942_v62, 0.0 }
 0x277   : > { %v2765_v40 = vpop.f32.mrf.mxu2 }
 0x278   : > { %3029 = vst [vmem:[%s4706_s10 + $0x80] sm:$0xff] %v2997_v5  ;;  %v2766_v43 = vadd.f32 %v2765_v40, %v2677_v8  ;;  %v2854_v50 = vpop.f32.mrf.mxu3 }
 0x279   : > { %v2679_v60 = vpop.f32.mrf.mxu1 }
 0x27a   : > { %v2855_v30 = vadd.f32 %v2854_v50, %v2766_v43  ;;  %v2680_v35 = vadd.f32 %v2679_v60, %v4612_v15 }
 0x27b   : > { %v2946_v59 = vpop.f32.mrf.mxu0 }
 0x27c   : > { %v2944_v31 = vadd.f32 %v2943_v48, %v2855_v30 }
 0x27e   : > { %v2998_v14 = vmax.f32 %v2944_v31, 0.0 }
 0x27f   : > { %v2768_v61 = vpop.f32.mrf.mxu2 }
 0x280   : > { %3030 = vst [vmem:[%s4706_s10 + $0x88] sm:$0xff] %v2998_v14  ;;  %v2769_v9 = vadd.f32 %v2768_v61, %v2680_v35  ;;  %v2857_v41 = vpop.f32.mrf.mxu3 }
 0x281   : > { %v2681_v28 = vpop.f32.mrf.mxu1 }
 0x282   : > { %v2858_v55 = vadd.f32 %v2857_v41, %v2769_v9  ;;  %v2682_v12 = vadd.f32 %v2681_v28, %v4622_v27 }
 0x283   : > { %v2948_v25 = vpop.f32.mrf.mxu0 }
 0x284   : > { %v2947_v42 = vadd.f32 %v2946_v59, %v2858_v55 }
 0x286   : > { %v2999_v7 = vmax.f32 %v2947_v42, 0.0 }
 0x287   : > { %v2770_v19 = vpop.f32.mrf.mxu2 }
 0x288   : > { %3031 = vst [vmem:[%s4706_s10 + $0x90] sm:$0xff] %v2999_v7  ;;  %v2771_v11 = vadd.f32 %v2770_v19, %v2682_v12  ;;  %v2859_v33 = vpop.f32.mrf.mxu3 }
 0x289   : > { %v2684_v44 = vpop.f32.mrf.mxu1 }
 0x28a   : > { %v2860_v24 = vadd.f32 %v2859_v33, %v2771_v11  ;;  %v2685_v39 = vadd.f32 %v2684_v44, %v4625_v47 }
 0x28b   : > { %v2951_v15 = vpop.f32.mrf.mxu0 }
 0x28c   : > { %v2949_v54 = vadd.f32 %v2948_v25, %v2860_v24 }
 0x28e   : > { %v3000_v2 = vmax.f32 %v2949_v54, 0.0 }
 0x28f   : > { %v2773_v36 = vpop.f32.mrf.mxu2 }
 0x290   : > { %3032 = vst [vmem:[%s4706_s10 + $0x98] sm:$0xff] %v3000_v2  ;;  %v2774_v52 = vadd.f32 %v2773_v36, %v2685_v39  ;;  %v2862_v22 = vpop.f32.mrf.mxu3 }
 0x291   : > { %v2686_v23 = vpop.f32.mrf.mxu1 }
 0x292   : > { %v2863_v13 = vadd.f32 %v2862_v22, %v2774_v52  ;;  %v2687_v18 = vadd.f32 %v2686_v23, %v4635_v38 }
 0x293   : > { %v2953_v27 = vpop.f32.mrf.mxu0 }
 0x294   : > { %v2952_v6 = vadd.f32 %v2951_v15, %v2863_v13 }
 0x296   : > { %v3001_v51 = vmax.f32 %v2952_v6, 0.0 }
 0x297   : > { %v2775_v21 = vpop.f32.mrf.mxu2 }
 0x298   : > { %3033 = vst [vmem:[%s4706_s10 + $0xa0] sm:$0xff] %v3001_v51  ;;  %v2776_v58 = vadd.f32 %v2775_v21, %v2687_v18  ;;  %v2864_v63 = vpop.f32.mrf.mxu3 }
 0x299   : > { %v2689_v16 = vpop.f32.mrf.mxu1 }
 0x29a   : > { %v2865_v37 = vadd.f32 %v2864_v63, %v2776_v58  ;;  %v2690_v45 = vadd.f32 %v2689_v16, %v4638_v4 }
 0x29b   : > { %v2956_v47 = vpop.f32.mrf.mxu0 }
 0x29c   : > { %v2954_v49 = vadd.f32 %v2953_v27, %v2865_v37 }
 0x29e   : > { %v3002_v46 = vmax.f32 %v2954_v49, 0.0 }
 0x29f   : > { %v2778_v17 = vpop.f32.mrf.mxu2 }
 0x2a0   : > { %3034 = vst [vmem:[%s4706_s10 + $0xa8] sm:$0xff] %v3002_v46  ;;  %v2779_v57 = vadd.f32 %v2778_v17, %v2690_v45  ;;  %v2867_v53 = vpop.f32.mrf.mxu3 }
 0x2a1   : > { %v2691_v32 = vpop.f32.mrf.mxu1 }
 0x2a2   : > { %v2868_v48 = vadd.f32 %v2867_v53, %v2779_v57  ;;  %v2692_v8 = vadd.f32 %v2691_v32, %v4648_v10 }
 0x2a3   : > { %v2958_v38 = vpop.f32.mrf.mxu0 }
 0x2a4   : > { %v2957_v62 = vadd.f32 %v2956_v47, %v2868_v48 }
 0x2a6   : > { %v3003_v5 = vmax.f32 %v2957_v62, 0.0 }
 0x2a7   : > { %v2780_v40 = vpop.f32.mrf.mxu2 }
 0x2a8   : > { %3035 = vst [vmem:[%s4706_s10 + $0xb0] sm:$0xff] %v3003_v5  ;;  %v2781_v43 = vadd.f32 %v2780_v40, %v2692_v8  ;;  %v2869_v50 = vpop.f32.mrf.mxu3 }
 0x2a9   : > { %v2694_v60 = vpop.f32.mrf.mxu1 }
 0x2aa   : > { %v2870_v30 = vadd.f32 %v2869_v50, %v2781_v43  ;;  %v2695_v14 = vadd.f32 %v2694_v60, %v4651_v1 }
 0x2ab   : > { %v2961_v4 = vpop.f32.mrf.mxu0 }
 0x2ac   : > { %v2959_v59 = vadd.f32 %v2958_v38, %v2870_v30 }
 0x2ae   : > { %v3004_v31 = vmax.f32 %v2959_v59, 0.0 }
 0x2af   : > { %v2783_v35 = vpop.f32.mrf.mxu2 }
 0x2b0   : > { %3036 = vst [vmem:[%s4706_s10 + $0xb8] sm:$0xff] %v3004_v31  ;;  %v2784_v61 = vadd.f32 %v2783_v35, %v2695_v14  ;;  %v2872_v9 = vpop.f32.mrf.mxu3 }
 0x2b1   : > { %v2696_v41 = vpop.f32.mrf.mxu1 }
 0x2b2   : > { %v2873_v28 = vadd.f32 %v2872_v9, %v2784_v61  ;;  %v2697_v42 = vadd.f32 %v2696_v41, %v4661_v0 }
 0x2b3   : > { %v2963_v10 = vpop.f32.mrf.mxu0 }
 0x2b4   : > { %v2962_v55 = vadd.f32 %v2961_v4, %v2873_v28 }
 0x2b6   : > { %v3005_v25 = vmax.f32 %v2962_v55, 0.0 }
 0x2b7   : > { %v2785_v7 = vpop.f32.mrf.mxu2 }
 0x2b8   : > { %3037 = vst [vmem:[%s4706_s10 + $0xc0] sm:$0xff] %v3005_v25  ;;  %v2786_v12 = vadd.f32 %v2785_v7, %v2697_v42  ;;  %v2874_v19 = vpop.f32.mrf.mxu3 }
 0x2b9   : > { %v2699_v11 = vpop.f32.mrf.mxu1 }
 0x2ba   : > { %v2875_v33 = vadd.f32 %v2874_v19, %v2786_v12  ;;  %v2700_v15 = vadd.f32 %v2699_v11, %v4664_v3 }
 0x2bb   : > { %v2966_v1 = vpop.f32.mrf.mxu0 }
 0x2bc   : > { %v2964_v44 = vadd.f32 %v2963_v10, %v2875_v33 }
 0x2be   : > { %v3006_v24 = vmax.f32 %v2964_v44, 0.0 }
 0x2bf   : > { %v2788_v54 = vpop.f32.mrf.mxu2 }
 0x2c0   : > { %3038 = vst [vmem:[%s4706_s10 + $0xc8] sm:$0xff] %v3006_v24  ;;  %v2789_v2 = vadd.f32 %v2788_v54, %v2700_v15  ;;  %v2877_v39 = vpop.f32.mrf.mxu3 }
 0x2c1   : > { %v2701_v36 = vpop.f32.mrf.mxu1 }
 0x2c2   : > { %v2878_v52 = vadd.f32 %v2877_v39, %v2789_v2  ;;  %v2702_v13 = vadd.f32 %v2701_v36, %v4674_v34 }
 0x2c3   : > { %v2968_v0 = vpop.f32.mrf.mxu0 }
 0x2c4   : > { %v2967_v22 = vadd.f32 %v2966_v1, %v2878_v52 }
 0x2c6   : > { %v3007_v23 = vmax.f32 %v2967_v22, 0.0 }
 0x2c7   : > { %v2790_v27 = vpop.f32.mrf.mxu2 }
 0x2c8   : > { %3039 = vst [vmem:[%s4706_s10 + $0xd0] sm:$0xff] %v3007_v23  ;;  %v2791_v6 = vadd.f32 %v2790_v27, %v2702_v13  ;;  %v2879_v51 = vpop.f32.mrf.mxu3 }
 0x2c9   : > { %v2704_v18 = vpop.f32.mrf.mxu1 }
 0x2ca   : > { %v2880_v21 = vadd.f32 %v2879_v51, %v2791_v6  ;;  %v2705_v16 = vadd.f32 %v2704_v18, %v4677_v29 }
 0x2cb   : > { %v2971_v58 = vpop.f32.mrf.mxu0 }
 0x2cc   : > { %v2969_v3 = vadd.f32 %v2968_v0, %v2880_v21 }
 0x2ce   : > { %v3008_v63 = vmax.f32 %v2969_v3, 0.0 }
 0x2cf   : > { %v2793_v37 = vpop.f32.mrf.mxu2 }
 0x2d0   : > { %3040 = vst [vmem:[%s4706_s10 + $0xd8] sm:$0xff] %v3008_v63  ;;  %v2794_v47 = vadd.f32 %v2793_v37, %v2705_v16  ;;  %v2882_v49 = vpop.f32.mrf.mxu3 }
 0x2d1   : > { %v2706_v46 = vpop.f32.mrf.mxu1 }
 0x2d2   : > { %v2883_v45 = vadd.f32 %v2882_v49, %v2794_v47  ;;  %v2707_v57 = vadd.f32 %v2706_v46, %v4687_v26 }
 0x2d3   : > { %v2973_v53 = vpop.f32.mrf.mxu0 }
 0x2d4   : > { %v2972_v34 = vadd.f32 %v2971_v58, %v2883_v45 }
 0x2d6   : > { %v3009_v17 = vmax.f32 %v2972_v34, 0.0 }
 0x2d7   : > { %v2795_v32 = vpop.f32.mrf.mxu2 }
 0x2d8   : > { %3041 = vst [vmem:[%s4706_s10 + $0xe0] sm:$0xff] %v3009_v17  ;;  %v2796_v48 = vadd.f32 %v2795_v32, %v2707_v57  ;;  %v2884_v38 = vpop.f32.mrf.mxu3 }
 0x2d9   : > { %v2709_v62 = vpop.f32.mrf.mxu1 }
 0x2da   : > { %v2885_v5 = vadd.f32 %v2884_v38, %v2796_v48  ;;  %v2710_v40 = vadd.f32 %v2709_v62, %v4690_v20 }
 0x2db   : > { %v2976_v30 = vpop.f32.mrf.mxu0 }
 0x2dc   : > { %v2974_v29 = vadd.f32 %v2973_v53, %v2885_v5 }
 0x2de   : > { %v3010_v8 = vmax.f32 %v2974_v29, 0.0 }
 0x2df   : > { %v2798_v43 = vpop.f32.mrf.mxu2 }
 0x2e0   : > { %3042 = vst [vmem:[%s4706_s10 + $0xe8] sm:$0xff] %v3010_v8  ;;  %v2799_v50 = vadd.f32 %v2798_v43, %v2710_v40  ;;  %v2887_v60 = vpop.f32.mrf.mxu3 }
 0x2e1   : > { %v2711_v26 = vpop.f32.mrf.mxu1 }
 0x2e2   : > { %v2888_v4 = vadd.f32 %v2887_v60, %v2799_v50  ;;  %v2712_v14 = vadd.f32 %v2711_v26, %v4699_v56 }
 0x2e3   : > { %v2978_v28 = vpop.f32.mrf.mxu0 }
 0x2e4   : > { %v2977_v59 = vadd.f32 %v2976_v30, %v2888_v4 }
 0x2e6   : > { %v3011_v31 = vmax.f32 %v2977_v59, 0.0 }
 0x2e7   : > { %v2800_v35 = vpop.f32.mrf.mxu2 }
 0x2e8   : > { %3043 = vst [vmem:[%s4706_s10 + $0xf0] sm:$0xff] %v3011_v31  ;;  %v2801_v61 = vadd.f32 %v2800_v35, %v2712_v14  ;;  %v2889_v9 = vpop.f32.mrf.mxu3 }
 0x2ea   : > { %v2890_v41 = vadd.f32 %v2889_v9, %v2801_v61 }
 0x2ec   : > { %v2979_v10 = vadd.f32 %v2978_v28, %v2890_v41 }
 0x2ee   : > { %v3012_v20 = vmax.f32 %v2979_v10, 0.0 }
 0x2f0   : > { %3044 = vst [vmem:[%s4706_s10 + $0xf8] sm:$0xff] %v3012_v20 }
 0x2f1 PF: > { %s13_s14 = sadd.s32 1, %s3935_s14   ;;  %s4857_s12 = smov %s3931_s13 }
 0x2f2   : > { %p10_p5 = scmp.ge.s32.totalorder %s13_s14, 4   ;;  %s4858_s13 = smov %s4860_s15 }
 0x2f4   :  { %12 = sbr.rel (!%p10_p5) target bundleno = 2 (0x2), region = 65 }

// kernel: decoder_block_forward.6
= control target key start
LH: loop header
LB: loop body
LE: loop exit
PB: predicated region body
PF: predicated region fallthrough
CT: control target
= control target key end

     0   :  { %s7682_s15 = smov 0   ;;  %s7684_s16 = smov 0   ;;  %s9309_s0 = inlined_call_operand.vmem [shape: bf16[2,18,24,128], index: 0, kind: input, shape index: {}]   ;;  %s9310_s1 = inlined_call_operand.vmem [shape: bf16[2,18,24,128], index: 1, kind: input, shape index: {}]   ;;  %s9311_s2 = inlined_call_operand.vmem [shape: bf16[2304,128], index: 2, kind: input, shape index: {}]   ;;  %s9312_s3 = inlined_call_operand.vmem [shape: f32[1,128], index: 3, kind: input, shape index: {}]   ;;  %s9313_s4 = inlined_call_operand.vmem [shape: bf16[2,256,128], index: 4, kind: output, shape index: {}]  }
   0x1   :  { %s7686_s17 = smov 0  }
   0x2 LB: > { %s26_s18 = sadd.s32 1, %s7651_s16  ;;  %p6016_p0 = scmp.ge.s32.totalorder %s7655_s17, 1  ;;  %s7655_s17 = sphi %s7686_s17, %s14_s17   ;;  %s7651_s16 = sphi %s7684_s16, %s9387_s16   ;;  %s7647_s15 = sphi %s7682_s15, %s9386_s15  }
   0x3   : > { %p28_p1 = scmp.ge.s32.totalorder %s26_s18, 2  ;;  %p186_p2 = scmp.lt.s32.totalorder %s7655_s17, 3 }
   0x5   : > { %s9389_s18 = smov (%p28_p1, %s26_s18), 0  ;;  %p187_p3 = pnand %p6016_p0, %p186_p2 }
   0x7   : > { %190 = sbr.rel (%p187_p3) target bundleno = 1333 (0x535), region = 36 }
   0xc   : > { %v7279_v0 = vld [vmem:[%s9311_s2 + $0x38] sm:$0xff]  ;;  %v7278_v2 = vld [vmem:[%s9311_s2 + $0x30] sm:$0xff]  ;;  %v7277_v4 = vld [vmem:[%s9311_s2 + $0x28] sm:$0xff]  ;;  %p221_p4 = scmp.lt.s32.totalorder %s7647_s15, 1  ;;  %vm787_vm0 = vsmask.f32 7424 }
   0xd   : > { %v7287_v1 = vld [vmem:[%s9311_s2 + $0x78] sm:$0xff]  ;;  %7511 = vmatpush.bf16.msra.mxu2 %v7279_v0  ;;  %v7286_v3 = vld [vmem:[%s9311_s2 + $0x70] sm:$0xff]  ;;  %4201 = vmatpush.bf16.msra.mxu0 %v7279_v0  ;;  %v7285_v5 = vld [vmem:[%s9311_s2 + $0x68] sm:$0xff]  ;;  %vm1252_vm1 = vcmask 1046528  }
   0xe   : > { %7519 = vmatpush.bf16.msra.mxu3 %v7287_v1  ;;  %4290 = vmatpush.bf16.msra.mxu1 %v7287_v1  ;;  %v7276_v6 = vld [vmem:[%s9311_s2 + $0x20] sm:$0xff]  ;;  %v7275_v8 = vld [vmem:[%s9311_s2 + $0x18] sm:$0xff]  ;;  %v7274_v10 = vld [vmem:[%s9311_s2 + $0x10] sm:$0xff]  ;;  %s9391_s15 = smov (!%p221_p4, %s7647_s15), 1 }
   0xf   : > { %v7284_v7 = vld [vmem:[%s9311_s2 + $0x60] sm:$0xff]  ;;  %v7283_v9 = vld [vmem:[%s9311_s2 + $0x58] sm:$0xff]  ;;  %v7282_v11 = vld [vmem:[%s9311_s2 + $0x50] sm:$0xff]  ;;  %s7527_s25 = smul.u32 216, %s9391_s15  ;;  %s7175_s7 = sshll.u32 %s9391_s15, 7 }
  0x10   : > { %v7273_v12 = vld [vmem:[%s9311_s2 + $0x8] sm:$0xff]  ;;  %v7272_v14 = vld [vmem:[%s9311_s2] sm:$0xff]  ;;  %v7295_v16 = vld [vmem:[%s9311_s2 + $0xb8] sm:$0xff]  ;;  %s9209_s11 = scalar_lea.vmem %s9313_s4, %s7175_s7 }
  0x11   : > { %7512 = vmatpush.bf16.msra.mxu2 %v7278_v2  ;;  %4202 = vmatpush.bf16.msra.mxu0 %v7278_v2  ;;  %v7281_v13 = vld [vmem:[%s9311_s2 + $0x48] sm:$0xff]  ;;  %v7280_v15 = vld [vmem:[%s9311_s2 + $0x40] sm:$0xff]  ;;  %s7758_s6 = scalar_lea.vmem %s9309_s0, %s7527_s25  ;;  %s7763_s9 = scalar_lea.vmem %s9310_s1, %s7527_s25  ;;  %v7303_v17 = vld [vmem:[%s9311_s2 + $0xf8] sm:$0xff] }
  0x12   : > { %7520 = vmatpush.bf16.msra.mxu3 %v7286_v3  ;;  %4291 = vmatpush.bf16.msra.mxu1 %v7286_v3  ;;  %v7184_v18 = vld [vmem:[%s7758_s6 + $0x60] sm:$0xff]  ;;  %v7319_v21 = vld [vmem:[%s9311_s2 + $0x178] sm:$0xff]  ;;  %v7294_v24 = vld [vmem:[%s9311_s2 + $0xb0] sm:$0xff] }
  0x13   : > { %v7200_v19 = vld [vmem:[%s7763_s9 + $0x60] sm:$0xff]  ;;  %v7311_v23 = vld [vmem:[%s9311_s2 + $0x138] sm:$0xff]  ;;  %v7302_v25 = vld [vmem:[%s9311_s2 + $0xf0] sm:$0xff] }
  0x14   : > { %v7774_v20 = vld [vmem:[%s7758_s6] sm:$0xff]  ;;  %v7318_v26 = vld [vmem:[%s9311_s2 + $0x170] sm:$0xff]  ;;  %v7293_v28 = vld [vmem:[%s9311_s2 + $0xa8] sm:$0xff] }
  0x15   : > { %7513 = vmatpush.bf16.msra.mxu2 %v7277_v4  ;;  %4203 = vmatpush.bf16.msra.mxu0 %v7277_v4  ;;  %v7780_v22 = vld [vmem:[%s7763_s9] sm:$0xff]  ;;  %v7310_v27 = vld [vmem:[%s9311_s2 + $0x130] sm:$0xff]  ;;  %v7301_v29 = vld [vmem:[%s9311_s2 + $0xe8] sm:$0xff] }
  0x16   : > { %7521 = vmatpush.bf16.msra.mxu3 %v7285_v5  ;;  %4292 = vmatpush.bf16.msra.mxu1 %v7285_v5  ;;  %v7317_v30 = vld [vmem:[%s9311_s2 + $0x168] sm:$0xff]  ;;  %v7292_v36 = vld [vmem:[%s9311_s2 + $0xa0] sm:$0xff]  ;;  %v7186_v40 = vld [vmem:[%s7758_s6 + $0x78] sm:$0xff] }
  0x17   : > { %v7309_v31 = vld [vmem:[%s9311_s2 + $0x128] sm:$0xff]  ;;  %v7300_v37 = vld [vmem:[%s9311_s2 + $0xe0] sm:$0xff]  ;;  %v7202_v41 = vld [vmem:[%s7763_s9 + $0x78] sm:$0xff] }
  0x18   : > { %v7185_v32 = vld [vmem:[%s7758_s6 + $0x6c] sm:$0xff]  ;;  %v7308_v38 = vld [vmem:[%s9311_s2 + $0x120] sm:$0xff]  ;;  %v7836_v42 = vld [vmem:[%s7758_s6 + $0x18] sm:$0xff] }
  0x19   : > { %7514 = vmatpush.bf16.msra.mxu2 %v7276_v6  ;;  %4204 = vmatpush.bf16.msra.mxu0 %v7276_v6  ;;  %v7201_v33 = vld [vmem:[%s7763_s9 + $0x6c] sm:$0xff]  ;;  %v7316_v39 = vld [vmem:[%s9311_s2 + $0x160] sm:$0xff]  ;;  %v7839_v43 = vld [vmem:[%s7763_s9 + $0x18] sm:$0xff] }
  0x1a   : > { %7522 = vmatpush.bf16.msra.mxu3 %v7284_v7  ;;  %4293 = vmatpush.bf16.msra.mxu1 %v7284_v7  ;;  %v7814_v34 = vld [vmem:[%s7758_s6 + $0xc] sm:$0xff]  ;;  %v7291_v44 = vld [vmem:[%s9311_s2 + $0x98] sm:$0xff]  ;;  %v7187_v48 = vld [vmem:[%s7758_s6 + $0x84] sm:$0xff] }
  0x1b   : > { %v7817_v35 = vld [vmem:[%s7763_s9 + $0xc] sm:$0xff]  ;;  %v7299_v45 = vld [vmem:[%s9311_s2 + $0xd8] sm:$0xff]  ;;  %v7203_v49 = vld [vmem:[%s7763_s9 + $0x84] sm:$0xff] }
  0x1c   : > { %v7307_v46 = vld [vmem:[%s9311_s2 + $0x118] sm:$0xff]  ;;  %v7858_v50 = vld [vmem:[%s7758_s6 + $0x24] sm:$0xff]  ;;  %v7290_v52 = vld [vmem:[%s9311_s2 + $0x90] sm:$0xff] }
  0x1d   : > { %7515 = vmatpush.bf16.msra.mxu2 %v7275_v8  ;;  %4205 = vmatpush.bf16.msra.mxu0 %v7275_v8  ;;  %v7315_v47 = vld [vmem:[%s9311_s2 + $0x158] sm:$0xff]  ;;  %v7861_v51 = vld [vmem:[%s7763_s9 + $0x24] sm:$0xff]  ;;  %v7298_v53 = vld [vmem:[%s9311_s2 + $0xd0] sm:$0xff] }
  0x1e   : > { %7523 = vmatpush.bf16.msra.mxu3 %v7283_v9  ;;  %4294 = vmatpush.bf16.msra.mxu1 %v7283_v9  ;;  %v7306_v54 = vld [vmem:[%s9311_s2 + $0x110] sm:$0xff]  ;;  %v7289_v60 = vld [vmem:[%s9311_s2 + $0x88] sm:$0xff]  ;;  %v7189_v0 = vld [vmem:[%s7758_s6 + $0x9c] sm:$0xff] }
  0x1f   : > { %v7314_v55 = vld [vmem:[%s9311_s2 + $0x150] sm:$0xff]  ;;  %v7297_v61 = vld [vmem:[%s9311_s2 + $0xc8] sm:$0xff]  ;;  %v7205_v1 = vld [vmem:[%s7763_s9 + $0x9c] sm:$0xff] }
  0x20   : > { %v7188_v56 = vld [vmem:[%s7758_s6 + $0x90] sm:$0xff]  ;;  %v7305_v62 = vld [vmem:[%s9311_s2 + $0x108] sm:$0xff]  ;;  %v7902_v2 = vld [vmem:[%s7758_s6 + $0x3c] sm:$0xff] }
  0x21   : > { %7516 = vmatpush.bf16.msra.mxu2 %v7274_v10  ;;  %4206 = vmatpush.bf16.msra.mxu0 %v7274_v10  ;;  %v7204_v57 = vld [vmem:[%s7763_s9 + $0x90] sm:$0xff]  ;;  %v7313_v63 = vld [vmem:[%s9311_s2 + $0x148] sm:$0xff]  ;;  %v7905_v3 = vld [vmem:[%s7763_s9 + $0x3c] sm:$0xff] }
  0x22   : > { %7524 = vmatpush.bf16.msra.mxu3 %v7282_v11  ;;  %4295 = vmatpush.bf16.msra.mxu1 %v7282_v11  ;;  %v7880_v58 = vld [vmem:[%s7758_s6 + $0x30] sm:$0xff]  ;;  %v7288_v4 = vld [vmem:[%s9311_s2 + $0x80] sm:$0xff]  ;;  %v7190_v8 = vld [vmem:[%s7758_s6 + $0xa8] sm:$0xff] }
  0x23   : > { %v7883_v59 = vld [vmem:[%s7763_s9 + $0x30] sm:$0xff]  ;;  %v7296_v5 = vld [vmem:[%s9311_s2 + $0xc0] sm:$0xff]  ;;  %v7206_v9 = vld [vmem:[%s7763_s9 + $0xa8] sm:$0xff] }
  0x24   : > { %v7304_v6 = vld [vmem:[%s9311_s2 + $0x100] sm:$0xff]  ;;  %v7924_v10 = vld [vmem:[%s7758_s6 + $0x48] sm:$0xff] }
  0x25   : > { %7517 = vmatpush.bf16.msra.mxu2 %v7273_v12  ;;  %4207 = vmatpush.bf16.msra.mxu0 %v7273_v12  ;;  %v7312_v7 = vld [vmem:[%s9311_s2 + $0x140] sm:$0xff]  ;;  %v7927_v11 = vld [vmem:[%s7763_s9 + $0x48] sm:$0xff]  ;;  %v7327_v12 = vld [vmem:[%s9311_s2 + $0x1b8] sm:$0xff] }
  0x26   : > { %7525 = vmatpush.bf16.msra.mxu3 %v7281_v13  ;;  %4296 = vmatpush.bf16.msra.mxu1 %v7281_v13  ;;  %v7335_v13 = vld [vmem:[%s9311_s2 + $0x1f8] sm:$0xff] }
  0x29   : > { %7518 = vmatpush.bf16.msra.mxu2 %v7272_v14  ;;  %4208 = vmatpush.bf16.msra.mxu0 %v7272_v14  ;;  %v7343_v14 = vld [vmem:[%s9311_s2 + $0x238] sm:$0xff] }
  0x2a   : > { %7526 = vmatpush.bf16.msra.mxu3 %v7280_v15  ;;  %4297 = vmatpush.bf16.msra.mxu1 %v7280_v15  ;;  %v247_v15 = vld [vmem:[%s7758_s6 + $0x8] sm:$0xf] }
  0x2c   : > { %4249 = vmatmul.bf16.vlgmr.msra.gmra.mxu2 %v7184_v18  ;;  %4209 = vmatmul.bf16.vlgmr.msra.gmra.mxu0 %v7774_v20  ;;  %v7207_v18 = vld [vmem:[%s7763_s9 + $0xb4] sm:$0xff] }
  0x2d   : > { %4379 = vmatpush.bf16.msrb.mxu2 %v7295_v16  ;;  %4338 = vmatmul.bf16.vlgmr.msra.gmra.mxu3 %v7200_v19  ;;  %v297_v16 = vld [vmem:[%s7763_s9 + $0x8] sm:$0xf]  ;;  %v7945_v19 = vld [vmem:[%s7758_s6 + $0x54] sm:$0xff] }
  0x2e   : > { %4468 = vmatpush.bf16.msrb.mxu3 %v7303_v17  ;;  %4646 = vmatpush.bf16.msrb.mxu1 %v7319_v21  ;;  %v7191_v17 = vld [vmem:[%s7758_s6 + $0xb4] sm:$0xff]  ;;  %v755_v21 = vunpack.c.l.b16 %v247_v15  ;;  %v1057_v15 = vshrl.u32 %v7817_v35, 16 }
  0x2f   : > { %4298 = vmatmul.bf16.vlgmr.msra.gmra.mxu1 %v7780_v22  ;;  %4557 = vmatpush.bf16.msrb.mxu0 %v7311_v23  ;;  %v1012_v23 = vunpack.c.l.b16 %v297_v16 }
  0x31   : > { %4380 = vmatpush.bf16.msrb.mxu2 %v7294_v24  ;;  %v7948_v24 = vld [vmem:[%s7763_s9 + $0x54] sm:$0xff] }
  0x32   : > { %4469 = vmatpush.bf16.msrb.mxu3 %v7302_v25  ;;  %4647 = vmatpush.bf16.msrb.mxu1 %v7318_v26  ;;  %v7351_v25 = vld [vmem:[%s9311_s2 + $0x278] sm:$0xff]  ;;  %v791_v26 = vshll.u32 %v7774_v20, 16 }
  0x33   : > { %4558 = vmatpush.bf16.msrb.mxu0 %v7310_v27  ;;  %v771_v27 = vpack.c.b16 %v755_v21, %v755_v21 }
  0x35   : > { %4381 = vmatpush.bf16.msrb.mxu2 %v7293_v28  ;;  %v1028_v28 = vpack.c.b16 %v1012_v23, %v1012_v23 }
  0x36   : > { %4470 = vmatpush.bf16.msrb.mxu3 %v7301_v29  ;;  %4648 = vmatpush.bf16.msrb.mxu1 %v7317_v30  ;;  %v1047_v29 = vshll.u32 %v7780_v22, 16  ;;  %v789_v30 = vshrl.u32 %v7774_v20, 16 }
  0x37   : > { %4559 = vmatpush.bf16.msrb.mxu0 %v7309_v31  ;;  %v793_v31 = vrot.slane %v791_v26, 1 }
  0x39   : > { %4382 = vmatpush.bf16.msrb.mxu2 %v7292_v36  ;;  %v1049_v36 = vrot.slane %v1047_v29, 1 }
  0x3a   : > { %4471 = vmatpush.bf16.msrb.mxu3 %v7300_v37  ;;  %4649 = vmatpush.bf16.msrb.mxu1 %v7316_v39  ;;  %v1052_v37 = vshll.u32 %v1028_v28, 16 }
  0x3b   : > { %4560 = vmatpush.bf16.msrb.mxu0 %v7308_v38  ;;  %v794_v38 = vor.u32 %v793_v31, %v789_v30  ;;  %v7342_v31 = vld [vmem:[%s9311_s2 + $0x230] sm:$0xff] }
  0x3c   : > { %4254 = vmatmul.bf16.gmra.mxu2 %v7185_v32  ;;  %4214 = vmatmul.bf16.gmra.mxu0 %v7814_v34  ;;  %v796_v32 = vshll.u32 %v771_v27, 16 }
  0x3d   : > { %4343 = vmatmul.bf16.gmra.mxu3 %v7201_v33  ;;  %4383 = vmatpush.bf16.msrb.mxu2 %v7291_v44  ;;  %v1045_v33 = vshrl.u32 %v7780_v22, 16  ;;  %v1253_v44 = vrot.slane %v7774_v20, 1 }
  0x3e   : > { %4472 = vmatpush.bf16.msrb.mxu3 %v7299_v45  ;;  %4650 = vmatpush.bf16.msrb.mxu1 %v7315_v47  ;;  %v798_v39 = vrot.slane %v796_v32, 1  ;;  %v1254_v45 = vrot.slane %v771_v27, 1  ;;  %v300_v47 = vld [vmem:[%s7763_s9 + $0x14] sm:$0xf]  ;;  %v1256_v32 = vrot.slane %v7814_v34, 1 }
  0x3f   : > { %4303 = vmatmul.bf16.gmra.mxu1 %v7817_v35  ;;  %4561 = vmatpush.bf16.msrb.mxu0 %v7307_v46  ;;  %v250_v46 = vld [vmem:[%s7758_s6 + $0x14] sm:$0xf] }
  0x40   : > { %v1255_v20 = vsel %vm1252_vm1, %v1253_v44, %v1254_v45 }
  0x41   : > { %4384 = vmatpush.bf16.msrb.mxu2 %v7290_v52  ;;  %v7966_v52 = vld [vmem:[%s9312_s3] ss:$0 sm:$0xff] }
  0x42   : > { %4473 = vmatpush.bf16.msrb.mxu3 %v7298_v53  ;;  %4651 = vmatpush.bf16.msrb.mxu1 %v7314_v55  ;;  %v799_v53 = vsel %vm787_vm0, %v794_v38, %v798_v39  ;;  %v756_v55 = vunpack.c.l.b16 %v250_v46 }
  0x43   : > { %4562 = vmatpush.bf16.msrb.mxu0 %v7306_v54 }
  0x45   : > { %4385 = vmatpush.bf16.msrb.mxu2 %v7289_v60 }
  0x46   : > { %4474 = vmatpush.bf16.msrb.mxu3 %v7297_v61  ;;  %4652 = vmatpush.bf16.msrb.mxu1 %v7313_v63  ;;  %v7326_v63 = vld [vmem:[%s9311_s2 + $0x1b0] sm:$0xff] }
  0x47   : > { %4563 = vmatpush.bf16.msrb.mxu0 %v7305_v62  ;;  %v803_v62 = vshll.u32 %v7814_v34, 16 }
  0x49   : > { %4386 = vmatpush.bf16.msrb.mxu2 %v7288_v4 }
  0x4a   : > { %4475 = vmatpush.bf16.msrb.mxu3 %v7296_v5  ;;  %4653 = vmatpush.bf16.msrb.mxu1 %v7312_v7  ;;  %v1059_v5 = vshll.u32 %v7817_v35, 16 }
  0x4b   : > { %4564 = vmatpush.bf16.msrb.mxu0 %v7304_v6  ;;  %v7334_v6 = vld [vmem:[%s9311_s2 + $0x1f0] sm:$0xff] }
  0x4c   : > { %4259 = vmatmul.bf16.gmra.mxu2 %v7186_v40  ;;  %4219 = vmatmul.bf16.gmra.mxu0 %v7836_v42  ;;  %v1050_v40 = vor.u32 %v1049_v36, %v1045_v33  ;;  %v1061_v16 = vrot.slane %v1059_v5, 1  ;;  %v253_v36 = vld [vmem:[%s7758_s6 + $0x20] sm:$0xf] }
  0x4d   : > { %4348 = vmatmul.bf16.gmra.mxu3 %v7202_v41  ;;  %4735 = vmatpush.bf16.msra.mxu2 %v7327_v12  ;;  %v1054_v41 = vrot.slane %v1052_v37, 1  ;;  %v801_v12 = vshrl.u32 %v7814_v34, 16  ;;  %v303_v37 = vld [vmem:[%s7763_s9 + $0x20] sm:$0xf] }
  0x4e   : > { %4824 = vmatpush.bf16.msra.mxu3 %v7335_v13  ;;  %5002 = vmatpush.bf16.msra.mxu1 %v7351_v25  ;;  %v805_v13 = vrot.slane %v803_v62, 1  ;;  %v1062_v29 = vor.u32 %v1061_v16, %v1057_v15 }
  0x4f   : > { %4308 = vmatmul.bf16.gmra.mxu1 %v7839_v43  ;;  %4913 = vmatpush.bf16.msra.mxu0 %v7343_v14  ;;  %v1055_v54 = vsel %vm787_vm0, %v1050_v40, %v1054_v41  ;;  %v1320_v40 = vrot.slane %v7817_v35, 1 }
  0x50   : > { %v806_v26 = vor.u32 %v805_v13, %v801_v12 }
  0x51   : > { %4736 = vmatpush.bf16.msra.mxu2 %v7326_v63 }
  0x52   : > { %4825 = vmatpush.bf16.msra.mxu3 %v7334_v6 }
  0x53   : > { %4914 = vmatpush.bf16.msra.mxu0 %v7342_v31 }
  0x5c   : > { %4264 = vmatmul.bf16.gmra.mxu2 %v7187_v48  ;;  %4224 = vmatmul.bf16.gmra.mxu0 %v7858_v50  ;;  %v1317_v48 = vrot.slane %v7780_v22, 1 }
  0x5d   : > { %4353 = vmatmul.bf16.gmra.mxu3 %v7203_v49  ;;  %v1318_v49 = vrot.slane %v1028_v28, 1 }
  0x5f   : > { %4313 = vmatmul.bf16.gmra.mxu1 %v7861_v51  ;;  %v1319_v22 = vsel %vm1252_vm1, %v1317_v48, %v1318_v49  ;;  %v1014_v48 = vunpack.c.l.b16 %v303_v37 }
  0x6c   : > { %4269 = vmatmul.bf16.gmra.mxu2 %v7188_v56  ;;  %4229 = vmatmul.bf16.gmra.mxu0 %v7880_v58  ;;  %v1013_v56 = vunpack.c.l.b16 %v300_v47  ;;  %v757_v47 = vunpack.c.l.b16 %v253_v36 }
  0x6d   : > { %4358 = vmatmul.bf16.gmra.mxu3 %v7204_v57 }
  0x6e   : > { %v1029_v4 = vpack.c.b16 %v1013_v56, %v1013_v56 }
  0x6f   : > { %4318 = vmatmul.bf16.gmra.mxu1 %v7883_v59 }
  0x70   : > { %v1321_v41 = vrot.slane %v1029_v4, 1 }
  0x72   : > { %v1322_v56 = vsel %vm1252_vm1, %v1320_v40, %v1321_v41 }
  0x7c   : > { %4274 = vmatmul.bf16.gmra.mxu2 %v7189_v0  ;;  %4234 = vmatmul.bf16.gmra.mxu0 %v7902_v2 }
  0x7d   : > { %4363 = vmatmul.bf16.gmra.mxu3 %v7205_v1  ;;  %v772_v1 = vpack.c.b16 %v756_v55, %v756_v55 }
  0x7f   : > { %4323 = vmatmul.bf16.gmra.mxu1 %v7905_v3  ;;  %v808_v14 = vshll.u32 %v772_v1, 16  ;;  %v1257_v33 = vrot.slane %v772_v1, 1 }
  0x81   : > { %v810_v28 = vrot.slane %v808_v14, 1 }
  0x83   : > { %v811_v45 = vsel %vm787_vm0, %v806_v26, %v810_v28  ;;  %v1259_v26 = vrot.slane %v7836_v42, 1 }
  0x8c   : > { %4279 = vmatmul.bf16.gmra.mxu2 %v7190_v8  ;;  %4239 = vmatmul.bf16.gmra.mxu0 %v7924_v10 }
  0x8d   : > { %4368 = vmatmul.bf16.gmra.mxu3 %v7206_v9 }
  0x8f   : > { %4328 = vmatmul.bf16.gmra.mxu1 %v7927_v11 }
  0x9c   : > { %4284 = vmatmul.bf16.gmra.mxu2 %v7191_v17  ;;  %4244 = vmatmul.bf16.gmra.mxu0 %v7945_v19  ;;  %v1064_v17 = vshll.u32 %v1029_v4, 16  ;;  %v813_v4 = vshrl.u32 %v7836_v42, 16 }
  0x9d   : > { %4373 = vmatmul.bf16.gmra.mxu3 %v7207_v18 }
  0x9e   : > { %v1066_v30 = vrot.slane %v1064_v17, 1 }
  0x9f   : > { %4333 = vmatmul.bf16.gmra.mxu1 %v7948_v24 }
  0xa0   : > { %v1067_v46 = vsel %vm787_vm0, %v1062_v29, %v1066_v30  ;;  %v256_v29 = vld [vmem:[%s7758_s6 + $0x2c] sm:$0xf] }
  0xa1   : > { %v306_v30 = vld [vmem:[%s7763_s9 + $0x2c] sm:$0xf]  ;;  %v758_v40 = vunpack.c.l.b16 %v256_v29  ;;  %v309_v29 = vld [vmem:[%s7763_s9 + $0x38] sm:$0xf] }
  0xa2   : > { %v1015_v41 = vunpack.c.l.b16 %v306_v30 }
  0xa9   : > { %v4210_v57 = vpop.f32.mrf.mxu0 }
  0xaa   : > { %v4211_v60 = vadd.f32 %v7966_v52, %v4210_v57  ;;  %v815_v57 = vshll.u32 %v7836_v42, 16 }
  0xac   : > { %v4299_v61 = vpop.f32.mrf.mxu1  ;;  %4387 = vmatmul.bf16.vlgmr.msrb.gmra.mxu2 %v799_v53  ;;  %4565 = vmatmul.bf16.vlgmr.msrb.gmra.mxu0 %v1255_v20  ;;  %v1258_v53 = vsel %vm1252_vm1, %v1256_v32, %v1257_v33  ;;  %v817_v5 = vrot.slane %v815_v57, 1  ;;  %v1323_v33 = vrot.slane %v7839_v43, 1 }
  0xad   : > { %4476 = vmatmul.bf16.vlgmr.msrb.gmra.mxu3 %v1055_v54  ;;  %v7977_v0 = vadd.f32 %v4299_v61, %v4211_v60  ;;  %v7350_v54 = vld [vmem:[%s9311_s2 + $0x270] sm:$0xff]  ;;  %v773_v60 = vpack.c.b16 %v757_v47, %v757_v47  ;;  %v1030_v61 = vpack.c.b16 %v1014_v48, %v1014_v48 }
  0xae   : > { %5003 = vmatpush.bf16.msra.mxu1 %v7350_v54  ;;  %v818_v16 = vor.u32 %v817_v5, %v813_v4  ;;  %v774_v54 = vpack.c.b16 %v758_v40, %v758_v40  ;;  %v1016_v40 = vunpack.c.l.b16 %v309_v29 }
  0xaf   : > { %4654 = vmatmul.bf16.vlgmr.msrb.gmra.mxu1 %v1319_v22  ;;  %v4250_v7 = vpop.f32.mrf.mxu2  ;;  %v1071_v22 = vshll.u32 %v7839_v43, 16  ;;  %v820_v6 = vshll.u32 %v773_v60, 16  ;;  %v1260_v28 = vrot.slane %v773_v60, 1  ;;  %v1324_v36 = vrot.slane %v1030_v61, 1 }
  0xb0   : > { %v4339_v8 = vpop.f32.mrf.mxu3  ;;  %v4251_v9 = vadd.f32 %v7966_v52, %v4250_v7  ;;  %v1069_v7 = vshrl.u32 %v7839_v43, 16  ;;  %v827_v43 = vshll.u32 %v7858_v50, 16 }
  0xb1   : > { %v4212_v21 = vpop.f32.mrf.mxu0  ;;  %v1261_v42 = vsel %vm1252_vm1, %v1259_v26, %v1260_v28  ;;  %v1325_v48 = vsel %vm1252_vm1, %v1323_v33, %v1324_v36  ;;  %v1263_v26 = vrot.slane %v774_v54, 1  ;;  %v259_v28 = vld [vmem:[%s7758_s6 + $0x38] sm:$0xf] }
  0xb2   : > { %v7986_v18 = vadd.f32 %v4339_v8, %v4251_v9  ;;  %v4213_v23 = vadd.f32 %v7966_v52, %v4212_v21  ;;  %v1073_v8 = vrot.slane %v1071_v22, 1  ;;  %v1076_v9 = vshll.u32 %v1030_v61, 16 }
  0xb3   : > { %v822_v21 = vrot.slane %v820_v6, 1  ;;  %v825_v22 = vshrl.u32 %v7858_v50, 16 }
  0xb4   : > { %v4301_v25 = vpop.f32.mrf.mxu1 }
  0xb5   : > { %v7989_v27 = vadd.f32 %v4301_v25, %v4213_v23  ;;  %v1074_v23 = vor.u32 %v1073_v8, %v1069_v7  ;;  %v1078_v25 = vrot.slane %v1076_v9, 1 }
  0xb7   : > { %v4252_v38 = vpop.f32.mrf.mxu2 }
  0xb8   : > { %v4341_v39 = vpop.f32.mrf.mxu3  ;;  %v4253_v44 = vadd.f32 %v7966_v52, %v4252_v38  ;;  %v823_v38 = vsel %vm787_vm0, %v818_v16, %v822_v21 }
  0xb9   : > { %v4215_v34 = vpop.f32.mrf.mxu0 }
  0xba   : > { %v8001_v49 = vadd.f32 %v4341_v39, %v4253_v44  ;;  %v4216_v35 = vadd.f32 %v7966_v52, %v4215_v34  ;;  %v1079_v39 = vsel %vm787_vm0, %v1074_v23, %v1078_v25  ;;  %v7325_v34 = vld [vmem:[%s9311_s2 + $0x1a8] sm:$0xff]  ;;  %v1262_v25 = vrot.slane %v7858_v50, 1 }
  0xbb   : > { %4737 = vmatpush.bf16.msra.mxu2 %v7325_v34  ;;  %v7341_v23 = vld [vmem:[%s9311_s2 + $0x228] sm:$0xff] }
  0xbc   : > { %v4304_v55 = vpop.f32.mrf.mxu1  ;;  %4392 = vmatmul.bf16.gmra.mxu2 %v811_v45  ;;  %4570 = vmatmul.bf16.gmra.mxu0 %v1258_v53 }
  0xbd   : > { %4481 = vmatmul.bf16.gmra.mxu3 %v1067_v46  ;;  %v8010_v20 = vadd.f32 %v4304_v55, %v4216_v35  ;;  %v1031_v35 = vpack.c.b16 %v1015_v41, %v1015_v41  ;;  %v1083_v55 = vshll.u32 %v7861_v51, 16  ;;  %4915 = vmatpush.bf16.msra.mxu0 %v7341_v23  ;;  %v1265_v23 = vrot.slane %v7880_v58, 1 }
  0xbf   : > { %4659 = vmatmul.bf16.gmra.mxu1 %v1322_v56  ;;  %v4255_v62 = vpop.f32.mrf.mxu2  ;;  %v7333_v56 = vld [vmem:[%s9311_s2 + $0x1e8] sm:$0xff]  ;;  %v1085_v4 = vrot.slane %v1083_v55, 1  ;;  %v1088_v5 = vshll.u32 %v1031_v35, 16  ;;  %v1327_v33 = vrot.slane %v1031_v35, 1  ;;  %v1095_v35 = vshll.u32 %v7883_v59, 16 }
  0xc0   : > { %v4344_v63 = vpop.f32.mrf.mxu3  ;;  %v4256_v1 = vadd.f32 %v7966_v52, %v4255_v62  ;;  %4826 = vmatpush.bf16.msra.mxu3 %v7333_v56  ;;  %v829_v62 = vrot.slane %v827_v43, 1 }
  0xc1   : > { %v4217_v13 = vpop.f32.mrf.mxu0  ;;  %v1090_v21 = vrot.slane %v1088_v5, 1 }
  0xc2   : > { %v8016_v12 = vadd.f32 %v4344_v63, %v4256_v1  ;;  %v4218_v14 = vadd.f32 %v7966_v52, %v4217_v13  ;;  %v832_v63 = vshll.u32 %v774_v54, 16  ;;  %v1081_v1 = vshrl.u32 %v7861_v51, 16 }
  0xc3   : > { %v830_v13 = vor.u32 %v829_v62, %v825_v22  ;;  %v1032_v54 = vpack.c.b16 %v1016_v40, %v1016_v40  ;;  %v1093_v62 = vshrl.u32 %v7883_v59, 16 }
  0xc4   : > { %v4306_v15 = vpop.f32.mrf.mxu1  ;;  %v1086_v16 = vor.u32 %v1085_v4, %v1081_v1 }
  0xc5   : > { %v8019_v17 = vadd.f32 %v4306_v15, %v4218_v14  ;;  %v834_v15 = vrot.slane %v832_v63, 1  ;;  %v1097_v63 = vrot.slane %v1095_v35, 1  ;;  %v1100_v1 = vshll.u32 %v1032_v54, 16  ;;  %v7332_v35 = vld [vmem:[%s9311_s2 + $0x1e0] sm:$0xff] }
  0xc6   : > { %4827 = vmatpush.bf16.msra.mxu3 %v7332_v35 }
  0xc7   : > { %v4257_v31 = vpop.f32.mrf.mxu2 }
  0xc8   : > { %v4346_v32 = vpop.f32.mrf.mxu3  ;;  %v4258_v37 = vadd.f32 %v7966_v52, %v4257_v31 }
  0xc9   : > { %v4220_v45 = vpop.f32.mrf.mxu0 }
  0xca   : > { %v8028_v44 = vadd.f32 %v4346_v32, %v4258_v37  ;;  %v4221_v46 = vadd.f32 %v7966_v52, %v4220_v45  ;;  %v1326_v32 = vrot.slane %v7861_v51, 1  ;;  %v835_v37 = vsel %vm787_vm0, %v830_v13, %v834_v15 }
  0xcb   : > { %v1264_v45 = vsel %vm1252_vm1, %v1262_v25, %v1263_v26  ;;  %v262_v26 = vld [vmem:[%s7758_s6 + $0x44] sm:$0xf] }
  0xcc   : > { %v4309_v47 = vpop.f32.mrf.mxu1  ;;  %4397 = vmatmul.bf16.gmra.mxu2 %v823_v38  ;;  %4575 = vmatmul.bf16.gmra.mxu0 %v1261_v42  ;;  %v1091_v38 = vsel %vm787_vm0, %v1086_v16, %v1090_v21  ;;  %v7349_v42 = vld [vmem:[%s9311_s2 + $0x268] sm:$0xff]  ;;  %v1098_v16 = vor.u32 %v1097_v63, %v1093_v62  ;;  %v1102_v21 = vrot.slane %v1100_v1, 1  ;;  %v1105_v62 = vshrl.u32 %v7905_v3, 16 }
  0xcd   : > { %4486 = vmatmul.bf16.gmra.mxu3 %v1079_v39  ;;  %v8037_v53 = vadd.f32 %v4309_v47, %v4221_v46  ;;  %v759_v39 = vunpack.c.l.b16 %v259_v28  ;;  %v1328_v47 = vsel %vm1252_vm1, %v1326_v32, %v1327_v33  ;;  %5004 = vmatpush.bf16.msra.mxu1 %v7349_v42  ;;  %v312_v28 = vld [vmem:[%s7763_s9 + $0x44] sm:$0xf]  ;;  %v1330_v32 = vrot.slane %v1032_v54, 1 }
  0xce   : > { %v1107_v54 = vshll.u32 %v7905_v3, 16 }
  0xcf   : > { %4664 = vmatmul.bf16.gmra.mxu1 %v1325_v48  ;;  %v4260_v57 = vpop.f32.mrf.mxu2  ;;  %v839_v48 = vshll.u32 %v7880_v58, 16  ;;  %v775_v34 = vpack.c.b16 %v759_v39, %v759_v39  ;;  %v1017_v39 = vunpack.c.l.b16 %v312_v28  ;;  %v1268_v28 = vrot.slane %v7902_v2, 1 }
  0xd0   : > { %v4349_v60 = vpop.f32.mrf.mxu3  ;;  %v4261_v61 = vadd.f32 %v7966_v52, %v4260_v57  ;;  %v1109_v63 = vrot.slane %v1107_v54, 1 }
  0xd1   : > { %v4222_v7 = vpop.f32.mrf.mxu0  ;;  %v844_v22 = vshll.u32 %v775_v34, 16  ;;  %v1266_v25 = vrot.slane %v775_v34, 1  ;;  %v1033_v34 = vpack.c.b16 %v1017_v39, %v1017_v39 }
  0xd2   : > { %v8046_v6 = vadd.f32 %v4349_v60, %v4261_v61  ;;  %v4223_v8 = vadd.f32 %v7966_v52, %v4222_v7  ;;  %v837_v60 = vshrl.u32 %v7880_v58, 16  ;;  %v841_v61 = vrot.slane %v839_v48, 1 }
  0xd3   : > { %v846_v15 = vrot.slane %v844_v22, 1  ;;  %v1267_v58 = vsel %vm1252_vm1, %v1265_v23, %v1266_v25  ;;  %v1112_v1 = vshll.u32 %v1033_v34, 16  ;;  %v1110_v23 = vor.u32 %v1109_v63, %v1105_v62 }
  0xd4   : > { %v4311_v9 = vpop.f32.mrf.mxu1 }
  0xd5   : > { %v8049_v14 = vadd.f32 %v4311_v9, %v4223_v8  ;;  %v842_v9 = vor.u32 %v841_v61, %v837_v60  ;;  %v849_v60 = vshrl.u32 %v7902_v2, 16  ;;  %v1114_v25 = vrot.slane %v1112_v1, 1 }
  0xd6   : > { %v1117_v1 = vshrl.u32 %v7927_v11, 16 }
  0xd7   : > { %v4262_v30 = vpop.f32.mrf.mxu2 }
  0xd8   : > { %v4351_v31 = vpop.f32.mrf.mxu3  ;;  %v4263_v36 = vadd.f32 %v7966_v52, %v4262_v30 }
  0xd9   : > { %v4225_v50 = vpop.f32.mrf.mxu0 }
  0xda   : > { %v8061_v41 = vadd.f32 %v4351_v31, %v4263_v36  ;;  %v4226_v51 = vadd.f32 %v7966_v52, %v4225_v50  ;;  %v1329_v31 = vrot.slane %v7883_v59, 1  ;;  %v847_v36 = vsel %vm787_vm0, %v842_v9, %v846_v15 }
  0xdb   : > { %v851_v59 = vshll.u32 %v7902_v2, 16 }
  0xdc   : > { %v4314_v46 = vpop.f32.mrf.mxu1  ;;  %4402 = vmatmul.bf16.gmra.mxu2 %v835_v37  ;;  %4580 = vmatmul.bf16.gmra.mxu0 %v1264_v45  ;;  %v1103_v37 = vsel %vm787_vm0, %v1098_v16, %v1102_v21 }
  0xdd   : > { %4491 = vmatmul.bf16.gmra.mxu3 %v1091_v38  ;;  %v8070_v43 = vadd.f32 %v4314_v46, %v4226_v51  ;;  %v760_v38 = vunpack.c.l.b16 %v262_v26  ;;  %v1331_v51 = vsel %vm1252_vm1, %v1329_v31, %v1330_v32  ;;  %v7324_v46 = vld [vmem:[%s9311_s2 + $0x1a0] sm:$0xff]  ;;  %v853_v61 = vrot.slane %v851_v59, 1  ;;  %v315_v31 = vld [vmem:[%s7763_s9 + $0x50] sm:$0xf] }
  0xde   : > { %4738 = vmatpush.bf16.msra.mxu2 %v7324_v46  ;;  %v7340_v26 = vld [vmem:[%s9311_s2 + $0x220] sm:$0xff] }
  0xdf   : > { %4669 = vmatmul.bf16.gmra.mxu1 %v1328_v47  ;;  %v4265_v55 = vpop.f32.mrf.mxu2  ;;  %v776_v48 = vpack.c.b16 %v760_v38, %v760_v38  ;;  %v854_v15 = vor.u32 %v853_v61, %v849_v60  ;;  %4916 = vmatpush.bf16.msra.mxu0 %v7340_v26  ;;  %v7348_v59 = vld [vmem:[%s9311_s2 + $0x260] sm:$0xff] }
  0xe0   : > { %v4354_v56 = vpop.f32.mrf.mxu3  ;;  %v4266_v57 = vadd.f32 %v7966_v52, %v4265_v55  ;;  %5005 = vmatpush.bf16.msra.mxu1 %v7348_v59 }
  0xe1   : > { %v4227_v5 = vpop.f32.mrf.mxu0  ;;  %v856_v22 = vshll.u32 %v776_v48, 16 }
  0xe2   : > { %v8076_v4 = vadd.f32 %v4354_v56, %v4266_v57  ;;  %v4228_v7 = vadd.f32 %v7966_v52, %v4227_v5 }
  0xe3   : > { %v858_v21 = vrot.slane %v856_v22, 1  ;;  %v861_v22 = vshrl.u32 %v7924_v10, 16 }
  0xe4   : > { %v4316_v8 = vpop.f32.mrf.mxu1 }
  0xe5   : > { %v8079_v13 = vadd.f32 %v4316_v8, %v4228_v7  ;;  %v859_v39 = vsel %vm787_vm0, %v854_v15, %v858_v21 }
  0xe7   : > { %v4267_v29 = vpop.f32.mrf.mxu2 }
  0xe8   : > { %v4356_v30 = vpop.f32.mrf.mxu3  ;;  %v4268_v33 = vadd.f32 %v7966_v52, %v4267_v29  ;;  %v1269_v29 = vrot.slane %v776_v48, 1 }
  0xe9   : > { %v4230_v50 = vpop.f32.mrf.mxu0 }
  0xea   : > { %v8088_v40 = vadd.f32 %v4356_v30, %v4268_v33  ;;  %v4231_v45 = vadd.f32 %v7966_v52, %v4230_v50  ;;  %v265_v30 = vld [vmem:[%s7758_s6 + $0x50] sm:$0xf]  ;;  %v1115_v50 = vsel %vm787_vm0, %v1110_v23, %v1114_v25 }
  0xec   : > { %v4319_v42 = vpop.f32.mrf.mxu1  ;;  %4407 = vmatmul.bf16.gmra.mxu2 %v847_v36  ;;  %4585 = vmatmul.bf16.gmra.mxu0 %v1267_v58  ;;  %v1332_v36 = vrot.slane %v7905_v3, 1  ;;  %v761_v58 = vunpack.c.l.b16 %v265_v30 }
  0xed   : > { %4496 = vmatmul.bf16.gmra.mxu3 %v1103_v37  ;;  %v8097_v47 = vadd.f32 %v4319_v42, %v4231_v45  ;;  %v1333_v37 = vrot.slane %v1033_v34, 1  ;;  %v1018_v45 = vunpack.c.l.b16 %v315_v31  ;;  %v863_v34 = vshll.u32 %v7924_v10, 16 }
  0xee   : > { %v777_v35 = vpack.c.b16 %v761_v58, %v761_v58  ;;  %v1271_v31 = vrot.slane %v7924_v10, 1 }
  0xef   : > { %4674 = vmatmul.bf16.gmra.mxu1 %v1331_v51  ;;  %v4270_v55 = vpop.f32.mrf.mxu2  ;;  %v1270_v51 = vsel %vm1252_vm1, %v1268_v28, %v1269_v29  ;;  %v1334_v48 = vsel %vm1252_vm1, %v1332_v36, %v1333_v37  ;;  %v865_v62 = vrot.slane %v863_v34, 1  ;;  %v318_v36 = vld [vmem:[%s7763_s9 + $0x5c] sm:$0xf] }
  0xf0   : > { %v4359_v56 = vpop.f32.mrf.mxu3  ;;  %v4271_v57 = vadd.f32 %v7966_v52, %v4270_v55  ;;  %v1034_v55 = vpack.c.b16 %v1018_v45, %v1018_v45  ;;  %v868_v63 = vshll.u32 %v777_v35, 16  ;;  %v1019_v59 = vunpack.c.l.b16 %v318_v36 }
  0xf1   : > { %v4232_v7 = vpop.f32.mrf.mxu0  ;;  %v866_v25 = vor.u32 %v865_v62, %v861_v22  ;;  %v7331_v22 = vld [vmem:[%s9311_s2 + $0x1d8] sm:$0xff] }
  0xf2   : > { %v8106_v5 = vadd.f32 %v4359_v56, %v4271_v57  ;;  %v4233_v8 = vadd.f32 %v7966_v52, %v4232_v7  ;;  %v1119_v56 = vshll.u32 %v7927_v11, 16  ;;  %v870_v28 = vrot.slane %v868_v63, 1  ;;  %4828 = vmatpush.bf16.msra.mxu3 %v7331_v22 }
  0xf4   : > { %v4321_v9 = vpop.f32.mrf.mxu1  ;;  %v1121_v7 = vrot.slane %v1119_v56, 1  ;;  %v871_v45 = vsel %vm787_vm0, %v866_v25, %v870_v28 }
  0xf5   : > { %v8109_v16 = vadd.f32 %v4321_v9, %v4233_v8  ;;  %v1124_v8 = vshll.u32 %v1034_v55, 16 }
  0xf6   : > { %v1122_v29 = vor.u32 %v1121_v7, %v1117_v1  ;;  %v873_v7 = vshrl.u32 %v7945_v19, 16 }
  0xf7   : > { %v4272_v32 = vpop.f32.mrf.mxu2  ;;  %v1126_v30 = vrot.slane %v1124_v8, 1 }
  0xf8   : > { %v4361_v33 = vpop.f32.mrf.mxu3  ;;  %v4273_v38 = vadd.f32 %v7966_v52, %v4272_v32  ;;  %v1272_v32 = vrot.slane %v777_v35, 1 }
  0xf9   : > { %v4235_v2 = vpop.f32.mrf.mxu0 }
  0xfa   : > { %v8121_v42 = vadd.f32 %v4361_v33, %v4273_v38  ;;  %v4236_v3 = vadd.f32 %v7966_v52, %v4235_v2  ;;  %v268_v33 = vld [vmem:[%s7758_s6 + $0x5c] sm:$0xf]  ;;  %v1127_v2 = vsel %vm787_vm0, %v1122_v29, %v1126_v30  ;;  %v1273_v10 = vsel %vm1252_vm1, %v1271_v31, %v1272_v32 }
  0xfc   : > { %v4324_v46 = vpop.f32.mrf.mxu1  ;;  %4412 = vmatmul.bf16.gmra.mxu2 %v859_v39  ;;  %4590 = vmatmul.bf16.gmra.mxu0 %v1270_v51  ;;  %v1335_v39 = vrot.slane %v7927_v11, 1  ;;  %v762_v51 = vunpack.c.l.b16 %v268_v33  ;;  %v875_v11 = vshll.u32 %v7945_v19, 16  ;;  %v7339_v33 = vld [vmem:[%s9311_s2 + $0x218] sm:$0xff] }
  0xfd   : > { %4501 = vmatmul.bf16.gmra.mxu3 %v1115_v50  ;;  %v8130_v54 = vadd.f32 %v4324_v46, %v4236_v3  ;;  %v1336_v50 = vrot.slane %v1034_v55, 1  ;;  %v7323_v55 = vld [vmem:[%s9311_s2 + $0x198] sm:$0xff]  ;;  %4917 = vmatpush.bf16.msra.mxu0 %v7339_v33 }
  0xfe   : > { %4739 = vmatpush.bf16.msra.mxu2 %v7323_v55  ;;  %v877_v8 = vrot.slane %v875_v11, 1 }
  0xff   : > { %4679 = vmatmul.bf16.gmra.mxu1 %v1334_v48  ;;  %v4275_v57 = vpop.f32.mrf.mxu2  ;;  %v1337_v35 = vsel %vm1252_vm1, %v1335_v39, %v1336_v50  ;;  %v1274_v50 = vrot.slane %v7945_v19, 1 }
 0x100   : > { %v4364_v60 = vpop.f32.mrf.mxu3  ;;  %v4276_v61 = vadd.f32 %v7966_v52, %v4275_v57  ;;  %v778_v57 = vpack.c.b16 %v762_v51, %v762_v51  ;;  %v878_v32 = vor.u32 %v877_v8, %v873_v7 }
 0x101   : > { %v4237_v15 = vpop.f32.mrf.mxu0 }
 0x102   : > { %v8136_v9 = vadd.f32 %v4364_v60, %v4276_v61  ;;  %v4238_v21 = vadd.f32 %v7966_v52, %v4237_v15  ;;  %v1035_v60 = vpack.c.b16 %v1019_v59, %v1019_v59  ;;  %v1131_v61 = vshll.u32 %v7948_v24, 16 }
 0x103   : > { %v880_v15 = vshll.u32 %v778_v57, 16 }
 0x104   : > { %v4326_v23 = vpop.f32.mrf.mxu1  ;;  %v1136_v25 = vshll.u32 %v1035_v60, 16 }
 0x105   : > { %v8139_v26 = vadd.f32 %v4326_v23, %v4238_v21  ;;  %v1129_v21 = vshrl.u32 %v7948_v24, 16  ;;  %v1133_v23 = vrot.slane %v1131_v61, 1 }
 0x106   : > { %v1138_v39 = vrot.slane %v1136_v25, 1 }
 0x107   : > { %v4277_v37 = vpop.f32.mrf.mxu2 }
 0x108   : > { %v4366_v38 = vpop.f32.mrf.mxu3  ;;  %v4278_v58 = vadd.f32 %v7966_v52, %v4277_v37  ;;  %v882_v37 = vrot.slane %v880_v15, 1 }
 0x109   : > { %v4240_v46 = vpop.f32.mrf.mxu0 }
 0x10a   : > { %v8148_v3 = vadd.f32 %v4366_v38, %v4278_v58  ;;  %v4241_v48 = vadd.f32 %v7966_v52, %v4240_v46  ;;  %v1134_v38 = vor.u32 %v1133_v23, %v1129_v21  ;;  %v1275_v58 = vrot.slane %v778_v57, 1  ;;  %v7554_v21 = vld [vmem:[%s7763_s9 + $0x60] sm:$0xff] }
 0x10b   : > { %v1338_v46 = vrot.slane %v7948_v24, 1  ;;  %v1143_v23 = vshll.u32 %v7554_v21, 16 }
 0x10c   : > { %v4329_v34 = vpop.f32.mrf.mxu1  ;;  %4417 = vmatmul.bf16.gmra.mxu2 %v871_v45  ;;  %4595 = vmatmul.bf16.gmra.mxu0 %v1273_v10  ;;  %v271_v45 = vld [vmem:[%s7758_s6 + $0x68] sm:$0xf]  ;;  %v1339_v10 = vrot.slane %v1035_v60, 1  ;;  %v1276_v61 = vsel %vm1252_vm1, %v1274_v50, %v1275_v58  ;;  %v7553_v60 = vld [vmem:[%s7758_s6 + $0x60] sm:$0xff] }
 0x10d   : > { %4506 = vmatmul.bf16.gmra.mxu3 %v1127_v2  ;;  %v8157_v56 = vadd.f32 %v4329_v34, %v4241_v48  ;;  %v321_v2 = vld [vmem:[%s7763_s9 + $0x68] sm:$0xf]  ;;  %v883_v34 = vsel %vm787_vm0, %v878_v32, %v882_v37  ;;  %v763_v11 = vunpack.c.l.b16 %v271_v45  ;;  %v1141_v37 = vshrl.u32 %v7554_v21, 16 }
 0x10e   : > { %v1020_v55 = vunpack.c.l.b16 %v321_v2  ;;  %v1340_v24 = vsel %vm1252_vm1, %v1338_v46, %v1339_v10 }
 0x10f   : > { %4684 = vmatmul.bf16.gmra.mxu1 %v1337_v35  ;;  %v4280_v62 = vpop.f32.mrf.mxu2  ;;  %v1139_v35 = vsel %vm787_vm0, %v1134_v38, %v1138_v39  ;;  %v779_v8 = vpack.c.b16 %v763_v11, %v763_v11  ;;  %v1145_v38 = vrot.slane %v1143_v23, 1  ;;  %v274_v11 = vld [vmem:[%s7758_s6 + $0x74] sm:$0xf] }
 0x110   : > { %v4369_v63 = vpop.f32.mrf.mxu3  ;;  %v4281_v1 = vadd.f32 %v7966_v52, %v4280_v62  ;;  %v1036_v15 = vpack.c.b16 %v1020_v55, %v1020_v55  ;;  %v324_v55 = vld [vmem:[%s7763_s9 + $0x74] sm:$0xf]  ;;  %v764_v23 = vunpack.c.l.b16 %v274_v11 }
 0x111   : > { %v4242_v29 = vpop.f32.mrf.mxu0  ;;  %v892_v33 = vshll.u32 %v779_v8, 16  ;;  %v1146_v10 = vor.u32 %v1145_v38, %v1141_v37  ;;  %v7556_v37 = vld [vmem:[%s7763_s9 + $0x6c] sm:$0xff] }
 0x112   : > { %v8166_v28 = vadd.f32 %v4369_v63, %v4281_v1  ;;  %v4243_v30 = vadd.f32 %v7966_v52, %v4242_v29  ;;  %v887_v63 = vshll.u32 %v7553_v60, 16  ;;  %v7347_v1 = vld [vmem:[%s9311_s2 + $0x258] sm:$0xff]  ;;  %v1148_v39 = vshll.u32 %v1036_v15, 16 }
 0x113   : > { %5006 = vmatpush.bf16.msra.mxu1 %v7347_v1  ;;  %v894_v46 = vrot.slane %v892_v33, 1  ;;  %v1155_v38 = vshll.u32 %v7556_v37, 16 }
 0x114   : > { %v4331_v31 = vpop.f32.mrf.mxu1  ;;  %v889_v32 = vrot.slane %v887_v63, 1 }
 0x115   : > { %v8172_v36 = vadd.f32 %v4331_v31, %v4243_v30  ;;  %v885_v31 = vshrl.u32 %v7553_v60, 16 }
 0x117   : > { %v4282_v51 = vpop.f32.mrf.mxu2 }
 0x118   : > { %v4371_v59 = vpop.f32.mrf.mxu3  ;;  %v4283_v48 = vadd.f32 %v7966_v52, %v4282_v51  ;;  %v890_v51 = vor.u32 %v889_v32, %v885_v31  ;;  %v780_v32 = vpack.c.b16 %v764_v23, %v764_v23 }
 0x119   : > { %v4245_v57 = vpop.f32.mrf.mxu0 }
 0x11a   : > { %v8181_v19 = vadd.f32 %v4371_v59, %v4283_v48  ;;  %v4246_v22 = vadd.f32 %v7966_v52, %v4245_v57  ;;  %v1150_v48 = vrot.slane %v1148_v39, 1  ;;  %v895_v63 = vsel %vm787_vm0, %v890_v51, %v894_v46  ;;  %v7330_v39 = vld [vmem:[%s9311_s2 + $0x1d0] sm:$0xff] }
 0x11b   : > { %4829 = vmatpush.bf16.msra.mxu3 %v7330_v39  ;;  %v1281_v23 = vrot.slane %v780_v32, 1 }
 0x11c   : > { %v4334_v62 = vpop.f32.mrf.mxu1  ;;  %4422 = vmatmul.bf16.gmra.mxu2 %v883_v34  ;;  %4600 = vmatmul.bf16.gmra.mxu0 %v1276_v61  ;;  %v1277_v34 = vrot.slane %v7553_v60, 1  ;;  %v1151_v1 = vsel %vm787_vm0, %v1146_v10, %v1150_v48  ;;  %v904_v10 = vshll.u32 %v780_v32, 16  ;;  %v1153_v48 = vshrl.u32 %v7556_v37, 16 }
 0x11d   : > { %4511 = vmatmul.bf16.gmra.mxu3 %v1139_v35  ;;  %v8190_v7 = vadd.f32 %v4334_v62, %v4246_v22  ;;  %v1278_v35 = vrot.slane %v779_v8, 1  ;;  %v1341_v22 = vrot.slane %v7554_v21, 1  ;;  %v1342_v62 = vrot.slane %v1036_v15, 1  ;;  %v7555_v15 = vld [vmem:[%s7758_s6 + $0x6c] sm:$0xff] }
 0x11e   : > { %v899_v21 = vshll.u32 %v7555_v15, 16  ;;  %v897_v51 = vshrl.u32 %v7555_v15, 16 }
 0x11f   : > { %4689 = vmatmul.bf16.gmra.mxu1 %v1340_v24  ;;  %v4285_v25 = vpop.f32.mrf.mxu2  ;;  %v1279_v8 = vsel %vm1252_vm1, %v1277_v34, %v1278_v35  ;;  %v1343_v31 = vsel %vm1252_vm1, %v1341_v22, %v1342_v62  ;;  %v1157_v34 = vrot.slane %v1155_v38, 1  ;;  %v7338_v22 = vld [vmem:[%s9311_s2 + $0x210] sm:$0xff]  ;;  %v1344_v38 = vrot.slane %v7556_v37, 1 }
 0x120   : > { %v4374_v29 = vpop.f32.mrf.mxu3  ;;  %v4286_v30 = vadd.f32 %v7966_v52, %v4285_v25  ;;  %v1021_v25 = vunpack.c.l.b16 %v324_v55  ;;  %v901_v46 = vrot.slane %v899_v21, 1  ;;  %4918 = vmatpush.bf16.msra.mxu0 %v7338_v22 }
 0x121   : > { %v4247_v58 = vpop.f32.mrf.mxu0 }
 0x122   : > { %v8194_v50 = vadd.f32 %v4374_v29, %v4286_v30  ;;  %v4248_v45 = vadd.f32 %v7966_v52, %v4247_v58  ;;  %v1037_v33 = vpack.c.b16 %v1021_v25, %v1021_v25  ;;  %v902_v62 = vor.u32 %v901_v46, %v897_v51  ;;  %v277_v25 = vld [vmem:[%s7758_s6 + $0x80] sm:$0xf] }
 0x124   : > { %v4336_v2 = vpop.f32.mrf.mxu1  ;;  %v1160_v35 = vshll.u32 %v1037_v33, 16 }
 0x125   : > { %v8197_v59 = vadd.f32 %v4336_v2, %v4248_v45 }
 0x127   : > { %v4287_v57 = vpop.f32.mrf.mxu2 }
 0x128   : > { %v4376_v61 = vpop.f32.mrf.mxu3  ;;  %v4288_v24 = vadd.f32 %v7966_v52, %v4287_v57  ;;  %v7322_v52 = vld [vmem:[%s9311_s2 + $0x190] sm:$0xff] }
 0x129   : > { %v4566_v60 = vpop.f32.mrf.mxu0  ;;  %4740 = vmatpush.bf16.msra.mxu2 %v7322_v52 }
 0x12a   : > { %v8204_v29 = vadd.f32 %v4376_v61, %v4288_v24  ;;  %v906_v24 = vrot.slane %v904_v10, 1 }
 0x12c   : > { %v4655_v30 = vpop.f32.mrf.mxu1  ;;  %4427 = vmatmul.bf16.gmra.mxu2 %v895_v63  ;;  %4605 = vmatmul.bf16.gmra.mxu0 %v1279_v8  ;;  %v1158_v63 = vor.u32 %v1157_v34, %v1153_v48  ;;  %v327_v8 = vld [vmem:[%s7763_s9 + $0x80] sm:$0xf] }
 0x12d   : > { %4516 = vmatmul.bf16.gmra.mxu3 %v1151_v1  ;;  %v1280_v1 = vrot.slane %v7555_v15, 1  ;;  %v1022_v15 = vunpack.c.l.b16 %v327_v8 }
 0x12f   : > { %4694 = vmatmul.bf16.gmra.mxu1 %v1343_v31  ;;  %v4388_v58 = vpop.f32.mrf.mxu2  ;;  %v1282_v46 = vsel %vm1252_vm1, %v1280_v1, %v1281_v23 }
 0x130   : > { %v4477_v45 = vpop.f32.mrf.mxu3  ;;  %v4389_v2 = vadd.f32 %v4388_v58, %v7977_v0  ;;  %v1162_v0 = vrot.slane %v1160_v35, 1  ;;  %v907_v58 = vsel %vm787_vm0, %v902_v62, %v906_v24  ;;  %v1038_v35 = vpack.c.b16 %v1022_v15, %v1022_v15 }
 0x131   : > { %v4568_v55 = vpop.f32.mrf.mxu0 }
 0x132   : > { %v4478_v11 = vadd.f32 %v4477_v45, %v4389_v2  ;;  %v1163_v45 = vsel %vm787_vm0, %v1158_v63, %v1162_v0  ;;  %v765_v2 = vunpack.c.l.b16 %v277_v25  ;;  %v1172_v8 = vshll.u32 %v1038_v35, 16 }
 0x134   : > { %v4657_v57 = vpop.f32.mrf.mxu1  ;;  %v4567_v61 = vadd.f32 %v4566_v60, %v4478_v11  ;;  %v1345_v60 = vrot.slane %v1037_v33, 1  ;;  %v7557_v33 = vld [vmem:[%s7758_s6 + $0x78] sm:$0xff]  ;;  %v781_v34 = vpack.c.b16 %v765_v2, %v765_v2 }
 0x135   : > { %v911_v37 = vshll.u32 %v7557_v33, 16  ;;  %v7558_v11 = vld [vmem:[%s7763_s9 + $0x78] sm:$0xff]  ;;  %v909_v63 = vshrl.u32 %v7557_v33, 16  ;;  %v1283_v2 = vrot.slane %v7557_v33, 1 }
 0x136   : > { %v8222_v31 = vadd.f32 %v4655_v30, %v4567_v61  ;;  %v1346_v10 = vsel %vm1252_vm1, %v1344_v38, %v1345_v60  ;;  %v1167_v61 = vshll.u32 %v7558_v11, 16  ;;  %v916_v1 = vshll.u32 %v781_v34, 16 }
 0x137   : > { %v4390_v21 = vpop.f32.mrf.mxu2  ;;  %v913_v0 = vrot.slane %v911_v37, 1  ;;  %v1165_v23 = vshrl.u32 %v7558_v11, 16  ;;  %v1284_v15 = vrot.slane %v781_v34, 1  ;;  %v1347_v37 = vrot.slane %v7558_v11, 1 }
 0x138   : > { %v4479_v52 = vpop.f32.mrf.mxu3  ;;  %v4391_v39 = vadd.f32 %v4390_v21, %v7989_v27  ;;  %v7346_v27 = vld [vmem:[%s9311_s2 + $0x250] sm:$0xff]  ;;  %v1169_v25 = vrot.slane %v1167_v61, 1 }
 0x139   : > { %v4571_v51 = vpop.f32.mrf.mxu0  ;;  %5007 = vmatpush.bf16.msra.mxu1 %v7346_v27  ;;  %v1348_v27 = vrot.slane %v1038_v35, 1  ;;  %v7559_v35 = vld [vmem:[%s7758_s6 + $0x84] sm:$0xff] }
 0x13a   : > { %v4480_v32 = vadd.f32 %v4479_v52, %v4391_v39  ;;  %v914_v39 = vor.u32 %v913_v0, %v909_v63  ;;  %v1285_v63 = vsel %vm1252_vm1, %v1283_v2, %v1284_v15  ;;  %v923_v11 = vshll.u32 %v7559_v35, 16 }
 0x13b   : > { %v1349_v0 = vsel %vm1252_vm1, %v1347_v37, %v1348_v27 }
 0x13c   : > { %v4660_v30 = vpop.f32.mrf.mxu1  ;;  %v4569_v48 = vadd.f32 %v4568_v55, %v4480_v32  ;;  %4432 = vmatmul.bf16.gmra.mxu2 %v907_v58  ;;  %4610 = vmatmul.bf16.gmra.mxu0 %v1282_v46  ;;  %v1170_v58 = vor.u32 %v1169_v25, %v1165_v23  ;;  %v280_v32 = vld [vmem:[%s7758_s6 + $0x8c] sm:$0xf]  ;;  %v925_v2 = vrot.slane %v923_v11, 1 }
 0x13d   : > { %4521 = vmatmul.bf16.gmra.mxu3 %v1163_v45  ;;  %v1174_v45 = vrot.slane %v1172_v8, 1  ;;  %v7560_v8 = vld [vmem:[%s7763_s9 + $0x84] sm:$0xff] }
 0x13e   : > { %v8234_v22 = vadd.f32 %v4657_v57, %v4569_v48  ;;  %v918_v57 = vrot.slane %v916_v1, 1 }
 0x13f   : > { %4699 = vmatmul.bf16.gmra.mxu1 %v1346_v10  ;;  %v4393_v62 = vpop.f32.mrf.mxu2 }
 0x140   : > { %v4482_v24 = vpop.f32.mrf.mxu3  ;;  %v4394_v55 = vadd.f32 %v4393_v62, %v8010_v20  ;;  %v330_v20 = vld [vmem:[%s7763_s9 + $0x8c] sm:$0xf]  ;;  %v919_v62 = vsel %vm787_vm0, %v914_v39, %v918_v57 }
 0x141   : > { %v4573_v52 = vpop.f32.mrf.mxu0 }
 0x142   : > { %v4483_v21 = vadd.f32 %v4482_v24, %v4394_v55  ;;  %v766_v24 = vunpack.c.l.b16 %v280_v32  ;;  %v1023_v55 = vunpack.c.l.b16 %v330_v20  ;;  %v1177_v32 = vshrl.u32 %v7560_v8, 16 }
 0x144   : > { %v4662_v38 = vpop.f32.mrf.mxu1  ;;  %v4572_v60 = vadd.f32 %v4571_v51, %v4483_v21  ;;  %v1175_v51 = vsel %vm787_vm0, %v1170_v58, %v1174_v45  ;;  %v782_v23 = vpack.c.b16 %v766_v24, %v766_v24  ;;  %v1039_v25 = vpack.c.b16 %v1023_v55, %v1023_v55 }
 0x145   : > { %v1179_v21 = vshll.u32 %v7560_v8, 16  ;;  %v921_v45 = vshrl.u32 %v7559_v35, 16  ;;  %v1286_v55 = vrot.slane %v7559_v35, 1 }
 0x146   : > { %v8239_v46 = vadd.f32 %v4660_v30, %v4572_v60  ;;  %v7329_v60 = vld [vmem:[%s9311_s2 + $0x1c8] sm:$0xff]  ;;  %v928_v15 = vshll.u32 %v782_v23, 16 }
 0x147   : > { %v4395_v10 = vpop.f32.mrf.mxu2  ;;  %4830 = vmatpush.bf16.msra.mxu3 %v7329_v60  ;;  %v1181_v20 = vrot.slane %v1179_v21, 1  ;;  %v1350_v21 = vrot.slane %v7560_v8, 1 }
 0x148   : > { %v4484_v48 = vpop.f32.mrf.mxu3  ;;  %v4396_v61 = vadd.f32 %v4395_v10, %v8019_v17  ;;  %v7321_v17 = vld [vmem:[%s9311_s2 + $0x188] sm:$0xff]  ;;  %v1184_v10 = vshll.u32 %v1039_v25, 16 }
 0x149   : > { %v4576_v34 = vpop.f32.mrf.mxu0  ;;  %4741 = vmatpush.bf16.msra.mxu2 %v7321_v17  ;;  %v1182_v24 = vor.u32 %v1181_v20, %v1177_v32 }
 0x14a   : > { %v4485_v33 = vadd.f32 %v4484_v48, %v4396_v61 }
 0x14c   : > { %v4665_v30 = vpop.f32.mrf.mxu1  ;;  %v4574_v1 = vadd.f32 %v4573_v52, %v4485_v33  ;;  %4437 = vmatmul.bf16.gmra.mxu2 %v919_v62  ;;  %4615 = vmatmul.bf16.gmra.mxu0 %v1285_v63  ;;  %v926_v62 = vor.u32 %v925_v2, %v921_v45  ;;  %v1287_v33 = vrot.slane %v782_v23, 1  ;;  %v283_v63 = vld [vmem:[%s7758_s6 + $0x98] sm:$0xf] }
 0x14d   : > { %4526 = vmatmul.bf16.gmra.mxu3 %v1175_v51  ;;  %v930_v51 = vrot.slane %v928_v15, 1 }
 0x14e   : > { %v8254_v52 = vadd.f32 %v4662_v38, %v4574_v1  ;;  %v7337_v38 = vld [vmem:[%s9311_s2 + $0x208] sm:$0xff]  ;;  %v1288_v2 = vsel %vm1252_vm1, %v1286_v55, %v1287_v33 }
 0x14f   : > { %4704 = vmatmul.bf16.gmra.mxu1 %v1349_v0  ;;  %v4398_v39 = vpop.f32.mrf.mxu2  ;;  %v333_v0 = vld [vmem:[%s7763_s9 + $0x98] sm:$0xf]  ;;  %4919 = vmatpush.bf16.msra.mxu0 %v7337_v38 }
 0x150   : > { %v4487_v57 = vpop.f32.mrf.mxu3  ;;  %v4399_v58 = vadd.f32 %v4398_v39, %v8037_v53  ;;  %v1186_v53 = vrot.slane %v1184_v10, 1  ;;  %v931_v39 = vsel %vm787_vm0, %v926_v62, %v930_v51  ;;  %v1024_v35 = vunpack.c.l.b16 %v333_v0 }
 0x151   : > { %v4578_v37 = vpop.f32.mrf.mxu0 }
 0x152   : > { %v4488_v48 = vadd.f32 %v4487_v57, %v4399_v58  ;;  %v1187_v57 = vsel %vm787_vm0, %v1182_v24, %v1186_v53  ;;  %v767_v58 = vunpack.c.l.b16 %v283_v63  ;;  %v1040_v10 = vpack.c.b16 %v1024_v35, %v1024_v35 }
 0x154   : > { %v4667_v27 = vpop.f32.mrf.mxu1  ;;  %v4577_v61 = vadd.f32 %v4576_v34, %v4488_v48  ;;  %v1351_v34 = vrot.slane %v1039_v25, 1  ;;  %v7561_v25 = vld [vmem:[%s7758_s6 + $0x90] sm:$0xff]  ;;  %v783_v20 = vpack.c.b16 %v767_v58, %v767_v58  ;;  %v1196_v0 = vshll.u32 %v1040_v10, 16 }
 0x155   : > { %v935_v8 = vshll.u32 %v7561_v25, 16  ;;  %v7562_v48 = vld [vmem:[%s7763_s9 + $0x90] sm:$0xff]  ;;  %v933_v24 = vshrl.u32 %v7561_v25, 16  ;;  %v1289_v58 = vrot.slane %v7561_v25, 1 }
 0x156   : > { %v8262_v1 = vadd.f32 %v4665_v30, %v4577_v61  ;;  %v1352_v15 = vsel %vm1252_vm1, %v1350_v21, %v1351_v34  ;;  %v1191_v61 = vshll.u32 %v7562_v48, 16  ;;  %v940_v55 = vshll.u32 %v783_v20, 16 }
 0x157   : > { %v4400_v11 = vpop.f32.mrf.mxu2  ;;  %v937_v53 = vrot.slane %v935_v8, 1  ;;  %v1189_v33 = vshrl.u32 %v7562_v48, 16  ;;  %v1290_v35 = vrot.slane %v783_v20, 1  ;;  %v1353_v8 = vrot.slane %v7562_v48, 1 }
 0x158   : > { %v4489_v17 = vpop.f32.mrf.mxu3  ;;  %v4401_v60 = vadd.f32 %v4400_v11, %v8049_v14  ;;  %v7345_v14 = vld [vmem:[%s9311_s2 + $0x248] sm:$0xff]  ;;  %v1193_v63 = vrot.slane %v1191_v61, 1 }
 0x159   : > { %v4581_v45 = vpop.f32.mrf.mxu0  ;;  %5008 = vmatpush.bf16.msra.mxu1 %v7345_v14  ;;  %v1354_v14 = vrot.slane %v1040_v10, 1  ;;  %v7563_v10 = vld [vmem:[%s7758_s6 + $0x9c] sm:$0xff] }
 0x15a   : > { %v4490_v23 = vadd.f32 %v4489_v17, %v4401_v60  ;;  %v938_v60 = vor.u32 %v937_v53, %v933_v24  ;;  %v1291_v24 = vsel %vm1252_vm1, %v1289_v58, %v1290_v35  ;;  %v947_v48 = vshll.u32 %v7563_v10, 16 }
 0x15b   : > { %v1355_v53 = vsel %vm1252_vm1, %v1353_v8, %v1354_v14 }
 0x15c   : > { %v4670_v30 = vpop.f32.mrf.mxu1  ;;  %v4579_v32 = vadd.f32 %v4578_v37, %v4490_v23  ;;  %4442 = vmatmul.bf16.gmra.mxu2 %v931_v39  ;;  %4620 = vmatmul.bf16.gmra.mxu0 %v1288_v2  ;;  %v1194_v39 = vor.u32 %v1193_v63, %v1189_v33  ;;  %v286_v23 = vld [vmem:[%s7758_s6 + $0xa4] sm:$0xf]  ;;  %v949_v58 = vrot.slane %v947_v48, 1 }
 0x15d   : > { %4531 = vmatmul.bf16.gmra.mxu3 %v1187_v57  ;;  %v1198_v57 = vrot.slane %v1196_v0, 1  ;;  %v7564_v0 = vld [vmem:[%s7763_s9 + $0x9c] sm:$0xff] }
 0x15e   : > { %v8274_v38 = vadd.f32 %v4667_v27, %v4579_v32  ;;  %v942_v27 = vrot.slane %v940_v55, 1 }
 0x15f   : > { %4709 = vmatmul.bf16.gmra.mxu1 %v1352_v15  ;;  %v4403_v62 = vpop.f32.mrf.mxu2 }
 0x160   : > { %v4492_v51 = vpop.f32.mrf.mxu3  ;;  %v4404_v37 = vadd.f32 %v4403_v62, %v8070_v43  ;;  %v336_v43 = vld [vmem:[%s7763_s9 + $0xa4] sm:$0xf]  ;;  %v943_v62 = vsel %vm787_vm0, %v938_v60, %v942_v27 }
 0x161   : > { %v4583_v17 = vpop.f32.mrf.mxu0 }
 0x162   : > { %v4493_v11 = vadd.f32 %v4492_v51, %v4404_v37  ;;  %v768_v51 = vunpack.c.l.b16 %v286_v23  ;;  %v1025_v37 = vunpack.c.l.b16 %v336_v43  ;;  %v1201_v23 = vshrl.u32 %v7564_v0, 16 }
 0x164   : > { %v4672_v21 = vpop.f32.mrf.mxu1  ;;  %v4582_v34 = vadd.f32 %v4581_v45, %v4493_v11  ;;  %v1199_v45 = vsel %vm787_vm0, %v1194_v39, %v1198_v57  ;;  %v784_v33 = vpack.c.b16 %v768_v51, %v768_v51  ;;  %v1041_v63 = vpack.c.b16 %v1025_v37, %v1025_v37 }
 0x165   : > { %v1203_v11 = vshll.u32 %v7564_v0, 16  ;;  %v945_v57 = vshrl.u32 %v7563_v10, 16  ;;  %v1292_v37 = vrot.slane %v7563_v10, 1 }
 0x166   : > { %v8279_v2 = vadd.f32 %v4670_v30, %v4582_v34  ;;  %v7328_v34 = vld [vmem:[%s9311_s2 + $0x1c0] sm:$0xff]  ;;  %v952_v35 = vshll.u32 %v784_v33, 16 }
 0x167   : > { %v4405_v15 = vpop.f32.mrf.mxu2  ;;  %4831 = vmatpush.bf16.msra.mxu3 %v7328_v34  ;;  %v1205_v43 = vrot.slane %v1203_v11, 1  ;;  %v1356_v11 = vrot.slane %v7564_v0, 1 }
 0x168   : > { %v4494_v32 = vpop.f32.mrf.mxu3  ;;  %v4406_v61 = vadd.f32 %v4405_v15, %v8079_v13  ;;  %v7320_v13 = vld [vmem:[%s9311_s2 + $0x180] sm:$0xff]  ;;  %v1208_v15 = vshll.u32 %v1041_v63, 16 }
 0x169   : > { %v4586_v20 = vpop.f32.mrf.mxu0  ;;  %4742 = vmatpush.bf16.msra.mxu2 %v7320_v13  ;;  %v1206_v51 = vor.u32 %v1205_v43, %v1201_v23 }
 0x16a   : > { %v4495_v25 = vadd.f32 %v4494_v32, %v4406_v61 }
 0x16c   : > { %v4675_v30 = vpop.f32.mrf.mxu1  ;;  %v4584_v55 = vadd.f32 %v4583_v17, %v4495_v25  ;;  %4447 = vmatmul.bf16.gmra.mxu2 %v943_v62  ;;  %4625 = vmatmul.bf16.gmra.mxu0 %v1291_v24  ;;  %v950_v62 = vor.u32 %v949_v58, %v945_v57  ;;  %v1293_v25 = vrot.slane %v784_v33, 1  ;;  %v289_v24 = vld [vmem:[%s7758_s6 + $0xb0] sm:$0xf] }
 0x16d   : > { %4536 = vmatmul.bf16.gmra.mxu3 %v1199_v45  ;;  %v954_v45 = vrot.slane %v952_v35, 1 }
 0x16e   : > { %v8294_v17 = vadd.f32 %v4672_v21, %v4584_v55  ;;  %v7336_v21 = vld [vmem:[%s9311_s2 + $0x200] sm:$0xff]  ;;  %v1294_v58 = vsel %vm1252_vm1, %v1292_v37, %v1293_v25 }
 0x16f   : > { %4714 = vmatmul.bf16.gmra.mxu1 %v1355_v53  ;;  %v4408_v60 = vpop.f32.mrf.mxu2  ;;  %v339_v53 = vld [vmem:[%s7763_s9 + $0xb0] sm:$0xf]  ;;  %4920 = vmatpush.bf16.msra.mxu0 %v7336_v21 }
 0x170   : > { %v4497_v27 = vpop.f32.mrf.mxu3  ;;  %v4409_v39 = vadd.f32 %v4408_v60, %v8097_v47  ;;  %v1210_v47 = vrot.slane %v1208_v15, 1  ;;  %v955_v60 = vsel %vm787_vm0, %v950_v62, %v954_v45  ;;  %v1026_v10 = vunpack.c.l.b16 %v339_v53 }
 0x171   : > { %v4588_v8 = vpop.f32.mrf.mxu0 }
 0x172   : > { %v4498_v32 = vadd.f32 %v4497_v27, %v4409_v39  ;;  %v1211_v27 = vsel %vm787_vm0, %v1206_v51, %v1210_v47  ;;  %v769_v39 = vunpack.c.l.b16 %v289_v24  ;;  %v1042_v15 = vpack.c.b16 %v1026_v10, %v1026_v10 }
 0x174   : > { %v4677_v14 = vpop.f32.mrf.mxu1  ;;  %v4587_v61 = vadd.f32 %v4586_v20, %v4498_v32  ;;  %v1357_v20 = vrot.slane %v1041_v63, 1  ;;  %v7565_v63 = vld [vmem:[%s7758_s6 + $0xa8] sm:$0xff]  ;;  %v785_v43 = vpack.c.b16 %v769_v39, %v769_v39  ;;  %v1220_v53 = vshll.u32 %v1042_v15, 16 }
 0x175   : > { %v959_v0 = vshll.u32 %v7565_v63, 16  ;;  %v7566_v32 = vld [vmem:[%s7763_s9 + $0xa8] sm:$0xff]  ;;  %v957_v51 = vshrl.u32 %v7565_v63, 16  ;;  %v1295_v39 = vrot.slane %v7565_v63, 1 }
 0x176   : > { %v8302_v55 = vadd.f32 %v4675_v30, %v4587_v61  ;;  %v1358_v35 = vsel %vm1252_vm1, %v1356_v11, %v1357_v20  ;;  %v1215_v61 = vshll.u32 %v7566_v32, 16  ;;  %v964_v37 = vshll.u32 %v785_v43, 16 }
 0x177   : > { %v4410_v48 = vpop.f32.mrf.mxu2  ;;  %v961_v47 = vrot.slane %v959_v0, 1  ;;  %v1213_v25 = vshrl.u32 %v7566_v32, 16  ;;  %v1296_v10 = vrot.slane %v785_v43, 1  ;;  %v1359_v0 = vrot.slane %v7566_v32, 1 }
 0x178   : > { %v4499_v13 = vpop.f32.mrf.mxu3  ;;  %v4411_v34 = vadd.f32 %v4410_v48, %v8109_v16  ;;  %v7344_v16 = vld [vmem:[%s9311_s2 + $0x240] sm:$0xff]  ;;  %v1217_v24 = vrot.slane %v1215_v61, 1 }
 0x179   : > { %v4591_v57 = vpop.f32.mrf.mxu0  ;;  %5009 = vmatpush.bf16.msra.mxu1 %v7344_v16  ;;  %v1360_v16 = vrot.slane %v1042_v15, 1  ;;  %v7567_v15 = vld [vmem:[%s7758_s6 + $0xb4] sm:$0xff] }
 0x17a   : > { %v4500_v33 = vadd.f32 %v4499_v13, %v4411_v34  ;;  %v962_v34 = vor.u32 %v961_v47, %v957_v51  ;;  %v1297_v51 = vsel %vm1252_vm1, %v1295_v39, %v1296_v10  ;;  %v971_v32 = vshll.u32 %v7567_v15, 16 }
 0x17b   : > { %v1361_v47 = vsel %vm1252_vm1, %v1359_v0, %v1360_v16 }
 0x17c   : > { %v4680_v30 = vpop.f32.mrf.mxu1  ;;  %v4589_v23 = vadd.f32 %v4588_v8, %v4500_v33  ;;  %4452 = vmatmul.bf16.gmra.mxu2 %v955_v60  ;;  %4630 = vmatmul.bf16.gmra.mxu0 %v1294_v58  ;;  %v1218_v60 = vor.u32 %v1217_v24, %v1213_v25  ;;  %v292_v33 = vld [vmem:[%s7758_s6 + $0xbc] sm:$0xf]  ;;  %v973_v39 = vrot.slane %v971_v32, 1 }
 0x17d   : > { %4541 = vmatmul.bf16.gmra.mxu3 %v1211_v27  ;;  %v1222_v27 = vrot.slane %v1220_v53, 1  ;;  %v7568_v53 = vld [vmem:[%s7763_s9 + $0xb4] sm:$0xff] }
 0x17e   : > { %v8314_v21 = vadd.f32 %v4677_v14, %v4589_v23  ;;  %v966_v14 = vrot.slane %v964_v37, 1  ;;  %v1362_v32 = vrot.slane %v7568_v53, 1 }
 0x17f   : > { %4719 = vmatmul.bf16.gmra.mxu1 %v1358_v35  ;;  %v4413_v62 = vpop.f32.mrf.mxu2 }
 0x180   : > { %v4502_v45 = vpop.f32.mrf.mxu3  ;;  %v4414_v8 = vadd.f32 %v4413_v62, %v8130_v54  ;;  %v342_v54 = vld [vmem:[%s7763_s9 + $0xbc] sm:$0xf]  ;;  %v967_v62 = vsel %vm787_vm0, %v962_v34, %v966_v14 }
 0x181   : > { %v4593_v13 = vpop.f32.mrf.mxu0 }
 0x182   : > { %v4503_v48 = vadd.f32 %v4502_v45, %v4414_v8  ;;  %v770_v45 = vunpack.c.l.b16 %v292_v33  ;;  %v1027_v8 = vunpack.c.l.b16 %v342_v54  ;;  %v1225_v33 = vshrl.u32 %v7568_v53, 16 }
 0x184   : > { %v4682_v11 = vpop.f32.mrf.mxu1  ;;  %v4592_v20 = vadd.f32 %v4591_v57, %v4503_v48  ;;  %v1223_v57 = vsel %vm787_vm0, %v1218_v60, %v1222_v27  ;;  %v786_v25 = vpack.c.b16 %v770_v45, %v770_v45  ;;  %v1043_v24 = vpack.c.b16 %v1027_v8, %v1027_v8 }
 0x185   : > { %v1227_v48 = vshll.u32 %v7568_v53, 16  ;;  %v969_v27 = vshrl.u32 %v7567_v15, 16  ;;  %v1298_v8 = vrot.slane %v7567_v15, 1 }
 0x186   : > { %v8319_v58 = vadd.f32 %v4680_v30, %v4592_v20  ;;  %v7367_v20 = vld [vmem:[%s9311_s2 + $0x2f8] sm:$0xff]  ;;  %v976_v10 = vshll.u32 %v786_v25, 16 }
 0x187   : > { %v4415_v35 = vpop.f32.mrf.mxu2  ;;  %5180 = vmatpush.bf16.msrb.mxu3 %v7367_v20  ;;  %v1229_v54 = vrot.slane %v1227_v48, 1  ;;  %v6071_v20 = vld [vmem:[%s7763_s9 + $0x14] sm:$0xf] }
 0x188   : > { %v4504_v23 = vpop.f32.mrf.mxu3  ;;  %v4416_v61 = vadd.f32 %v4415_v35, %v8139_v26  ;;  %v7359_v26 = vld [vmem:[%s9311_s2 + $0x2b8] sm:$0xff]  ;;  %v1232_v35 = vshll.u32 %v1043_v24, 16  ;;  %v1845_v53 = vunpack.c.l.b16 %v6071_v20 }
 0x189   : > { %v4596_v43 = vpop.f32.mrf.mxu0  ;;  %5091 = vmatpush.bf16.msrb.mxu2 %v7359_v26  ;;  %v1230_v45 = vor.u32 %v1229_v54, %v1225_v33  ;;  %v6023_v26 = vld [vmem:[%s7758_s6 + $0x14] sm:$0xf]  ;;  %v7224_v33 = vld [vmem:[%s7763_s9 + $0xc] sm:$0xff] }
 0x18a   : > { %v4505_v63 = vadd.f32 %v4504_v23, %v4416_v61 }
 0x18c   : > { %v4685_v30 = vpop.f32.mrf.mxu1  ;;  %v4594_v37 = vadd.f32 %v4593_v13, %v4505_v63  ;;  %4457 = vmatmul.bf16.gmra.mxu2 %v967_v62  ;;  %4635 = vmatmul.bf16.gmra.mxu0 %v1297_v51  ;;  %v974_v62 = vor.u32 %v973_v39, %v969_v27  ;;  %v1299_v63 = vrot.slane %v786_v25, 1  ;;  %v7208_v27 = vld [vmem:[%s7758_s6 + $0xc] sm:$0xff] }
 0x18d   : > { %4546 = vmatmul.bf16.gmra.mxu3 %v1223_v57  ;;  %v978_v57 = vrot.slane %v976_v10, 1 }
 0x18e   : > { %v8334_v13 = vadd.f32 %v4682_v11, %v4594_v37  ;;  %v7375_v11 = vld [vmem:[%s9311_s2 + $0x338] sm:$0xff]  ;;  %v1300_v25 = vsel %vm1252_vm1, %v1298_v8, %v1299_v63  ;;  %v1622_v8 = vshrl.u32 %v7208_v27, 16 }
 0x18f   : > { %4724 = vmatmul.bf16.gmra.mxu1 %v1361_v47  ;;  %v4418_v34 = vpop.f32.mrf.mxu2  ;;  %5269 = vmatpush.bf16.msrb.mxu0 %v7375_v11 }
 0x190   : > { %v4507_v14 = vpop.f32.mrf.mxu3  ;;  %v4419_v60 = vadd.f32 %v4418_v34, %v8157_v56  ;;  %v1234_v56 = vrot.slane %v1232_v35, 1  ;;  %v979_v34 = vsel %vm787_vm0, %v974_v62, %v978_v57  ;;  %v1624_v35 = vshll.u32 %v7208_v27, 16 }
 0x191   : > { %v4598_v0 = vpop.f32.mrf.mxu0  ;;  %v8358_v62 = vpack.c.b16 %v1845_v53, %v1845_v53  ;;  %v1880_v57 = vshll.u32 %v7224_v33, 16  ;;  %v6074_v53 = vld [vmem:[%s7763_s9 + $0x20] sm:$0xf] }
 0x192   : > { %v4508_v23 = vadd.f32 %v4507_v14, %v4419_v60  ;;  %v1235_v14 = vsel %vm787_vm0, %v1230_v45, %v1234_v56  ;;  %v1626_v63 = vrot.slane %v1624_v35, 1 }
 0x194   : > { %v4687_v16 = vpop.f32.mrf.mxu1  ;;  %v4597_v61 = vadd.f32 %v4596_v43, %v4508_v23  ;;  %v1363_v43 = vrot.slane %v1043_v24, 1 }
 0x196   : > { %v8340_v51 = vadd.f32 %v4685_v30, %v4597_v61  ;;  %v1589_v30 = vunpack.c.l.b16 %v6023_v26  ;;  %v1364_v10 = vsel %vm1252_vm1, %v1362_v32, %v1363_v43  ;;  %v1878_v32 = vshrl.u32 %v7224_v33, 16 }
 0x197   : > { %v4420_v47 = vpop.f32.mrf.mxu2  ;;  %v1885_v43 = vshll.u32 %v8358_v62, 16 }
 0x198   : > { %v4509_v37 = vpop.f32.mrf.mxu3  ;;  %v4421_v48 = vadd.f32 %v4420_v47, %v8172_v36  ;;  %v7383_v36 = vld [vmem:[%s9311_s2 + $0x378] sm:$0xff]  ;;  %v8354_v54 = vpack.c.b16 %v1589_v30, %v1589_v30  ;;  %v6026_v30 = vld [vmem:[%s7758_s6 + $0x20] sm:$0xf] }
 0x199   : > { %v4601_v15 = vpop.f32.mrf.mxu0  ;;  %5358 = vmatpush.bf16.msrb.mxu1 %v7383_v36 }
 0x19a   : > { %v4510_v60 = vadd.f32 %v4509_v37, %v4421_v48  ;;  %v1629_v47 = vshll.u32 %v8354_v54, 16  ;;  %v1627_v48 = vor.u32 %v1626_v63, %v1622_v8  ;;  %v7358_v8 = vld [vmem:[%s9311_s2 + $0x2b0] sm:$0xff] }
 0x19b   : > { %5092 = vmatpush.bf16.msrb.mxu2 %v7358_v8  ;;  %v6029_v8 = vld [vmem:[%s7758_s6 + $0x2c] sm:$0xf] }
 0x19c   : > { %v4690_v39 = vpop.f32.mrf.mxu1  ;;  %v4599_v24 = vadd.f32 %v4598_v0, %v4510_v60  ;;  %4462 = vmatmul.bf16.gmra.mxu2 %v979_v34  ;;  %4640 = vmatmul.bf16.gmra.mxu0 %v1300_v25  ;;  %v1631_v20 = vrot.slane %v1629_v47, 1  ;;  %v1887_v25 = vrot.slane %v1885_v43, 1 }
 0x19d   : > { %4551 = vmatmul.bf16.gmra.mxu3 %v1235_v14 }
 0x19e   : > { %v8356_v23 = vadd.f32 %v4687_v16, %v4599_v24  ;;  %v1882_v16 = vrot.slane %v1880_v57, 1  ;;  %v1632_v35 = vsel %vm787_vm0, %v1627_v48, %v1631_v20 }
 0x19f   : > { %4729 = vmatmul.bf16.gmra.mxu1 %v1364_v10  ;;  %v4423_v61 = vpop.f32.mrf.mxu2 }
 0x1a0   : > { %v4512_v11 = vpop.f32.mrf.mxu3  ;;  %v4424_v0 = vadd.f32 %v4423_v61, %v8190_v7  ;;  %v1883_v60 = vor.u32 %v1882_v16, %v1878_v32  ;;  %v7209_v61 = vld [vmem:[%s7758_s6 + $0x18] sm:$0xff] }
 0x1a1   : > { %v4603_v56 = vpop.f32.mrf.mxu0  ;;  %v1636_v47 = vshll.u32 %v7209_v61, 16  ;;  %v1634_v20 = vshrl.u32 %v7209_v61, 16 }
 0x1a2   : > { %v4513_v45 = vadd.f32 %v4512_v11, %v4424_v0  ;;  %v1590_v11 = vunpack.c.l.b16 %v6026_v30  ;;  %v1888_v57 = vsel %vm787_vm0, %v1883_v60, %v1887_v25  ;;  %v7225_v0 = vld [vmem:[%s7763_s9 + $0x18] sm:$0xff] }
 0x1a3   : > { %v1890_v25 = vshrl.u32 %v7225_v0, 16 }
 0x1a4   : > { %v4692_v37 = vpop.f32.mrf.mxu1  ;;  %v4602_v26 = vadd.f32 %v4601_v15, %v4513_v45  ;;  %v8378_v63 = vpack.c.b16 %v1590_v11, %v1590_v11 }
 0x1a6   : > { %v8363_v34 = vadd.f32 %v4690_v39, %v4602_v26  ;;  %v1846_v39 = vunpack.c.l.b16 %v6074_v53  ;;  %v7374_v53 = vld [vmem:[%s9311_s2 + $0x330] sm:$0xff] }
 0x1a7   : > { %v4425_v7 = vpop.f32.mrf.mxu2  ;;  %5270 = vmatpush.bf16.msrb.mxu0 %v7374_v53 }
 0x1a8   : > { %v4514_v14 = vpop.f32.mrf.mxu3  ;;  %v4426_v10 = vadd.f32 %v4425_v7, %v8197_v59  ;;  %v7366_v59 = vld [vmem:[%s9311_s2 + $0x2f0] sm:$0xff]  ;;  %v1638_v7 = vrot.slane %v1636_v47, 1  ;;  %v6077_v47 = vld [vmem:[%s7763_s9 + $0x2c] sm:$0xf] }
 0x1a9   : > { %v4606_v36 = vpop.f32.mrf.mxu0  ;;  %5181 = vmatpush.bf16.msrb.mxu3 %v7366_v59 }
 0x1aa   : > { %v4515_v24 = vadd.f32 %v4514_v14, %v4426_v10  ;;  %v1641_v14 = vshll.u32 %v8378_v63, 16 }
 0x1ac   : > { %v4695_v15 = vpop.f32.mrf.mxu1  ;;  %v4604_v45 = vadd.f32 %v4603_v56, %v4515_v24  ;;  %4743 = vmatmul.bf16.vlgmr.msra.gmra.mxu2 %v7208_v27  ;;  %4921 = vmatmul.bf16.vlgmr.msra.gmra.mxu0 %v1632_v35  ;;  %v8382_v27 = vpack.c.b16 %v1846_v39, %v1846_v39  ;;  %v1643_v24 = vrot.slane %v1641_v14, 1 }
 0x1ad   : > { %4832 = vmatmul.bf16.vlgmr.msra.gmra.mxu3 %v7224_v33  ;;  %v1892_v33 = vshll.u32 %v7225_v0, 16 }
 0x1ae   : > { %v8380_v32 = vadd.f32 %v4692_v37, %v4604_v45  ;;  %v1897_v30 = vshll.u32 %v8382_v27, 16 }
 0x1af   : > { %5010 = vmatmul.bf16.vlgmr.msra.gmra.mxu1 %v1888_v57  ;;  %v4428_v16 = vpop.f32.mrf.mxu2  ;;  %v1894_v37 = vrot.slane %v1892_v33, 1  ;;  %v7210_v33 = vld [vmem:[%s7758_s6 + $0x24] sm:$0xff] }
 0x1b0   : > { %v4517_v56 = vpop.f32.mrf.mxu3  ;;  %v4429_v43 = vadd.f32 %v4428_v16, %v7986_v18  ;;  %v1639_v18 = vor.u32 %v1638_v7, %v1634_v20  ;;  %v1899_v45 = vrot.slane %v1897_v30, 1  ;;  %v7226_v7 = vld [vmem:[%s7763_s9 + $0x24] sm:$0xff] }
 0x1b1   : > { %v4608_v48 = vpop.f32.mrf.mxu0  ;;  %v1895_v39 = vor.u32 %v1894_v37, %v1890_v25  ;;  %v7382_v25 = vld [vmem:[%s9311_s2 + $0x370] sm:$0xff]  ;;  %v1648_v37 = vshll.u32 %v7210_v33, 16 }
 0x1b2   : > { %v4518_v26 = vadd.f32 %v4517_v56, %v4429_v43  ;;  %v1644_v56 = vsel %vm787_vm0, %v1639_v18, %v1643_v24  ;;  %v1591_v43 = vunpack.c.l.b16 %v6029_v8  ;;  %v1904_v24 = vshll.u32 %v7226_v7, 16  ;;  %5359 = vmatpush.bf16.msrb.mxu1 %v7382_v25  ;;  %v6032_v25 = vld [vmem:[%s7758_s6 + $0x38] sm:$0xf] }
 0x1b3   : > { %v1900_v20 = vsel %vm787_vm0, %v1895_v39, %v1899_v45  ;;  %v1902_v8 = vshrl.u32 %v7226_v7, 16 }
 0x1b4   : > { %v4697_v60 = vpop.f32.mrf.mxu1  ;;  %v4607_v10 = vadd.f32 %v4606_v36, %v4518_v26 }
 0x1b6   : > { %v8390_v35 = vadd.f32 %v4695_v15, %v4607_v10  ;;  %v1847_v15 = vunpack.c.l.b16 %v6077_v47 }
 0x1b7   : > { %v4430_v11 = vpop.f32.mrf.mxu2 }
 0x1b8   : > { %v4519_v57 = vpop.f32.mrf.mxu3  ;;  %v4431_v59 = vadd.f32 %v4430_v11, %v8001_v49  ;;  %v8402_v49 = vpack.c.b16 %v1591_v43, %v1591_v43  ;;  %v8406_v18 = vpack.c.b16 %v1847_v15, %v1847_v15  ;;  %v1646_v11 = vshrl.u32 %v7210_v33, 16 }
 0x1b9   : > { %v4611_v16 = vpop.f32.mrf.mxu0 }
 0x1ba   : > { %v4520_v36 = vadd.f32 %v4519_v57, %v4431_v59  ;;  %9334 = vst [vmem:[#allocation2_spill] sm:$0xff] %v8402_v49  ;;  %v1650_v57 = vrot.slane %v1648_v37, 1  ;;  %v1653_v39 = vshll.u32 %v8402_v49, 16  ;;  %v1909_v59 = vshll.u32 %v8406_v18, 16  ;;  %v7211_v49 = vld [vmem:[%s7758_s6 + $0x30] sm:$0xff] }
 0x1bb   : > { %9335 = vst [vmem:[#allocation3_spill] sm:$0xff] %v8406_v18  ;;  %v1592_v18 = vunpack.c.l.b16 %v6032_v25 }
 0x1bc   : > { %v4700_v26 = vpop.f32.mrf.mxu1  ;;  %v4609_v14 = vadd.f32 %v4608_v48, %v4520_v36  ;;  %4748 = vmatmul.bf16.gmra.mxu2 %v7209_v61  ;;  %4926 = vmatmul.bf16.gmra.mxu0 %v1644_v56  ;;  %v1651_v36 = vor.u32 %v1650_v57, %v1646_v11  ;;  %v1655_v56 = vrot.slane %v1653_v39, 1  ;;  %v7227_v11 = vld [vmem:[%s7763_s9 + $0x30] sm:$0xff]  ;;  %v7357_v39 = vld [vmem:[%s9311_s2 + $0x2a8] sm:$0xff] }
 0x1bd   : > { %4837 = vmatmul.bf16.gmra.mxu3 %v7225_v0  ;;  %5093 = vmatpush.bf16.msrb.mxu2 %v7357_v39  ;;  %v1914_v25 = vshrl.u32 %v7227_v11, 16 }
 0x1be   : > { %v8404_v30 = vadd.f32 %v4697_v60, %v4609_v14  ;;  %v1906_v60 = vrot.slane %v1904_v24, 1  ;;  %v1911_v14 = vrot.slane %v1909_v59, 1  ;;  %v1656_v24 = vsel %vm787_vm0, %v1651_v36, %v1655_v56 }
 0x1bf   : > { %5015 = vmatmul.bf16.gmra.mxu1 %v1900_v20  ;;  %v4433_v10 = vpop.f32.mrf.mxu2 }
 0x1c0   : > { %v4522_v53 = vpop.f32.mrf.mxu3  ;;  %v4434_v61 = vadd.f32 %v4433_v10, %v8016_v12  ;;  %v1907_v15 = vor.u32 %v1906_v60, %v1902_v8  ;;  %v6080_v10 = vld [vmem:[%s7763_s9 + $0x38] sm:$0xf]  ;;  %v8426_v8 = vpack.c.b16 %v1592_v18, %v1592_v18  ;;  %v1660_v60 = vshll.u32 %v7211_v49, 16 }
 0x1c1   : > { %v4613_v48 = vpop.f32.mrf.mxu0 }
 0x1c2   : > { %v4523_v0 = vadd.f32 %v4522_v53, %v4434_v61  ;;  %v1665_v18 = vshll.u32 %v8426_v8, 16 }
 0x1c4   : > { %v4702_v45 = vpop.f32.mrf.mxu1  ;;  %v4612_v47 = vadd.f32 %v4611_v16, %v4523_v0  ;;  %v1912_v0 = vsel %vm787_vm0, %v1907_v15, %v1911_v14  ;;  %v1662_v15 = vrot.slane %v1660_v60, 1  ;;  %v6035_v60 = vld [vmem:[%s7758_s6 + $0x44] sm:$0xf] }
 0x1c6   : > { %v8411_v43 = vadd.f32 %v4700_v26, %v4612_v47  ;;  %v1848_v26 = vunpack.c.l.b16 %v6080_v10 }
 0x1c7   : > { %v4435_v12 = vpop.f32.mrf.mxu2 }
 0x1c8   : > { %v4524_v20 = vpop.f32.mrf.mxu3  ;;  %v4436_v37 = vadd.f32 %v4435_v12, %v8028_v44  ;;  %v7365_v44 = vld [vmem:[%s9311_s2 + $0x2e8] sm:$0xff] }
 0x1c9   : > { %v4616_v61 = vpop.f32.mrf.mxu0  ;;  %5182 = vmatpush.bf16.msrb.mxu3 %v7365_v44 }
 0x1ca   : > { %v4525_v53 = vadd.f32 %v4524_v20, %v4436_v37  ;;  %v1658_v20 = vshrl.u32 %v7211_v49, 16 }
 0x1cc   : > { %v4705_v16 = vpop.f32.mrf.mxu1  ;;  %v4614_v57 = vadd.f32 %v4613_v48, %v4525_v53  ;;  %4753 = vmatmul.bf16.gmra.mxu2 %v7210_v33  ;;  %4931 = vmatmul.bf16.gmra.mxu0 %v1656_v24  ;;  %v8430_v33 = vpack.c.b16 %v1848_v26, %v1848_v26  ;;  %v7373_v53 = vld [vmem:[%s9311_s2 + $0x328] sm:$0xff]  ;;  %v1667_v24 = vrot.slane %v1665_v18, 1  ;;  %v7228_v18 = vld [vmem:[%s7763_s9 + $0x3c] sm:$0xff] }
 0x1cd   : > { %4842 = vmatmul.bf16.gmra.mxu3 %v7226_v7  ;;  %v1916_v7 = vshll.u32 %v7227_v11, 16  ;;  %5271 = vmatpush.bf16.msrb.mxu0 %v7373_v53 }
 0x1ce   : > { %v8428_v59 = vadd.f32 %v4702_v45, %v4614_v57  ;;  %9336 = vst [vmem:[#allocation4_spill] sm:$0xff] %v8430_v33  ;;  %v1921_v37 = vshll.u32 %v8430_v33, 16  ;;  %v1593_v33 = vunpack.c.l.b16 %v6035_v60  ;;  %v1926_v60 = vshrl.u32 %v7228_v18, 16 }
 0x1cf   : > { %5020 = vmatmul.bf16.gmra.mxu1 %v1912_v0  ;;  %v4438_v47 = vpop.f32.mrf.mxu2  ;;  %v1918_v45 = vrot.slane %v1916_v7, 1 }
 0x1d0   : > { %v4527_v48 = vpop.f32.mrf.mxu3  ;;  %v4439_v36 = vadd.f32 %v4438_v47, %v8046_v6  ;;  %v1663_v6 = vor.u32 %v1662_v15, %v1658_v20  ;;  %v1923_v44 = vrot.slane %v1921_v37, 1 }
 0x1d1   : > { %v4618_v12 = vpop.f32.mrf.mxu0  ;;  %v1919_v39 = vor.u32 %v1918_v45, %v1914_v25  ;;  %v7381_v25 = vld [vmem:[%s9311_s2 + $0x368] sm:$0xff] }
 0x1d2   : > { %v4528_v56 = vadd.f32 %v4527_v48, %v4439_v36  ;;  %v6083_v48 = vld [vmem:[%s7763_s9 + $0x44] sm:$0xf]  ;;  %v1668_v36 = vsel %vm787_vm0, %v1663_v6, %v1667_v24  ;;  %5360 = vmatpush.bf16.msrb.mxu1 %v7381_v25 }
 0x1d3   : > { %v1924_v15 = vsel %vm787_vm0, %v1919_v39, %v1923_v44 }
 0x1d4   : > { %v4707_v14 = vpop.f32.mrf.mxu1  ;;  %v4617_v10 = vadd.f32 %v4616_v61, %v4528_v56  ;;  %v7212_v56 = vld [vmem:[%s7758_s6 + $0x3c] sm:$0xff] }
 0x1d5   : > { %v1672_v45 = vshll.u32 %v7212_v56, 16 }
 0x1d6   : > { %v8438_v0 = vadd.f32 %v4705_v16, %v4617_v10  ;;  %v1849_v16 = vunpack.c.l.b16 %v6083_v48 }
 0x1d7   : > { %v4440_v26 = vpop.f32.mrf.mxu2  ;;  %v1674_v39 = vrot.slane %v1672_v45, 1  ;;  %v6038_v45 = vld [vmem:[%s7758_s6 + $0x50] sm:$0xf] }
 0x1d8   : > { %v4529_v57 = vpop.f32.mrf.mxu3  ;;  %v4441_v47 = vadd.f32 %v4440_v26, %v8061_v41  ;;  %v8450_v41 = vpack.c.b16 %v1593_v33, %v1593_v33  ;;  %v8454_v24 = vpack.c.b16 %v1849_v16, %v1849_v16  ;;  %v1928_v26 = vshll.u32 %v7228_v18, 16 }
 0x1d9   : > { %v4621_v7 = vpop.f32.mrf.mxu0 }
 0x1da   : > { %v4530_v61 = vadd.f32 %v4529_v57, %v4441_v47  ;;  %9337 = vst [vmem:[#allocation5_spill] sm:$0xff] %v8450_v41  ;;  %v1670_v57 = vshrl.u32 %v7212_v56, 16  ;;  %v1677_v33 = vshll.u32 %v8450_v41, 16  ;;  %v1933_v47 = vshll.u32 %v8454_v24, 16 }
 0x1db   : > { %9339 = vst [vmem:[#allocation7_spill] sm:$0xff] %v8454_v24  ;;  %v1594_v24 = vunpack.c.l.b16 %v6038_v45 }
 0x1dc   : > { %v4710_v20 = vpop.f32.mrf.mxu1  ;;  %v4619_v10 = vadd.f32 %v4618_v12, %v4530_v61  ;;  %4758 = vmatmul.bf16.gmra.mxu2 %v7211_v49  ;;  %4936 = vmatmul.bf16.gmra.mxu0 %v1668_v36  ;;  %v1675_v61 = vor.u32 %v1674_v39, %v1670_v57  ;;  %v1679_v36 = vrot.slane %v1677_v33, 1  ;;  %v1935_v25 = vrot.slane %v1933_v47, 1  ;;  %v7229_v57 = vld [vmem:[%s7763_s9 + $0x48] sm:$0xff]  ;;  %v7356_v33 = vld [vmem:[%s9311_s2 + $0x2a0] sm:$0xff] }
 0x1dd   : > { %4847 = vmatmul.bf16.gmra.mxu3 %v7227_v11  ;;  %5094 = vmatpush.bf16.msrb.mxu2 %v7356_v33  ;;  %v1938_v45 = vshrl.u32 %v7229_v57, 16 }
 0x1de   : > { %v8452_v37 = vadd.f32 %v4707_v14, %v4619_v10  ;;  %v1930_v14 = vrot.slane %v1928_v26, 1  ;;  %v1680_v26 = vsel %vm787_vm0, %v1675_v61, %v1679_v36 }
 0x1df   : > { %5025 = vmatmul.bf16.gmra.mxu1 %v1924_v15  ;;  %v4443_v53 = vpop.f32.mrf.mxu2 }
 0x1e0   : > { %9338 = vst [vmem:[#allocation6_spill] sm:$0xff] %v8452_v37  ;;  %v4532_v6 = vpop.f32.mrf.mxu3  ;;  %v4444_v49 = vadd.f32 %v4443_v53, %v8076_v4  ;;  %v1931_v10 = vor.u32 %v1930_v14, %v1926_v60  ;;  %v7213_v37 = vld [vmem:[%s7758_s6 + $0x48] sm:$0xff]  ;;  %v8474_v60 = vpack.c.b16 %v1594_v24, %v1594_v24 }
 0x1e1   : > { %v4623_v12 = vpop.f32.mrf.mxu0  ;;  %v1684_v14 = vshll.u32 %v7213_v37, 16 }
 0x1e2   : > { %v4533_v11 = vadd.f32 %v4532_v6, %v4444_v49  ;;  %v6086_v6 = vld [vmem:[%s7763_s9 + $0x50] sm:$0xf]  ;;  %v1689_v24 = vshll.u32 %v8474_v60, 16 }
 0x1e4   : > { %v4712_v44 = vpop.f32.mrf.mxu1  ;;  %v4622_v48 = vadd.f32 %v4621_v7, %v4533_v11  ;;  %v1936_v11 = vsel %vm787_vm0, %v1931_v10, %v1935_v25  ;;  %v1686_v10 = vrot.slane %v1684_v14, 1  ;;  %v6041_v14 = vld [vmem:[%s7758_s6 + $0x5c] sm:$0xf] }
 0x1e6   : > { %v8459_v15 = vadd.f32 %v4710_v20, %v4622_v48  ;;  %v1850_v20 = vunpack.c.l.b16 %v6086_v6 }
 0x1e7   : > { %v4445_v4 = vpop.f32.mrf.mxu2 }
 0x1e8   : > { %v4534_v16 = vpop.f32.mrf.mxu3  ;;  %v4446_v53 = vadd.f32 %v4445_v4, %v8088_v40  ;;  %v7364_v40 = vld [vmem:[%s9311_s2 + $0x2e0] sm:$0xff] }
 0x1e9   : > { %v4626_v41 = vpop.f32.mrf.mxu0  ;;  %5183 = vmatpush.bf16.msrb.mxu3 %v7364_v40 }
 0x1ea   : > { %v4535_v49 = vadd.f32 %v4534_v16, %v4446_v53  ;;  %v1682_v16 = vshrl.u32 %v7213_v37, 16 }
 0x1ec   : > { %v4715_v7 = vpop.f32.mrf.mxu1  ;;  %v4624_v39 = vadd.f32 %v4623_v12, %v4535_v49  ;;  %4763 = vmatmul.bf16.gmra.mxu2 %v7212_v56  ;;  %4941 = vmatmul.bf16.gmra.mxu0 %v1680_v26  ;;  %v8478_v56 = vpack.c.b16 %v1850_v20, %v1850_v20  ;;  %v7372_v49 = vld [vmem:[%s9311_s2 + $0x320] sm:$0xff]  ;;  %v1691_v26 = vrot.slane %v1689_v24, 1  ;;  %v7230_v24 = vld [vmem:[%s7763_s9 + $0x54] sm:$0xff] }
 0x1ed   : > { %4852 = vmatmul.bf16.gmra.mxu3 %v7228_v18  ;;  %v1940_v18 = vshll.u32 %v7229_v57, 16  ;;  %5272 = vmatpush.bf16.msrb.mxu0 %v7372_v49 }
 0x1ee   : > { %v8476_v47 = vadd.f32 %v4712_v44, %v4624_v39  ;;  %9340 = vst [vmem:[#allocation8_spill] sm:$0xff] %v8478_v56  ;;  %v1945_v53 = vshll.u32 %v8478_v56, 16  ;;  %v1595_v56 = vunpack.c.l.b16 %v6041_v14  ;;  %v1950_v14 = vshrl.u32 %v7230_v24, 16 }
 0x1ef   : > { %5030 = vmatmul.bf16.gmra.mxu1 %v1936_v11  ;;  %v4448_v48 = vpop.f32.mrf.mxu2  ;;  %v1942_v44 = vrot.slane %v1940_v18, 1 }
 0x1f0   : > { %v4537_v12 = vpop.f32.mrf.mxu3  ;;  %v4449_v61 = vadd.f32 %v4448_v48, %v8106_v5  ;;  %v1687_v5 = vor.u32 %v1686_v10, %v1682_v16  ;;  %v1947_v40 = vrot.slane %v1945_v53, 1 }
 0x1f1   : > { %v4628_v4 = vpop.f32.mrf.mxu0  ;;  %v1943_v33 = vor.u32 %v1942_v44, %v1938_v45  ;;  %v7380_v45 = vld [vmem:[%s9311_s2 + $0x360] sm:$0xff] }
 0x1f2   : > { %v4538_v36 = vadd.f32 %v4537_v12, %v4449_v61  ;;  %v6089_v12 = vld [vmem:[%s7763_s9 + $0x5c] sm:$0xf]  ;;  %v1692_v61 = vsel %vm787_vm0, %v1687_v5, %v1691_v26  ;;  %5361 = vmatpush.bf16.msrb.mxu1 %v7380_v45 }
 0x1f3   : > { %v1948_v10 = vsel %vm787_vm0, %v1943_v33, %v1947_v40 }
 0x1f4   : > { %v4717_v25 = vpop.f32.mrf.mxu1  ;;  %v4627_v6 = vadd.f32 %v4626_v41, %v4538_v36  ;;  %v7214_v36 = vld [vmem:[%s7758_s6 + $0x54] sm:$0xff] }
 0x1f5   : > { %v1696_v44 = vshll.u32 %v7214_v36, 16 }
 0x1f6   : > { %v8486_v11 = vadd.f32 %v4715_v7, %v4627_v6  ;;  %v1851_v7 = vunpack.c.l.b16 %v6089_v12 }
 0x1f7   : > { %v4450_v20 = vpop.f32.mrf.mxu2  ;;  %v1698_v33 = vrot.slane %v1696_v44, 1  ;;  %v6044_v44 = vld [vmem:[%s7758_s6 + $0x68] sm:$0xf] }
 0x1f8   : > { %v4539_v39 = vpop.f32.mrf.mxu3  ;;  %v4451_v48 = vadd.f32 %v4450_v20, %v8121_v42  ;;  %v8498_v42 = vpack.c.b16 %v1595_v56, %v1595_v56  ;;  %v8502_v26 = vpack.c.b16 %v1851_v7, %v1851_v7  ;;  %v1952_v20 = vshll.u32 %v7230_v24, 16 }
 0x1f9   : > { %v4631_v18 = vpop.f32.mrf.mxu0 }
 0x1fa   : > { %v4540_v41 = vadd.f32 %v4539_v39, %v4451_v48  ;;  %9341 = vst [vmem:[#allocation9_spill] sm:$0xff] %v8498_v42  ;;  %v1694_v39 = vshrl.u32 %v7214_v36, 16  ;;  %v1701_v56 = vshll.u32 %v8498_v42, 16  ;;  %v1957_v48 = vshll.u32 %v8502_v26, 16 }
 0x1fb   : > { %9343 = vst [vmem:[#allocation11_spill] sm:$0xff] %v8502_v26  ;;  %v1596_v26 = vunpack.c.l.b16 %v6044_v44 }
 0x1fc   : > { %v4720_v16 = vpop.f32.mrf.mxu1  ;;  %v4629_v6 = vadd.f32 %v4628_v4, %v4540_v41  ;;  %4768 = vmatmul.bf16.gmra.mxu2 %v7213_v37  ;;  %4946 = vmatmul.bf16.gmra.mxu0 %v1692_v61  ;;  %v1699_v41 = vor.u32 %v1698_v33, %v1694_v39  ;;  %v1703_v61 = vrot.slane %v1701_v56, 1  ;;  %v1959_v45 = vrot.slane %v1957_v48, 1  ;;  %v7231_v39 = vld [vmem:[%s7763_s9 + $0x60] sm:$0xff]  ;;  %v7355_v56 = vld [vmem:[%s9311_s2 + $0x298] sm:$0xff] }
 0x1fd   : > { %4857 = vmatmul.bf16.gmra.mxu3 %v7229_v57  ;;  %5095 = vmatpush.bf16.msrb.mxu2 %v7355_v56  ;;  %v1962_v44 = vshrl.u32 %v7231_v39, 16 }
 0x1fe   : > { %v8500_v53 = vadd.f32 %v4717_v25, %v4629_v6  ;;  %v1954_v25 = vrot.slane %v1952_v20, 1  ;;  %v1704_v20 = vsel %vm787_vm0, %v1699_v41, %v1703_v61 }
 0x1ff   : > { %5035 = vmatmul.bf16.gmra.mxu1 %v1948_v10  ;;  %v4453_v49 = vpop.f32.mrf.mxu2 }
 0x200   : > { %9342 = vst [vmem:[#allocation10_spill] sm:$0xff] %v8500_v53  ;;  %v4542_v5 = vpop.f32.mrf.mxu3  ;;  %v4454_v37 = vadd.f32 %v4453_v49, %v8136_v9  ;;  %v1955_v6 = vor.u32 %v1954_v25, %v1950_v14  ;;  %v7215_v53 = vld [vmem:[%s7758_s6 + $0x60] sm:$0xff]  ;;  %v8522_v14 = vpack.c.b16 %v1596_v26, %v1596_v26 }
 0x201   : > { %v4633_v4 = vpop.f32.mrf.mxu0  ;;  %v1708_v25 = vshll.u32 %v7215_v53, 16 }
 0x202   : > { %v4543_v57 = vadd.f32 %v4542_v5, %v4454_v37  ;;  %v6092_v5 = vld [vmem:[%s7763_s9 + $0x68] sm:$0xf]  ;;  %v1713_v26 = vshll.u32 %v8522_v14, 16 }
 0x204   : > { %v4722_v40 = vpop.f32.mrf.mxu1  ;;  %v4632_v12 = vadd.f32 %v4631_v18, %v4543_v57  ;;  %v1960_v57 = vsel %vm787_vm0, %v1955_v6, %v1959_v45  ;;  %v1710_v6 = vrot.slane %v1708_v25, 1  ;;  %v6047_v25 = vld [vmem:[%s7758_s6 + $0x74] sm:$0xf] }
 0x206   : > { %v8507_v10 = vadd.f32 %v4720_v16, %v4632_v12  ;;  %v1852_v16 = vunpack.c.l.b16 %v6092_v5 }
 0x207   : > { %v4455_v9 = vpop.f32.mrf.mxu2 }
 0x208   : > { %v4544_v7 = vpop.f32.mrf.mxu3  ;;  %v4456_v49 = vadd.f32 %v4455_v9, %v8148_v3  ;;  %v7363_v3 = vld [vmem:[%s9311_s2 + $0x2d8] sm:$0xff] }
 0x209   : > { %v4636_v42 = vpop.f32.mrf.mxu0  ;;  %5184 = vmatpush.bf16.msrb.mxu3 %v7363_v3 }
 0x20a   : > { %v4545_v37 = vadd.f32 %v4544_v7, %v4456_v49  ;;  %v1706_v7 = vshrl.u32 %v7215_v53, 16 }
 0x20c   : > { %v4725_v18 = vpop.f32.mrf.mxu1  ;;  %v4634_v33 = vadd.f32 %v4633_v4, %v4545_v37  ;;  %4773 = vmatmul.bf16.gmra.mxu2 %v7214_v36  ;;  %4951 = vmatmul.bf16.gmra.mxu0 %v1704_v20  ;;  %v8526_v36 = vpack.c.b16 %v1852_v16, %v1852_v16  ;;  %v7371_v37 = vld [vmem:[%s9311_s2 + $0x318] sm:$0xff]  ;;  %v1715_v20 = vrot.slane %v1713_v26, 1  ;;  %v7232_v26 = vld [vmem:[%s7763_s9 + $0x6c] sm:$0xff] }
 0x20d   : > { %4862 = vmatmul.bf16.gmra.mxu3 %v7230_v24  ;;  %v1964_v24 = vshll.u32 %v7231_v39, 16  ;;  %5273 = vmatpush.bf16.msrb.mxu0 %v7371_v37 }
 0x20e   : > { %v8524_v48 = vadd.f32 %v4722_v40, %v4634_v33  ;;  %9344 = vst [vmem:[#allocation12_spill] sm:$0xff] %v8526_v36  ;;  %v1969_v49 = vshll.u32 %v8526_v36, 16  ;;  %v1597_v36 = vunpack.c.l.b16 %v6047_v25  ;;  %v1974_v25 = vshrl.u32 %v7232_v26, 16 }
 0x20f   : > { %5040 = vmatmul.bf16.gmra.mxu1 %v1960_v57  ;;  %v4458_v12 = vpop.f32.mrf.mxu2  ;;  %v1966_v40 = vrot.slane %v1964_v24, 1 }
 0x210   : > { %v4547_v4 = vpop.f32.mrf.mxu3  ;;  %v4459_v41 = vadd.f32 %v4458_v12, %v8166_v28  ;;  %v1711_v28 = vor.u32 %v1710_v6, %v1706_v7  ;;  %v1971_v3 = vrot.slane %v1969_v49, 1 }
 0x211   : > { %v4638_v9 = vpop.f32.mrf.mxu0  ;;  %v1967_v56 = vor.u32 %v1966_v40, %v1962_v44  ;;  %v7379_v44 = vld [vmem:[%s9311_s2 + $0x358] sm:$0xff] }
 0x212   : > { %v4548_v61 = vadd.f32 %v4547_v4, %v4459_v41  ;;  %v6095_v4 = vld [vmem:[%s7763_s9 + $0x74] sm:$0xf]  ;;  %v1716_v41 = vsel %vm787_vm0, %v1711_v28, %v1715_v20  ;;  %5362 = vmatpush.bf16.msrb.mxu1 %v7379_v44 }
 0x213   : > { %v1972_v6 = vsel %vm787_vm0, %v1967_v56, %v1971_v3 }
 0x214   : > { %v4727_v45 = vpop.f32.mrf.mxu1  ;;  %v4637_v5 = vadd.f32 %v4636_v42, %v4548_v61  ;;  %v7216_v61 = vld [vmem:[%s7758_s6 + $0x6c] sm:$0xff] }
 0x215   : > { %v1720_v40 = vshll.u32 %v7216_v61, 16 }
 0x216   : > { %v8534_v57 = vadd.f32 %v4725_v18, %v4637_v5  ;;  %v1853_v18 = vunpack.c.l.b16 %v6095_v4 }
 0x217   : > { %v4460_v16 = vpop.f32.mrf.mxu2  ;;  %v1722_v56 = vrot.slane %v1720_v40, 1  ;;  %v6050_v40 = vld [vmem:[%s7758_s6 + $0x80] sm:$0xf] }
 0x218   : > { %v4549_v33 = vpop.f32.mrf.mxu3  ;;  %v4461_v12 = vadd.f32 %v4460_v16, %v8181_v19  ;;  %v8546_v19 = vpack.c.b16 %v1597_v36, %v1597_v36  ;;  %v8550_v20 = vpack.c.b16 %v1853_v18, %v1853_v18  ;;  %v1976_v16 = vshll.u32 %v7232_v26, 16 }
 0x219   : > { %v4641_v24 = vpop.f32.mrf.mxu0 }
 0x21a   : > { %v4550_v42 = vadd.f32 %v4549_v33, %v4461_v12  ;;  %9345 = vst [vmem:[#allocation13_spill] sm:$0xff] %v8546_v19  ;;  %v1718_v33 = vshrl.u32 %v7216_v61, 16  ;;  %v1725_v36 = vshll.u32 %v8546_v19, 16  ;;  %v1981_v12 = vshll.u32 %v8550_v20, 16 }
 0x21b   : > { %9347 = vst [vmem:[#allocation15_spill] sm:$0xff] %v8550_v20  ;;  %v1598_v20 = vunpack.c.l.b16 %v6050_v40 }
 0x21c   : > { %v4730_v7 = vpop.f32.mrf.mxu1  ;;  %v4639_v5 = vadd.f32 %v4638_v9, %v4550_v42  ;;  %4778 = vmatmul.bf16.gmra.mxu2 %v7215_v53  ;;  %4956 = vmatmul.bf16.gmra.mxu0 %v1716_v41  ;;  %v1723_v42 = vor.u32 %v1722_v56, %v1718_v33  ;;  %v1727_v41 = vrot.slane %v1725_v36, 1  ;;  %v1983_v44 = vrot.slane %v1981_v12, 1  ;;  %v7233_v33 = vld [vmem:[%s7763_s9 + $0x78] sm:$0xff]  ;;  %v7354_v36 = vld [vmem:[%s9311_s2 + $0x290] sm:$0xff] }
 0x21d   : > { %4867 = vmatmul.bf16.gmra.mxu3 %v7231_v39  ;;  %5096 = vmatpush.bf16.msrb.mxu2 %v7354_v36  ;;  %v1986_v40 = vshrl.u32 %v7233_v33, 16 }
 0x21e   : > { %v8548_v49 = vadd.f32 %v4727_v45, %v4639_v5  ;;  %v1978_v45 = vrot.slane %v1976_v16, 1  ;;  %v1728_v16 = vsel %vm787_vm0, %v1723_v42, %v1727_v41 }
 0x21f   : > { %5045 = vmatmul.bf16.gmra.mxu1 %v1972_v6  ;;  %v4463_v37 = vpop.f32.mrf.mxu2 }
 0x220   : > { %9346 = vst [vmem:[#allocation14_spill] sm:$0xff] %v8548_v49  ;;  %v4552_v28 = vpop.f32.mrf.mxu3  ;;  %v4464_v53 = vadd.f32 %v4463_v37, %v8194_v50  ;;  %v1979_v5 = vor.u32 %v1978_v45, %v1974_v25  ;;  %v7217_v49 = vld [vmem:[%s7758_s6 + $0x78] sm:$0xff]  ;;  %v8570_v25 = vpack.c.b16 %v1598_v20, %v1598_v20 }
 0x221   : > { %v4643_v9 = vpop.f32.mrf.mxu0  ;;  %v1732_v45 = vshll.u32 %v7217_v49, 16 }
 0x222   : > { %v4553_v39 = vadd.f32 %v4552_v28, %v4464_v53  ;;  %v6098_v28 = vld [vmem:[%s7763_s9 + $0x80] sm:$0xf]  ;;  %v1737_v20 = vshll.u32 %v8570_v25, 16 }
 0x224   : > { %v4732_v3 = vpop.f32.mrf.mxu1  ;;  %v4642_v4 = vadd.f32 %v4641_v24, %v4553_v39  ;;  %v1984_v39 = vsel %vm787_vm0, %v1979_v5, %v1983_v44  ;;  %v1734_v5 = vrot.slane %v1732_v45, 1  ;;  %v6053_v45 = vld [vmem:[%s7758_s6 + $0x8c] sm:$0xf] }
 0x226   : > { %v8555_v6 = vadd.f32 %v4730_v7, %v4642_v4  ;;  %v1854_v7 = vunpack.c.l.b16 %v6098_v28 }
 0x227   : > { %v4465_v50 = vpop.f32.mrf.mxu2 }
 0x228   : > { %v4554_v18 = vpop.f32.mrf.mxu3  ;;  %v4466_v37 = vadd.f32 %v4465_v50, %v8204_v29  ;;  %v7362_v29 = vld [vmem:[%s9311_s2 + $0x2d0] sm:$0xff] }
 0x229   : > { %v4922_v19 = vpop.f32.mrf.mxu0  ;;  %5185 = vmatpush.bf16.msrb.mxu3 %v7362_v29 }
 0x22a   : > { %v4555_v53 = vadd.f32 %v4554_v18, %v4466_v37  ;;  %v1730_v18 = vshrl.u32 %v7217_v49, 16 }
 0x22c   : > { %v5011_v24 = vpop.f32.mrf.mxu1  ;;  %v4644_v56 = vadd.f32 %v4643_v9, %v4555_v53  ;;  %4783 = vmatmul.bf16.gmra.mxu2 %v7216_v61  ;;  %4961 = vmatmul.bf16.gmra.mxu0 %v1728_v16  ;;  %v8574_v61 = vpack.c.b16 %v1854_v7, %v1854_v7  ;;  %v7370_v53 = vld [vmem:[%s9311_s2 + $0x310] sm:$0xff]  ;;  %v1739_v16 = vrot.slane %v1737_v20, 1  ;;  %v7234_v20 = vld [vmem:[%s7763_s9 + $0x84] sm:$0xff] }
 0x22d   : > { %4872 = vmatmul.bf16.gmra.mxu3 %v7232_v26  ;;  %v1988_v26 = vshll.u32 %v7233_v33, 16  ;;  %5274 = vmatpush.bf16.msrb.mxu0 %v7370_v53 }
 0x22e   : > { %v8572_v12 = vadd.f32 %v4732_v3, %v4644_v56  ;;  %9348 = vst [vmem:[#allocation16_spill] sm:$0xff] %v8574_v61  ;;  %v1993_v37 = vshll.u32 %v8574_v61, 16  ;;  %v1599_v61 = vunpack.c.l.b16 %v6053_v45  ;;  %v1998_v45 = vshrl.u32 %v7234_v20, 16 }
 0x22f   : > { %5050 = vmatmul.bf16.gmra.mxu1 %v1984_v39  ;;  %v4744_v4 = vpop.f32.mrf.mxu2  ;;  %v1990_v3 = vrot.slane %v1988_v26, 1 }
 0x230   : > { %v4833_v9 = vpop.f32.mrf.mxu3  ;;  %v4745_v42 = vadd.f32 %v4744_v4, %v8222_v31  ;;  %v1735_v31 = vor.u32 %v1734_v5, %v1730_v18  ;;  %v1995_v29 = vrot.slane %v1993_v37, 1 }
 0x231   : > { %v4924_v50 = vpop.f32.mrf.mxu0  ;;  %v1991_v36 = vor.u32 %v1990_v3, %v1986_v40  ;;  %v7378_v40 = vld [vmem:[%s9311_s2 + $0x350] sm:$0xff] }
 0x232   : > { %v4834_v41 = vadd.f32 %v4833_v9, %v4745_v42  ;;  %v6101_v9 = vld [vmem:[%s7763_s9 + $0x8c] sm:$0xf]  ;;  %v1740_v42 = vsel %vm787_vm0, %v1735_v31, %v1739_v16  ;;  %5363 = vmatpush.bf16.msrb.mxu1 %v7378_v40 }
 0x233   : > { %v1996_v5 = vsel %vm787_vm0, %v1991_v36, %v1995_v29 }
 0x234   : > { %v5013_v44 = vpop.f32.mrf.mxu1  ;;  %v4923_v28 = vadd.f32 %v4922_v19, %v4834_v41  ;;  %v7218_v41 = vld [vmem:[%s7758_s6 + $0x84] sm:$0xff] }
 0x235   : > { %v1744_v3 = vshll.u32 %v7218_v41, 16 }
 0x236   : > { %v8582_v39 = vadd.f32 %v5011_v24, %v4923_v28  ;;  %v1855_v24 = vunpack.c.l.b16 %v6101_v9 }
 0x237   : > { %v4746_v7 = vpop.f32.mrf.mxu2  ;;  %v1746_v36 = vrot.slane %v1744_v3, 1  ;;  %v6056_v3 = vld [vmem:[%s7758_s6 + $0x98] sm:$0xf] }
 0x238   : > { %v4835_v56 = vpop.f32.mrf.mxu3  ;;  %v4747_v4 = vadd.f32 %v4746_v7, %v8234_v22  ;;  %v8594_v22 = vpack.c.b16 %v1599_v61, %v1599_v61  ;;  %v8598_v16 = vpack.c.b16 %v1855_v24, %v1855_v24  ;;  %v2000_v7 = vshll.u32 %v7234_v20, 16 }
 0x239   : > { %v4927_v26 = vpop.f32.mrf.mxu0 }
 0x23a   : > { %v4836_v19 = vadd.f32 %v4835_v56, %v4747_v4  ;;  %9349 = vst [vmem:[#allocation17_spill] sm:$0xff] %v8594_v22  ;;  %v1742_v56 = vshrl.u32 %v7218_v41, 16  ;;  %v1749_v61 = vshll.u32 %v8594_v22, 16  ;;  %v2005_v4 = vshll.u32 %v8598_v16, 16 }
 0x23b   : > { %9351 = vst [vmem:[#allocation19_spill] sm:$0xff] %v8598_v16  ;;  %v1600_v16 = vunpack.c.l.b16 %v6056_v3 }
 0x23c   : > { %v5016_v18 = vpop.f32.mrf.mxu1  ;;  %v4925_v28 = vadd.f32 %v4924_v50, %v4836_v19  ;;  %4788 = vmatmul.bf16.gmra.mxu2 %v7217_v49  ;;  %4966 = vmatmul.bf16.gmra.mxu0 %v1740_v42  ;;  %v1747_v19 = vor.u32 %v1746_v36, %v1742_v56  ;;  %v1751_v42 = vrot.slane %v1749_v61, 1  ;;  %v2007_v40 = vrot.slane %v2005_v4, 1  ;;  %v7235_v56 = vld [vmem:[%s7763_s9 + $0x90] sm:$0xff]  ;;  %v7353_v61 = vld [vmem:[%s9311_s2 + $0x288] sm:$0xff] }
 0x23d   : > { %4877 = vmatmul.bf16.gmra.mxu3 %v7233_v33  ;;  %5097 = vmatpush.bf16.msrb.mxu2 %v7353_v61  ;;  %v2010_v3 = vshrl.u32 %v7235_v56, 16 }
 0x23e   : > { %v8596_v37 = vadd.f32 %v5013_v44, %v4925_v28  ;;  %v2002_v44 = vrot.slane %v2000_v7, 1  ;;  %v1752_v7 = vsel %vm787_vm0, %v1747_v19, %v1751_v42 }
 0x23f   : > { %5055 = vmatmul.bf16.gmra.mxu1 %v1996_v5  ;;  %v4749_v53 = vpop.f32.mrf.mxu2 }
 0x240   : > { %9350 = vst [vmem:[#allocation18_spill] sm:$0xff] %v8596_v37  ;;  %v4838_v31 = vpop.f32.mrf.mxu3  ;;  %v4750_v49 = vadd.f32 %v4749_v53, %v8239_v46  ;;  %v2003_v28 = vor.u32 %v2002_v44, %v1998_v45  ;;  %v7219_v37 = vld [vmem:[%s7758_s6 + $0x90] sm:$0xff]  ;;  %v8618_v45 = vpack.c.b16 %v1600_v16, %v1600_v16 }
 0x241   : > { %v4929_v50 = vpop.f32.mrf.mxu0  ;;  %v1756_v44 = vshll.u32 %v7219_v37, 16 }
 0x242   : > { %v4839_v33 = vadd.f32 %v4838_v31, %v4750_v49  ;;  %v6104_v31 = vld [vmem:[%s7763_s9 + $0x98] sm:$0xf]  ;;  %v1761_v16 = vshll.u32 %v8618_v45, 16 }
 0x244   : > { %v5018_v29 = vpop.f32.mrf.mxu1  ;;  %v4928_v9 = vadd.f32 %v4927_v26, %v4839_v33  ;;  %v2008_v33 = vsel %vm787_vm0, %v2003_v28, %v2007_v40  ;;  %v1758_v28 = vrot.slane %v1756_v44, 1  ;;  %v6059_v44 = vld [vmem:[%s7758_s6 + $0xa4] sm:$0xf] }
 0x246   : > { %v8603_v5 = vadd.f32 %v5016_v18, %v4928_v9  ;;  %v1856_v18 = vunpack.c.l.b16 %v6104_v31 }
 0x247   : > { %v4751_v46 = vpop.f32.mrf.mxu2 }
 0x248   : > { %v4840_v24 = vpop.f32.mrf.mxu3  ;;  %v4752_v53 = vadd.f32 %v4751_v46, %v8254_v52  ;;  %v7361_v52 = vld [vmem:[%s9311_s2 + $0x2c8] sm:$0xff] }
 0x249   : > { %v4932_v22 = vpop.f32.mrf.mxu0  ;;  %5186 = vmatpush.bf16.msrb.mxu3 %v7361_v52 }
 0x24a   : > { %v4841_v49 = vadd.f32 %v4840_v24, %v4752_v53  ;;  %v1754_v24 = vshrl.u32 %v7219_v37, 16 }
 0x24c   : > { %v5021_v26 = vpop.f32.mrf.mxu1  ;;  %v4930_v36 = vadd.f32 %v4929_v50, %v4841_v49  ;;  %4793 = vmatmul.bf16.gmra.mxu2 %v7218_v41  ;;  %4971 = vmatmul.bf16.gmra.mxu0 %v1752_v7  ;;  %v8622_v41 = vpack.c.b16 %v1856_v18, %v1856_v18  ;;  %v7369_v49 = vld [vmem:[%s9311_s2 + $0x308] sm:$0xff]  ;;  %v1763_v7 = vrot.slane %v1761_v16, 1  ;;  %v7236_v16 = vld [vmem:[%s7763_s9 + $0x9c] sm:$0xff] }
 0x24d   : > { %4882 = vmatmul.bf16.gmra.mxu3 %v7234_v20  ;;  %v2012_v20 = vshll.u32 %v7235_v56, 16  ;;  %5275 = vmatpush.bf16.msrb.mxu0 %v7369_v49 }
 0x24e   : > { %v8620_v4 = vadd.f32 %v5018_v29, %v4930_v36  ;;  %9352 = vst [vmem:[#allocation20_spill] sm:$0xff] %v8622_v41  ;;  %v2017_v53 = vshll.u32 %v8622_v41, 16  ;;  %v1601_v41 = vunpack.c.l.b16 %v6059_v44  ;;  %v2022_v44 = vshrl.u32 %v7236_v16, 16 }
 0x24f   : > { %5060 = vmatmul.bf16.gmra.mxu1 %v2008_v33  ;;  %v4754_v9 = vpop.f32.mrf.mxu2  ;;  %v2014_v29 = vrot.slane %v2012_v20, 1 }
 0x250   : > { %v4843_v50 = vpop.f32.mrf.mxu3  ;;  %v4755_v19 = vadd.f32 %v4754_v9, %v8262_v1  ;;  %v1759_v1 = vor.u32 %v1758_v28, %v1754_v24  ;;  %v2019_v52 = vrot.slane %v2017_v53, 1 }
 0x251   : > { %v4934_v46 = vpop.f32.mrf.mxu0  ;;  %v2015_v61 = vor.u32 %v2014_v29, %v2010_v3  ;;  %v7377_v3 = vld [vmem:[%s9311_s2 + $0x348] sm:$0xff] }
 0x252   : > { %v4844_v42 = vadd.f32 %v4843_v50, %v4755_v19  ;;  %v6107_v50 = vld [vmem:[%s7763_s9 + $0xa4] sm:$0xf]  ;;  %v1764_v19 = vsel %vm787_vm0, %v1759_v1, %v1763_v7  ;;  %5364 = vmatpush.bf16.msrb.mxu1 %v7377_v3 }
 0x253   : > { %v2020_v28 = vsel %vm787_vm0, %v2015_v61, %v2019_v52 }
 0x254   : > { %v5023_v40 = vpop.f32.mrf.mxu1  ;;  %v4933_v31 = vadd.f32 %v4932_v22, %v4844_v42  ;;  %v7220_v42 = vld [vmem:[%s7758_s6 + $0x9c] sm:$0xff] }
 0x255   : > { %v1768_v29 = vshll.u32 %v7220_v42, 16 }
 0x256   : > { %v8630_v33 = vadd.f32 %v5021_v26, %v4933_v31  ;;  %v1857_v26 = vunpack.c.l.b16 %v6107_v50 }
 0x257   : > { %v4756_v18 = vpop.f32.mrf.mxu2  ;;  %v1770_v61 = vrot.slane %v1768_v29, 1  ;;  %v6062_v29 = vld [vmem:[%s7758_s6 + $0xb0] sm:$0xf] }
 0x258   : > { %v4845_v36 = vpop.f32.mrf.mxu3  ;;  %v4757_v9 = vadd.f32 %v4756_v18, %v8274_v38  ;;  %v8642_v38 = vpack.c.b16 %v1601_v41, %v1601_v41  ;;  %v8646_v7 = vpack.c.b16 %v1857_v26, %v1857_v26  ;;  %v2024_v18 = vshll.u32 %v7236_v16, 16 }
 0x259   : > { %v4937_v20 = vpop.f32.mrf.mxu0 }
 0x25a   : > { %v4846_v22 = vadd.f32 %v4845_v36, %v4757_v9  ;;  %9353 = vst [vmem:[#allocation21_spill] sm:$0xff] %v8642_v38  ;;  %v1766_v36 = vshrl.u32 %v7220_v42, 16  ;;  %v1773_v41 = vshll.u32 %v8642_v38, 16  ;;  %v2029_v9 = vshll.u32 %v8646_v7, 16 }
 0x25b   : > { %9355 = vst [vmem:[#allocation23_spill] sm:$0xff] %v8646_v7  ;;  %v1602_v7 = vunpack.c.l.b16 %v6062_v29 }
 0x25c   : > { %v5026_v24 = vpop.f32.mrf.mxu1  ;;  %v4935_v31 = vadd.f32 %v4934_v46, %v4846_v22  ;;  %4798 = vmatmul.bf16.gmra.mxu2 %v7219_v37  ;;  %4976 = vmatmul.bf16.gmra.mxu0 %v1764_v19  ;;  %v1771_v22 = vor.u32 %v1770_v61, %v1766_v36  ;;  %v1775_v19 = vrot.slane %v1773_v41, 1  ;;  %v2031_v3 = vrot.slane %v2029_v9, 1  ;;  %v7237_v36 = vld [vmem:[%s7763_s9 + $0xa8] sm:$0xff]  ;;  %v7352_v41 = vld [vmem:[%s9311_s2 + $0x280] sm:$0xff] }
 0x25d   : > { %4887 = vmatmul.bf16.gmra.mxu3 %v7235_v56  ;;  %5098 = vmatpush.bf16.msrb.mxu2 %v7352_v41  ;;  %v2034_v29 = vshrl.u32 %v7237_v36, 16 }
 0x25e   : > { %v8644_v53 = vadd.f32 %v5023_v40, %v4935_v31  ;;  %v2026_v40 = vrot.slane %v2024_v18, 1  ;;  %v1776_v18 = vsel %vm787_vm0, %v1771_v22, %v1775_v19 }
 0x25f   : > { %5065 = vmatmul.bf16.gmra.mxu1 %v2020_v28  ;;  %v4759_v49 = vpop.f32.mrf.mxu2 }
 0x260   : > { %9354 = vst [vmem:[#allocation22_spill] sm:$0xff] %v8644_v53  ;;  %v4848_v1 = vpop.f32.mrf.mxu3  ;;  %v4760_v37 = vadd.f32 %v4759_v49, %v8279_v2  ;;  %v2027_v31 = vor.u32 %v2026_v40, %v2022_v44  ;;  %v7221_v53 = vld [vmem:[%s7758_s6 + $0xa8] sm:$0xff]  ;;  %v8666_v44 = vpack.c.b16 %v1602_v7, %v1602_v7 }
 0x261   : > { %v4939_v46 = vpop.f32.mrf.mxu0  ;;  %v1780_v40 = vshll.u32 %v7221_v53, 16 }
 0x262   : > { %v4849_v56 = vadd.f32 %v4848_v1, %v4760_v37  ;;  %v6110_v1 = vld [vmem:[%s7763_s9 + $0xb0] sm:$0xf]  ;;  %v1785_v7 = vshll.u32 %v8666_v44, 16 }
 0x264   : > { %v5028_v52 = vpop.f32.mrf.mxu1  ;;  %v4938_v50 = vadd.f32 %v4937_v20, %v4849_v56  ;;  %v2032_v56 = vsel %vm787_vm0, %v2027_v31, %v2031_v3  ;;  %v1782_v31 = vrot.slane %v1780_v40, 1  ;;  %v6065_v40 = vld [vmem:[%s7758_s6 + $0xbc] sm:$0xf] }
 0x266   : > { %v8651_v28 = vadd.f32 %v5026_v24, %v4938_v50  ;;  %v1858_v24 = vunpack.c.l.b16 %v6110_v1 }
 0x267   : > { %v4761_v2 = vpop.f32.mrf.mxu2 }
 0x268   : > { %v4850_v26 = vpop.f32.mrf.mxu3  ;;  %v4762_v49 = vadd.f32 %v4761_v2, %v8294_v17  ;;  %v7360_v17 = vld [vmem:[%s9311_s2 + $0x2c0] sm:$0xff] }
 0x269   : > { %v4942_v38 = vpop.f32.mrf.mxu0  ;;  %5187 = vmatpush.bf16.msrb.mxu3 %v7360_v17 }
 0x26a   : > { %v4851_v37 = vadd.f32 %v4850_v26, %v4762_v49  ;;  %v1778_v26 = vshrl.u32 %v7221_v53, 16 }
 0x26c   : > { %v5031_v20 = vpop.f32.mrf.mxu1  ;;  %v4940_v61 = vadd.f32 %v4939_v46, %v4851_v37  ;;  %4803 = vmatmul.bf16.gmra.mxu2 %v7220_v42  ;;  %4981 = vmatmul.bf16.gmra.mxu0 %v1776_v18  ;;  %v8670_v42 = vpack.c.b16 %v1858_v24, %v1858_v24  ;;  %v7368_v37 = vld [vmem:[%s9311_s2 + $0x300] sm:$0xff]  ;;  %v1787_v18 = vrot.slane %v1785_v7, 1  ;;  %v7238_v7 = vld [vmem:[%s7763_s9 + $0xb4] sm:$0xff] }
 0x26d   : > { %4892 = vmatmul.bf16.gmra.mxu3 %v7236_v16  ;;  %v2036_v16 = vshll.u32 %v7237_v36, 16  ;;  %5276 = vmatpush.bf16.msrb.mxu0 %v7368_v37 }
 0x26e   : > { %v8668_v9 = vadd.f32 %v5028_v52, %v4940_v61  ;;  %9356 = vst [vmem:[#allocation24_spill] sm:$0xff] %v8670_v42  ;;  %v2041_v49 = vshll.u32 %v8670_v42, 16  ;;  %v1603_v42 = vunpack.c.l.b16 %v6065_v40  ;;  %v2046_v40 = vshrl.u32 %v7238_v7, 16 }
 0x26f   : > { %5070 = vmatmul.bf16.gmra.mxu1 %v2032_v56  ;;  %v4764_v50 = vpop.f32.mrf.mxu2  ;;  %v2038_v52 = vrot.slane %v2036_v16, 1 }
 0x270   : > { %v4853_v46 = vpop.f32.mrf.mxu3  ;;  %v4765_v22 = vadd.f32 %v4764_v50, %v8302_v55  ;;  %v1783_v55 = vor.u32 %v1782_v31, %v1778_v26  ;;  %v2043_v17 = vrot.slane %v2041_v49, 1 }
 0x271   : > { %v4944_v2 = vpop.f32.mrf.mxu0  ;;  %v2039_v41 = vor.u32 %v2038_v52, %v2034_v29  ;;  %v7376_v29 = vld [vmem:[%s9311_s2 + $0x340] sm:$0xff] }
 0x272   : > { %v4854_v19 = vadd.f32 %v4853_v46, %v4765_v22  ;;  %v6113_v46 = vld [vmem:[%s7763_s9 + $0xbc] sm:$0xf]  ;;  %v1788_v22 = vsel %vm787_vm0, %v1783_v55, %v1787_v18  ;;  %5365 = vmatpush.bf16.msrb.mxu1 %v7376_v29 }
 0x273   : > { %v2044_v31 = vsel %vm787_vm0, %v2039_v41, %v2043_v17 }
 0x274   : > { %v5033_v3 = vpop.f32.mrf.mxu1  ;;  %v4943_v1 = vadd.f32 %v4942_v38, %v4854_v19  ;;  %v7222_v19 = vld [vmem:[%s7758_s6 + $0xb4] sm:$0xff] }
 0x275   : > { %v1792_v52 = vshll.u32 %v7222_v19, 16 }
 0x276   : > { %v8678_v56 = vadd.f32 %v5031_v20, %v4943_v1  ;;  %v1859_v20 = vunpack.c.l.b16 %v6113_v46 }
 0x277   : > { %v4766_v24 = vpop.f32.mrf.mxu2  ;;  %v1794_v41 = vrot.slane %v1792_v52, 1  ;;  %v6068_v52 = vld [vmem:[%s7758_s6 + $0xc8] sm:$0xf] }
 0x278   : > { %v4855_v61 = vpop.f32.mrf.mxu3  ;;  %v4767_v50 = vadd.f32 %v4766_v24, %v8314_v21  ;;  %v8690_v21 = vpack.c.b16 %v1603_v42, %v1603_v42  ;;  %v8694_v18 = vpack.c.b16 %v1859_v20, %v1859_v20  ;;  %v2048_v24 = vshll.u32 %v7238_v7, 16 }
 0x279   : > { %v4947_v16 = vpop.f32.mrf.mxu0 }
 0x27a   : > { %v4856_v38 = vadd.f32 %v4855_v61, %v4767_v50  ;;  %9357 = vst [vmem:[#allocation25_spill] sm:$0xff] %v8690_v21  ;;  %v1790_v61 = vshrl.u32 %v7222_v19, 16  ;;  %v1797_v42 = vshll.u32 %v8690_v21, 16  ;;  %v2053_v50 = vshll.u32 %v8694_v18, 16 }
 0x27b   : > { %9359 = vst [vmem:[#allocation27_spill] sm:$0xff] %v8694_v18  ;;  %v1604_v18 = vunpack.c.l.b16 %v6068_v52 }
 0x27c   : > { %v5036_v26 = vpop.f32.mrf.mxu1  ;;  %v4945_v1 = vadd.f32 %v4944_v2, %v4856_v38  ;;  %4808 = vmatmul.bf16.gmra.mxu2 %v7221_v53  ;;  %4986 = vmatmul.bf16.gmra.mxu0 %v1788_v22  ;;  %v1795_v38 = vor.u32 %v1794_v41, %v1790_v61  ;;  %v1799_v22 = vrot.slane %v1797_v42, 1  ;;  %v2055_v29 = vrot.slane %v2053_v50, 1  ;;  %v7239_v61 = vld [vmem:[%s7763_s9 + $0xc0] sm:$0xff]  ;;  %v7391_v42 = vld [vmem:[%s9311_s2 + $0x3b8] sm:$0xff] }
 0x27d   : > { %4897 = vmatmul.bf16.gmra.mxu3 %v7237_v36  ;;  %5447 = vmatpush.bf16.msra.mxu2 %v7391_v42  ;;  %v2058_v52 = vshrl.u32 %v7239_v61, 16 }
 0x27e   : > { %v8692_v49 = vadd.f32 %v5033_v3, %v4945_v1  ;;  %v2050_v3 = vrot.slane %v2048_v24, 1  ;;  %v1800_v24 = vsel %vm787_vm0, %v1795_v38, %v1799_v22 }
 0x27f   : > { %5075 = vmatmul.bf16.gmra.mxu1 %v2044_v31  ;;  %v4769_v37 = vpop.f32.mrf.mxu2 }
 0x280   : > { %9358 = vst [vmem:[#allocation26_spill] sm:$0xff] %v8692_v49  ;;  %v4858_v55 = vpop.f32.mrf.mxu3  ;;  %v4770_v53 = vadd.f32 %v4769_v37, %v8319_v58  ;;  %v2051_v1 = vor.u32 %v2050_v3, %v2046_v40  ;;  %v7223_v49 = vld [vmem:[%s7758_s6 + $0xc0] sm:$0xff]  ;;  %v8714_v40 = vpack.c.b16 %v1604_v18, %v1604_v18 }
 0x281   : > { %v4949_v2 = vpop.f32.mrf.mxu0  ;;  %v1804_v3 = vshll.u32 %v7223_v49, 16 }
 0x282   : > { %v4859_v36 = vadd.f32 %v4858_v55, %v4770_v53  ;;  %v6116_v55 = vld [vmem:[%s7763_s9 + $0xc8] sm:$0xf] }
 0x284   : > { %v5038_v17 = vpop.f32.mrf.mxu1  ;;  %v4948_v46 = vadd.f32 %v4947_v16, %v4859_v36  ;;  %v2056_v36 = vsel %vm787_vm0, %v2051_v1, %v2055_v29  ;;  %v1806_v1 = vrot.slane %v1804_v3, 1  ;;  %v1809_v29 = vshll.u32 %v8714_v40, 16 }
 0x286   : > { %v8699_v31 = vadd.f32 %v5036_v26, %v4948_v46  ;;  %v1860_v26 = vunpack.c.l.b16 %v6116_v55 }
 0x287   : > { %v4771_v58 = vpop.f32.mrf.mxu2 }
 0x288   : > { %v4860_v20 = vpop.f32.mrf.mxu3  ;;  %v4772_v37 = vadd.f32 %v4771_v58, %v8334_v13  ;;  %v7399_v13 = vld [vmem:[%s9311_s2 + $0x3f8] sm:$0xff] }
 0x289   : > { %v4952_v21 = vpop.f32.mrf.mxu0  ;;  %5536 = vmatpush.bf16.msra.mxu3 %v7399_v13 }
 0x28a   : > { %v4861_v53 = vadd.f32 %v4860_v20, %v4772_v37  ;;  %v1802_v20 = vshrl.u32 %v7223_v49, 16 }
 0x28c   : > { %v5041_v16 = vpop.f32.mrf.mxu1  ;;  %v4950_v41 = vadd.f32 %v4949_v2, %v4861_v53  ;;  %4813 = vmatmul.bf16.gmra.mxu2 %v7222_v19  ;;  %4991 = vmatmul.bf16.gmra.mxu0 %v1800_v24  ;;  %v8718_v19 = vpack.c.b16 %v1860_v26, %v1860_v26  ;;  %v7407_v53 = vld [vmem:[%s9311_s2 + $0x438] sm:$0xff]  ;;  %v1807_v24 = vor.u32 %v1806_v1, %v1802_v20 }
 0x28d   : > { %4902 = vmatmul.bf16.gmra.mxu3 %v7238_v7  ;;  %v2060_v7 = vshll.u32 %v7239_v61, 16  ;;  %5625 = vmatpush.bf16.msra.mxu0 %v7407_v53  ;;  %v7570_v53 = vld [vmem:[%s7763_s9 + $0xc] sm:$0xff] }
 0x28e   : > { %v8716_v50 = vadd.f32 %v5038_v17, %v4950_v41  ;;  %v2065_v17 = vshll.u32 %v8718_v19, 16 }
 0x28f   : > { %5080 = vmatmul.bf16.gmra.mxu1 %v2056_v36  ;;  %v4774_v46 = vpop.f32.mrf.mxu2  ;;  %v2062_v37 = vrot.slane %v2060_v7, 1  ;;  %v1811_v36 = vrot.slane %v1809_v29, 1 }
 0x290   : > { %v4863_v2 = vpop.f32.mrf.mxu3  ;;  %v4775_v38 = vadd.f32 %v4774_v46, %v8340_v51  ;;  %v2067_v13 = vrot.slane %v2065_v17, 1 }
 0x291   : > { %v4954_v58 = vpop.f32.mrf.mxu0  ;;  %v2063_v42 = vor.u32 %v2062_v37, %v2058_v52  ;;  %v1812_v7 = vsel %vm787_vm0, %v1807_v24, %v1811_v36  ;;  %v2149_v24 = vrot.slane %v7570_v53, 1 }
 0x292   : > { %v4864_v22 = vadd.f32 %v4863_v2, %v4775_v38 }
 0x293   : > { %v2068_v38 = vsel %vm787_vm0, %v2063_v42, %v2067_v13 }
 0x294   : > { %v5043_v18 = vpop.f32.mrf.mxu1  ;;  %v4953_v55 = vadd.f32 %v4952_v21, %v4864_v22 }
 0x296   : > { %v8726_v51 = vadd.f32 %v5041_v16, %v4953_v55  ;;  %v7415_v16 = vld [vmem:[%s9311_s2 + $0x478] sm:$0xff]  ;;  %v2086_v55 = vrot.slane %v8354_v54, 1 }
 0x297   : > { %v4776_v26 = vpop.f32.mrf.mxu2  ;;  %5714 = vmatpush.bf16.msra.mxu1 %v7415_v16 }
 0x298   : > { %v4865_v41 = vpop.f32.mrf.mxu3  ;;  %v4777_v3 = vadd.f32 %v4776_v26, %v8356_v23 }
 0x299   : > { %v4957_v2 = vpop.f32.mrf.mxu0 }
 0x29a   : > { %v4866_v46 = vadd.f32 %v4865_v41, %v4777_v3  ;;  %v8747_v3 = vld [vmem:[%s7758_s6 + $0x18] sm:$0xff] }
 0x29c   : > { %v5046_v21 = vpop.f32.mrf.mxu1  ;;  %v4955_v22 = vadd.f32 %v4954_v58, %v4866_v46  ;;  %4818 = vmatmul.bf16.gmra.mxu2 %v7223_v49  ;;  %4996 = vmatmul.bf16.gmra.mxu0 %v1812_v7  ;;  %v8750_v7 = vld [vmem:[%s7763_s9 + $0x18] sm:$0xff] }
 0x29d   : > { %4907 = vmatmul.bf16.gmra.mxu3 %v7239_v61  ;;  %v7569_v61 = vld [vmem:[%s7758_s6 + $0xc] sm:$0xff] }
 0x29e   : > { %v8734_v20 = vadd.f32 %v5043_v18, %v4955_v22  ;;  %v2085_v17 = vrot.slane %v7569_v61, 1  ;;  %v2150_v18 = vrot.slane %v8358_v62, 1  ;;  %v7390_v62 = vld [vmem:[%s9311_s2 + $0x3b0] sm:$0xff]  ;;  %v7571_v61 = vld [vmem:[%s7758_s6 + $0x18] sm:$0xff] }
 0x29f   : > { %5085 = vmatmul.bf16.gmra.mxu1 %v2068_v38  ;;  %v4779_v23 = vpop.f32.mrf.mxu2  ;;  %5448 = vmatpush.bf16.msra.mxu2 %v7390_v62 }
 0x2a0   : > { %v4868_v1 = vpop.f32.mrf.mxu3  ;;  %v4780_v29 = vadd.f32 %v4779_v23, %v8363_v34  ;;  %v2087_v42 = vsel %vm1252_vm1, %v2085_v17, %v2086_v55  ;;  %v2151_v13 = vsel %vm1252_vm1, %v2149_v24, %v2150_v18  ;;  %v2088_v17 = vrot.slane %v7571_v61, 1  ;;  %v7572_v55 = vld [vmem:[%s7763_s9 + $0x18] sm:$0xff]  ;;  %v9360_v61 = vld [vmem:[#allocation2_spill] sm:$0xff] }
 0x2a1   : > { %v4959_v37 = vpop.f32.mrf.mxu0  ;;  %v2152_v53 = vrot.slane %v7572_v55, 1  ;;  %v2153_v24 = vrot.slane %v8382_v27, 1 }
 0x2a2   : > { %v4869_v52 = vadd.f32 %v4868_v1, %v4780_v29 }
 0x2a4   : > { %v5048_v58 = vpop.f32.mrf.mxu1  ;;  %v4958_v49 = vadd.f32 %v4957_v2, %v4869_v52 }
 0x2a6   : > { %v8741_v36 = vadd.f32 %v5046_v21, %v4958_v49  ;;  %v7406_v49 = vld [vmem:[%s9311_s2 + $0x430] sm:$0xff] }
 0x2a7   : > { %v4781_v26 = vpop.f32.mrf.mxu2  ;;  %5626 = vmatpush.bf16.msra.mxu0 %v7406_v49 }
 0x2a8   : > { %v4870_v41 = vpop.f32.mrf.mxu3  ;;  %v4782_v34 = vadd.f32 %v4781_v26, %v8380_v32  ;;  %v7398_v32 = vld [vmem:[%s9311_s2 + $0x3f0] sm:$0xff] }
 0x2a9   : > { %v4962_v2 = vpop.f32.mrf.mxu0  ;;  %5537 = vmatpush.bf16.msra.mxu3 %v7398_v32 }
 0x2aa   : > { %v4871_v46 = vadd.f32 %v4870_v41, %v4782_v34 }
 0x2ac   : > { %v5051_v54 = vpop.f32.mrf.mxu1  ;;  %v4960_v38 = vadd.f32 %v4959_v37, %v4871_v46  ;;  %5099 = vmatmul.bf16.vlgmr.msrb.gmra.mxu2 %v2087_v42  ;;  %5277 = vmatmul.bf16.vlgmr.msrb.gmra.mxu0 %v8747_v3  ;;  %v2154_v42 = vsel %vm1252_vm1, %v2152_v53, %v2153_v24  ;;  %v9361_v53 = vld [vmem:[#allocation3_spill] sm:$0xff] }
 0x2ad   : > { %5188 = vmatmul.bf16.vlgmr.msrb.gmra.mxu3 %v2151_v13  ;;  %v8776_v13 = vld [vmem:[%s7758_s6 + $0x24] sm:$0xff] }
 0x2ae   : > { %v8760_v21 = vadd.f32 %v5048_v58, %v4960_v38  ;;  %v2089_v58 = vrot.slane %v8378_v63, 1  ;;  %v8779_v63 = vld [vmem:[%s7763_s9 + $0x24] sm:$0xff] }
 0x2af   : > { %5366 = vmatmul.bf16.vlgmr.msrb.gmra.mxu1 %v8750_v7  ;;  %v4784_v22 = vpop.f32.mrf.mxu2 }
 0x2b0   : > { %v4873_v16 = vpop.f32.mrf.mxu3  ;;  %v4785_v23 = vadd.f32 %v4784_v22, %v8390_v35  ;;  %v2090_v34 = vsel %vm1252_vm1, %v2088_v17, %v2089_v58  ;;  %v2092_v17 = vrot.slane %v9360_v61, 1  ;;  %v7574_v58 = vld [vmem:[%s7763_s9 + $0x24] sm:$0xff] }
 0x2b1   : > { %v4964_v29 = vpop.f32.mrf.mxu0  ;;  %v2155_v55 = vrot.slane %v7574_v58, 1  ;;  %v7575_v58 = vld [vmem:[%s7758_s6 + $0x30] sm:$0xff] }
 0x2b2   : > { %v4874_v1 = vadd.f32 %v4873_v16, %v4785_v23 }
 0x2b4   : > { %v5053_v52 = vpop.f32.mrf.mxu1  ;;  %v4963_v37 = vadd.f32 %v4962_v2, %v4874_v1 }
 0x2b6   : > { %v8770_v35 = vadd.f32 %v5051_v54, %v4963_v37  ;;  %v7573_v37 = vld [vmem:[%s7758_s6 + $0x24] sm:$0xff] }
 0x2b7   : > { %v4786_v18 = vpop.f32.mrf.mxu2  ;;  %v2091_v49 = vrot.slane %v7573_v37, 1 }
 0x2b8   : > { %v4875_v26 = vpop.f32.mrf.mxu3  ;;  %v4787_v41 = vadd.f32 %v4786_v18, %v8404_v30  ;;  %v7414_v30 = vld [vmem:[%s9311_s2 + $0x470] sm:$0xff] }
 0x2b9   : > { %v4967_v2 = vpop.f32.mrf.mxu0  ;;  %5715 = vmatpush.bf16.msra.mxu1 %v7414_v30 }
 0x2ba   : > { %v4876_v46 = vadd.f32 %v4875_v26, %v4787_v41  ;;  %v2093_v41 = vsel %vm1252_vm1, %v2091_v49, %v2092_v17  ;;  %v7405_v17 = vld [vmem:[%s9311_s2 + $0x428] sm:$0xff] }
 0x2bb   : > { %5627 = vmatpush.bf16.msra.mxu0 %v7405_v17 }
 0x2bc   : > { %v5056_v38 = vpop.f32.mrf.mxu1  ;;  %v4965_v27 = vadd.f32 %v4964_v29, %v4876_v46  ;;  %5104 = vmatmul.bf16.gmra.mxu2 %v2090_v34  ;;  %5282 = vmatmul.bf16.gmra.mxu0 %v8776_v13 }
 0x2bd   : > { %5193 = vmatmul.bf16.gmra.mxu3 %v2154_v42  ;;  %v7242_v42 = vld [vmem:[%s7758_s6 + $0x30] sm:$0xff] }
 0x2be   : > { %v8786_v54 = vadd.f32 %v5053_v52, %v4965_v27  ;;  %v2156_v52 = vrot.slane %v9361_v53, 1  ;;  %v7258_v27 = vld [vmem:[%s7763_s9 + $0x30] sm:$0xff] }
 0x2bf   : > { %5371 = vmatmul.bf16.gmra.mxu1 %v8779_v63  ;;  %v4789_v62 = vpop.f32.mrf.mxu2  ;;  %v7576_v53 = vld [vmem:[%s7763_s9 + $0x30] sm:$0xff] }
 0x2c0   : > { %v4878_v32 = vpop.f32.mrf.mxu3  ;;  %v4790_v22 = vadd.f32 %v4789_v62, %v8411_v43  ;;  %v2157_v34 = vsel %vm1252_vm1, %v2155_v55, %v2156_v52  ;;  %v2094_v55 = vrot.slane %v7575_v58, 1  ;;  %v2158_v52 = vrot.slane %v7576_v53, 1 }
 0x2c1   : > { %v4969_v23 = vpop.f32.mrf.mxu0 }
 0x2c2   : > { %v4879_v16 = vadd.f32 %v4878_v32, %v4790_v22 }
 0x2c4   : > { %v5058_v1 = vpop.f32.mrf.mxu1  ;;  %v4968_v29 = vadd.f32 %v4967_v2, %v4879_v16 }
 0x2c6   : > { %v8793_v24 = vadd.f32 %v5056_v38, %v4968_v29  ;;  %v7389_v38 = vld [vmem:[%s9311_s2 + $0x3a8] sm:$0xff] }
 0x2c7   : > { %v4791_v18 = vpop.f32.mrf.mxu2  ;;  %5449 = vmatpush.bf16.msra.mxu2 %v7389_v38 }
 0x2c8   : > { %v4880_v26 = vpop.f32.mrf.mxu3  ;;  %v4792_v43 = vadd.f32 %v4791_v18, %v8428_v59  ;;  %v7397_v59 = vld [vmem:[%s9311_s2 + $0x3e8] sm:$0xff]  ;;  %v9362_v18 = vld [vmem:[#allocation4_spill] sm:$0xff] }
 0x2c9   : > { %v4972_v2 = vpop.f32.mrf.mxu0  ;;  %5538 = vmatpush.bf16.msra.mxu3 %v7397_v59  ;;  %v7259_v59 = vld [vmem:[%s7763_s9 + $0x3c] sm:$0xff] }
 0x2ca   : > { %v4881_v46 = vadd.f32 %v4880_v26, %v4792_v43  ;;  %v2159_v26 = vrot.slane %v9362_v18, 1 }
 0x2cc   : > { %v5061_v30 = vpop.f32.mrf.mxu1  ;;  %v4970_v62 = vadd.f32 %v4969_v23, %v4881_v46  ;;  %5109 = vmatmul.bf16.gmra.mxu2 %v2093_v41  ;;  %5287 = vmatmul.bf16.gmra.mxu0 %v7242_v42 }
 0x2cd   : > { %5198 = vmatmul.bf16.gmra.mxu3 %v2157_v34  ;;  %v9363_v34 = vld [vmem:[#allocation6_spill] sm:$0xff] }
 0x2ce   : > { %v8806_v32 = vadd.f32 %v5058_v1, %v4970_v62  ;;  %v2095_v1 = vrot.slane %v8426_v8, 1 }
 0x2cf   : > { %5376 = vmatmul.bf16.gmra.mxu1 %v7258_v27  ;;  %v4794_v22 = vpop.f32.mrf.mxu2  ;;  %v7243_v27 = vld [vmem:[%s7758_s6 + $0x3c] sm:$0xff] }
 0x2d0   : > { %v4883_v16 = vpop.f32.mrf.mxu3  ;;  %v4795_v23 = vadd.f32 %v4794_v22, %v8438_v0  ;;  %v2096_v46 = vsel %vm1252_vm1, %v2094_v55, %v2095_v1  ;;  %v7577_v1 = vld [vmem:[%s7758_s6 + $0x3c] sm:$0xff] }
 0x2d1   : > { %v4974_v37 = vpop.f32.mrf.mxu0  ;;  %v2097_v53 = vrot.slane %v7577_v1, 1 }
 0x2d2   : > { %v4884_v29 = vadd.f32 %v4883_v16, %v4795_v23 }
 0x2d4   : > { %v5063_v49 = vpop.f32.mrf.mxu1  ;;  %v4973_v61 = vadd.f32 %v4972_v2, %v4884_v29  ;;  %v2160_v2 = vsel %vm1252_vm1, %v2158_v52, %v2159_v26  ;;  %v9364_v52 = vld [vmem:[#allocation5_spill] sm:$0xff] }
 0x2d5   : > { %v2098_v18 = vrot.slane %v9364_v52, 1  ;;  %v7578_v26 = vld [vmem:[%s7763_s9 + $0x3c] sm:$0xff] }
 0x2d6   : > { %v8816_v0 = vadd.f32 %v5061_v30, %v4973_v61  ;;  %v7413_v30 = vld [vmem:[%s9311_s2 + $0x468] sm:$0xff] }
 0x2d7   : > { %v4796_v43 = vpop.f32.mrf.mxu2  ;;  %5716 = vmatpush.bf16.msra.mxu1 %v7413_v30 }
 0x2d8   : > { %v4885_v41 = vpop.f32.mrf.mxu3  ;;  %v4797_v42 = vadd.f32 %v4796_v43, %v9363_v34  ;;  %v2161_v43 = vrot.slane %v7578_v26, 1  ;;  %v7579_v26 = vld [vmem:[%s7758_s6 + $0x48] sm:$0xff] }
 0x2d9   : > { %v4977_v38 = vpop.f32.mrf.mxu0 }
 0x2da   : > { %v4886_v62 = vadd.f32 %v4885_v41, %v4797_v42  ;;  %v9365_v41 = vld [vmem:[#allocation7_spill] sm:$0xff] }
 0x2dc   : > { %v5066_v8 = vpop.f32.mrf.mxu1  ;;  %v4975_v22 = vadd.f32 %v4974_v37, %v4886_v62  ;;  %5114 = vmatmul.bf16.gmra.mxu2 %v2096_v46  ;;  %5292 = vmatmul.bf16.gmra.mxu0 %v7243_v27  ;;  %v7244_v62 = vld [vmem:[%s7758_s6 + $0x48] sm:$0xff] }
 0x2dd   : > { %5203 = vmatmul.bf16.gmra.mxu3 %v2160_v2  ;;  %v2099_v2 = vsel %vm1252_vm1, %v2097_v53, %v2098_v18  ;;  %v7404_v18 = vld [vmem:[%s9311_s2 + $0x420] sm:$0xff] }
 0x2de   : > { %v8826_v16 = vadd.f32 %v5063_v49, %v4975_v22  ;;  %v2162_v49 = vrot.slane %v9365_v41, 1  ;;  %v7260_v22 = vld [vmem:[%s7763_s9 + $0x48] sm:$0xff]  ;;  %5628 = vmatpush.bf16.msra.mxu0 %v7404_v18 }
 0x2df   : > { %5381 = vmatmul.bf16.gmra.mxu1 %v7259_v59  ;;  %v4799_v23 = vpop.f32.mrf.mxu2  ;;  %v7580_v41 = vld [vmem:[%s7763_s9 + $0x48] sm:$0xff] }
 0x2e0   : > { %v4888_v29 = vpop.f32.mrf.mxu3  ;;  %v4800_v61 = vadd.f32 %v4799_v23, %v8459_v15  ;;  %v2163_v27 = vsel %vm1252_vm1, %v2161_v43, %v2162_v49  ;;  %v2100_v43 = vrot.slane %v7579_v26, 1  ;;  %v2164_v49 = vrot.slane %v7580_v41, 1 }
 0x2e1   : > { %v4979_v58 = vpop.f32.mrf.mxu0 }
 0x2e2   : > { %v4889_v17 = vadd.f32 %v4888_v29, %v4800_v61 }
 0x2e4   : > { %v5068_v37 = vpop.f32.mrf.mxu1  ;;  %v4978_v55 = vadd.f32 %v4977_v38, %v4889_v17 }
 0x2e6   : > { %v8833_v34 = vadd.f32 %v5066_v8, %v4978_v55  ;;  %v7388_v8 = vld [vmem:[%s9311_s2 + $0x3a0] sm:$0xff] }
 0x2e7   : > { %v4801_v42 = vpop.f32.mrf.mxu2  ;;  %5450 = vmatpush.bf16.msra.mxu2 %v7388_v8 }
 0x2e8   : > { %v4890_v46 = vpop.f32.mrf.mxu3  ;;  %v4802_v15 = vadd.f32 %v4801_v42, %v8476_v47  ;;  %v7396_v47 = vld [vmem:[%s9311_s2 + $0x3e0] sm:$0xff]  ;;  %v9366_v42 = vld [vmem:[#allocation8_spill] sm:$0xff] }
 0x2e9   : > { %v4982_v59 = vpop.f32.mrf.mxu0  ;;  %5539 = vmatpush.bf16.msra.mxu3 %v7396_v47  ;;  %v7261_v47 = vld [vmem:[%s7763_s9 + $0x54] sm:$0xff] }
 0x2ea   : > { %v4891_v38 = vadd.f32 %v4890_v46, %v4802_v15  ;;  %v2165_v46 = vrot.slane %v9366_v42, 1 }
 0x2ec   : > { %v5071_v30 = vpop.f32.mrf.mxu1  ;;  %v4980_v23 = vadd.f32 %v4979_v58, %v4891_v38  ;;  %5119 = vmatmul.bf16.gmra.mxu2 %v2099_v2  ;;  %5297 = vmatmul.bf16.gmra.mxu0 %v7244_v62 }
 0x2ed   : > { %5208 = vmatmul.bf16.gmra.mxu3 %v2163_v27  ;;  %v9367_v27 = vld [vmem:[#allocation10_spill] sm:$0xff] }
 0x2ee   : > { %v8846_v29 = vadd.f32 %v5068_v37, %v4980_v23  ;;  %v2101_v37 = vrot.slane %v8474_v60, 1 }
 0x2ef   : > { %5386 = vmatmul.bf16.gmra.mxu1 %v7260_v22  ;;  %v4804_v61 = vpop.f32.mrf.mxu2  ;;  %v7245_v22 = vld [vmem:[%s7758_s6 + $0x54] sm:$0xff] }
 0x2f0   : > { %v4893_v17 = vpop.f32.mrf.mxu3  ;;  %v4805_v58 = vadd.f32 %v4804_v61, %v8486_v11  ;;  %v2102_v38 = vsel %vm1252_vm1, %v2100_v43, %v2101_v37  ;;  %v7581_v37 = vld [vmem:[%s7758_s6 + $0x54] sm:$0xff] }
 0x2f1   : > { %v4984_v1 = vpop.f32.mrf.mxu0  ;;  %v2103_v41 = vrot.slane %v7581_v37, 1 }
 0x2f2   : > { %v4894_v55 = vadd.f32 %v4893_v17, %v4805_v58 }
 0x2f4   : > { %v5073_v53 = vpop.f32.mrf.mxu1  ;;  %v4983_v52 = vadd.f32 %v4982_v59, %v4894_v55  ;;  %v2166_v59 = vsel %vm1252_vm1, %v2164_v49, %v2165_v46  ;;  %v9368_v49 = vld [vmem:[#allocation9_spill] sm:$0xff] }
 0x2f5   : > { %v2104_v42 = vrot.slane %v9368_v49, 1  ;;  %v7582_v46 = vld [vmem:[%s7763_s9 + $0x54] sm:$0xff] }
 0x2f6   : > { %v8856_v11 = vadd.f32 %v5071_v30, %v4983_v52  ;;  %v7412_v30 = vld [vmem:[%s9311_s2 + $0x460] sm:$0xff] }
 0x2f7   : > { %v4806_v15 = vpop.f32.mrf.mxu2  ;;  %5717 = vmatpush.bf16.msra.mxu1 %v7412_v30 }
 0x2f8   : > { %v4895_v2 = vpop.f32.mrf.mxu3  ;;  %v4807_v62 = vadd.f32 %v4806_v15, %v9367_v27  ;;  %v2167_v15 = vrot.slane %v7582_v46, 1  ;;  %v7583_v46 = vld [vmem:[%s7758_s6 + $0x60] sm:$0xff] }
 0x2f9   : > { %v4987_v8 = vpop.f32.mrf.mxu0 }
 0x2fa   : > { %v4896_v23 = vadd.f32 %v4895_v2, %v4807_v62  ;;  %v9369_v2 = vld [vmem:[#allocation11_spill] sm:$0xff] }
 0x2fc   : > { %v5076_v60 = vpop.f32.mrf.mxu1  ;;  %v4985_v61 = vadd.f32 %v4984_v1, %v4896_v23  ;;  %5124 = vmatmul.bf16.gmra.mxu2 %v2102_v38  ;;  %5302 = vmatmul.bf16.gmra.mxu0 %v7245_v22  ;;  %v7246_v23 = vld [vmem:[%s7758_s6 + $0x60] sm:$0xff] }
 0x2fd   : > { %5213 = vmatmul.bf16.gmra.mxu3 %v2166_v59  ;;  %v2105_v59 = vsel %vm1252_vm1, %v2103_v41, %v2104_v42  ;;  %v7403_v42 = vld [vmem:[%s9311_s2 + $0x418] sm:$0xff] }
 0x2fe   : > { %v8866_v17 = vadd.f32 %v5073_v53, %v4985_v61  ;;  %v2168_v53 = vrot.slane %v9369_v2, 1  ;;  %v7262_v61 = vld [vmem:[%s7763_s9 + $0x60] sm:$0xff]  ;;  %5629 = vmatpush.bf16.msra.mxu0 %v7403_v42 }
 0x2ff   : > { %5391 = vmatmul.bf16.gmra.mxu1 %v7261_v47  ;;  %v4809_v58 = vpop.f32.mrf.mxu2  ;;  %v7584_v2 = vld [vmem:[%s7763_s9 + $0x60] sm:$0xff] }
 0x300   : > { %v4898_v55 = vpop.f32.mrf.mxu3  ;;  %v4810_v52 = vadd.f32 %v4809_v58, %v8507_v10  ;;  %v2169_v22 = vsel %vm1252_vm1, %v2167_v15, %v2168_v53  ;;  %v2106_v15 = vrot.slane %v7583_v46, 1  ;;  %v2170_v53 = vrot.slane %v7584_v2, 1 }
 0x301   : > { %v4989_v26 = vpop.f32.mrf.mxu0 }
 0x302   : > { %v4899_v18 = vadd.f32 %v4898_v55, %v4810_v52 }
 0x304   : > { %v5078_v1 = vpop.f32.mrf.mxu1  ;;  %v4988_v43 = vadd.f32 %v4987_v8, %v4899_v18 }
 0x306   : > { %v8873_v27 = vadd.f32 %v5076_v60, %v4988_v43  ;;  %v7387_v60 = vld [vmem:[%s9311_s2 + $0x398] sm:$0xff] }
 0x307   : > { %v4811_v62 = vpop.f32.mrf.mxu2  ;;  %5451 = vmatpush.bf16.msra.mxu2 %v7387_v60 }
 0x308   : > { %v4900_v38 = vpop.f32.mrf.mxu3  ;;  %v4812_v10 = vadd.f32 %v4811_v62, %v8524_v48  ;;  %v7395_v48 = vld [vmem:[%s9311_s2 + $0x3d8] sm:$0xff]  ;;  %v9370_v62 = vld [vmem:[#allocation12_spill] sm:$0xff] }
 0x309   : > { %v4992_v47 = vpop.f32.mrf.mxu0  ;;  %5540 = vmatpush.bf16.msra.mxu3 %v7395_v48  ;;  %v7263_v48 = vld [vmem:[%s7763_s9 + $0x6c] sm:$0xff] }
 0x30a   : > { %v4901_v8 = vadd.f32 %v4900_v38, %v4812_v10  ;;  %v2171_v38 = vrot.slane %v9370_v62, 1 }
 0x30c   : > { %v5081_v30 = vpop.f32.mrf.mxu1  ;;  %v4990_v58 = vadd.f32 %v4989_v26, %v4901_v8  ;;  %5129 = vmatmul.bf16.gmra.mxu2 %v2105_v59  ;;  %5307 = vmatmul.bf16.gmra.mxu0 %v7246_v23 }
 0x30d   : > { %5218 = vmatmul.bf16.gmra.mxu3 %v2169_v22  ;;  %v9371_v22 = vld [vmem:[#allocation14_spill] sm:$0xff] }
 0x30e   : > { %v8886_v55 = vadd.f32 %v5078_v1, %v4990_v58  ;;  %v2107_v1 = vrot.slane %v8522_v14, 1 }
 0x30f   : > { %5396 = vmatmul.bf16.gmra.mxu1 %v7262_v61  ;;  %v4814_v52 = vpop.f32.mrf.mxu2  ;;  %v7247_v61 = vld [vmem:[%s7758_s6 + $0x6c] sm:$0xff] }
 0x310   : > { %v4903_v18 = vpop.f32.mrf.mxu3  ;;  %v4815_v26 = vadd.f32 %v4814_v52, %v8534_v57  ;;  %v2108_v8 = vsel %vm1252_vm1, %v2106_v15, %v2107_v1  ;;  %v7585_v1 = vld [vmem:[%s7758_s6 + $0x6c] sm:$0xff] }
 0x311   : > { %v4994_v37 = vpop.f32.mrf.mxu0  ;;  %v2109_v2 = vrot.slane %v7585_v1, 1 }
 0x312   : > { %v4904_v43 = vadd.f32 %v4903_v18, %v4815_v26 }
 0x314   : > { %v5083_v41 = vpop.f32.mrf.mxu1  ;;  %v4993_v49 = vadd.f32 %v4992_v47, %v4904_v43  ;;  %v2172_v47 = vsel %vm1252_vm1, %v2170_v53, %v2171_v38  ;;  %v9372_v53 = vld [vmem:[#allocation13_spill] sm:$0xff]  ;;  %v7586_v38 = vld [vmem:[%s7763_s9 + $0x6c] sm:$0xff] }
 0x315   : > { %v2110_v62 = vrot.slane %v9372_v53, 1 }
 0x316   : > { %v8896_v57 = vadd.f32 %v5081_v30, %v4993_v49  ;;  %v7411_v30 = vld [vmem:[%s9311_s2 + $0x458] sm:$0xff] }
 0x317   : > { %v4816_v10 = vpop.f32.mrf.mxu2  ;;  %5718 = vmatpush.bf16.msra.mxu1 %v7411_v30 }
 0x318   : > { %v4905_v59 = vpop.f32.mrf.mxu3  ;;  %v4817_v23 = vadd.f32 %v4816_v10, %v9371_v22  ;;  %v2173_v10 = vrot.slane %v7586_v38, 1  ;;  %v7587_v38 = vld [vmem:[%s7758_s6 + $0x78] sm:$0xff] }
 0x319   : > { %v4997_v60 = vpop.f32.mrf.mxu0 }
 0x31a   : > { %v4906_v58 = vadd.f32 %v4905_v59, %v4817_v23  ;;  %v9373_v59 = vld [vmem:[#allocation15_spill] sm:$0xff] }
 0x31c   : > { %v5086_v14 = vpop.f32.mrf.mxu1  ;;  %v4995_v52 = vadd.f32 %v4994_v37, %v4906_v58  ;;  %5134 = vmatmul.bf16.gmra.mxu2 %v2108_v8  ;;  %5312 = vmatmul.bf16.gmra.mxu0 %v7247_v61  ;;  %v7248_v58 = vld [vmem:[%s7758_s6 + $0x78] sm:$0xff] }
 0x31d   : > { %5223 = vmatmul.bf16.gmra.mxu3 %v2172_v47  ;;  %v2111_v47 = vsel %vm1252_vm1, %v2109_v2, %v2110_v62  ;;  %v7402_v62 = vld [vmem:[%s9311_s2 + $0x410] sm:$0xff] }
 0x31e   : > { %v8906_v18 = vadd.f32 %v5083_v41, %v4995_v52  ;;  %v2174_v41 = vrot.slane %v9373_v59, 1  ;;  %v7264_v52 = vld [vmem:[%s7763_s9 + $0x78] sm:$0xff]  ;;  %5630 = vmatpush.bf16.msra.mxu0 %v7402_v62 }
 0x31f   : > { %5401 = vmatmul.bf16.gmra.mxu1 %v7263_v48  ;;  %v4819_v26 = vpop.f32.mrf.mxu2  ;;  %v7588_v59 = vld [vmem:[%s7763_s9 + $0x78] sm:$0xff] }
 0x320   : > { %v4908_v43 = vpop.f32.mrf.mxu3  ;;  %v4820_v49 = vadd.f32 %v4819_v26, %v8555_v6  ;;  %v2175_v61 = vsel %vm1252_vm1, %v2173_v10, %v2174_v41  ;;  %v2112_v10 = vrot.slane %v7587_v38, 1  ;;  %v2176_v41 = vrot.slane %v7588_v59, 1 }
 0x321   : > { %v4999_v46 = vpop.f32.mrf.mxu0 }
 0x322   : > { %v4909_v42 = vadd.f32 %v4908_v43, %v4820_v49 }
 0x324   : > { %v5088_v37 = vpop.f32.mrf.mxu1  ;;  %v4998_v15 = vadd.f32 %v4997_v60, %v4909_v42 }
 0x326   : > { %v8913_v22 = vadd.f32 %v5086_v14, %v4998_v15  ;;  %v7386_v14 = vld [vmem:[%s9311_s2 + $0x390] sm:$0xff] }
 0x327   : > { %v4821_v23 = vpop.f32.mrf.mxu2  ;;  %5452 = vmatpush.bf16.msra.mxu2 %v7386_v14 }
 0x328   : > { %v4910_v8 = vpop.f32.mrf.mxu3  ;;  %v4822_v6 = vadd.f32 %v4821_v23, %v8572_v12  ;;  %v7394_v12 = vld [vmem:[%s9311_s2 + $0x3d0] sm:$0xff] }
 0x329   : > { %v5278_v48 = vpop.f32.mrf.mxu0  ;;  %5541 = vmatpush.bf16.msra.mxu3 %v7394_v12  ;;  %v9374_v23 = vld [vmem:[#allocation16_spill] sm:$0xff]  ;;  %v7265_v12 = vld [vmem:[%s7763_s9 + $0x84] sm:$0xff] }
 0x32a   : > { %v4911_v60 = vadd.f32 %v4910_v8, %v4822_v6  ;;  %v2177_v8 = vrot.slane %v9374_v23, 1 }
 0x32c   : > { %v5367_v30 = vpop.f32.mrf.mxu1  ;;  %v5000_v26 = vadd.f32 %v4999_v46, %v4911_v60  ;;  %5139 = vmatmul.bf16.gmra.mxu2 %v2111_v47  ;;  %5317 = vmatmul.bf16.gmra.mxu0 %v7248_v58 }
 0x32d   : > { %5228 = vmatmul.bf16.gmra.mxu3 %v2175_v61  ;;  %v9375_v61 = vld [vmem:[#allocation18_spill] sm:$0xff] }
 0x32e   : > { %v8926_v43 = vadd.f32 %v5088_v37, %v5000_v26  ;;  %v2113_v37 = vrot.slane %v8570_v25, 1 }
 0x32f   : > { %5406 = vmatmul.bf16.gmra.mxu1 %v7264_v52  ;;  %v5100_v49 = vpop.f32.mrf.mxu2  ;;  %v7249_v52 = vld [vmem:[%s7758_s6 + $0x84] sm:$0xff] }
 0x330   : > { %v5189_v42 = vpop.f32.mrf.mxu3  ;;  %v5101_v46 = vadd.f32 %v5100_v49, %v8582_v39  ;;  %v2114_v60 = vsel %vm1252_vm1, %v2112_v10, %v2113_v37  ;;  %v7589_v37 = vld [vmem:[%s7758_s6 + $0x84] sm:$0xff] }
 0x331   : > { %v5280_v1 = vpop.f32.mrf.mxu0  ;;  %v2115_v59 = vrot.slane %v7589_v37, 1 }
 0x332   : > { %v5190_v15 = vadd.f32 %v5189_v42, %v5101_v46 }
 0x334   : > { %v5369_v2 = vpop.f32.mrf.mxu1  ;;  %v5279_v53 = vadd.f32 %v5278_v48, %v5190_v15  ;;  %v2178_v48 = vsel %vm1252_vm1, %v2176_v41, %v2177_v8  ;;  %v9376_v41 = vld [vmem:[#allocation17_spill] sm:$0xff]  ;;  %v7590_v8 = vld [vmem:[%s7763_s9 + $0x84] sm:$0xff] }
 0x335   : > { %v2116_v23 = vrot.slane %v9376_v41, 1 }
 0x336   : > { %v8936_v39 = vadd.f32 %v5367_v30, %v5279_v53  ;;  %v7410_v30 = vld [vmem:[%s9311_s2 + $0x450] sm:$0xff] }
 0x337   : > { %v5102_v6 = vpop.f32.mrf.mxu2  ;;  %5719 = vmatpush.bf16.msra.mxu1 %v7410_v30 }
 0x338   : > { %v5191_v47 = vpop.f32.mrf.mxu3  ;;  %v5103_v58 = vadd.f32 %v5102_v6, %v9375_v61  ;;  %v2179_v6 = vrot.slane %v7590_v8, 1  ;;  %v7591_v8 = vld [vmem:[%s7758_s6 + $0x90] sm:$0xff] }
 0x339   : > { %v5283_v14 = vpop.f32.mrf.mxu0 }
 0x33a   : > { %v5192_v26 = vadd.f32 %v5191_v47, %v5103_v58  ;;  %v9377_v47 = vld [vmem:[#allocation19_spill] sm:$0xff] }
 0x33c   : > { %v5372_v25 = vpop.f32.mrf.mxu1  ;;  %v5281_v49 = vadd.f32 %v5280_v1, %v5192_v26  ;;  %5144 = vmatmul.bf16.gmra.mxu2 %v2114_v60  ;;  %5322 = vmatmul.bf16.gmra.mxu0 %v7249_v52  ;;  %v7250_v26 = vld [vmem:[%s7758_s6 + $0x90] sm:$0xff] }
 0x33d   : > { %5233 = vmatmul.bf16.gmra.mxu3 %v2178_v48  ;;  %v2117_v48 = vsel %vm1252_vm1, %v2115_v59, %v2116_v23  ;;  %v7401_v23 = vld [vmem:[%s9311_s2 + $0x408] sm:$0xff] }
 0x33e   : > { %v8946_v42 = vadd.f32 %v5369_v2, %v5281_v49  ;;  %v2180_v2 = vrot.slane %v9377_v47, 1  ;;  %v7266_v49 = vld [vmem:[%s7763_s9 + $0x90] sm:$0xff]  ;;  %5631 = vmatpush.bf16.msra.mxu0 %v7401_v23 }
 0x33f   : > { %5411 = vmatmul.bf16.gmra.mxu1 %v7265_v12  ;;  %v5105_v46 = vpop.f32.mrf.mxu2  ;;  %v7592_v47 = vld [vmem:[%s7763_s9 + $0x90] sm:$0xff] }
 0x340   : > { %v5194_v15 = vpop.f32.mrf.mxu3  ;;  %v5106_v53 = vadd.f32 %v5105_v46, %v8603_v5  ;;  %v2181_v52 = vsel %vm1252_vm1, %v2179_v6, %v2180_v2  ;;  %v2118_v6 = vrot.slane %v7591_v8, 1  ;;  %v2182_v2 = vrot.slane %v7592_v47, 1 }
 0x341   : > { %v5285_v38 = vpop.f32.mrf.mxu0 }
 0x342   : > { %v5195_v62 = vadd.f32 %v5194_v15, %v5106_v53 }
 0x344   : > { %v5374_v1 = vpop.f32.mrf.mxu1  ;;  %v5284_v10 = vadd.f32 %v5283_v14, %v5195_v62 }
 0x346   : > { %v8953_v61 = vadd.f32 %v5372_v25, %v5284_v10  ;;  %v7385_v25 = vld [vmem:[%s9311_s2 + $0x388] sm:$0xff] }
 0x347   : > { %v5107_v58 = vpop.f32.mrf.mxu2  ;;  %5453 = vmatpush.bf16.msra.mxu2 %v7385_v25 }
 0x348   : > { %v5196_v60 = vpop.f32.mrf.mxu3  ;;  %v5108_v5 = vadd.f32 %v5107_v58, %v8620_v4  ;;  %v7393_v4 = vld [vmem:[%s9311_s2 + $0x3c8] sm:$0xff]  ;;  %v9378_v58 = vld [vmem:[#allocation20_spill] sm:$0xff] }
 0x349   : > { %v5288_v12 = vpop.f32.mrf.mxu0  ;;  %5542 = vmatpush.bf16.msra.mxu3 %v7393_v4  ;;  %v7267_v4 = vld [vmem:[%s7763_s9 + $0x9c] sm:$0xff] }
 0x34a   : > { %v5197_v14 = vadd.f32 %v5196_v60, %v5108_v5  ;;  %v2183_v60 = vrot.slane %v9378_v58, 1 }
 0x34c   : > { %v5377_v30 = vpop.f32.mrf.mxu1  ;;  %v5286_v46 = vadd.f32 %v5285_v38, %v5197_v14  ;;  %5149 = vmatmul.bf16.gmra.mxu2 %v2117_v48  ;;  %5327 = vmatmul.bf16.gmra.mxu0 %v7250_v26 }
 0x34d   : > { %5238 = vmatmul.bf16.gmra.mxu3 %v2181_v52  ;;  %v9379_v52 = vld [vmem:[#allocation22_spill] sm:$0xff] }
 0x34e   : > { %v8966_v15 = vadd.f32 %v5374_v1, %v5286_v46  ;;  %v2119_v1 = vrot.slane %v8618_v45, 1 }
 0x34f   : > { %5416 = vmatmul.bf16.gmra.mxu1 %v7266_v49  ;;  %v5110_v53 = vpop.f32.mrf.mxu2  ;;  %v7251_v49 = vld [vmem:[%s7758_s6 + $0x9c] sm:$0xff] }
 0x350   : > { %v5199_v62 = vpop.f32.mrf.mxu3  ;;  %v5111_v38 = vadd.f32 %v5110_v53, %v8630_v33  ;;  %v2120_v14 = vsel %vm1252_vm1, %v2118_v6, %v2119_v1  ;;  %v7593_v1 = vld [vmem:[%s7758_s6 + $0x9c] sm:$0xff] }
 0x351   : > { %v5290_v37 = vpop.f32.mrf.mxu0  ;;  %v2121_v47 = vrot.slane %v7593_v1, 1 }
 0x352   : > { %v5200_v10 = vadd.f32 %v5199_v62, %v5111_v38 }
 0x354   : > { %v5379_v59 = vpop.f32.mrf.mxu1  ;;  %v5289_v41 = vadd.f32 %v5288_v12, %v5200_v10  ;;  %v2184_v12 = vsel %vm1252_vm1, %v2182_v2, %v2183_v60  ;;  %v9380_v2 = vld [vmem:[#allocation21_spill] sm:$0xff] }
 0x355   : > { %v2122_v58 = vrot.slane %v9380_v2, 1  ;;  %v7594_v60 = vld [vmem:[%s7763_s9 + $0x9c] sm:$0xff] }
 0x356   : > { %v8976_v33 = vadd.f32 %v5377_v30, %v5289_v41  ;;  %v7409_v30 = vld [vmem:[%s9311_s2 + $0x448] sm:$0xff] }
 0x357   : > { %v5112_v5 = vpop.f32.mrf.mxu2  ;;  %5720 = vmatpush.bf16.msra.mxu1 %v7409_v30 }
 0x358   : > { %v5201_v48 = vpop.f32.mrf.mxu3  ;;  %v5113_v26 = vadd.f32 %v5112_v5, %v9379_v52  ;;  %v2185_v5 = vrot.slane %v7594_v60, 1  ;;  %v7595_v60 = vld [vmem:[%s7758_s6 + $0xa8] sm:$0xff] }
 0x359   : > { %v5293_v25 = vpop.f32.mrf.mxu0 }
 0x35a   : > { %v5202_v46 = vadd.f32 %v5201_v48, %v5113_v26  ;;  %v9381_v48 = vld [vmem:[#allocation23_spill] sm:$0xff] }
 0x35c   : > { %v5382_v45 = vpop.f32.mrf.mxu1  ;;  %v5291_v53 = vadd.f32 %v5290_v37, %v5202_v46  ;;  %5154 = vmatmul.bf16.gmra.mxu2 %v2120_v14  ;;  %5332 = vmatmul.bf16.gmra.mxu0 %v7251_v49  ;;  %v7252_v46 = vld [vmem:[%s7758_s6 + $0xa8] sm:$0xff] }
 0x35d   : > { %5243 = vmatmul.bf16.gmra.mxu3 %v2184_v12  ;;  %v2123_v12 = vsel %vm1252_vm1, %v2121_v47, %v2122_v58  ;;  %v7400_v58 = vld [vmem:[%s9311_s2 + $0x400] sm:$0xff] }
 0x35e   : > { %v8986_v62 = vadd.f32 %v5379_v59, %v5291_v53  ;;  %v2186_v59 = vrot.slane %v9381_v48, 1  ;;  %v7268_v53 = vld [vmem:[%s7763_s9 + $0xa8] sm:$0xff]  ;;  %5632 = vmatpush.bf16.msra.mxu0 %v7400_v58 }
 0x35f   : > { %5421 = vmatmul.bf16.gmra.mxu1 %v7267_v4  ;;  %v5115_v38 = vpop.f32.mrf.mxu2  ;;  %v7596_v48 = vld [vmem:[%s7763_s9 + $0xa8] sm:$0xff] }
 0x360   : > { %v5204_v10 = vpop.f32.mrf.mxu3  ;;  %v5116_v41 = vadd.f32 %v5115_v38, %v8651_v28  ;;  %v2187_v49 = vsel %vm1252_vm1, %v2185_v5, %v2186_v59  ;;  %v2124_v5 = vrot.slane %v7595_v60, 1  ;;  %v2188_v59 = vrot.slane %v7596_v48, 1 }
 0x361   : > { %v5295_v8 = vpop.f32.mrf.mxu0 }
 0x362   : > { %v5205_v23 = vadd.f32 %v5204_v10, %v5116_v41 }
 0x364   : > { %v5384_v37 = vpop.f32.mrf.mxu1  ;;  %v5294_v6 = vadd.f32 %v5293_v25, %v5205_v23 }
 0x366   : > { %v8993_v52 = vadd.f32 %v5382_v45, %v5294_v6  ;;  %v7384_v45 = vld [vmem:[%s9311_s2 + $0x380] sm:$0xff] }
 0x367   : > { %v5117_v26 = vpop.f32.mrf.mxu2  ;;  %5454 = vmatpush.bf16.msra.mxu2 %v7384_v45 }
 0x368   : > { %v5206_v14 = vpop.f32.mrf.mxu3  ;;  %v5118_v28 = vadd.f32 %v5117_v26, %v8668_v9  ;;  %v7392_v9 = vld [vmem:[%s9311_s2 + $0x3c0] sm:$0xff]  ;;  %v9382_v26 = vld [vmem:[#allocation24_spill] sm:$0xff] }
 0x369   : > { %v5298_v4 = vpop.f32.mrf.mxu0  ;;  %5543 = vmatpush.bf16.msra.mxu3 %v7392_v9  ;;  %v7269_v9 = vld [vmem:[%s7763_s9 + $0xb4] sm:$0xff] }
 0x36a   : > { %v5207_v25 = vadd.f32 %v5206_v14, %v5118_v28  ;;  %v2189_v14 = vrot.slane %v9382_v26, 1 }
 0x36c   : > { %v5387_v30 = vpop.f32.mrf.mxu1  ;;  %v5296_v38 = vadd.f32 %v5295_v8, %v5207_v25  ;;  %5159 = vmatmul.bf16.gmra.mxu2 %v2123_v12  ;;  %5337 = vmatmul.bf16.gmra.mxu0 %v7252_v46 }
 0x36d   : > { %5248 = vmatmul.bf16.gmra.mxu3 %v2187_v49  ;;  %v9383_v49 = vld [vmem:[#allocation26_spill] sm:$0xff] }
 0x36e   : > { %v9006_v10 = vadd.f32 %v5384_v37, %v5296_v38  ;;  %v2125_v37 = vrot.slane %v8666_v44, 1 }
 0x36f   : > { %5426 = vmatmul.bf16.gmra.mxu1 %v7268_v53  ;;  %v5120_v41 = vpop.f32.mrf.mxu2  ;;  %v7253_v53 = vld [vmem:[%s7758_s6 + $0xb4] sm:$0xff] }
 0x370   : > { %v5209_v23 = vpop.f32.mrf.mxu3  ;;  %v5121_v8 = vadd.f32 %v5120_v41, %v8678_v56  ;;  %v2126_v25 = vsel %vm1252_vm1, %v2124_v5, %v2125_v37  ;;  %v7597_v37 = vld [vmem:[%s7758_s6 + $0xb4] sm:$0xff] }
 0x371   : > { %v5300_v1 = vpop.f32.mrf.mxu0  ;;  %v2127_v48 = vrot.slane %v7597_v37, 1 }
 0x372   : > { %v5210_v6 = vadd.f32 %v5209_v23, %v5121_v8 }
 0x374   : > { %v5389_v47 = vpop.f32.mrf.mxu1  ;;  %v5299_v2 = vadd.f32 %v5298_v4, %v5210_v6  ;;  %v2190_v4 = vsel %vm1252_vm1, %v2188_v59, %v2189_v14  ;;  %v9384_v59 = vld [vmem:[#allocation25_spill] sm:$0xff] }
 0x375   : > { %v2128_v26 = vrot.slane %v9384_v59, 1  ;;  %v7598_v14 = vld [vmem:[%s7763_s9 + $0xb4] sm:$0xff]  ;;  %v7599_v59 = vld [vmem:[%s7758_s6 + $0xc0] sm:$0xff] }
 0x376   : > { %v9016_v56 = vadd.f32 %v5387_v30, %v5299_v2  ;;  %v7408_v30 = vld [vmem:[%s9311_s2 + $0x440] sm:$0xff] }
 0x377   : > { %v5122_v28 = vpop.f32.mrf.mxu2  ;;  %5721 = vmatpush.bf16.msra.mxu1 %v7408_v30 }
 0x378   : > { %v5211_v12 = vpop.f32.mrf.mxu3  ;;  %v5123_v46 = vadd.f32 %v5122_v28, %v9383_v49  ;;  %v2191_v28 = vrot.slane %v7598_v14, 1  ;;  %v7600_v14 = vld [vmem:[%s7763_s9 + $0xc0] sm:$0xff] }
 0x379   : > { %v5303_v45 = vpop.f32.mrf.mxu0 }
 0x37a   : > { %v5212_v38 = vadd.f32 %v5211_v12, %v5123_v46  ;;  %v9385_v12 = vld [vmem:[#allocation27_spill] sm:$0xff] }
 0x37c   : > { %v5392_v44 = vpop.f32.mrf.mxu1  ;;  %v5301_v41 = vadd.f32 %v5300_v1, %v5212_v38  ;;  %5164 = vmatmul.bf16.gmra.mxu2 %v2126_v25  ;;  %5342 = vmatmul.bf16.gmra.mxu0 %v7253_v53  ;;  %v7254_v38 = vld [vmem:[%s7758_s6 + $0xc0] sm:$0xff] }
 0x37d   : > { %5253 = vmatmul.bf16.gmra.mxu3 %v2190_v4  ;;  %v2129_v4 = vsel %vm1252_vm1, %v2127_v48, %v2128_v26  ;;  %v2131_v26 = vrot.slane %v8714_v40, 1 }
 0x37e   : > { %v9026_v23 = vadd.f32 %v5389_v47, %v5301_v41  ;;  %v2192_v47 = vrot.slane %v9385_v12, 1  ;;  %v7270_v41 = vld [vmem:[%s7763_s9 + $0xc0] sm:$0xff]  ;;  %v2195_v12 = vrot.slane %v8718_v19, 1 }
 0x37f   : > { %5431 = vmatmul.bf16.gmra.mxu1 %v7269_v9  ;;  %v5125_v8 = vpop.f32.mrf.mxu2 }
 0x380   : > { %v5214_v6 = vpop.f32.mrf.mxu3  ;;  %v5126_v2 = vadd.f32 %v5125_v8, %v8699_v31  ;;  %v2193_v53 = vsel %vm1252_vm1, %v2191_v28, %v2192_v47  ;;  %v2194_v28 = vrot.slane %v7600_v14, 1  ;;  %v6167_v47 = vld [vmem:[%s7763_s9 + $0x20] sm:$0xf] }
 0x381   : > { %v5305_v60 = vpop.f32.mrf.mxu0  ;;  %v2677_v40 = vunpack.c.l.b16 %v6167_v47 }
 0x382   : > { %v5215_v58 = vadd.f32 %v5214_v6, %v5126_v2 }
 0x384   : > { %v5394_v1 = vpop.f32.mrf.mxu1  ;;  %v5304_v5 = vadd.f32 %v5303_v45, %v5215_v58 }
 0x386   : > { %v9033_v49 = vadd.f32 %v5392_v44, %v5304_v5 }
 0x387   : > { %v5127_v46 = vpop.f32.mrf.mxu2 }
 0x388   : > { %v5216_v25 = vpop.f32.mrf.mxu3  ;;  %v5128_v31 = vadd.f32 %v5127_v46, %v8716_v50 }
 0x389   : > { %v5308_v9 = vpop.f32.mrf.mxu0 }
 0x38a   : > { %v5217_v45 = vadd.f32 %v5216_v25, %v5128_v31 }
 0x38c   : > { %v5397_v30 = vpop.f32.mrf.mxu1  ;;  %v5306_v8 = vadd.f32 %v5305_v60, %v5217_v45  ;;  %5169 = vmatmul.bf16.gmra.mxu2 %v2129_v4  ;;  %5347 = vmatmul.bf16.gmra.mxu0 %v7254_v38  ;;  %v2130_v60 = vrot.slane %v7599_v59, 1  ;;  %v7255_v38 = vld [vmem:[%s7758_s6 + $0xcc] sm:$0xff] }
 0x38d   : > { %5258 = vmatmul.bf16.gmra.mxu3 %v2193_v53  ;;  %v2196_v53 = vsel %vm1252_vm1, %v2194_v28, %v2195_v12  ;;  %v2710_v28 = vshrl.u32 %v8750_v7, 16 }
 0x38e   : > { %v9040_v44 = vadd.f32 %v5394_v1, %v5306_v8  ;;  %v6119_v1 = vld [vmem:[%s7758_s6 + $0x20] sm:$0xf]  ;;  %v2132_v4 = vsel %vm1252_vm1, %v2130_v60, %v2131_v26  ;;  %v7271_v8 = vld [vmem:[%s7763_s9 + $0xcc] sm:$0xff]  ;;  %v2454_v26 = vshrl.u32 %v8747_v3, 16 }
 0x38f   : > { %5436 = vmatmul.bf16.gmra.mxu1 %v7270_v41  ;;  %v5130_v50 = vpop.f32.mrf.mxu2  ;;  %v2421_v45 = vunpack.c.l.b16 %v6119_v1 }
 0x390   : > { %v5219_v6 = vpop.f32.mrf.mxu3  ;;  %v5131_v2 = vadd.f32 %v5130_v50, %v8726_v51 }
 0x391   : > { %v5310_v5 = vpop.f32.mrf.mxu0 }
 0x392   : > { %v5220_v58 = vadd.f32 %v5219_v6, %v5131_v2  ;;  %v2437_v6 = vpack.c.b16 %v2421_v45, %v2421_v45  ;;  %v2693_v2 = vpack.c.b16 %v2677_v40, %v2677_v40  ;;  %v6122_v40 = vld [vmem:[%s7758_s6 + $0x2c] sm:$0xf] }
 0x394   : > { %v5399_v37 = vpop.f32.mrf.mxu1  ;;  %v5309_v48 = vadd.f32 %v5308_v9, %v5220_v58  ;;  %v2461_v14 = vshll.u32 %v2437_v6, 16  ;;  %v2717_v1 = vshll.u32 %v2693_v2, 16 }
 0x396   : > { %v9049_v46 = vadd.f32 %v5397_v30, %v5309_v48  ;;  %v2456_v30 = vshll.u32 %v8747_v3, 16  ;;  %v2918_v3 = vrot.slane %v2437_v6, 1 }
 0x397   : > { %v5132_v25 = vpop.f32.mrf.mxu2 }
 0x398   : > { %v5221_v51 = vpop.f32.mrf.mxu3  ;;  %v5133_v31 = vadd.f32 %v5132_v25, %v8734_v20  ;;  %v2712_v20 = vshll.u32 %v8750_v7, 16 }
 0x399   : > { %v5313_v41 = vpop.f32.mrf.mxu0 }
 0x39a   : > { %v5222_v9 = vadd.f32 %v5221_v51, %v5133_v31  ;;  %v2714_v12 = vrot.slane %v2712_v20, 1 }
 0x39c   : > { %v5402_v50 = vpop.f32.mrf.mxu1  ;;  %v5311_v19 = vadd.f32 %v5310_v5, %v5222_v9  ;;  %5174 = vmatmul.bf16.gmra.mxu2 %v2132_v4  ;;  %5352 = vmatmul.bf16.gmra.mxu0 %v7255_v38  ;;  %v2458_v5 = vrot.slane %v2456_v30, 1  ;;  %v2463_v4 = vrot.slane %v2461_v14, 1  ;;  %v2719_v38 = vrot.slane %v2717_v1, 1  ;;  %v6170_v9 = vld [vmem:[%s7763_s9 + $0x2c] sm:$0xf]  ;;  %v7602_v30 = vld [vmem:[%s7763_s9 + $0x18] sm:$0xff] }
 0x39d   : > { %5263 = vmatmul.bf16.gmra.mxu3 %v2196_v53  ;;  %v2715_v53 = vor.u32 %v2714_v12, %v2710_v28  ;;  %v2920_v20 = vrot.slane %v7602_v30, 1 }
 0x39e   : > { %v9058_v58 = vadd.f32 %v5399_v37, %v5311_v19  ;;  %v2459_v31 = vor.u32 %v2458_v5, %v2454_v26  ;;  %v2422_v26 = vunpack.c.l.b16 %v6122_v40  ;;  %v2678_v5 = vunpack.c.l.b16 %v6170_v9 }
 0x39f   : > { %5441 = vmatmul.bf16.gmra.mxu1 %v7271_v8  ;;  %v5135_v48 = vpop.f32.mrf.mxu2 }
 0x3a0   : > { %v5224_v59 = vpop.f32.mrf.mxu3  ;;  %v5136_v60 = vadd.f32 %v5135_v48, %v8741_v36  ;;  %v7601_v36 = vld [vmem:[%s7758_s6 + $0x18] sm:$0xff]  ;;  %v2921_v48 = vrot.slane %v2693_v2, 1  ;;  %v2468_v2 = vshll.u32 %v8776_v13, 16 }
 0x3a1   : > { %v5315_v25 = vpop.f32.mrf.mxu0  ;;  %v2917_v45 = vrot.slane %v7601_v36, 1  ;;  %v2466_v36 = vshrl.u32 %v8776_v13, 16 }
 0x3a2   : > { %v5225_v47 = vadd.f32 %v5224_v59, %v5136_v60  ;;  %v2720_v60 = vsel %vm787_vm0, %v2715_v53, %v2719_v38 }
 0x3a3   : > { %v2919_v6 = vsel %vm1252_vm1, %v2917_v45, %v2918_v3  ;;  %v2722_v3 = vshrl.u32 %v8779_v63, 16 }
 0x3a4   : > { %v5404_v37 = vpop.f32.mrf.mxu1  ;;  %v5314_v51 = vadd.f32 %v5313_v41, %v5225_v47  ;;  %v2464_v41 = vsel %vm787_vm0, %v2459_v31, %v2463_v4  ;;  %v2694_v47 = vpack.c.b16 %v2678_v5, %v2678_v5  ;;  %v6173_v5 = vld [vmem:[%s7763_s9 + $0x38] sm:$0xf] }
 0x3a6   : > { %v9066_v8 = vadd.f32 %v5402_v50, %v5314_v51  ;;  %v2922_v50 = vsel %vm1252_vm1, %v2920_v20, %v2921_v48  ;;  %v2724_v51 = vshll.u32 %v8779_v63, 16  ;;  %v2729_v9 = vshll.u32 %v2694_v47, 16 }
 0x3a7   : > { %v5137_v19 = vpop.f32.mrf.mxu2 }
 0x3a8   : > { %v5226_v7 = vpop.f32.mrf.mxu3  ;;  %v5138_v59 = vadd.f32 %v5137_v19, %v8760_v21  ;;  %v2438_v21 = vpack.c.b16 %v2422_v26, %v2422_v26  ;;  %v2726_v40 = vrot.slane %v2724_v51, 1  ;;  %v6125_v26 = vld [vmem:[%s7758_s6 + $0x38] sm:$0xf] }
 0x3a9   : > { %v5318_v28 = vpop.f32.mrf.mxu0 }
 0x3aa   : > { %v5227_v14 = vadd.f32 %v5226_v7, %v5138_v59  ;;  %v2473_v45 = vshll.u32 %v2438_v21, 16  ;;  %v2727_v59 = vor.u32 %v2726_v40, %v2722_v3  ;;  %v2924_v13 = vrot.slane %v2438_v21, 1 }
 0x3ac   : > { %v5407_v12 = vpop.f32.mrf.mxu1  ;;  %v5316_v1 = vadd.f32 %v5315_v25, %v5227_v14  ;;  %5455 = vmatmul.bf16.vlgmr.msra.gmra.mxu2 %v2464_v41  ;;  %5633 = vmatmul.bf16.vlgmr.msra.gmra.mxu0 %v2919_v6  ;;  %v2470_v25 = vrot.slane %v2468_v2, 1  ;;  %v2475_v48 = vrot.slane %v2473_v45, 1  ;;  %v2731_v41 = vrot.slane %v2729_v9, 1 }
 0x3ad   : > { %5544 = vmatmul.bf16.vlgmr.msra.gmra.mxu3 %v2720_v60  ;;  %v2927_v2 = vrot.slane %v2694_v47, 1  ;;  %v7605_v47 = vld [vmem:[%s7758_s6 + $0x30] sm:$0xff] }
 0x3ae   : > { %v9076_v31 = vadd.f32 %v5404_v37, %v5316_v1  ;;  %v2471_v20 = vor.u32 %v2470_v25, %v2466_v36  ;;  %v2480_v40 = vshll.u32 %v7605_v47, 16 }
 0x3af   : > { %5722 = vmatmul.bf16.vlgmr.msra.gmra.mxu1 %v2922_v50  ;;  %v5140_v4 = vpop.f32.mrf.mxu2  ;;  %v7604_v50 = vld [vmem:[%s7763_s9 + $0x24] sm:$0xff] }
 0x3b0   : > { %v5229_v53 = vpop.f32.mrf.mxu3  ;;  %v5141_v38 = vadd.f32 %v5140_v4, %v8770_v35  ;;  %v7603_v35 = vld [vmem:[%s7758_s6 + $0x24] sm:$0xff]  ;;  %v2926_v1 = vrot.slane %v7604_v50, 1  ;;  %v2732_v4 = vsel %vm787_vm0, %v2727_v59, %v2731_v41 }
 0x3b1   : > { %v5320_v7 = vpop.f32.mrf.mxu0  ;;  %v2923_v60 = vrot.slane %v7603_v35, 1  ;;  %v2478_v35 = vshrl.u32 %v7605_v47, 16 }
 0x3b2   : > { %v5230_v19 = vadd.f32 %v5229_v53, %v5141_v38  ;;  %v2423_v53 = vunpack.c.l.b16 %v6125_v26  ;;  %v2679_v38 = vunpack.c.l.b16 %v6173_v5  ;;  %v2928_v45 = vsel %vm1252_vm1, %v2926_v1, %v2927_v2 }
 0x3b4   : > { %v5409_v37 = vpop.f32.mrf.mxu1  ;;  %v5319_v30 = vadd.f32 %v5318_v28, %v5230_v19  ;;  %v2476_v28 = vsel %vm787_vm0, %v2471_v20, %v2475_v48  ;;  %v2695_v9 = vpack.c.b16 %v2679_v38, %v2679_v38  ;;  %v7606_v19 = vld [vmem:[%s7763_s9 + $0x30] sm:$0xff]  ;;  %v6128_v38 = vld [vmem:[%s7758_s6 + $0x44] sm:$0xf] }
 0x3b6   : > { %v9084_v14 = vadd.f32 %v5407_v12, %v5319_v30  ;;  %v2925_v12 = vsel %vm1252_vm1, %v2923_v60, %v2924_v13  ;;  %v2736_v30 = vshll.u32 %v7606_v19, 16  ;;  %v2482_v60 = vrot.slane %v2480_v40, 1 }
 0x3b7   : > { %v5142_v6 = vpop.f32.mrf.mxu2  ;;  %v2734_v13 = vshrl.u32 %v7606_v19, 16  ;;  %v2741_v5 = vshll.u32 %v2695_v9, 16  ;;  %v2933_v40 = vrot.slane %v2695_v9, 1  ;;  %v7607_v9 = vld [vmem:[%s7758_s6 + $0x3c] sm:$0xff] }
 0x3b8   : > { %v5231_v63 = vpop.f32.mrf.mxu3  ;;  %v5143_v51 = vadd.f32 %v5142_v6, %v8786_v54  ;;  %v2439_v54 = vpack.c.b16 %v2423_v53, %v2423_v53  ;;  %v2738_v26 = vrot.slane %v2736_v30, 1  ;;  %v2483_v2 = vor.u32 %v2482_v60, %v2478_v35 }
 0x3b9   : > { %v5323_v36 = vpop.f32.mrf.mxu0 }
 0x3ba   : > { %v5232_v21 = vadd.f32 %v5231_v63, %v5143_v51  ;;  %v2930_v53 = vrot.slane %v2439_v54, 1 }
 0x3bc   : > { %v5412_v25 = vpop.f32.mrf.mxu1  ;;  %v5321_v3 = vadd.f32 %v5320_v7, %v5232_v21  ;;  %5460 = vmatmul.bf16.gmra.mxu2 %v2476_v28  ;;  %5638 = vmatmul.bf16.gmra.mxu0 %v2925_v12  ;;  %v2485_v7 = vshll.u32 %v2439_v54, 16  ;;  %v2743_v28 = vrot.slane %v2741_v5, 1 }
 0x3bd   : > { %5549 = vmatmul.bf16.gmra.mxu3 %v2732_v4  ;;  %v2929_v4 = vrot.slane %v7605_v47, 1 }
 0x3be   : > { %v9094_v20 = vadd.f32 %v5409_v37, %v5321_v3  ;;  %v2487_v51 = vrot.slane %v2485_v7, 1  ;;  %v2739_v37 = vor.u32 %v2738_v26, %v2734_v13  ;;  %v2932_v3 = vrot.slane %v7606_v19, 1  ;;  %v7608_v26 = vld [vmem:[%s7763_s9 + $0x3c] sm:$0xff] }
 0x3bf   : > { %5727 = vmatmul.bf16.gmra.mxu1 %v2928_v45  ;;  %v5145_v48 = vpop.f32.mrf.mxu2  ;;  %v2931_v35 = vsel %vm1252_vm1, %v2929_v4, %v2930_v53  ;;  %v2492_v19 = vshll.u32 %v7607_v9, 16  ;;  %v2748_v5 = vshll.u32 %v7608_v26, 16  ;;  %v2746_v4 = vshrl.u32 %v7608_v26, 16 }
 0x3c0   : > { %v5234_v59 = vpop.f32.mrf.mxu3  ;;  %v5146_v41 = vadd.f32 %v5145_v48, %v8793_v24  ;;  %v6176_v24 = vld [vmem:[%s7763_s9 + $0x44] sm:$0xf]  ;;  %v2488_v48 = vsel %vm787_vm0, %v2483_v2, %v2487_v51  ;;  %v2934_v60 = vsel %vm1252_vm1, %v2932_v3, %v2933_v40 }
 0x3c1   : > { %v5325_v63 = vpop.f32.mrf.mxu0  ;;  %v2750_v53 = vrot.slane %v2748_v5, 1 }
 0x3c2   : > { %v5235_v6 = vadd.f32 %v5234_v59, %v5146_v41  ;;  %v2424_v59 = vunpack.c.l.b16 %v6128_v38  ;;  %v2680_v41 = vunpack.c.l.b16 %v6176_v24 }
 0x3c4   : > { %v5414_v50 = vpop.f32.mrf.mxu1  ;;  %v5324_v1 = vadd.f32 %v5323_v36, %v5235_v6  ;;  %v2744_v36 = vsel %vm787_vm0, %v2739_v37, %v2743_v28  ;;  %v2696_v13 = vpack.c.b16 %v2680_v41, %v2680_v41  ;;  %v2490_v37 = vshrl.u32 %v7607_v9, 16  ;;  %v6131_v41 = vld [vmem:[%s7758_s6 + $0x50] sm:$0xf] }
 0x3c5   : > { %v2494_v28 = vrot.slane %v2492_v19, 1 }
 0x3c6   : > { %v9099_v21 = vadd.f32 %v5412_v25, %v5324_v1  ;;  %v2753_v38 = vshll.u32 %v2696_v13, 16  ;;  %v2939_v19 = vrot.slane %v2696_v13, 1  ;;  %v7609_v13 = vld [vmem:[%s7758_s6 + $0x48] sm:$0xff] }
 0x3c7   : > { %v5147_v12 = vpop.f32.mrf.mxu2  ;;  %v2495_v40 = vor.u32 %v2494_v28, %v2490_v37 }
 0x3c8   : > { %v5236_v45 = vpop.f32.mrf.mxu3  ;;  %v5148_v30 = vadd.f32 %v5147_v12, %v8806_v32  ;;  %v2440_v32 = vpack.c.b16 %v2424_v59, %v2424_v59 }
 0x3c9   : > { %v5328_v54 = vpop.f32.mrf.mxu0 }
 0x3ca   : > { %v5237_v47 = vadd.f32 %v5236_v45, %v5148_v30  ;;  %v2936_v59 = vrot.slane %v2440_v32, 1 }
 0x3cc   : > { %v5417_v25 = vpop.f32.mrf.mxu1  ;;  %v5326_v7 = vadd.f32 %v5325_v63, %v5237_v47  ;;  %5465 = vmatmul.bf16.gmra.mxu2 %v2488_v48  ;;  %5643 = vmatmul.bf16.gmra.mxu0 %v2931_v35  ;;  %v2497_v63 = vshll.u32 %v2440_v32, 16  ;;  %v2755_v48 = vrot.slane %v2753_v38, 1 }
 0x3cd   : > { %5554 = vmatmul.bf16.gmra.mxu3 %v2744_v36  ;;  %v2935_v36 = vrot.slane %v7607_v9, 1 }
 0x3ce   : > { %v9108_v6 = vadd.f32 %v5414_v50, %v5326_v7  ;;  %v2499_v30 = vrot.slane %v2497_v63, 1  ;;  %v2751_v50 = vor.u32 %v2750_v53, %v2746_v4  ;;  %v2938_v7 = vrot.slane %v7608_v26, 1  ;;  %v7610_v53 = vld [vmem:[%s7763_s9 + $0x48] sm:$0xff] }
 0x3cf   : > { %5732 = vmatmul.bf16.gmra.mxu1 %v2934_v60  ;;  %v5150_v1 = vpop.f32.mrf.mxu2  ;;  %v2937_v37 = vsel %vm1252_vm1, %v2935_v36, %v2936_v59  ;;  %v2504_v26 = vshll.u32 %v7609_v13, 16  ;;  %v2760_v38 = vshll.u32 %v7610_v53, 16  ;;  %v2758_v36 = vshrl.u32 %v7610_v53, 16 }
 0x3d0   : > { %v5239_v2 = vpop.f32.mrf.mxu3  ;;  %v5151_v51 = vadd.f32 %v5150_v1, %v8816_v0  ;;  %v6179_v0 = vld [vmem:[%s7763_s9 + $0x50] sm:$0xf]  ;;  %v2500_v1 = vsel %vm787_vm0, %v2495_v40, %v2499_v30  ;;  %v2940_v28 = vsel %vm1252_vm1, %v2938_v7, %v2939_v19 }
 0x3d1   : > { %v5330_v12 = vpop.f32.mrf.mxu0  ;;  %v2762_v59 = vrot.slane %v2760_v38, 1 }
 0x3d2   : > { %v5240_v24 = vadd.f32 %v5239_v2, %v5151_v51  ;;  %v2425_v2 = vunpack.c.l.b16 %v6131_v41  ;;  %v2681_v51 = vunpack.c.l.b16 %v6179_v0 }
 0x3d4   : > { %v5419_v45 = vpop.f32.mrf.mxu1  ;;  %v5329_v3 = vadd.f32 %v5328_v54, %v5240_v24  ;;  %v2756_v54 = vsel %vm787_vm0, %v2751_v50, %v2755_v48  ;;  %v2697_v4 = vpack.c.b16 %v2681_v51, %v2681_v51  ;;  %v2502_v50 = vshrl.u32 %v7609_v13, 16  ;;  %v6134_v51 = vld [vmem:[%s7758_s6 + $0x5c] sm:$0xf] }
 0x3d5   : > { %v2506_v48 = vrot.slane %v2504_v26, 1 }
 0x3d6   : > { %v9113_v47 = vadd.f32 %v5417_v25, %v5329_v3  ;;  %v2765_v41 = vshll.u32 %v2697_v4, 16  ;;  %v2945_v26 = vrot.slane %v2697_v4, 1  ;;  %v7611_v4 = vld [vmem:[%s7758_s6 + $0x54] sm:$0xff] }
 0x3d7   : > { %v5152_v35 = vpop.f32.mrf.mxu2  ;;  %v2507_v19 = vor.u32 %v2506_v48, %v2502_v50 }
 0x3d8   : > { %v5241_v60 = vpop.f32.mrf.mxu3  ;;  %v5153_v5 = vadd.f32 %v5152_v35, %v8826_v16  ;;  %v2441_v16 = vpack.c.b16 %v2425_v2, %v2425_v2 }
 0x3d9   : > { %v5333_v32 = vpop.f32.mrf.mxu0 }
 0x3da   : > { %v5242_v9 = vadd.f32 %v5241_v60, %v5153_v5  ;;  %v2942_v2 = vrot.slane %v2441_v16, 1 }
 0x3dc   : > { %v5422_v25 = vpop.f32.mrf.mxu1  ;;  %v5331_v63 = vadd.f32 %v5330_v12, %v5242_v9  ;;  %5470 = vmatmul.bf16.gmra.mxu2 %v2500_v1  ;;  %5648 = vmatmul.bf16.gmra.mxu0 %v2937_v37  ;;  %v2509_v12 = vshll.u32 %v2441_v16, 16  ;;  %v2767_v1 = vrot.slane %v2765_v41, 1 }
 0x3dd   : > { %5559 = vmatmul.bf16.gmra.mxu3 %v2756_v54  ;;  %v2941_v54 = vrot.slane %v7609_v13, 1 }
 0x3de   : > { %v9122_v24 = vadd.f32 %v5419_v45, %v5331_v63  ;;  %v2511_v5 = vrot.slane %v2509_v12, 1  ;;  %v2763_v45 = vor.u32 %v2762_v59, %v2758_v36  ;;  %v2944_v63 = vrot.slane %v7610_v53, 1  ;;  %v7612_v59 = vld [vmem:[%s7763_s9 + $0x54] sm:$0xff] }
 0x3df   : > { %5737 = vmatmul.bf16.gmra.mxu1 %v2940_v28  ;;  %v5155_v3 = vpop.f32.mrf.mxu2  ;;  %v2943_v50 = vsel %vm1252_vm1, %v2941_v54, %v2942_v2  ;;  %v2516_v53 = vshll.u32 %v7611_v4, 16  ;;  %v2772_v41 = vshll.u32 %v7612_v59, 16  ;;  %v2770_v54 = vshrl.u32 %v7612_v59, 16 }
 0x3e0   : > { %v5244_v40 = vpop.f32.mrf.mxu3  ;;  %v5156_v30 = vadd.f32 %v5155_v3, %v8833_v34  ;;  %v6182_v34 = vld [vmem:[%s7763_s9 + $0x5c] sm:$0xf]  ;;  %v2512_v3 = vsel %vm787_vm0, %v2507_v19, %v2511_v5  ;;  %v2946_v48 = vsel %vm1252_vm1, %v2944_v63, %v2945_v26 }
 0x3e1   : > { %v5335_v35 = vpop.f32.mrf.mxu0  ;;  %v2774_v2 = vrot.slane %v2772_v41, 1 }
 0x3e2   : > { %v5245_v0 = vadd.f32 %v5244_v40, %v5156_v30  ;;  %v2426_v40 = vunpack.c.l.b16 %v6134_v51  ;;  %v2682_v30 = vunpack.c.l.b16 %v6182_v34 }
 0x3e4   : > { %v5424_v60 = vpop.f32.mrf.mxu1  ;;  %v5334_v7 = vadd.f32 %v5333_v32, %v5245_v0  ;;  %v2768_v32 = vsel %vm787_vm0, %v2763_v45, %v2767_v1  ;;  %v2698_v36 = vpack.c.b16 %v2682_v30, %v2682_v30  ;;  %v2514_v45 = vshrl.u32 %v7611_v4, 16  ;;  %v6137_v30 = vld [vmem:[%s7758_s6 + $0x68] sm:$0xf] }
 0x3e5   : > { %v2518_v1 = vrot.slane %v2516_v53, 1 }
 0x3e6   : > { %v9127_v9 = vadd.f32 %v5422_v25, %v5334_v7  ;;  %v2777_v51 = vshll.u32 %v2698_v36, 16  ;;  %v2951_v53 = vrot.slane %v2698_v36, 1  ;;  %v7613_v36 = vld [vmem:[%s7758_s6 + $0x60] sm:$0xff] }
 0x3e7   : > { %v5157_v37 = vpop.f32.mrf.mxu2  ;;  %v2519_v26 = vor.u32 %v2518_v1, %v2514_v45 }
 0x3e8   : > { %v5246_v28 = vpop.f32.mrf.mxu3  ;;  %v5158_v38 = vadd.f32 %v5157_v37, %v8846_v29  ;;  %v2442_v29 = vpack.c.b16 %v2426_v40, %v2426_v40 }
 0x3e9   : > { %v5338_v16 = vpop.f32.mrf.mxu0 }
 0x3ea   : > { %v5247_v13 = vadd.f32 %v5246_v28, %v5158_v38  ;;  %v2948_v40 = vrot.slane %v2442_v29, 1 }
 0x3ec   : > { %v5427_v25 = vpop.f32.mrf.mxu1  ;;  %v5336_v12 = vadd.f32 %v5335_v35, %v5247_v13  ;;  %5475 = vmatmul.bf16.gmra.mxu2 %v2512_v3  ;;  %5653 = vmatmul.bf16.gmra.mxu0 %v2943_v50  ;;  %v2521_v35 = vshll.u32 %v2442_v29, 16  ;;  %v2779_v3 = vrot.slane %v2777_v51, 1 }
 0x3ed   : > { %5564 = vmatmul.bf16.gmra.mxu3 %v2768_v32  ;;  %v2947_v32 = vrot.slane %v7611_v4, 1 }
 0x3ee   : > { %v9136_v0 = vadd.f32 %v5424_v60, %v5336_v12  ;;  %v2523_v38 = vrot.slane %v2521_v35, 1  ;;  %v2775_v60 = vor.u32 %v2774_v2, %v2770_v54  ;;  %v2950_v12 = vrot.slane %v7612_v59, 1  ;;  %v7614_v2 = vld [vmem:[%s7763_s9 + $0x60] sm:$0xff] }
 0x3ef   : > { %5742 = vmatmul.bf16.gmra.mxu1 %v2946_v48  ;;  %v5160_v7 = vpop.f32.mrf.mxu2  ;;  %v2949_v45 = vsel %vm1252_vm1, %v2947_v32, %v2948_v40  ;;  %v2528_v59 = vshll.u32 %v7613_v36, 16  ;;  %v2784_v51 = vshll.u32 %v7614_v2, 16  ;;  %v2782_v32 = vshrl.u32 %v7614_v2, 16 }
 0x3f0   : > { %v5249_v19 = vpop.f32.mrf.mxu3  ;;  %v5161_v5 = vadd.f32 %v5160_v7, %v8856_v11  ;;  %v6185_v11 = vld [vmem:[%s7763_s9 + $0x68] sm:$0xf]  ;;  %v2524_v7 = vsel %vm787_vm0, %v2519_v26, %v2523_v38  ;;  %v2952_v1 = vsel %vm1252_vm1, %v2950_v12, %v2951_v53 }
 0x3f1   : > { %v5340_v37 = vpop.f32.mrf.mxu0  ;;  %v2786_v40 = vrot.slane %v2784_v51, 1 }
 0x3f2   : > { %v5250_v34 = vadd.f32 %v5249_v19, %v5161_v5  ;;  %v2427_v19 = vunpack.c.l.b16 %v6137_v30  ;;  %v2683_v5 = vunpack.c.l.b16 %v6185_v11 }
 0x3f4   : > { %v5429_v28 = vpop.f32.mrf.mxu1  ;;  %v5339_v63 = vadd.f32 %v5338_v16, %v5250_v34  ;;  %v2780_v16 = vsel %vm787_vm0, %v2775_v60, %v2779_v3  ;;  %v2699_v54 = vpack.c.b16 %v2683_v5, %v2683_v5  ;;  %v2526_v60 = vshrl.u32 %v7613_v36, 16  ;;  %v6140_v5 = vld [vmem:[%s7758_s6 + $0x74] sm:$0xf] }
 0x3f5   : > { %v2530_v3 = vrot.slane %v2528_v59, 1 }
 0x3f6   : > { %v9141_v13 = vadd.f32 %v5427_v25, %v5339_v63  ;;  %v2789_v30 = vshll.u32 %v2699_v54, 16  ;;  %v2957_v59 = vrot.slane %v2699_v54, 1  ;;  %v7615_v54 = vld [vmem:[%s7758_s6 + $0x6c] sm:$0xff] }
 0x3f7   : > { %v5162_v50 = vpop.f32.mrf.mxu2  ;;  %v2531_v53 = vor.u32 %v2530_v3, %v2526_v60 }
 0x3f8   : > { %v5251_v48 = vpop.f32.mrf.mxu3  ;;  %v5163_v41 = vadd.f32 %v5162_v50, %v8866_v17  ;;  %v2443_v17 = vpack.c.b16 %v2427_v19, %v2427_v19 }
 0x3f9   : > { %v5343_v29 = vpop.f32.mrf.mxu0 }
 0x3fa   : > { %v5252_v4 = vadd.f32 %v5251_v48, %v5163_v41  ;;  %v2954_v19 = vrot.slane %v2443_v17, 1 }
 0x3fc   : > { %v5432_v25 = vpop.f32.mrf.mxu1  ;;  %v5341_v35 = vadd.f32 %v5340_v37, %v5252_v4  ;;  %5480 = vmatmul.bf16.gmra.mxu2 %v2524_v7  ;;  %5658 = vmatmul.bf16.gmra.mxu0 %v2949_v45  ;;  %v2533_v37 = vshll.u32 %v2443_v17, 16  ;;  %v2791_v7 = vrot.slane %v2789_v30, 1 }
 0x3fd   : > { %5569 = vmatmul.bf16.gmra.mxu3 %v2780_v16  ;;  %v2953_v16 = vrot.slane %v7613_v36, 1 }
 0x3fe   : > { %v9150_v34 = vadd.f32 %v5429_v28, %v5341_v35  ;;  %v2535_v41 = vrot.slane %v2533_v37, 1  ;;  %v2787_v28 = vor.u32 %v2786_v40, %v2782_v32  ;;  %v2956_v35 = vrot.slane %v7614_v2, 1  ;;  %v7616_v40 = vld [vmem:[%s7763_s9 + $0x6c] sm:$0xff] }
 0x3ff   : > { %5747 = vmatmul.bf16.gmra.mxu1 %v2952_v1  ;;  %v5165_v63 = vpop.f32.mrf.mxu2  ;;  %v2955_v60 = vsel %vm1252_vm1, %v2953_v16, %v2954_v19  ;;  %v2540_v2 = vshll.u32 %v7615_v54, 16  ;;  %v2796_v30 = vshll.u32 %v7616_v40, 16  ;;  %v2794_v16 = vshrl.u32 %v7616_v40, 16 }
 0x400   : > { %v5254_v26 = vpop.f32.mrf.mxu3  ;;  %v5166_v38 = vadd.f32 %v5165_v63, %v8873_v27  ;;  %v6188_v27 = vld [vmem:[%s7763_s9 + $0x74] sm:$0xf]  ;;  %v2536_v63 = vsel %vm787_vm0, %v2531_v53, %v2535_v41  ;;  %v2958_v3 = vsel %vm1252_vm1, %v2956_v35, %v2957_v59 }
 0x401   : > { %v5345_v50 = vpop.f32.mrf.mxu0  ;;  %v2798_v19 = vrot.slane %v2796_v30, 1 }
 0x402   : > { %v5255_v11 = vadd.f32 %v5254_v26, %v5166_v38  ;;  %v2428_v26 = vunpack.c.l.b16 %v6140_v5  ;;  %v2684_v38 = vunpack.c.l.b16 %v6188_v27 }
 0x404   : > { %v5434_v48 = vpop.f32.mrf.mxu1  ;;  %v5344_v12 = vadd.f32 %v5343_v29, %v5255_v11  ;;  %v2792_v29 = vsel %vm787_vm0, %v2787_v28, %v2791_v7  ;;  %v2700_v32 = vpack.c.b16 %v2684_v38, %v2684_v38  ;;  %v2538_v28 = vshrl.u32 %v7615_v54, 16  ;;  %v6143_v38 = vld [vmem:[%s7758_s6 + $0x80] sm:$0xf] }
 0x405   : > { %v2542_v7 = vrot.slane %v2540_v2, 1 }
 0x406   : > { %v9155_v4 = vadd.f32 %v5432_v25, %v5344_v12  ;;  %v2801_v5 = vshll.u32 %v2700_v32, 16  ;;  %v2963_v2 = vrot.slane %v2700_v32, 1  ;;  %v7617_v32 = vld [vmem:[%s7758_s6 + $0x78] sm:$0xff] }
 0x407   : > { %v5167_v45 = vpop.f32.mrf.mxu2  ;;  %v2543_v59 = vor.u32 %v2542_v7, %v2538_v28 }
 0x408   : > { %v5256_v1 = vpop.f32.mrf.mxu3  ;;  %v5168_v51 = vadd.f32 %v5167_v45, %v8886_v55  ;;  %v2444_v55 = vpack.c.b16 %v2428_v26, %v2428_v26 }
 0x409   : > { %v5348_v17 = vpop.f32.mrf.mxu0 }
 0x40a   : > { %v5257_v36 = vadd.f32 %v5256_v1, %v5168_v51  ;;  %v2960_v26 = vrot.slane %v2444_v55, 1 }
 0x40c   : > { %v5437_v25 = vpop.f32.mrf.mxu1  ;;  %v5346_v37 = vadd.f32 %v5345_v50, %v5257_v36  ;;  %5485 = vmatmul.bf16.gmra.mxu2 %v2536_v63  ;;  %5663 = vmatmul.bf16.gmra.mxu0 %v2955_v60  ;;  %v2545_v50 = vshll.u32 %v2444_v55, 16  ;;  %v2803_v63 = vrot.slane %v2801_v5, 1 }
 0x40d   : > { %5574 = vmatmul.bf16.gmra.mxu3 %v2792_v29  ;;  %v2959_v29 = vrot.slane %v7615_v54, 1 }
 0x40e   : > { %v9164_v11 = vadd.f32 %v5434_v48, %v5346_v37  ;;  %v2547_v51 = vrot.slane %v2545_v50, 1  ;;  %v2799_v48 = vor.u32 %v2798_v19, %v2794_v16  ;;  %v2962_v37 = vrot.slane %v7616_v40, 1  ;;  %v7618_v19 = vld [vmem:[%s7763_s9 + $0x78] sm:$0xff] }
 0x40f   : > { %5752 = vmatmul.bf16.gmra.mxu1 %v2958_v3  ;;  %v5170_v12 = vpop.f32.mrf.mxu2  ;;  %v2961_v28 = vsel %vm1252_vm1, %v2959_v29, %v2960_v26  ;;  %v2552_v40 = vshll.u32 %v7617_v32, 16  ;;  %v2808_v5 = vshll.u32 %v7618_v19, 16  ;;  %v2806_v29 = vshrl.u32 %v7618_v19, 16 }
 0x410   : > { %v5259_v53 = vpop.f32.mrf.mxu3  ;;  %v5171_v41 = vadd.f32 %v5170_v12, %v8896_v57  ;;  %v6191_v57 = vld [vmem:[%s7763_s9 + $0x80] sm:$0xf]  ;;  %v2548_v12 = vsel %vm787_vm0, %v2543_v59, %v2547_v51  ;;  %v2964_v7 = vsel %vm1252_vm1, %v2962_v37, %v2963_v2 }
 0x411   : > { %v5350_v45 = vpop.f32.mrf.mxu0  ;;  %v2810_v26 = vrot.slane %v2808_v5, 1 }
 0x412   : > { %v5260_v27 = vadd.f32 %v5259_v53, %v5171_v41  ;;  %v2429_v53 = vunpack.c.l.b16 %v6143_v38  ;;  %v2685_v41 = vunpack.c.l.b16 %v6191_v57 }
 0x414   : > { %v5439_v1 = vpop.f32.mrf.mxu1  ;;  %v5349_v35 = vadd.f32 %v5348_v17, %v5260_v27  ;;  %v2804_v17 = vsel %vm787_vm0, %v2799_v48, %v2803_v63  ;;  %v2701_v16 = vpack.c.b16 %v2685_v41, %v2685_v41  ;;  %v2550_v48 = vshrl.u32 %v7617_v32, 16  ;;  %v6146_v41 = vld [vmem:[%s7758_s6 + $0x8c] sm:$0xf] }
 0x415   : > { %v2554_v63 = vrot.slane %v2552_v40, 1 }
 0x416   : > { %v9169_v36 = vadd.f32 %v5437_v25, %v5349_v35  ;;  %v2813_v38 = vshll.u32 %v2701_v16, 16  ;;  %v2969_v40 = vrot.slane %v2701_v16, 1  ;;  %v7619_v16 = vld [vmem:[%s7758_s6 + $0x84] sm:$0xff] }
 0x417   : > { %v5172_v60 = vpop.f32.mrf.mxu2  ;;  %v2555_v2 = vor.u32 %v2554_v63, %v2550_v48 }
 0x418   : > { %v5261_v3 = vpop.f32.mrf.mxu3  ;;  %v5173_v30 = vadd.f32 %v5172_v60, %v8906_v18  ;;  %v2445_v18 = vpack.c.b16 %v2429_v53, %v2429_v53 }
 0x419   : > { %v5353_v55 = vpop.f32.mrf.mxu0 }
 0x41a   : > { %v5262_v54 = vadd.f32 %v5261_v3, %v5173_v30  ;;  %v2966_v53 = vrot.slane %v2445_v18, 1 }
 0x41c   : > { %v5442_v25 = vpop.f32.mrf.mxu1  ;;  %v5351_v50 = vadd.f32 %v5350_v45, %v5262_v54  ;;  %5490 = vmatmul.bf16.gmra.mxu2 %v2548_v12  ;;  %5668 = vmatmul.bf16.gmra.mxu0 %v2961_v28  ;;  %v2557_v45 = vshll.u32 %v2445_v18, 16  ;;  %v2815_v12 = vrot.slane %v2813_v38, 1 }
 0x41d   : > { %5579 = vmatmul.bf16.gmra.mxu3 %v2804_v17  ;;  %v2965_v17 = vrot.slane %v7617_v32, 1 }
 0x41e   : > { %v9178_v27 = vadd.f32 %v5439_v1, %v5351_v50  ;;  %v2559_v30 = vrot.slane %v2557_v45, 1  ;;  %v2811_v1 = vor.u32 %v2810_v26, %v2806_v29  ;;  %v2968_v50 = vrot.slane %v7618_v19, 1  ;;  %v7620_v26 = vld [vmem:[%s7763_s9 + $0x84] sm:$0xff] }
 0x41f   : > { %5757 = vmatmul.bf16.gmra.mxu1 %v2964_v7  ;;  %v5175_v35 = vpop.f32.mrf.mxu2  ;;  %v2967_v48 = vsel %vm1252_vm1, %v2965_v17, %v2966_v53  ;;  %v2564_v19 = vshll.u32 %v7619_v16, 16  ;;  %v2820_v38 = vshll.u32 %v7620_v26, 16  ;;  %v2818_v17 = vshrl.u32 %v7620_v26, 16 }
 0x420   : > { %v5264_v59 = vpop.f32.mrf.mxu3  ;;  %v5176_v51 = vadd.f32 %v5175_v35, %v8913_v22  ;;  %v6194_v22 = vld [vmem:[%s7763_s9 + $0x8c] sm:$0xf]  ;;  %v2560_v35 = vsel %vm787_vm0, %v2555_v2, %v2559_v30  ;;  %v2970_v63 = vsel %vm1252_vm1, %v2968_v50, %v2969_v40 }
 0x421   : > { %v5355_v60 = vpop.f32.mrf.mxu0  ;;  %v2822_v53 = vrot.slane %v2820_v38, 1 }
 0x422   : > { %v5265_v57 = vadd.f32 %v5264_v59, %v5176_v51  ;;  %v2430_v59 = vunpack.c.l.b16 %v6146_v41  ;;  %v2686_v51 = vunpack.c.l.b16 %v6194_v22 }
 0x424   : > { %v5444_v3 = vpop.f32.mrf.mxu1  ;;  %v5354_v37 = vadd.f32 %v5353_v55, %v5265_v57  ;;  %v2816_v55 = vsel %vm787_vm0, %v2811_v1, %v2815_v12  ;;  %v2702_v29 = vpack.c.b16 %v2686_v51, %v2686_v51  ;;  %v2562_v1 = vshrl.u32 %v7619_v16, 16  ;;  %v6197_v51 = vld [vmem:[%s7763_s9 + $0x98] sm:$0xf] }
 0x426   : > { %v9183_v54 = vadd.f32 %v5442_v25, %v5354_v37  ;;  %v2825_v41 = vshll.u32 %v2702_v29, 16 }
 0x427   : > { %v5177_v28 = vpop.f32.mrf.mxu2 }
 0x428   : > { %v5266_v7 = vpop.f32.mrf.mxu3  ;;  %v5178_v5 = vadd.f32 %v5177_v28, %v8926_v43  ;;  %v2446_v43 = vpack.c.b16 %v2430_v59, %v2430_v59  ;;  %v6149_v59 = vld [vmem:[%s7758_s6 + $0x98] sm:$0xf] }
 0x429   : > { %v5634_v18 = vpop.f32.mrf.mxu0 }
 0x42a   : > { %v5267_v32 = vadd.f32 %v5266_v7, %v5178_v5  ;;  %v2569_v12 = vshll.u32 %v2446_v43, 16  ;;  %v2823_v5 = vor.u32 %v2822_v53, %v2818_v17 }
 0x42c   : > { %v5723_v25 = vpop.f32.mrf.mxu1  ;;  %v5356_v45 = vadd.f32 %v5355_v60, %v5267_v32  ;;  %5495 = vmatmul.bf16.gmra.mxu2 %v2560_v35  ;;  %5673 = vmatmul.bf16.gmra.mxu0 %v2967_v48  ;;  %v2566_v60 = vrot.slane %v2564_v19, 1  ;;  %v2571_v40 = vrot.slane %v2569_v12, 1  ;;  %v2971_v35 = vrot.slane %v7619_v16, 1 }
 0x42d   : > { %5584 = vmatmul.bf16.gmra.mxu3 %v2816_v55  ;;  %v2972_v55 = vrot.slane %v2446_v43, 1  ;;  %v2974_v48 = vrot.slane %v7620_v26, 1 }
 0x42e   : > { %v9192_v57 = vadd.f32 %v5444_v3, %v5356_v45  ;;  %v2567_v50 = vor.u32 %v2566_v60, %v2562_v1  ;;  %v2827_v3 = vrot.slane %v2825_v41, 1  ;;  %v7622_v41 = vld [vmem:[%s7763_s9 + $0x90] sm:$0xff] }
 0x42f   : > { %5762 = vmatmul.bf16.gmra.mxu1 %v2970_v63  ;;  %v5456_v37 = vpop.f32.mrf.mxu2  ;;  %v2975_v63 = vrot.slane %v2702_v29, 1  ;;  %v2973_v43 = vsel %vm1252_vm1, %v2971_v35, %v2972_v55 }
 0x430   : > { %v5545_v2 = vpop.f32.mrf.mxu3  ;;  %v5457_v30 = vadd.f32 %v5456_v37, %v8936_v39  ;;  %v2572_v38 = vsel %vm787_vm0, %v2567_v50, %v2571_v40  ;;  %v2828_v37 = vsel %vm787_vm0, %v2823_v5, %v2827_v3 }
 0x431   : > { %v5636_v22 = vpop.f32.mrf.mxu0  ;;  %v2976_v26 = vsel %vm1252_vm1, %v2974_v48, %v2975_v63 }
 0x432   : > { %v5546_v7 = vadd.f32 %v5545_v2, %v5457_v30  ;;  %v2431_v2 = vunpack.c.l.b16 %v6149_v59  ;;  %v2687_v30 = vunpack.c.l.b16 %v6197_v51  ;;  %v2830_v51 = vshrl.u32 %v7622_v41, 16 }
 0x434   : > { %v5725_v28 = vpop.f32.mrf.mxu1  ;;  %v5635_v45 = vadd.f32 %v5634_v18, %v5546_v7  ;;  %v2447_v17 = vpack.c.b16 %v2431_v2, %v2431_v2  ;;  %v2703_v53 = vpack.c.b16 %v2687_v30, %v2687_v30  ;;  %v2832_v7 = vshll.u32 %v7622_v41, 16 }
 0x436   : > { %v5724_v29 = vadd.f32 %v5723_v25, %v5635_v45  ;;  %v2581_v59 = vshll.u32 %v2447_v17, 16  ;;  %v2978_v30 = vrot.slane %v2447_v17, 1 }
 0x437   : > { %v5458_v39 = vpop.f32.mrf.mxu2 }
 0x438   : > { %v5547_v32 = vpop.f32.mrf.mxu3  ;;  %v5459_v19 = vadd.f32 %v5458_v39, %v8946_v42  ;;  %v7621_v42 = vld [vmem:[%s7758_s6 + $0x90] sm:$0xff]  ;;  %v5803_v35 = vmax.f32 %v5724_v29, 0.0  ;;  %v2837_v39 = vshll.u32 %v2703_v53, 16 }
 0x439   : > { %v5639_v16 = vpop.f32.mrf.mxu0  ;;  %v2576_v18 = vshll.u32 %v7621_v42, 16  ;;  %v2574_v3 = vshrl.u32 %v7621_v42, 16  ;;  %v2977_v2 = vrot.slane %v7621_v42, 1 }
 0x43a   : > { %v5548_v1 = vadd.f32 %v5547_v32, %v5459_v19 }
 0x43b   : > { %v2979_v17 = vsel %vm1252_vm1, %v2977_v2, %v2978_v30 }
 0x43c   : > { %v5728_v60 = vpop.f32.mrf.mxu1  ;;  %v5637_v12 = vadd.f32 %v5636_v22, %v5548_v1  ;;  %5500 = vmatmul.bf16.gmra.mxu2 %v2572_v38  ;;  %5678 = vmatmul.bf16.gmra.mxu0 %v2973_v43  ;;  %v2578_v22 = vrot.slane %v2576_v18, 1  ;;  %v6152_v1 = vld [vmem:[%s7758_s6 + $0xa4] sm:$0xf]  ;;  %v2981_v18 = vrot.slane %v2703_v53, 1 }
 0x43d   : > { %5589 = vmatmul.bf16.gmra.mxu3 %v2828_v37  ;;  %v2839_v37 = vrot.slane %v2837_v39, 1  ;;  %v6200_v43 = vld [vmem:[%s7763_s9 + $0xa4] sm:$0xf] }
 0x43e   : > { %v5726_v50 = vadd.f32 %v5725_v28, %v5637_v12  ;;  %v2834_v28 = vrot.slane %v2832_v7, 1  ;;  %v2579_v19 = vor.u32 %v2578_v22, %v2574_v3  ;;  %v2980_v12 = vrot.slane %v7622_v41, 1 }
 0x43f   : > { %5767 = vmatmul.bf16.gmra.mxu1 %v2976_v26  ;;  %v5461_v40 = vpop.f32.mrf.mxu2  ;;  %v2432_v3 = vunpack.c.l.b16 %v6152_v1 }
 0x440   : > { %v5550_v5 = vpop.f32.mrf.mxu3  ;;  %v5804_v55 = vmax.f32 %v5726_v50, 0.0  ;;  %v5462_v25 = vadd.f32 %v5461_v40, %v8953_v61  ;;  %v2583_v61 = vrot.slane %v2581_v59, 1  ;;  %v2835_v38 = vor.u32 %v2834_v28, %v2830_v51  ;;  %v7624_v28 = vld [vmem:[%s7763_s9 + $0x9c] sm:$0xff] }
 0x441   : > { %v5641_v48 = vpop.f32.mrf.mxu0  ;;  %v2982_v22 = vsel %vm1252_vm1, %v2980_v12, %v2981_v18  ;;  %v2448_v59 = vpack.c.b16 %v2432_v3, %v2432_v3  ;;  %v2844_v39 = vshll.u32 %v7624_v28, 16  ;;  %v2842_v30 = vshrl.u32 %v7624_v28, 16 }
 0x442   : > { %v7419_v32 = vpack.c.bf16 %v5804_v55, %v5803_v35  ;;  %v5551_v45 = vadd.f32 %v5550_v5, %v5462_v25  ;;  %v2584_v40 = vsel %vm787_vm0, %v2579_v19, %v2583_v61  ;;  %v2840_v5 = vsel %vm787_vm0, %v2835_v38, %v2839_v37 }
 0x443   : > { %v2688_v35 = vunpack.c.l.b16 %v6200_v43  ;;  %v2593_v2 = vshll.u32 %v2448_v59, 16  ;;  %v2846_v1 = vrot.slane %v2844_v39, 1  ;;  %v2984_v3 = vrot.slane %v2448_v59, 1 }
 0x444   : > { %v5730_v63 = vpop.f32.mrf.mxu1  ;;  %7420 = vst [vmem:[%s9209_s11] sm:$0xff] %v7419_v32   ;;  %v5640_v7 = vadd.f32 %v5639_v16, %v5551_v45  ;;  %v7623_v16 = vld [vmem:[%s7758_s6 + $0x9c] sm:$0xff] }
 0x445   : > { %v2704_v51 = vpack.c.b16 %v2688_v35, %v2688_v35  ;;  %v2586_v61 = vshrl.u32 %v7623_v16, 16  ;;  %v6155_v35 = vld [vmem:[%s7758_s6 + $0xb0] sm:$0xf] }
 0x446   : > { %v5729_v41 = vadd.f32 %v5728_v60, %v5640_v7  ;;  %v2595_v7 = vrot.slane %v2593_v2, 1  ;;  %v7626_v2 = vld [vmem:[%s7763_s9 + $0xa8] sm:$0xff] }
 0x447   : > { %v5463_v26 = vpop.f32.mrf.mxu2  ;;  %v2849_v43 = vshll.u32 %v2704_v51, 16 }
 0x448   : > { %v5552_v29 = vpop.f32.mrf.mxu3  ;;  %v5464_v50 = vadd.f32 %v5463_v26, %v8966_v15  ;;  %v2588_v15 = vshll.u32 %v7623_v16, 16  ;;  %v5805_v38 = vmax.f32 %v5729_v41, 0.0  ;;  %v2987_v41 = vrot.slane %v2704_v51, 1 }
 0x449   : > { %v5644_v42 = vpop.f32.mrf.mxu0 }
 0x44a   : > { %v5553_v55 = vadd.f32 %v5552_v29, %v5464_v50  ;;  %v2847_v50 = vor.u32 %v2846_v1, %v2842_v30  ;;  %v2856_v30 = vshll.u32 %v7626_v2, 16 }
 0x44c   : > { %v5733_v25 = vpop.f32.mrf.mxu1  ;;  %v5642_v53 = vadd.f32 %v5641_v48, %v5553_v55  ;;  %5505 = vmatmul.bf16.gmra.mxu2 %v2584_v40  ;;  %5683 = vmatmul.bf16.gmra.mxu0 %v2979_v17  ;;  %v2590_v48 = vrot.slane %v2588_v15, 1  ;;  %v2851_v40 = vrot.slane %v2849_v43, 1 }
 0x44d   : > { %5594 = vmatmul.bf16.gmra.mxu3 %v2840_v5  ;;  %v2983_v5 = vrot.slane %v7623_v16, 1 }
 0x44e   : > { %v5731_v32 = vadd.f32 %v5730_v63, %v5642_v53  ;;  %v2591_v18 = vor.u32 %v2590_v48, %v2586_v61 }
 0x44f   : > { %5772 = vmatmul.bf16.gmra.mxu1 %v2982_v22  ;;  %v5466_v45 = vpop.f32.mrf.mxu2  ;;  %v2986_v22 = vrot.slane %v7624_v28, 1  ;;  %v2985_v59 = vsel %vm1252_vm1, %v2983_v5, %v2984_v3  ;;  %v2858_v5 = vrot.slane %v2856_v30, 1 }
 0x450   : > { %v5555_v19 = vpop.f32.mrf.mxu3  ;;  %v5806_v37 = vmax.f32 %v5731_v32, 0.0  ;;  %v5467_v60 = vadd.f32 %v5466_v45, %v8976_v33  ;;  %v6203_v33 = vld [vmem:[%s7763_s9 + $0xb0] sm:$0xf]  ;;  %v2596_v39 = vsel %vm787_vm0, %v2591_v18, %v2595_v7  ;;  %v2852_v32 = vsel %vm787_vm0, %v2847_v50, %v2851_v40 }
 0x451   : > { %v5646_v29 = vpop.f32.mrf.mxu0  ;;  %v2433_v45 = vunpack.c.l.b16 %v6155_v35  ;;  %v2854_v40 = vshrl.u32 %v7626_v2, 16 }
 0x452   : > { %v7424_v26 = vpack.c.bf16 %v5806_v37, %v5805_v38  ;;  %v5556_v63 = vadd.f32 %v5555_v19, %v5467_v60  ;;  %v2689_v19 = vunpack.c.l.b16 %v6203_v33  ;;  %v2988_v37 = vsel %vm1252_vm1, %v2986_v22, %v2987_v41 }
 0x453   : > { %v2449_v60 = vpack.c.b16 %v2433_v45, %v2433_v45  ;;  %v2859_v41 = vor.u32 %v2858_v5, %v2854_v40 }
 0x454   : > { %v5735_v12 = vpop.f32.mrf.mxu1  ;;  %7496 = vst [vmem:[%s9209_s11 + $0x8] sm:$0xff] %v7424_v26   ;;  %v5645_v53 = vadd.f32 %v5644_v42, %v5556_v63  ;;  %v7625_v42 = vld [vmem:[%s7758_s6 + $0xa8] sm:$0xff]  ;;  %v2705_v48 = vpack.c.b16 %v2689_v19, %v2689_v19 }
 0x455   : > { %v2598_v63 = vshrl.u32 %v7625_v42, 16  ;;  %v2605_v50 = vshll.u32 %v2449_v60, 16 }
 0x456   : > { %v5734_v28 = vadd.f32 %v5733_v25, %v5645_v53  ;;  %v2861_v3 = vshll.u32 %v2705_v48, 16 }
 0x457   : > { %v5468_v55 = vpop.f32.mrf.mxu2  ;;  %v2607_v22 = vrot.slane %v2605_v50, 1 }
 0x458   : > { %v5557_v17 = vpop.f32.mrf.mxu3  ;;  %v5469_v15 = vadd.f32 %v5468_v55, %v8986_v62  ;;  %v2600_v62 = vshll.u32 %v7625_v42, 16  ;;  %v5807_v18 = vmax.f32 %v5734_v28, 0.0  ;;  %v2863_v53 = vrot.slane %v2861_v3, 1 }
 0x459   : > { %v5649_v16 = vpop.f32.mrf.mxu0 }
 0x45a   : > { %v5558_v61 = vadd.f32 %v5557_v17, %v5469_v15  ;;  %v2989_v15 = vrot.slane %v7625_v42, 1 }
 0x45c   : > { %v5738_v38 = vpop.f32.mrf.mxu1  ;;  %v5647_v51 = vadd.f32 %v5646_v29, %v5558_v61  ;;  %5510 = vmatmul.bf16.gmra.mxu2 %v2596_v39  ;;  %5688 = vmatmul.bf16.gmra.mxu0 %v2985_v59  ;;  %v2602_v29 = vrot.slane %v2600_v62, 1  ;;  %v2990_v39 = vrot.slane %v2449_v60, 1  ;;  %v2992_v61 = vrot.slane %v7626_v2, 1 }
 0x45d   : > { %5599 = vmatmul.bf16.gmra.mxu3 %v2852_v32  ;;  %v6158_v32 = vld [vmem:[%s7758_s6 + $0xbc] sm:$0xf]  ;;  %v2993_v59 = vrot.slane %v2705_v48, 1  ;;  %v2864_v62 = vsel %vm787_vm0, %v2859_v41, %v2863_v53 }
 0x45e   : > { %v5736_v1 = vadd.f32 %v5735_v12, %v5647_v51  ;;  %v2603_v17 = vor.u32 %v2602_v29, %v2598_v63  ;;  %v2434_v30 = vunpack.c.l.b16 %v6158_v32  ;;  %v2991_v60 = vsel %vm1252_vm1, %v2989_v15, %v2990_v39 }
 0x45f   : > { %5777 = vmatmul.bf16.gmra.mxu1 %v2988_v37  ;;  %v5471_v43 = vpop.f32.mrf.mxu2  ;;  %v2994_v63 = vsel %vm1252_vm1, %v2992_v61, %v2993_v59 }
 0x460   : > { %v5560_v26 = vpop.f32.mrf.mxu3  ;;  %v5808_v7 = vmax.f32 %v5736_v1, 0.0  ;;  %v5472_v25 = vadd.f32 %v5471_v43, %v8993_v52  ;;  %v6206_v52 = vld [vmem:[%s7763_s9 + $0xbc] sm:$0xf]  ;;  %v2608_v51 = vsel %vm787_vm0, %v2603_v17, %v2607_v22 }
 0x461   : > { %v5651_v33 = vpop.f32.mrf.mxu0  ;;  %v2690_v1 = vunpack.c.l.b16 %v6206_v52 }
 0x462   : > { %v7429_v35 = vpack.c.bf16 %v5808_v7, %v5807_v18  ;;  %v5561_v12 = vadd.f32 %v5560_v26, %v5472_v25  ;;  %v2450_v18 = vpack.c.b16 %v2434_v30, %v2434_v30  ;;  %v7628_v25 = vld [vmem:[%s7763_s9 + $0xb4] sm:$0xff] }
 0x463   : > { %v2706_v7 = vpack.c.b16 %v2690_v1, %v2690_v1  ;;  %v2868_v29 = vshll.u32 %v7628_v25, 16  ;;  %v2866_v22 = vshrl.u32 %v7628_v25, 16  ;;  %v2998_v30 = vrot.slane %v7628_v25, 1 }
 0x464   : > { %v5740_v55 = vpop.f32.mrf.mxu1  ;;  %7497 = vst [vmem:[%s9209_s11 + $0x10] sm:$0xff] %v7429_v35   ;;  %v5650_v37 = vadd.f32 %v5649_v16, %v5561_v12  ;;  %v7627_v16 = vld [vmem:[%s7758_s6 + $0xb4] sm:$0xff]  ;;  %v2617_v17 = vshll.u32 %v2450_v18, 16 }
 0x465   : > { %v2610_v3 = vshrl.u32 %v7627_v16, 16  ;;  %v2870_v41 = vrot.slane %v2868_v29, 1  ;;  %v2873_v53 = vshll.u32 %v2706_v7, 16  ;;  %v2995_v59 = vrot.slane %v7627_v16, 1 }
 0x466   : > { %v5739_v2 = vadd.f32 %v5738_v38, %v5650_v37  ;;  %v2996_v37 = vrot.slane %v2450_v18, 1  ;;  %v2999_v1 = vrot.slane %v2706_v7, 1 }
 0x467   : > { %v5473_v45 = vpop.f32.mrf.mxu2  ;;  %v2875_v61 = vrot.slane %v2873_v53, 1 }
 0x468   : > { %v5562_v19 = vpop.f32.mrf.mxu3  ;;  %v5474_v28 = vadd.f32 %v5473_v45, %v9006_v10  ;;  %v2612_v10 = vshll.u32 %v7627_v16, 16  ;;  %v5809_v35 = vmax.f32 %v5739_v2, 0.0  ;;  %v2619_v45 = vrot.slane %v2617_v17, 1 }
 0x469   : > { %v5654_v42 = vpop.f32.mrf.mxu0  ;;  %v2997_v18 = vsel %vm1252_vm1, %v2995_v59, %v2996_v37 }
 0x46a   : > { %v5563_v43 = vadd.f32 %v5562_v19, %v5474_v28  ;;  %v2871_v19 = vor.u32 %v2870_v41, %v2866_v22  ;;  %v6161_v28 = vld [vmem:[%s7758_s6 + $0xc8] sm:$0xf] }
 0x46c   : > { %v5743_v26 = vpop.f32.mrf.mxu1  ;;  %v5652_v48 = vadd.f32 %v5651_v33, %v5563_v43  ;;  %5515 = vmatmul.bf16.gmra.mxu2 %v2608_v51  ;;  %5693 = vmatmul.bf16.gmra.mxu0 %v2991_v60  ;;  %v2614_v33 = vrot.slane %v2612_v10, 1  ;;  %v2876_v2 = vsel %vm787_vm0, %v2871_v19, %v2875_v61 }
 0x46d   : > { %5604 = vmatmul.bf16.gmra.mxu3 %v2864_v62 }
 0x46e   : > { %v5741_v50 = vadd.f32 %v5740_v55, %v5652_v48  ;;  %v2615_v52 = vor.u32 %v2614_v33, %v2610_v3  ;;  %v2435_v48 = vunpack.c.l.b16 %v6161_v28 }
 0x46f   : > { %5782 = vmatmul.bf16.gmra.mxu1 %v2994_v63  ;;  %v5476_v40 = vpop.f32.mrf.mxu2 }
 0x470   : > { %v5565_v5 = vpop.f32.mrf.mxu3  ;;  %v5810_v12 = vmax.f32 %v5741_v50, 0.0  ;;  %v5477_v38 = vadd.f32 %v5476_v40, %v9016_v56  ;;  %v6209_v56 = vld [vmem:[%s7763_s9 + $0xc8] sm:$0xf]  ;;  %v2620_v63 = vsel %vm787_vm0, %v2615_v52, %v2619_v45  ;;  %v3000_v40 = vsel %vm1252_vm1, %v2998_v30, %v2999_v1  ;;  %v6164_v1 = vld [vmem:[%s7758_s6 + $0xd4] sm:$0xf] }
 0x471   : > { %v5656_v39 = vpop.f32.mrf.mxu0  ;;  %v2691_v10 = vunpack.c.l.b16 %v6209_v56 }
 0x472   : > { %v7434_v15 = vpack.c.bf16 %v5810_v12, %v5809_v35  ;;  %v5566_v55 = vadd.f32 %v5565_v5, %v5477_v38  ;;  %v2451_v5 = vpack.c.b16 %v2435_v48, %v2435_v48  ;;  %v7630_v35 = vld [vmem:[%s7763_s9 + $0xc0] sm:$0xff] }
 0x473   : > { %v2707_v3 = vpack.c.b16 %v2691_v10, %v2691_v10  ;;  %v2880_v12 = vshll.u32 %v7630_v35, 16 }
 0x474   : > { %v5745_v32 = vpop.f32.mrf.mxu1  ;;  %7498 = vst [vmem:[%s9209_s11 + $0x18] sm:$0xff] %v7434_v15   ;;  %v5655_v43 = vadd.f32 %v5654_v42, %v5566_v55  ;;  %v7629_v42 = vld [vmem:[%s7758_s6 + $0xc0] sm:$0xff]  ;;  %v2878_v55 = vshrl.u32 %v7630_v35, 16  ;;  %v3002_v30 = vrot.slane %v2451_v5, 1 }
 0x475   : > { %v2622_v22 = vshrl.u32 %v7629_v42, 16  ;;  %v2882_v52 = vrot.slane %v2880_v12, 1  ;;  %v2885_v45 = vshll.u32 %v2707_v3, 16 }
 0x476   : > { %v5744_v25 = vadd.f32 %v5743_v26, %v5655_v43 }
 0x477   : > { %v5478_v51 = vpop.f32.mrf.mxu2  ;;  %v2883_v56 = vor.u32 %v2882_v52, %v2878_v55 }
 0x478   : > { %v5567_v62 = vpop.f32.mrf.mxu3  ;;  %v5479_v60 = vadd.f32 %v5478_v51, %v9026_v23  ;;  %v2624_v23 = vshll.u32 %v7629_v42, 16  ;;  %v5811_v41 = vmax.f32 %v5744_v25, 0.0  ;;  %v2887_v51 = vrot.slane %v2885_v45, 1 }
 0x479   : > { %v5659_v16 = vpop.f32.mrf.mxu0 }
 0x47a   : > { %v5568_v29 = vadd.f32 %v5567_v62, %v5479_v60  ;;  %v2626_v15 = vrot.slane %v2624_v23, 1  ;;  %v3001_v62 = vrot.slane %v7629_v42, 1 }
 0x47c   : > { %v5748_v50 = vpop.f32.mrf.mxu1  ;;  %v5657_v7 = vadd.f32 %v5656_v39, %v5568_v29  ;;  %5520 = vmatmul.bf16.gmra.mxu2 %v2620_v63  ;;  %5698 = vmatmul.bf16.gmra.mxu0 %v2997_v18  ;;  %v2629_v39 = vshll.u32 %v2451_v5, 16  ;;  %v2627_v37 = vor.u32 %v2626_v15, %v2622_v22  ;;  %v3004_v63 = vrot.slane %v7630_v35, 1 }
 0x47d   : > { %5609 = vmatmul.bf16.gmra.mxu3 %v2876_v2  ;;  %v3005_v2 = vrot.slane %v2707_v3, 1  ;;  %v2888_v18 = vsel %vm787_vm0, %v2883_v56, %v2887_v51  ;;  %v3003_v23 = vsel %vm1252_vm1, %v3001_v62, %v3002_v30 }
 0x47e   : > { %v5746_v38 = vadd.f32 %v5745_v32, %v5657_v7  ;;  %v2631_v28 = vrot.slane %v2629_v39, 1 }
 0x47f   : > { %5787 = vmatmul.bf16.gmra.mxu1 %v3000_v40  ;;  %v5481_v33 = vpop.f32.mrf.mxu2  ;;  %v2436_v40 = vunpack.c.l.b16 %v6164_v1  ;;  %v3006_v12 = vsel %vm1252_vm1, %v3004_v63, %v3005_v2 }
 0x480   : > { %v5570_v17 = vpop.f32.mrf.mxu3  ;;  %v5812_v53 = vmax.f32 %v5746_v38, 0.0  ;;  %v5482_v26 = vadd.f32 %v5481_v33, %v9033_v49  ;;  %v6212_v49 = vld [vmem:[%s7763_s9 + $0xd4] sm:$0xf]  ;;  %v2632_v29 = vsel %vm787_vm0, %v2627_v37, %v2631_v28 }
 0x481   : > { %v5661_v61 = vpop.f32.mrf.mxu0  ;;  %v2692_v25 = vunpack.c.l.b16 %v6212_v49  ;;  %v2452_v38 = vpack.c.b16 %v2436_v40, %v2436_v40 }
 0x482   : > { %v7439_v19 = vpack.c.bf16 %v5812_v53, %v5811_v41  ;;  %v5571_v32 = vadd.f32 %v5570_v17, %v5482_v26  ;;  %v7632_v17 = vld [vmem:[%s7763_s9 + $0xcc] sm:$0xff] }
 0x483   : > { %v2708_v33 = vpack.c.b16 %v2692_v25, %v2692_v25  ;;  %v2892_v22 = vshll.u32 %v7632_v17, 16  ;;  %v2641_v45 = vshll.u32 %v2452_v38, 16  ;;  %v3010_v2 = vrot.slane %v7632_v17, 1 }
 0x484   : > { %v5750_v59 = vpop.f32.mrf.mxu1  ;;  %7499 = vst [vmem:[%s9209_s11 + $0x20] sm:$0xff] %v7439_v19   ;;  %v5660_v48 = vadd.f32 %v5659_v16, %v5571_v32  ;;  %v7631_v16 = vld [vmem:[%s7758_s6 + $0xcc] sm:$0xff]  ;;  %v2890_v19 = vshrl.u32 %v7632_v17, 16 }
 0x485   : > { %v2634_v15 = vshrl.u32 %v7631_v16, 16  ;;  %v2897_v32 = vshll.u32 %v2708_v33, 16  ;;  %v2643_v62 = vrot.slane %v2641_v45, 1  ;;  %v3007_v49 = vrot.slane %v7631_v16, 1 }
 0x486   : > { %v5749_v35 = vadd.f32 %v5748_v50, %v5660_v48 }
 0x487   : > { %v5483_v43 = vpop.f32.mrf.mxu2  ;;  %v2899_v1 = vrot.slane %v2897_v32, 1 }
 0x488   : > { %v5572_v60 = vpop.f32.mrf.mxu3  ;;  %v5484_v10 = vadd.f32 %v5483_v43, %v9040_v44  ;;  %v2636_v44 = vshll.u32 %v7631_v16, 16  ;;  %v5813_v39 = vmax.f32 %v5749_v35, 0.0  ;;  %v3008_v43 = vrot.slane %v2452_v38, 1 }
 0x489   : > { %v5664_v42 = vpop.f32.mrf.mxu0 }
 0x48a   : > { %v5573_v7 = vadd.f32 %v5572_v60, %v5484_v10  ;;  %v2638_v52 = vrot.slane %v2636_v44, 1 }
 0x48c   : > { %v5753_v5 = vpop.f32.mrf.mxu1  ;;  %v5662_v3 = vadd.f32 %v5661_v61, %v5573_v7  ;;  %5525 = vmatmul.bf16.gmra.mxu2 %v2632_v29  ;;  %5703 = vmatmul.bf16.gmra.mxu0 %v3003_v23  ;;  %v2894_v61 = vrot.slane %v2892_v22, 1  ;;  %v3009_v7 = vsel %vm1252_vm1, %v3007_v49, %v3008_v43 }
 0x48d   : > { %5614 = vmatmul.bf16.gmra.mxu3 %v2888_v18 }
 0x48e   : > { %v5751_v41 = vadd.f32 %v5750_v59, %v5662_v3  ;;  %v2639_v59 = vor.u32 %v2638_v52, %v2634_v15  ;;  %v2895_v30 = vor.u32 %v2894_v61, %v2890_v19 }
 0x48f   : > { %5792 = vmatmul.bf16.gmra.mxu1 %v3006_v12  ;;  %v5486_v53 = vpop.f32.mrf.mxu2 }
 0x490   : > { %v5575_v26 = vpop.f32.mrf.mxu3  ;;  %v5814_v55 = vmax.f32 %v5751_v41, 0.0  ;;  %v5487_v50 = vadd.f32 %v5486_v53, %v9049_v46  ;;  %v3011_v46 = vrot.slane %v2708_v33, 1  ;;  %v2644_v29 = vsel %vm787_vm0, %v2639_v59, %v2643_v62 }
 0x491   : > { %v5666_v28 = vpop.f32.mrf.mxu0  ;;  %v2900_v18 = vsel %vm787_vm0, %v2895_v30, %v2899_v1 }
 0x492   : > { %v7444_v37 = vpack.c.bf16 %v5814_v55, %v5813_v39  ;;  %v5576_v51 = vadd.f32 %v5575_v26, %v5487_v50  ;;  %v3012_v12 = vsel %vm1252_vm1, %v3010_v2, %v3011_v46 }
 0x494   : > { %v5755_v56 = vpop.f32.mrf.mxu1  ;;  %7500 = vst [vmem:[%s9209_s11 + $0x28] sm:$0xff] %v7444_v37   ;;  %v5665_v48 = vadd.f32 %v5664_v42, %v5576_v51 }
 0x496   : > { %v5754_v35 = vadd.f32 %v5753_v5, %v5665_v48 }
 0x497   : > { %v5488_v60 = vpop.f32.mrf.mxu2 }
 0x498   : > { %v5577_v63 = vpop.f32.mrf.mxu3  ;;  %v5489_v10 = vadd.f32 %v5488_v60, %v9058_v58  ;;  %v5815_v44 = vmax.f32 %v5754_v35, 0.0 }
 0x499   : > { %v5669_v25 = vpop.f32.mrf.mxu0 }
 0x49a   : > { %v5578_v40 = vadd.f32 %v5577_v63, %v5489_v10 }
 0x49c   : > { %v5758_v23 = vpop.f32.mrf.mxu1  ;;  %v5667_v3 = vadd.f32 %v5666_v28, %v5578_v40  ;;  %5530 = vmatmul.bf16.gmra.mxu2 %v2644_v29  ;;  %5708 = vmatmul.bf16.gmra.mxu0 %v3009_v7 }
 0x49d   : > { %5619 = vmatmul.bf16.gmra.mxu3 %v2900_v18 }
 0x49e   : > { %v5756_v42 = vadd.f32 %v5755_v56, %v5667_v3 }
 0x49f   : > { %5797 = vmatmul.bf16.gmra.mxu1 %v3012_v12  ;;  %v5491_v58 = vpop.f32.mrf.mxu2 }
 0x4a0   : > { %v5580_v16 = vpop.f32.mrf.mxu3  ;;  %v5816_v38 = vmax.f32 %v5756_v42, 0.0  ;;  %v5492_v33 = vadd.f32 %v5491_v58, %v9066_v8 }
 0x4a1   : > { %v5671_v22 = vpop.f32.mrf.mxu0 }
 0x4a2   : > { %v7449_v17 = vpack.c.bf16 %v5816_v38, %v5815_v44  ;;  %v5581_v53 = vadd.f32 %v5580_v16, %v5492_v33 }
 0x4a4   : > { %v5760_v41 = vpop.f32.mrf.mxu1  ;;  %7501 = vst [vmem:[%s9209_s11 + $0x30] sm:$0xff] %v7449_v17   ;;  %v5670_v5 = vadd.f32 %v5669_v25, %v5581_v53 }
 0x4a6   : > { %v5759_v45 = vadd.f32 %v5758_v23, %v5670_v5 }
 0x4a7   : > { %v5493_v26 = vpop.f32.mrf.mxu2 }
 0x4a8   : > { %v5582_v15 = vpop.f32.mrf.mxu3  ;;  %v5494_v39 = vadd.f32 %v5493_v26, %v9076_v31  ;;  %v5817_v8 = vmax.f32 %v5759_v45, 0.0 }
 0x4a9   : > { %v5674_v50 = vpop.f32.mrf.mxu0 }
 0x4aa   : > { %v5583_v55 = vadd.f32 %v5582_v15, %v5494_v39 }
 0x4ac   : > { %v5763_v52 = vpop.f32.mrf.mxu1  ;;  %v5672_v19 = vadd.f32 %v5671_v22, %v5583_v55 }
 0x4ae   : > { %v5761_v61 = vadd.f32 %v5760_v41, %v5672_v19 }
 0x4af   : > { %v5496_v32 = vpop.f32.mrf.mxu2 }
 0x4b0   : > { %v5585_v37 = vpop.f32.mrf.mxu3  ;;  %v5818_v28 = vmax.f32 %v5761_v61, 0.0  ;;  %v5497_v56 = vadd.f32 %v5496_v32, %v9084_v14 }
 0x4b1   : > { %v5676_v59 = vpop.f32.mrf.mxu0 }
 0x4b2   : > { %v7454_v51 = vpack.c.bf16 %v5818_v28, %v5817_v8  ;;  %v5586_v30 = vadd.f32 %v5585_v37, %v5497_v56 }
 0x4b4   : > { %v5765_v62 = vpop.f32.mrf.mxu1  ;;  %7502 = vst [vmem:[%s9209_s11 + $0x38] sm:$0xff] %v7454_v51   ;;  %v5675_v31 = vadd.f32 %v5674_v50, %v5586_v30 }
 0x4b6   : > { %v5764_v46 = vadd.f32 %v5763_v52, %v5675_v31 }
 0x4b7   : > { %v5498_v1 = vpop.f32.mrf.mxu2 }
 0x4b8   : > { %v5587_v49 = vpop.f32.mrf.mxu3  ;;  %v5499_v43 = vadd.f32 %v5498_v1, %v9094_v20  ;;  %v5819_v14 = vmax.f32 %v5764_v46, 0.0 }
 0x4b9   : > { %v5679_v63 = vpop.f32.mrf.mxu0 }
 0x4ba   : > { %v5588_v60 = vadd.f32 %v5587_v49, %v5499_v43 }
 0x4bc   : > { %v5768_v2 = vpop.f32.mrf.mxu1  ;;  %v5677_v48 = vadd.f32 %v5676_v59, %v5588_v60 }
 0x4be   : > { %v5766_v10 = vadd.f32 %v5765_v62, %v5677_v48 }
 0x4bf   : > { %v5501_v29 = vpop.f32.mrf.mxu2 }
 0x4c0   : > { %v5590_v18 = vpop.f32.mrf.mxu3  ;;  %v5820_v40 = vmax.f32 %v5766_v10, 0.0  ;;  %v5502_v25 = vadd.f32 %v5501_v29, %v9099_v21 }
 0x4c1   : > { %v5681_v23 = vpop.f32.mrf.mxu0 }
 0x4c2   : > { %v7459_v7 = vpack.c.bf16 %v5820_v40, %v5819_v14  ;;  %v5591_v35 = vadd.f32 %v5590_v18, %v5502_v25 }
 0x4c4   : > { %v5770_v12 = vpop.f32.mrf.mxu1  ;;  %7503 = vst [vmem:[%s9209_s11 + $0x40] sm:$0xff] %v7459_v7   ;;  %v5680_v20 = vadd.f32 %v5679_v63, %v5591_v35 }
 0x4c6   : > { %v5769_v33 = vadd.f32 %v5768_v2, %v5680_v20 }
 0x4c7   : > { %v5503_v3 = vpop.f32.mrf.mxu2 }
 0x4c8   : > { %v5592_v42 = vpop.f32.mrf.mxu3  ;;  %v5504_v58 = vadd.f32 %v5503_v3, %v9108_v6  ;;  %v5821_v21 = vmax.f32 %v5769_v33, 0.0 }
 0x4c9   : > { %v5684_v44 = vpop.f32.mrf.mxu0 }
 0x4ca   : > { %v5593_v16 = vadd.f32 %v5592_v42, %v5504_v58 }
 0x4cc   : > { %v5773_v38 = vpop.f32.mrf.mxu1  ;;  %v5682_v17 = vadd.f32 %v5681_v23, %v5593_v16 }
 0x4ce   : > { %v5771_v22 = vadd.f32 %v5770_v12, %v5682_v17 }
 0x4cf   : > { %v5506_v41 = vpop.f32.mrf.mxu2 }
 0x4d0   : > { %v5595_v53 = vpop.f32.mrf.mxu3  ;;  %v5822_v26 = vmax.f32 %v5771_v22, 0.0  ;;  %v5507_v15 = vadd.f32 %v5506_v41, %v9113_v47 }
 0x4d1   : > { %v5686_v39 = vpop.f32.mrf.mxu0 }
 0x4d2   : > { %v7464_v5 = vpack.c.bf16 %v5822_v26, %v5821_v21  ;;  %v5596_v50 = vadd.f32 %v5595_v53, %v5507_v15 }
 0x4d4   : > { %v5775_v55 = vpop.f32.mrf.mxu1  ;;  %7504 = vst [vmem:[%s9209_s11 + $0x48] sm:$0xff] %v7464_v5   ;;  %v5685_v6 = vadd.f32 %v5684_v44, %v5596_v50 }
 0x4d6   : > { %v5774_v8 = vadd.f32 %v5773_v38, %v5685_v6 }
 0x4d7   : > { %v5508_v52 = vpop.f32.mrf.mxu2 }
 0x4d8   : > { %v5597_v45 = vpop.f32.mrf.mxu3  ;;  %v5509_v19 = vadd.f32 %v5508_v52, %v9122_v24  ;;  %v5823_v47 = vmax.f32 %v5774_v8, 0.0 }
 0x4d9   : > { %v5689_v32 = vpop.f32.mrf.mxu0 }
 0x4da   : > { %v5598_v61 = vadd.f32 %v5597_v45, %v5509_v19 }
 0x4dc   : > { %v5778_v37 = vpop.f32.mrf.mxu1  ;;  %v5687_v28 = vadd.f32 %v5686_v39, %v5598_v61 }
 0x4de   : > { %v5776_v56 = vadd.f32 %v5775_v55, %v5687_v28 }
 0x4df   : > { %v5511_v51 = vpop.f32.mrf.mxu2 }
 0x4e0   : > { %v5600_v59 = vpop.f32.mrf.mxu3  ;;  %v5824_v62 = vmax.f32 %v5776_v56, 0.0  ;;  %v5512_v30 = vadd.f32 %v5511_v51, %v9127_v9 }
 0x4e1   : > { %v5691_v49 = vpop.f32.mrf.mxu0 }
 0x4e2   : > { %v7469_v1 = vpack.c.bf16 %v5824_v62, %v5823_v47  ;;  %v5601_v43 = vadd.f32 %v5600_v59, %v5512_v30 }
 0x4e4   : > { %v5780_v31 = vpop.f32.mrf.mxu1  ;;  %7505 = vst [vmem:[%s9209_s11 + $0x50] sm:$0xff] %v7469_v1   ;;  %v5690_v24 = vadd.f32 %v5689_v32, %v5601_v43 }
 0x4e6   : > { %v5779_v29 = vadd.f32 %v5778_v37, %v5690_v24 }
 0x4e7   : > { %v5513_v60 = vpop.f32.mrf.mxu2 }
 0x4e8   : > { %v5602_v63 = vpop.f32.mrf.mxu3  ;;  %v5514_v2 = vadd.f32 %v5513_v60, %v9136_v0  ;;  %v5825_v9 = vmax.f32 %v5779_v29, 0.0 }
 0x4e9   : > { %v5694_v48 = vpop.f32.mrf.mxu0 }
 0x4ea   : > { %v5603_v46 = vadd.f32 %v5602_v63, %v5514_v2 }
 0x4ec   : > { %v5783_v10 = vpop.f32.mrf.mxu1  ;;  %v5692_v18 = vadd.f32 %v5691_v49, %v5603_v46 }
 0x4ee   : > { %v5781_v14 = vadd.f32 %v5780_v31, %v5692_v18 }
 0x4ef   : > { %v5516_v40 = vpop.f32.mrf.mxu2 }
 0x4f0   : > { %v5605_v25 = vpop.f32.mrf.mxu3  ;;  %v5826_v7 = vmax.f32 %v5781_v14, 0.0  ;;  %v5517_v23 = vadd.f32 %v5516_v40, %v9141_v13 }
 0x4f1   : > { %v5696_v35 = vpop.f32.mrf.mxu0 }
 0x4f2   : > { %v7474_v12 = vpack.c.bf16 %v5826_v7, %v5825_v9  ;;  %v5606_v42 = vadd.f32 %v5605_v25, %v5517_v23 }
 0x4f4   : > { %v5785_v3 = vpop.f32.mrf.mxu1  ;;  %7506 = vst [vmem:[%s9209_s11 + $0x58] sm:$0xff] %v7474_v12   ;;  %v5695_v0 = vadd.f32 %v5694_v48, %v5606_v42 }
 0x4f6   : > { %v5784_v17 = vadd.f32 %v5783_v10, %v5695_v0 }
 0x4f7   : > { %v5518_v20 = vpop.f32.mrf.mxu2 }
 0x4f8   : > { %v5607_v58 = vpop.f32.mrf.mxu3  ;;  %v5519_v16 = vadd.f32 %v5518_v20, %v9150_v34  ;;  %v5827_v13 = vmax.f32 %v5784_v17, 0.0 }
 0x4f9   : > { %v5699_v38 = vpop.f32.mrf.mxu0 }
 0x4fa   : > { %v5608_v44 = vadd.f32 %v5607_v58, %v5519_v16 }
 0x4fc   : > { %v5788_v33 = vpop.f32.mrf.mxu1  ;;  %v5697_v22 = vadd.f32 %v5696_v35, %v5608_v44 }
 0x4fe   : > { %v5786_v41 = vadd.f32 %v5785_v3, %v5697_v22 }
 0x4ff   : > { %v5521_v53 = vpop.f32.mrf.mxu2 }
 0x500   : > { %v5610_v21 = vpop.f32.mrf.mxu3  ;;  %v5828_v26 = vmax.f32 %v5786_v41, 0.0  ;;  %v5522_v15 = vadd.f32 %v5521_v53, %v9155_v4 }
 0x501   : > { %v5701_v39 = vpop.f32.mrf.mxu0 }
 0x502   : > { %v7479_v5 = vpack.c.bf16 %v5828_v26, %v5827_v13  ;;  %v5611_v55 = vadd.f32 %v5610_v21, %v5522_v15 }
 0x504   : > { %7507 = vst [vmem:[%s9209_s11 + $0x60] sm:$0xff] %v7479_v5   ;;  %v5790_v50 = vpop.f32.mrf.mxu1  ;;  %v5700_v45 = vadd.f32 %v5699_v38, %v5611_v55 }
 0x506   : > { %v5789_v61 = vadd.f32 %v5788_v33, %v5700_v45 }
 0x507   : > { %v5523_v52 = vpop.f32.mrf.mxu2 }
 0x508   : > { %v5612_v34 = vpop.f32.mrf.mxu3  ;;  %v5524_v6 = vadd.f32 %v5523_v52, %v9164_v11  ;;  %v5829_v4 = vmax.f32 %v5789_v61, 0.0 }
 0x509   : > { %v5704_v37 = vpop.f32.mrf.mxu0 }
 0x50a   : > { %v5613_v19 = vadd.f32 %v5612_v34, %v5524_v6 }
 0x50c   : > { %v5702_v32 = vadd.f32 %v5701_v39, %v5613_v19  ;;  %v5793_v28 = vpop.f32.mrf.mxu1 }
 0x50e   : > { %v5791_v8 = vadd.f32 %v5790_v50, %v5702_v32 }
 0x50f   : > { %v5526_v56 = vpop.f32.mrf.mxu2 }
 0x510   : > { %v5615_v51 = vpop.f32.mrf.mxu3  ;;  %v5830_v59 = vmax.f32 %v5791_v8, 0.0  ;;  %v5527_v47 = vadd.f32 %v5526_v56, %v9169_v36 }
 0x511   : > { %v5706_v1 = vpop.f32.mrf.mxu0 }
 0x512   : > { %v7484_v62 = vpack.c.bf16 %v5830_v59, %v5829_v4  ;;  %v5616_v30 = vadd.f32 %v5615_v51, %v5527_v47 }
 0x514   : > { %7508 = vst [vmem:[%s9209_s11 + $0x68] sm:$0xff] %v7484_v62   ;;  %v5705_v11 = vadd.f32 %v5704_v37, %v5616_v30  ;;  %v5795_v60 = vpop.f32.mrf.mxu1 }
 0x516   : > { %v5794_v24 = vadd.f32 %v5793_v28, %v5705_v11 }
 0x517   : > { %v5528_v49 = vpop.f32.mrf.mxu2 }
 0x518   : > { %v5617_v31 = vpop.f32.mrf.mxu3  ;;  %v5529_v43 = vadd.f32 %v5528_v49, %v9178_v27  ;;  %v5831_v29 = vmax.f32 %v5794_v24, 0.0 }
 0x519   : > { %v5709_v14 = vpop.f32.mrf.mxu0 }
 0x51a   : > { %v5618_v63 = vadd.f32 %v5617_v31, %v5529_v43 }
 0x51c   : > { %v5707_v2 = vadd.f32 %v5706_v1, %v5618_v63  ;;  %v5798_v25 = vpop.f32.mrf.mxu1 }
 0x51e   : > { %v5796_v46 = vadd.f32 %v5795_v60, %v5707_v2 }
 0x51f   : > { %v5531_v48 = vpop.f32.mrf.mxu2 }
 0x520   : > { %v5620_v10 = vpop.f32.mrf.mxu3  ;;  %v5832_v18 = vmax.f32 %v5796_v46, 0.0  ;;  %v5532_v36 = vadd.f32 %v5531_v48, %v9183_v54 }
 0x521   : > { %v5711_v3 = vpop.f32.mrf.mxu0 }
 0x522   : > { %v7489_v40 = vpack.c.bf16 %v5832_v18, %v5831_v29  ;;  %v5621_v9 = vadd.f32 %v5620_v10, %v5532_v36 }
 0x524   : > { %7509 = vst [vmem:[%s9209_s11 + $0x70] sm:$0xff] %v7489_v40   ;;  %v5710_v23 = vadd.f32 %v5709_v14, %v5621_v9  ;;  %v5800_v58 = vpop.f32.mrf.mxu1 }
 0x526   : > { %v5799_v42 = vadd.f32 %v5798_v25, %v5710_v23 }
 0x527   : > { %v5533_v7 = vpop.f32.mrf.mxu2 }
 0x528   : > { %v5534_v27 = vadd.f32 %v5533_v7, %v9192_v57  ;;  %v5622_v12 = vpop.f32.mrf.mxu3  ;;  %v5833_v16 = vmax.f32 %v5799_v42, 0.0 }
 0x52a   : > { %v5623_v35 = vadd.f32 %v5622_v12, %v5534_v27 }
 0x52c   : > { %v5712_v20 = vadd.f32 %v5711_v3, %v5623_v35 }
 0x52e   : > { %v5801_v0 = vadd.f32 %v5800_v58, %v5712_v20 }
 0x530   : > { %v5834_v44 = vmax.f32 %v5801_v0, 0.0 }
 0x532   : > { %v7494_v54 = vpack.c.bf16 %v5834_v44, %v5833_v16 }
 0x534   : > { %7510 = vst [vmem:[%s9209_s11 + $0x78] sm:$0xff] %v7494_v54  }
 0x535 PF: > { %s14_s17 = sadd.s32 1, %s7655_s17   ;;  %s9386_s15 = smov %s7651_s16 }
 0x536   : > { %p11_p5 = scmp.ge.s32.totalorder %s14_s17, 4   ;;  %s9387_s16 = smov %s9389_s18 }
 0x538   :  { %13 = sbr.rel (!%p11_p5) target bundleno = 2 (0x2), region = 75 }

</bundles_post_ra>
